<compile_context>
chip_gen: v5e
topology: v5e:2x2
jax: 0.10.0
libtpu: 0.0.40
codegen_flags: <defaults>
</compile_context>

<pallas_src>
import jax
import jax.numpy as jnp
from jax import lax
from jax.experimental import pallas as pl
from jax.experimental.pallas import tpu as pltpu


def _shift_rows(y, top, bottom):
    """Return y with `top` leading and `bottom` trailing all-zero rows (row concat)."""
    parts = []
    if top:
        parts.append(jnp.zeros((top, y.shape[1]), y.dtype))
    parts.append(y)
    if bottom:
        parts.append(jnp.zeros((bottom, y.shape[1]), y.dtype))
    return jnp.concatenate(parts, axis=0) if len(parts) > 1 else y


def _make_kernel(H, W, C):
    """Build the fused kernel for fixed spatial/channel sizes (all offsets static)."""
    Wp = W + 2
    HWp = H * Wp
    NS = HWp + 2 * Wp          # stacked-scratch rows (largest slab read ends at 2*Wp+HWp)
    lo = Wp - 1                # first scratch row holding conv_2 data (block kx=2)
    hi = Wp + 1 + HWp          # one past the last conv_2 data row (block kx=0)
    lo_a = (lo // 8) * 8       # sublane-aligned start for the conv_2 bulk store
    pre = lo - lo_a            # extra zero rows prepended so the store start is aligned
    hi_a = (hi // 8) * 8       # aligned start for the tail zeroing (overwritten by bulk store)

    def kernel(x_ref, w1_ref, w2_ref, s1_ref, b1_ref, s2_ref, b2_ref, mask_ref,
               out_ref, stk_ref):
        # x_ref   : (1, (H+3)*Wp, C) bf16  flattened zero-padded input
        # w*_ref  : (3, 3C, C)       bf16  conv weights, kx stacked along the K dim
        # s*/b*   : (1, C)           f32   folded BN scale / bias
        # mask_ref: (HWp, C)         f32   lane-dense column-validity mask
        # out_ref : (1, HWp, C)      bf16  dense output slab (interior sliced on host)
        # stk_ref : (NS, 3C)         bf16  kx-stacked staging scratch (shared by both convs)

        # ---- conv_1: stack kx taps along K (one staging store), then 3 MXU matmuls ----
        stk_ref[...] = jnp.concatenate(
            [x_ref[0, kx:kx + NS, :] for kx in range(3)], axis=1)

        acc1 = jnp.dot(stk_ref[0:HWp, :], w1_ref[0],
                       preferred_element_type=jnp.float32)
        for ky in (1, 2):
            acc1 = acc1 + jnp.dot(stk_ref[ky * Wp:ky * Wp + HWp, :], w1_ref[ky],
                                  preferred_element_type=jnp.float32)

        # ---- bn_1 + relu_1; zero wrapped columns (they become conv_2's pad columns) ----
        y1 = (jnp.maximum(acc1 * s1_ref[...] + b1_ref[...], 0.0) * mask_ref[...]
              ).astype(jnp.bfloat16)

        # ---- rebuild the scratch as the kx-stacked padded y1 image ----
        # stk[r, kx*C:(kx+1)*C] = y1_padded_flat[r + kx]; the three blocks are y1 at
        # row offsets (pre+2-kx), written with ONE aligned full-width store; the small
        # head/tail border regions are zeroed (re-written every grid step because the
        # scratch is per-core under megacore 'parallel' batch sharding).
        stk_ref[hi_a:NS, :] = jnp.zeros((NS - hi_a, 3 * C), jnp.bfloat16)
        if lo_a > 0:
            stk_ref[0:lo_a, :] = jnp.zeros((lo_a, 3 * C), jnp.bfloat16)
        stk_ref[lo_a:hi, :] = jnp.concatenate(
            [_shift_rows(y1, pre + 2 - kx, kx) for kx in range(3)], axis=1)

        # ---- conv_2: same 3-matmul K=3C scheme reading the rebuilt scratch ----
        acc2 = jnp.dot(stk_ref[0:HWp, :], w2_ref[0],
                       preferred_element_type=jnp.float32)
        for ky in (1, 2):
            acc2 = acc2 + jnp.dot(stk_ref[ky * Wp:ky * Wp + HWp, :], w2_ref[ky],
                                  preferred_element_type=jnp.float32)

        # ---- bn_2 + identity shortcut (re-read center tap) + relu_2, bf16 store ----
        shortcut = x_ref[0, Wp + 1:Wp + 1 + HWp, :].astype(jnp.float32)
        y2 = acc2 * s2_ref[...] + b2_ref[...] + shortcut
        out_ref[0] = jnp.maximum(y2, 0.0).astype(out_ref.dtype)

    return kernel, NS


def basic_block_forward(x_nchw, w1_oihw, w2_oihw, bn1, bn2, eps=1e-5):
    """NCHW in / NCHW out (bf16), matching the PyTorch module (downsample=False)."""
    x = jnp.transpose(x_nchw, (0, 2, 3, 1))              # NCHW -> NHWC
    B, H, W, C = x.shape
    Wp = W + 2
    HWp = H * Wp
    n_in = (H + 3) * Wp                                   # 1 top + 2 bottom pad rows

    # Conv weights: PyTorch (O, I, 3, 3) -> HWIO -> kx stacked along K: (3, 3C, C) bf16.
    w1 = jnp.transpose(w1_oihw, (2, 3, 1, 0)).astype(jnp.bfloat16).reshape(3, 3 * C, C)
    w2 = jnp.transpose(w2_oihw, (2, 3, 1, 0)).astype(jnp.bfloat16).reshape(3, 3 * C, C)

    # Fold eval-mode BatchNorm into per-channel scale / bias (f32 epilogue).
    def fold(bn):
        gamma, beta, mean, var = bn
        scale = (gamma / jnp.sqrt(var + eps)).astype(jnp.float32)
        bias = (beta - mean * scale).astype(jnp.float32)
        return scale.reshape(1, C), bias.reshape(1, C)

    s1, b1 = fold(bn1)
    s2, b2 = fold(bn2)

    # Cast to bf16, pad, flatten rows so every conv tap is a contiguous slab.
    xp = jnp.pad(x.astype(jnp.bfloat16), ((0, 0), (1, 2), (1, 1), (0, 0)))
    xp = xp.reshape(B, n_in, C)

    # Lane-dense column-validity mask: 1.0 where (flat % Wp) < W.
    col = jnp.arange(HWp, dtype=jnp.int32) % Wp
    mask = jnp.broadcast_to((col < W).astype(jnp.float32)[:, None], (HWp, C))

    kernel, NS = _make_kernel(H, W, C)

    # Rough per-step VMEM need (double-buffered worst case + in-kernel temporaries).
    vmem_need = (2 * n_in * C * 2 + 4 * 9 * C * C * 2 + 8 * C * 4
                 + 2 * HWp * C * 4 + 2 * HWp * C * 2 + NS * 3 * C * 2
                 + 10 * HWp * C * 4)

    def build(single_buffer_invariants):
        def inv_spec(shape, imap):
            if single_buffer_invariants:
                return pl.BlockSpec(shape, imap, pipeline_mode=pl.Buffered(1))
            return pl.BlockSpec(shape, imap)

        grid_spec = pltpu.PrefetchScalarGridSpec(
            num_scalar_prefetch=0,
            grid=(B,),
            in_specs=[
                pl.BlockSpec((1, n_in, C), lambda b: (b, 0, 0)),          # x (per batch)
                inv_spec((3, 3 * C, C), lambda b: (0, 0, 0)),             # w1 stacked
                inv_spec((3, 3 * C, C), lambda b: (0, 0, 0)),             # w2 stacked
                inv_spec((1, C), lambda b: (0, 0)),                       # bn1 scale
                inv_spec((1, C), lambda b: (0, 0)),                       # bn1 bias
                inv_spec((1, C), lambda b: (0, 0)),                       # bn2 scale
                inv_spec((1, C), lambda b: (0, 0)),                       # bn2 bias
                inv_spec((HWp, C), lambda b: (0, 0)),                     # column mask
            ],
            out_specs=pl.BlockSpec((1, HWp, C), lambda b: (b, 0, 0)),
            scratch_shapes=[pltpu.VMEM((NS, 3 * C), jnp.bfloat16)],
        )
        params = dict(dimension_semantics=("parallel",))
        if vmem_need > 24 * 2**20:
            params["vmem_limit_bytes"] = int(min(vmem_need * 3 // 2, 100 * 2**20))
        return pl.pallas_call(
            kernel,
            out_shape=jax.ShapeDtypeStruct((B, HWp, C), jnp.bfloat16),
            grid_spec=grid_spec,
            compiler_params=pltpu.CompilerParams(**params),
        )

    args = (xp, w1, w2, s1, b1, s2, b2, mask)
    try:
        out_flat = jax.block_until_ready(build(True)(*args))
    except Exception:
        # Compatibility fallback: some JAX versions may reject Buffered(1);
        # fall back to default (double-buffered) invariant operands.
        out_flat = jax.block_until_ready(build(False)(*args))

    # Slice out the valid interior (stays bf16, fuses with the transpose), back to NCHW.
    out = out_flat.reshape(B, H, Wp, C)[:, :, :W, :]
    return jnp.transpose(out, (0, 3, 1, 2))


def _reference_forward(x_nchw, w1_oihw, w2_oihw, bn1, bn2, eps=1e-5):
    """Pure-JAX f32 reference of the PyTorch forward (eval-mode BN, downsample=False)."""
    x = jnp.transpose(x_nchw, (0, 2, 3, 1)).astype(jnp.float32)
    w1 = jnp.transpose(w1_oihw, (2, 3, 1, 0)).astype(jnp.float32)
    w2 = jnp.transpose(w2_oihw, (2, 3, 1, 0)).astype(jnp.float32)
    dn = ("NHWC", "HWIO", "NHWC")

    def bn_apply(y, bn):
        gamma, beta, mean, var = bn
        return (y - mean) / jnp.sqrt(var + eps) * gamma + beta

    y = lax.conv_general_dilated(x, w1, (1, 1), "SAME", dimension_numbers=dn)
    y = jnp.maximum(bn_apply(y, bn1), 0.0)
    y = lax.conv_general_dilated(y, w2, (1, 1), "SAME", dimension_numbers=dn)
    y = bn_apply(y, bn2)
    out = jnp.maximum(y + x, 0.0)
    return jnp.transpose(out, (0, 3, 1, 2))


def _run_case(key, B, C, H, W, atol=5e-2, rtol=5e-2):
    kx_, kw1, kw2, kb1, kb2 = jax.random.split(key, 5)
    x = jax.random.normal(kx_, (B, C, H, W), dtype=jnp.float32)
    # Conv weights in PyTorch layout (out, in, 3, 3).
    w1 = 0.1 * jax.random.normal(kw1, (C, C, 3, 3), dtype=jnp.float32)
    w2 = 0.1 * jax.random.normal(kw2, (C, C, 3, 3), dtype=jnp.float32)

    def mk_bn(k):
        a, b, c, d = jax.random.split(k, 4)
        return (1.0 + 0.1 * jax.random.normal(a, (C,)),
                0.1 * jax.random.normal(b, (C,)),
                0.1 * jax.random.normal(c, (C,)),
                1.0 + 0.1 * jax.nn.softplus(jax.random.normal(d, (C,))))

    bn1, bn2 = mk_bn(kb1), mk_bn(kb2)

    out = jax.block_until_ready(basic_block_forward(x, w1, w2, bn1, bn2))
    ref = _reference_forward(x, w1, w2, bn1, bn2)

    assert out.shape == (B, C, H, W)
    assert out.dtype == jnp.bfloat16
    # bf16 activations/weights/output in the kernel vs f32 reference -> loose tolerance.
    assert jnp.allclose(out.astype(jnp.float32), ref, atol=atol, rtol=rtol), (
        f"mismatch vs pure-JAX reference at B={B} C={C} H={H} W={W}")


if __name__ == "__main__":
    # downsample=False requires in_channel == out_channel (conv_1 takes out_channel inputs).
    key = jax.random.PRNGKey(0)
    k1, k2 = jax.random.split(key)
    _run_case(k1, B=2, C=4, H=16, W=16)   # primary small-shape check
    _run_case(k2, B=1, C=8, H=7, W=11)    # odd spatial dims: Wp not a multiple of 8
    print("KERNEL_OK")
</pallas_src>

<mosaic_0001>
module attributes {stable_mosaic.version = 11 : i64} {
  func.func @kernel(%arg0: i32, %arg1: memref<1x342x4xbf16, #tpu.memory_space<vmem>>, %arg2: memref<3x12x4xbf16, #tpu.memory_space<vmem>>, %arg3: memref<3x12x4xbf16, #tpu.memory_space<vmem>>, %arg4: memref<1x4xf32, #tpu.memory_space<vmem>>, %arg5: memref<1x4xf32, #tpu.memory_space<vmem>>, %arg6: memref<1x4xf32, #tpu.memory_space<vmem>>, %arg7: memref<1x4xf32, #tpu.memory_space<vmem>>, %arg8: memref<288x4xf32, #tpu.memory_space<vmem>>, %arg9: memref<1x288x4xbf16, #tpu.memory_space<vmem>>, %arg10: memref<324x12xbf16, #tpu.memory_space<vmem>>) attributes {dimension_semantics = [#tpu.dimension_semantics<parallel>], iteration_bounds = array<i64: 2>, scalar_prefetch = 0 : i64, scratch_operands = 1 : i64, tpu.core_type = #tpu.core_type<tc>, window_params = [{transform_indices = @transform_0, window_bounds = array<i64: 1, 342, 4>}, {pipeline_mode = #tpu.pipeline_mode<synchronous>, transform_indices = @transform_1, window_bounds = array<i64: 3, 12, 4>}, {pipeline_mode = #tpu.pipeline_mode<synchronous>, transform_indices = @transform_2, window_bounds = array<i64: 3, 12, 4>}, {pipeline_mode = #tpu.pipeline_mode<synchronous>, transform_indices = @transform_3, window_bounds = array<i64: 1, 4>}, {pipeline_mode = #tpu.pipeline_mode<synchronous>, transform_indices = @transform_4, window_bounds = array<i64: 1, 4>}, {pipeline_mode = #tpu.pipeline_mode<synchronous>, transform_indices = @transform_5, window_bounds = array<i64: 1, 4>}, {pipeline_mode = #tpu.pipeline_mode<synchronous>, transform_indices = @transform_6, window_bounds = array<i64: 1, 4>}, {pipeline_mode = #tpu.pipeline_mode<synchronous>, transform_indices = @transform_7, window_bounds = array<i64: 288, 4>}, {transform_indices = @transform_8, window_bounds = array<i64: 1, 288, 4>}]} {
    %c0 = arith.constant 0 : index
    %c0_0 = arith.constant 0 : index
    %c0_1 = arith.constant 0 : index
    %0 = vector.load %arg1[%c0, %c0_0, %c0_1] : memref<1x342x4xbf16, #tpu.memory_space<vmem>>, vector<1x324x4xbf16>
    %1 = vector.shape_cast %0 : vector<1x324x4xbf16> to vector<324x4xbf16>
    %c0_2 = arith.constant 0 : index
    %c1 = arith.constant 1 : index
    %c0_3 = arith.constant 0 : index
    %2 = vector.load %arg1[%c0_2, %c1, %c0_3] : memref<1x342x4xbf16, #tpu.memory_space<vmem>>, vector<1x324x4xbf16>
    %3 = vector.shape_cast %2 : vector<1x324x4xbf16> to vector<324x4xbf16>
    %c0_4 = arith.constant 0 : index
    %c2 = arith.constant 2 : index
    %c0_5 = arith.constant 0 : index
    %4 = vector.load %arg1[%c0_4, %c2, %c0_5] : memref<1x342x4xbf16, #tpu.memory_space<vmem>>, vector<1x324x4xbf16>
    %5 = vector.shape_cast %4 : vector<1x324x4xbf16> to vector<324x4xbf16>
    %6 = tpu.concatenate %1, %3, %5 in 1 : vector<324x4xbf16>, vector<324x4xbf16>, vector<324x4xbf16> -> vector<324x12xbf16>
    %c0_6 = arith.constant 0 : index
    %c0_7 = arith.constant 0 : index
    %7 = vector.load %arg10[%c0_6, %c0_7] : memref<324x12xbf16, #tpu.memory_space<vmem>>, vector<324x12xbf16>
    tpu.vector_store %arg10[%c0_6, %c0_7], %6 {strides = array<i32>} : memref<324x12xbf16, #tpu.memory_space<vmem>>, vector<324x12xbf16>,
    %c0_8 = arith.constant 0 : index
    %c0_9 = arith.constant 0 : index
    %8 = vector.load %arg10[%c0_8, %c0_9] : memref<324x12xbf16, #tpu.memory_space<vmem>>, vector<288x12xbf16>
    %c0_10 = arith.constant 0 : index
    %c0_11 = arith.constant 0 : index
    %c0_12 = arith.constant 0 : index
    %9 = vector.load %arg2[%c0_10, %c0_11, %c0_12] : memref<3x12x4xbf16, #tpu.memory_space<vmem>>, vector<1x12x4xbf16>
    %10 = vector.shape_cast %9 : vector<1x12x4xbf16> to vector<12x4xbf16>
    %cst = arith.constant dense<0.000000e+00> : vector<288x4xf32>
    %11 = tpu.matmul %8, %10, %cst {dimension_numbers = #tpu.dot_dimension_numbers<[1], [0], [0], [1], [0, 0, 1, 1], [], []>} : vector<288x12xbf16>, vector<12x4xbf16>, vector<288x4xf32> -> vector<288x4xf32>
    %c18 = arith.constant 18 : index
    %c0_13 = arith.constant 0 : index
    %12 = vector.load %arg10[%c18, %c0_13] : memref<324x12xbf16, #tpu.memory_space<vmem>>, vector<288x12xbf16>
    %c1_14 = arith.constant 1 : index
    %c0_15 = arith.constant 0 : index
    %c0_16 = arith.constant 0 : index
    %13 = vector.load %arg2[%c1_14, %c0_15, %c0_16] : memref<3x12x4xbf16, #tpu.memory_space<vmem>>, vector<1x12x4xbf16>
    %14 = vector.shape_cast %13 : vector<1x12x4xbf16> to vector<12x4xbf16>
    %cst_17 = arith.constant dense<0.000000e+00> : vector<288x4xf32>
    %15 = tpu.matmul %12, %14, %cst_17 {dimension_numbers = #tpu.dot_dimension_numbers<[1], [0], [0], [1], [0, 0, 1, 1], [], []>} : vector<288x12xbf16>, vector<12x4xbf16>, vector<288x4xf32> -> vector<288x4xf32>
    %16 = arith.addf %11, %15 : vector<288x4xf32>
    %c36 = arith.constant 36 : index
    %c0_18 = arith.constant 0 : index
    %17 = vector.load %arg10[%c36, %c0_18] : memref<324x12xbf16, #tpu.memory_space<vmem>>, vector<288x12xbf16>
    %c2_19 = arith.constant 2 : index
    %c0_20 = arith.constant 0 : index
    %c0_21 = arith.constant 0 : index
    %18 = vector.load %arg2[%c2_19, %c0_20, %c0_21] : memref<3x12x4xbf16, #tpu.memory_space<vmem>>, vector<1x12x4xbf16>
    %19 = vector.shape_cast %18 : vector<1x12x4xbf16> to vector<12x4xbf16>
    %cst_22 = arith.constant dense<0.000000e+00> : vector<288x4xf32>
    %20 = tpu.matmul %17, %19, %cst_22 {dimension_numbers = #tpu.dot_dimension_numbers<[1], [0], [0], [1], [0, 0, 1, 1], [], []>} : vector<288x12xbf16>, vector<12x4xbf16>, vector<288x4xf32> -> vector<288x4xf32>
    %21 = arith.addf %16, %20 : vector<288x4xf32>
    %c0_23 = arith.constant 0 : index
    %c0_24 = arith.constant 0 : index
    %22 = vector.load %arg4[%c0_23, %c0_24] : memref<1x4xf32, #tpu.memory_space<vmem>>, vector<1x4xf32>
    %23 = vector.broadcast %22 : vector<1x4xf32> to vector<288x4xf32>
    %24 = arith.mulf %21, %23 : vector<288x4xf32>
    %c0_25 = arith.constant 0 : index
    %c0_26 = arith.constant 0 : index
    %25 = vector.load %arg5[%c0_25, %c0_26] : memref<1x4xf32, #tpu.memory_space<vmem>>, vector<1x4xf32>
    %26 = vector.broadcast %25 : vector<1x4xf32> to vector<288x4xf32>
    %27 = arith.addf %24, %26 : vector<288x4xf32>
    %cst_27 = arith.constant 0.000000e+00 : f32
    %28 = vector.broadcast %cst_27 : f32 to vector<288x4xf32>
    %29 = arith.maximumf %27, %28 : vector<288x4xf32>
    %c0_28 = arith.constant 0 : index
    %c0_29 = arith.constant 0 : index
    %30 = vector.load %arg8[%c0_28, %c0_29] : memref<288x4xf32, #tpu.memory_space<vmem>>, vector<288x4xf32>
    %31 = arith.mulf %29, %30 : vector<288x4xf32>
    %32 = arith.truncf %31 : vector<288x4xf32> to vector<288x4xbf16>
    %cst_30 = arith.constant 0.000000e+00 : bf16
    %33 = vector.broadcast %cst_30 : bf16 to vector<20x12xbf16>
    %c304 = arith.constant 304 : index
    %c0_31 = arith.constant 0 : index
    %34 = vector.load %arg10[%c304, %c0_31] : memref<324x12xbf16, #tpu.memory_space<vmem>>, vector<20x12xbf16>
    tpu.vector_store %arg10[%c304, %c0_31], %33 {strides = array<i32>} : memref<324x12xbf16, #tpu.memory_space<vmem>>, vector<20x12xbf16>,
    %cst_32 = arith.constant 0.000000e+00 : bf16
    %35 = vector.broadcast %cst_32 : bf16 to vector<16x12xbf16>
    %c0_33 = arith.constant 0 : index
    %c0_34 = arith.constant 0 : index
    %36 = vector.load %arg10[%c0_33, %c0_34] : memref<324x12xbf16, #tpu.memory_space<vmem>>, vector<16x12xbf16>
    tpu.vector_store %arg10[%c0_33, %c0_34], %35 {strides = array<i32>} : memref<324x12xbf16, #tpu.memory_space<vmem>>, vector<16x12xbf16>,
    %cst_35 = arith.constant 0.000000e+00 : bf16
    %37 = vector.broadcast %cst_35 : bf16 to vector<3x4xbf16>
    %38 = tpu.concatenate %37, %32 in 0 : vector<3x4xbf16>, vector<288x4xbf16> -> vector<291x4xbf16>
    %cst_36 = arith.constant 0.000000e+00 : bf16
    %39 = vector.broadcast %cst_36 : bf16 to vector<2x4xbf16>
    %cst_37 = arith.constant 0.000000e+00 : bf16
    %40 = vector.broadcast %cst_37 : bf16 to vector<1x4xbf16>
    %41 = tpu.concatenate %39, %32, %40 in 0 : vector<2x4xbf16>, vector<288x4xbf16>, vector<1x4xbf16> -> vector<291x4xbf16>
    %cst_38 = arith.constant 0.000000e+00 : bf16
    %42 = vector.broadcast %cst_38 : bf16 to vector<1x4xbf16>
    %cst_39 = arith.constant 0.000000e+00 : bf16
    %43 = vector.broadcast %cst_39 : bf16 to vector<2x4xbf16>
    %44 = tpu.concatenate %42, %32, %43 in 0 : vector<1x4xbf16>, vector<288x4xbf16>, vector<2x4xbf16> -> vector<291x4xbf16>
    %45 = tpu.concatenate %38, %41, %44 in 1 : vector<291x4xbf16>, vector<291x4xbf16>, vector<291x4xbf16> -> vector<291x12xbf16>
    %c16 = arith.constant 16 : index
    %c0_40 = arith.constant 0 : index
    %46 = vector.load %arg10[%c16, %c0_40] : memref<324x12xbf16, #tpu.memory_space<vmem>>, vector<291x12xbf16>
    tpu.vector_store %arg10[%c16, %c0_40], %45 {strides = array<i32>} : memref<324x12xbf16, #tpu.memory_space<vmem>>, vector<291x12xbf16>,
    %c0_41 = arith.constant 0 : index
    %c0_42 = arith.constant 0 : index
    %47 = vector.load %arg10[%c0_41, %c0_42] : memref<324x12xbf16, #tpu.memory_space<vmem>>, vector<288x12xbf16>
    %c0_43 = arith.constant 0 : index
    %c0_44 = arith.constant 0 : index
    %c0_45 = arith.constant 0 : index
    %48 = vector.load %arg3[%c0_43, %c0_44, %c0_45] : memref<3x12x4xbf16, #tpu.memory_space<vmem>>, vector<1x12x4xbf16>
    %49 = vector.shape_cast %48 : vector<1x12x4xbf16> to vector<12x4xbf16>
    %cst_46 = arith.constant dense<0.000000e+00> : vector<288x4xf32>
    %50 = tpu.matmul %47, %49, %cst_46 {dimension_numbers = #tpu.dot_dimension_numbers<[1], [0], [0], [1], [0, 0, 1, 1], [], []>} : vector<288x12xbf16>, vector<12x4xbf16>, vector<288x4xf32> -> vector<288x4xf32>
    %c18_47 = arith.constant 18 : index
    %c0_48 = arith.constant 0 : index
    %51 = vector.load %arg10[%c18_47, %c0_48] : memref<324x12xbf16, #tpu.memory_space<vmem>>, vector<288x12xbf16>
    %c1_49 = arith.constant 1 : index
    %c0_50 = arith.constant 0 : index
    %c0_51 = arith.constant 0 : index
    %52 = vector.load %arg3[%c1_49, %c0_50, %c0_51] : memref<3x12x4xbf16, #tpu.memory_space<vmem>>, vector<1x12x4xbf16>
    %53 = vector.shape_cast %52 : vector<1x12x4xbf16> to vector<12x4xbf16>
    %cst_52 = arith.constant dense<0.000000e+00> : vector<288x4xf32>
    %54 = tpu.matmul %51, %53, %cst_52 {dimension_numbers = #tpu.dot_dimension_numbers<[1], [0], [0], [1], [0, 0, 1, 1], [], []>} : vector<288x12xbf16>, vector<12x4xbf16>, vector<288x4xf32> -> vector<288x4xf32>
    %55 = arith.addf %50, %54 : vector<288x4xf32>
    %c36_53 = arith.constant 36 : index
    %c0_54 = arith.constant 0 : index
    %56 = vector.load %arg10[%c36_53, %c0_54] : memref<324x12xbf16, #tpu.memory_space<vmem>>, vector<288x12xbf16>
    %c2_55 = arith.constant 2 : index
    %c0_56 = arith.constant 0 : index
    %c0_57 = arith.constant 0 : index
    %57 = vector.load %arg3[%c2_55, %c0_56, %c0_57] : memref<3x12x4xbf16, #tpu.memory_space<vmem>>, vector<1x12x4xbf16>
    %58 = vector.shape_cast %57 : vector<1x12x4xbf16> to vector<12x4xbf16>
    %cst_58 = arith.constant dense<0.000000e+00> : vector<288x4xf32>
    %59 = tpu.matmul %56, %58, %cst_58 {dimension_numbers = #tpu.dot_dimension_numbers<[1], [0], [0], [1], [0, 0, 1, 1], [], []>} : vector<288x12xbf16>, vector<12x4xbf16>, vector<288x4xf32> -> vector<288x4xf32>
    %60 = arith.addf %55, %59 : vector<288x4xf32>
    %c0_59 = arith.constant 0 : index
    %c19 = arith.constant 19 : index
    %c0_60 = arith.constant 0 : index
    %61 = vector.load %arg1[%c0_59, %c19, %c0_60] : memref<1x342x4xbf16, #tpu.memory_space<vmem>>, vector<1x288x4xbf16>
    %62 = vector.shape_cast %61 : vector<1x288x4xbf16> to vector<288x4xbf16>
    %63 = arith.extf %62 : vector<288x4xbf16> to vector<288x4xf32>
    %c0_61 = arith.constant 0 : index
    %c0_62 = arith.constant 0 : index
    %64 = vector.load %arg6[%c0_61, %c0_62] : memref<1x4xf32, #tpu.memory_space<vmem>>, vector<1x4xf32>
    %65 = vector.broadcast %64 : vector<1x4xf32> to vector<288x4xf32>
    %66 = arith.mulf %60, %65 : vector<288x4xf32>
    %c0_63 = arith.constant 0 : index
    %c0_64 = arith.constant 0 : index
    %67 = vector.load %arg7[%c0_63, %c0_64] : memref<1x4xf32, #tpu.memory_space<vmem>>, vector<1x4xf32>
    %68 = vector.broadcast %67 : vector<1x4xf32> to vector<288x4xf32>
    %69 = arith.addf %66, %68 : vector<288x4xf32>
    %70 = arith.addf %69, %63 : vector<288x4xf32>
    %cst_65 = arith.constant 0.000000e+00 : f32
    %71 = vector.broadcast %cst_65 : f32 to vector<288x4xf32>
    %72 = arith.maximumf %70, %71 : vector<288x4xf32>
    %73 = arith.truncf %72 : vector<288x4xf32> to vector<288x4xbf16>
    %c0_66 = arith.constant 0 : index
    %c0_67 = arith.constant 0 : index
    %c0_68 = arith.constant 0 : index
    %74 = vector.load %arg9[%c0_66, %c0_67, %c0_68] : memref<1x288x4xbf16, #tpu.memory_space<vmem>>, vector<1x288x4xbf16>
    %75 = vector.shape_cast %74 : vector<1x288x4xbf16> to vector<288x4xbf16>
    %76 = vector.shape_cast %73 : vector<288x4xbf16> to vector<1x288x4xbf16>
    tpu.vector_store %arg9[%c0_66, %c0_67, %c0_68], %76 {strides = array<i32>} : memref<1x288x4xbf16, #tpu.memory_space<vmem>>, vector<1x288x4xbf16>,
    return
  }
  func.func @transform_0(%arg0: i32) -> (i32, i32, i32) {
    %c0_i32 = arith.constant 0 : i32
    %c0_i32_0 = arith.constant 0 : i32
    %c0_i32_1 = arith.constant 0 : i32
    return %arg0, %c0_i32, %c0_i32_0 : i32, i32, i32
  }
  func.func @transform_1(%arg0: i32) -> (i32, i32, i32) {
    %c0_i32 = arith.constant 0 : i32
    %c0_i32_0 = arith.constant 0 : i32
    %c0_i32_1 = arith.constant 0 : i32
    %c0_i32_2 = arith.constant 0 : i32
    return %c0_i32, %c0_i32_0, %c0_i32_1 : i32, i32, i32
  }
  func.func @transform_2(%arg0: i32) -> (i32, i32, i32) {
    %c0_i32 = arith.constant 0 : i32
    %c0_i32_0 = arith.constant 0 : i32
    %c0_i32_1 = arith.constant 0 : i32
    %c0_i32_2 = arith.constant 0 : i32
    return %c0_i32, %c0_i32_0, %c0_i32_1 : i32, i32, i32
  }
  func.func @transform_3(%arg0: i32) -> (i32, i32) {
    %c0_i32 = arith.constant 0 : i32
    %c0_i32_0 = arith.constant 0 : i32
    %c0_i32_1 = arith.constant 0 : i32
    return %c0_i32, %c0_i32_0 : i32, i32
  }
  func.func @transform_4(%arg0: i32) -> (i32, i32) {
    %c0_i32 = arith.constant 0 : i32
    %c0_i32_0 = arith.constant 0 : i32
    %c0_i32_1 = arith.constant 0 : i32
    return %c0_i32, %c0_i32_0 : i32, i32
  }
  func.func @transform_5(%arg0: i32) -> (i32, i32) {
    %c0_i32 = arith.constant 0 : i32
    %c0_i32_0 = arith.constant 0 : i32
    %c0_i32_1 = arith.constant 0 : i32
    return %c0_i32, %c0_i32_0 : i32, i32
  }
  func.func @transform_6(%arg0: i32) -> (i32, i32) {
    %c0_i32 = arith.constant 0 : i32
    %c0_i32_0 = arith.constant 0 : i32
    %c0_i32_1 = arith.constant 0 : i32
    return %c0_i32, %c0_i32_0 : i32, i32
  }
  func.func @transform_7(%arg0: i32) -> (i32, i32) {
    %c0_i32 = arith.constant 0 : i32
    %c0_i32_0 = arith.constant 0 : i32
    %c0_i32_1 = arith.constant 0 : i32
    return %c0_i32, %c0_i32_0 : i32, i32
  }
  func.func @transform_8(%arg0: i32) -> (i32, i32, i32) {
    %c0_i32 = arith.constant 0 : i32
    %c0_i32_0 = arith.constant 0 : i32
    %c0_i32_1 = arith.constant 0 : i32
    return %arg0, %c0_i32, %c0_i32_0 : i32, i32, i32
  }
}

module attributes {stable_mosaic.version = 11 : i64} {
  func.func @kernel(%arg0: i32, %arg1: memref<1x342x4xbf16, #tpu.memory_space<vmem>>, %arg2: memref<3x12x4xbf16, #tpu.memory_space<vmem>>, %arg3: memref<3x12x4xbf16, #tpu.memory_space<vmem>>, %arg4: memref<1x4xf32, #tpu.memory_space<vmem>>, %arg5: memref<1x4xf32, #tpu.memory_space<vmem>>, %arg6: memref<1x4xf32, #tpu.memory_space<vmem>>, %arg7: memref<1x4xf32, #tpu.memory_space<vmem>>, %arg8: memref<288x4xf32, #tpu.memory_space<vmem>>, %arg9: memref<1x288x4xbf16, #tpu.memory_space<vmem>>, %arg10: memref<324x12xbf16, #tpu.memory_space<vmem>>) attributes {dimension_semantics = [#tpu.dimension_semantics<parallel>], iteration_bounds = array<i64: 2>, scalar_prefetch = 0 : i64, scratch_operands = 1 : i64, tpu.core_type = #tpu.core_type<tc>, window_params = [{transform_indices = @transform_0, window_bounds = array<i64: 1, 342, 4>}, {pipeline_mode = #tpu.pipeline_mode<synchronous>, transform_indices = @transform_1, window_bounds = array<i64: 3, 12, 4>}, {pipeline_mode = #tpu.pipeline_mode<synchronous>, transform_indices = @transform_2, window_bounds = array<i64: 3, 12, 4>}, {pipeline_mode = #tpu.pipeline_mode<synchronous>, transform_indices = @transform_3, window_bounds = array<i64: 1, 4>}, {pipeline_mode = #tpu.pipeline_mode<synchronous>, transform_indices = @transform_4, window_bounds = array<i64: 1, 4>}, {pipeline_mode = #tpu.pipeline_mode<synchronous>, transform_indices = @transform_5, window_bounds = array<i64: 1, 4>}, {pipeline_mode = #tpu.pipeline_mode<synchronous>, transform_indices = @transform_6, window_bounds = array<i64: 1, 4>}, {pipeline_mode = #tpu.pipeline_mode<synchronous>, transform_indices = @transform_7, window_bounds = array<i64: 288, 4>}, {transform_indices = @transform_8, window_bounds = array<i64: 1, 288, 4>}]} {
    %c0 = arith.constant 0 : index
    %c0_0 = arith.constant 0 : index
    %c0_1 = arith.constant 0 : index
    %0 = vector.load %arg1[%c0, %c0_0, %c0_1] : memref<1x342x4xbf16, #tpu.memory_space<vmem>>, vector<1x324x4xbf16>
    %1 = vector.shape_cast %0 : vector<1x324x4xbf16> to vector<324x4xbf16>
    %c0_2 = arith.constant 0 : index
    %c1 = arith.constant 1 : index
    %c0_3 = arith.constant 0 : index
    %2 = vector.load %arg1[%c0_2, %c1, %c0_3] : memref<1x342x4xbf16, #tpu.memory_space<vmem>>, vector<1x324x4xbf16>
    %3 = vector.shape_cast %2 : vector<1x324x4xbf16> to vector<324x4xbf16>
    %c0_4 = arith.constant 0 : index
    %c2 = arith.constant 2 : index
    %c0_5 = arith.constant 0 : index
    %4 = vector.load %arg1[%c0_4, %c2, %c0_5] : memref<1x342x4xbf16, #tpu.memory_space<vmem>>, vector<1x324x4xbf16>
    %5 = vector.shape_cast %4 : vector<1x324x4xbf16> to vector<324x4xbf16>
    %6 = tpu.concatenate %1, %3, %5 in 1 : vector<324x4xbf16>, vector<324x4xbf16>, vector<324x4xbf16> -> vector<324x12xbf16>
    %c0_6 = arith.constant 0 : index
    %c0_7 = arith.constant 0 : index
    %7 = vector.load %arg10[%c0_6, %c0_7] : memref<324x12xbf16, #tpu.memory_space<vmem>>, vector<324x12xbf16>
    tpu.vector_store %arg10[%c0_6, %c0_7], %6 {strides = array<i32>} : memref<324x12xbf16, #tpu.memory_space<vmem>>, vector<324x12xbf16>,
    %c0_8 = arith.constant 0 : index
    %c0_9 = arith.constant 0 : index
    %8 = vector.load %arg10[%c0_8, %c0_9] : memref<324x12xbf16, #tpu.memory_space<vmem>>, vector<288x12xbf16>
    %c0_10 = arith.constant 0 : index
    %c0_11 = arith.constant 0 : index
    %c0_12 = arith.constant 0 : index
    %9 = vector.load %arg2[%c0_10, %c0_11, %c0_12] : memref<3x12x4xbf16, #tpu.memory_space<vmem>>, vector<1x12x4xbf16>
    %10 = vector.shape_cast %9 : vector<1x12x4xbf16> to vector<12x4xbf16>
    %cst = arith.constant dense<0.000000e+00> : vector<288x4xf32>
    %11 = tpu.matmul %8, %10, %cst {dimension_numbers = #tpu.dot_dimension_numbers<[1], [0], [0], [1], [0, 0, 1, 1], [], []>} : vector<288x12xbf16>, vector<12x4xbf16>, vector<288x4xf32> -> vector<288x4xf32>
    %c18 = arith.constant 18 : index
    %c0_13 = arith.constant 0 : index
    %12 = vector.load %arg10[%c18, %c0_13] : memref<324x12xbf16, #tpu.memory_space<vmem>>, vector<288x12xbf16>
    %c1_14 = arith.constant 1 : index
    %c0_15 = arith.constant 0 : index
    %c0_16 = arith.constant 0 : index
    %13 = vector.load %arg2[%c1_14, %c0_15, %c0_16] : memref<3x12x4xbf16, #tpu.memory_space<vmem>>, vector<1x12x4xbf16>
    %14 = vector.shape_cast %13 : vector<1x12x4xbf16> to vector<12x4xbf16>
    %cst_17 = arith.constant dense<0.000000e+00> : vector<288x4xf32>
    %15 = tpu.matmul %12, %14, %cst_17 {dimension_numbers = #tpu.dot_dimension_numbers<[1], [0], [0], [1], [0, 0, 1, 1], [], []>} : vector<288x12xbf16>, vector<12x4xbf16>, vector<288x4xf32> -> vector<288x4xf32>
    %16 = arith.addf %11, %15 : vector<288x4xf32>
    %c36 = arith.constant 36 : index
    %c0_18 = arith.constant 0 : index
    %17 = vector.load %arg10[%c36, %c0_18] : memref<324x12xbf16, #tpu.memory_space<vmem>>, vector<288x12xbf16>
    %c2_19 = arith.constant 2 : index
    %c0_20 = arith.constant 0 : index
    %c0_21 = arith.constant 0 : index
    %18 = vector.load %arg2[%c2_19, %c0_20, %c0_21] : memref<3x12x4xbf16, #tpu.memory_space<vmem>>, vector<1x12x4xbf16>
    %19 = vector.shape_cast %18 : vector<1x12x4xbf16> to vector<12x4xbf16>
    %cst_22 = arith.constant dense<0.000000e+00> : vector<288x4xf32>
    %20 = tpu.matmul %17, %19, %cst_22 {dimension_numbers = #tpu.dot_dimension_numbers<[1], [0], [0], [1], [0, 0, 1, 1], [], []>} : vector<288x12xbf16>, vector<12x4xbf16>, vector<288x4xf32> -> vector<288x4xf32>
    %21 = arith.addf %16, %20 : vector<288x4xf32>
    %c0_23 = arith.constant 0 : index
    %c0_24 = arith.constant 0 : index
    %22 = vector.load %arg4[%c0_23, %c0_24] : memref<1x4xf32, #tpu.memory_space<vmem>>, vector<1x4xf32>
    %23 = vector.broadcast %22 : vector<1x4xf32> to vector<288x4xf32>
    %24 = arith.mulf %21, %23 : vector<288x4xf32>
    %c0_25 = arith.constant 0 : index
    %c0_26 = arith.constant 0 : index
    %25 = vector.load %arg5[%c0_25, %c0_26] : memref<1x4xf32, #tpu.memory_space<vmem>>, vector<1x4xf32>
    %26 = vector.broadcast %25 : vector<1x4xf32> to vector<288x4xf32>
    %27 = arith.addf %24, %26 : vector<288x4xf32>
    %cst_27 = arith.constant 0.000000e+00 : f32
    %28 = vector.broadcast %cst_27 : f32 to vector<288x4xf32>
    %29 = arith.maximumf %27, %28 : vector<288x4xf32>
    %c0_28 = arith.constant 0 : index
    %c0_29 = arith.constant 0 : index
    %30 = vector.load %arg8[%c0_28, %c0_29] : memref<288x4xf32, #tpu.memory_space<vmem>>, vector<288x4xf32>
    %31 = arith.mulf %29, %30 : vector<288x4xf32>
    %32 = arith.truncf %31 : vector<288x4xf32> to vector<288x4xbf16>
    %cst_30 = arith.constant 0.000000e+00 : bf16
    %33 = vector.broadcast %cst_30 : bf16 to vector<20x12xbf16>
    %c304 = arith.constant 304 : index
    %c0_31 = arith.constant 0 : index
    %34 = vector.load %arg10[%c304, %c0_31] : memref<324x12xbf16, #tpu.memory_space<vmem>>, vector<20x12xbf16>
    tpu.vector_store %arg10[%c304, %c0_31], %33 {strides = array<i32>} : memref<324x12xbf16, #tpu.memory_space<vmem>>, vector<20x12xbf16>,
    %cst_32 = arith.constant 0.000000e+00 : bf16
    %35 = vector.broadcast %cst_32 : bf16 to vector<16x12xbf16>
    %c0_33 = arith.constant 0 : index
    %c0_34 = arith.constant 0 : index
    %36 = vector.load %arg10[%c0_33, %c0_34] : memref<324x12xbf16, #tpu.memory_space<vmem>>, vector<16x12xbf16>
    tpu.vector_store %arg10[%c0_33, %c0_34], %35 {strides = array<i32>} : memref<324x12xbf16, #tpu.memory_space<vmem>>, vector<16x12xbf16>,
    %cst_35 = arith.constant 0.000000e+00 : bf16
    %37 = vector.broadcast %cst_35 : bf16 to vector<3x4xbf16>
    %38 = tpu.concatenate %37, %32 in 0 : vector<3x4xbf16>, vector<288x4xbf16> -> vector<291x4xbf16>
    %cst_36 = arith.constant 0.000000e+00 : bf16
    %39 = vector.broadcast %cst_36 : bf16 to vector<2x4xbf16>
    %cst_37 = arith.constant 0.000000e+00 : bf16
    %40 = vector.broadcast %cst_37 : bf16 to vector<1x4xbf16>
    %41 = tpu.concatenate %39, %32, %40 in 0 : vector<2x4xbf16>, vector<288x4xbf16>, vector<1x4xbf16> -> vector<291x4xbf16>
    %cst_38 = arith.constant 0.000000e+00 : bf16
    %42 = vector.broadcast %cst_38 : bf16 to vector<1x4xbf16>
    %cst_39 = arith.constant 0.000000e+00 : bf16
    %43 = vector.broadcast %cst_39 : bf16 to vector<2x4xbf16>
    %44 = tpu.concatenate %42, %32, %43 in 0 : vector<1x4xbf16>, vector<288x4xbf16>, vector<2x4xbf16> -> vector<291x4xbf16>
    %45 = tpu.concatenate %38, %41, %44 in 1 : vector<291x4xbf16>, vector<291x4xbf16>, vector<291x4xbf16> -> vector<291x12xbf16>
    %c16 = arith.constant 16 : index
    %c0_40 = arith.constant 0 : index
    %46 = vector.load %arg10[%c16, %c0_40] : memref<324x12xbf16, #tpu.memory_space<vmem>>, vector<291x12xbf16>
    tpu.vector_store %arg10[%c16, %c0_40], %45 {strides = array<i32>} : memref<324x12xbf16, #tpu.memory_space<vmem>>, vector<291x12xbf16>,
    %c0_41 = arith.constant 0 : index
    %c0_42 = arith.constant 0 : index
    %47 = vector.load %arg10[%c0_41, %c0_42] : memref<324x12xbf16, #tpu.memory_space<vmem>>, vector<288x12xbf16>
    %c0_43 = arith.constant 0 : index
    %c0_44 = arith.constant 0 : index
    %c0_45 = arith.constant 0 : index
    %48 = vector.load %arg3[%c0_43, %c0_44, %c0_45] : memref<3x12x4xbf16, #tpu.memory_space<vmem>>, vector<1x12x4xbf16>
    %49 = vector.shape_cast %48 : vector<1x12x4xbf16> to vector<12x4xbf16>
    %cst_46 = arith.constant dense<0.000000e+00> : vector<288x4xf32>
    %50 = tpu.matmul %47, %49, %cst_46 {dimension_numbers = #tpu.dot_dimension_numbers<[1], [0], [0], [1], [0, 0, 1, 1], [], []>} : vector<288x12xbf16>, vector<12x4xbf16>, vector<288x4xf32> -> vector<288x4xf32>
    %c18_47 = arith.constant 18 : index
    %c0_48 = arith.constant 0 : index
    %51 = vector.load %arg10[%c18_47, %c0_48] : memref<324x12xbf16, #tpu.memory_space<vmem>>, vector<288x12xbf16>
    %c1_49 = arith.constant 1 : index
    %c0_50 = arith.constant 0 : index
    %c0_51 = arith.constant 0 : index
    %52 = vector.load %arg3[%c1_49, %c0_50, %c0_51] : memref<3x12x4xbf16, #tpu.memory_space<vmem>>, vector<1x12x4xbf16>
    %53 = vector.shape_cast %52 : vector<1x12x4xbf16> to vector<12x4xbf16>
    %cst_52 = arith.constant dense<0.000000e+00> : vector<288x4xf32>
    %54 = tpu.matmul %51, %53, %cst_52 {dimension_numbers = #tpu.dot_dimension_numbers<[1], [0], [0], [1], [0, 0, 1, 1], [], []>} : vector<288x12xbf16>, vector<12x4xbf16>, vector<288x4xf32> -> vector<288x4xf32>
    %55 = arith.addf %50, %54 : vector<288x4xf32>
    %c36_53 = arith.constant 36 : index
    %c0_54 = arith.constant 0 : index
    %56 = vector.load %arg10[%c36_53, %c0_54] : memref<324x12xbf16, #tpu.memory_space<vmem>>, vector<288x12xbf16>
    %c2_55 = arith.constant 2 : index
    %c0_56 = arith.constant 0 : index
    %c0_57 = arith.constant 0 : index
    %57 = vector.load %arg3[%c2_55, %c0_56, %c0_57] : memref<3x12x4xbf16, #tpu.memory_space<vmem>>, vector<1x12x4xbf16>
    %58 = vector.shape_cast %57 : vector<1x12x4xbf16> to vector<12x4xbf16>
    %cst_58 = arith.constant dense<0.000000e+00> : vector<288x4xf32>
    %59 = tpu.matmul %56, %58, %cst_58 {dimension_numbers = #tpu.dot_dimension_numbers<[1], [0], [0], [1], [0, 0, 1, 1], [], []>} : vector<288x12xbf16>, vector<12x4xbf16>, vector<288x4xf32> -> vector<288x4xf32>
    %60 = arith.addf %55, %59 : vector<288x4xf32>
    %c0_59 = arith.constant 0 : index
    %c19 = arith.constant 19 : index
    %c0_60 = arith.constant 0 : index
    %61 = vector.load %arg1[%c0_59, %c19, %c0_60] : memref<1x342x4xbf16, #tpu.memory_space<vmem>>, vector<1x288x4xbf16>
    %62 = vector.shape_cast %61 : vector<1x288x4xbf16> to vector<288x4xbf16>
    %63 = arith.extf %62 : vector<288x4xbf16> to vector<288x4xf32>
    %c0_61 = arith.constant 0 : index
    %c0_62 = arith.constant 0 : index
    %64 = vector.load %arg6[%c0_61, %c0_62] : memref<1x4xf32, #tpu.memory_space<vmem>>, vector<1x4xf32>
    %65 = vector.broadcast %64 : vector<1x4xf32> to vector<288x4xf32>
    %66 = arith.mulf %60, %65 : vector<288x4xf32>
    %c0_63 = arith.constant 0 : index
    %c0_64 = arith.constant 0 : index
    %67 = vector.load %arg7[%c0_63, %c0_64] : memref<1x4xf32, #tpu.memory_space<vmem>>, vector<1x4xf32>
    %68 = vector.broadcast %67 : vector<1x4xf32> to vector<288x4xf32>
    %69 = arith.addf %66, %68 : vector<288x4xf32>
    %70 = arith.addf %69, %63 : vector<288x4xf32>
    %cst_65 = arith.constant 0.000000e+00 : f32
    %71 = vector.broadcast %cst_65 : f32 to vector<288x4xf32>
    %72 = arith.maximumf %70, %71 : vector<288x4xf32>
    %73 = arith.truncf %72 : vector<288x4xf32> to vector<288x4xbf16>
    %c0_66 = arith.constant 0 : index
    %c0_67 = arith.constant 0 : index
    %c0_68 = arith.constant 0 : index
    %74 = vector.load %arg9[%c0_66, %c0_67, %c0_68] : memref<1x288x4xbf16, #tpu.memory_space<vmem>>, vector<1x288x4xbf16>
    %75 = vector.shape_cast %74 : vector<1x288x4xbf16> to vector<288x4xbf16>
    %76 = vector.shape_cast %73 : vector<288x4xbf16> to vector<1x288x4xbf16>
    tpu.vector_store %arg9[%c0_66, %c0_67, %c0_68], %76 {strides = array<i32>} : memref<1x288x4xbf16, #tpu.memory_space<vmem>>, vector<1x288x4xbf16>,
    return
  }
  func.func @transform_0(%arg0: i32) -> (i32, i32, i32) {
    %c0_i32 = arith.constant 0 : i32
    %c0_i32_0 = arith.constant 0 : i32
    %c0_i32_1 = arith.constant 0 : i32
    return %arg0, %c0_i32, %c0_i32_0 : i32, i32, i32
  }
  func.func @transform_1(%arg0: i32) -> (i32, i32, i32) {
    %c0_i32 = arith.constant 0 : i32
    %c0_i32_0 = arith.constant 0 : i32
    %c0_i32_1 = arith.constant 0 : i32
    %c0_i32_2 = arith.constant 0 : i32
    return %c0_i32, %c0_i32_0, %c0_i32_1 : i32, i32, i32
  }
  func.func @transform_2(%arg0: i32) -> (i32, i32, i32) {
    %c0_i32 = arith.constant 0 : i32
    %c0_i32_0 = arith.constant 0 : i32
    %c0_i32_1 = arith.constant 0 : i32
    %c0_i32_2 = arith.constant 0 : i32
    return %c0_i32, %c0_i32_0, %c0_i32_1 : i32, i32, i32
  }
  func.func @transform_3(%arg0: i32) -> (i32, i32) {
    %c0_i32 = arith.constant 0 : i32
    %c0_i32_0 = arith.constant 0 : i32
    %c0_i32_1 = arith.constant 0 : i32
    return %c0_i32, %c0_i32_0 : i32, i32
  }
  func.func @transform_4(%arg0: i32) -> (i32, i32) {
    %c0_i32 = arith.constant 0 : i32
    %c0_i32_0 = arith.constant 0 : i32
    %c0_i32_1 = arith.constant 0 : i32
    return %c0_i32, %c0_i32_0 : i32, i32
  }
  func.func @transform_5(%arg0: i32) -> (i32, i32) {
    %c0_i32 = arith.constant 0 : i32
    %c0_i32_0 = arith.constant 0 : i32
    %c0_i32_1 = arith.constant 0 : i32
    return %c0_i32, %c0_i32_0 : i32, i32
  }
  func.func @transform_6(%arg0: i32) -> (i32, i32) {
    %c0_i32 = arith.constant 0 : i32
    %c0_i32_0 = arith.constant 0 : i32
    %c0_i32_1 = arith.constant 0 : i32
    return %c0_i32, %c0_i32_0 : i32, i32
  }
  func.func @transform_7(%arg0: i32) -> (i32, i32) {
    %c0_i32 = arith.constant 0 : i32
    %c0_i32_0 = arith.constant 0 : i32
    %c0_i32_1 = arith.constant 0 : i32
    return %c0_i32, %c0_i32_0 : i32, i32
  }
  func.func @transform_8(%arg0: i32) -> (i32, i32, i32) {
    %c0_i32 = arith.constant 0 : i32
    %c0_i32_0 = arith.constant 0 : i32
    %c0_i32_1 = arith.constant 0 : i32
    return %arg0, %c0_i32, %c0_i32_0 : i32, i32, i32
  }
}

</mosaic_0001>

<bundles_post_ra>
// kernel: tpu_custom_call.1
= control target key start
LH: loop header
LB: loop body
LE: loop exit
PB: predicated region body
PF: predicated region fallthrough
CT: control target
= control target key end

     0   :  { %s5006_s27 = smov 0   ;;  %s6755_s0 = inlined_call_operand.vmem [shape: bf16[2,342,4], index: 0, kind: input, shape index: {}]   ;;  %s6756_s1 = inlined_call_operand.vmem [shape: bf16[3,12,4], index: 1, kind: input, shape index: {}]   ;;  %s6757_s2 = inlined_call_operand.vmem [shape: bf16[3,12,4], index: 2, kind: input, shape index: {}]   ;;  %s6758_s3 = inlined_call_operand.vmem [shape: f32[1,4], index: 3, kind: input, shape index: {}]   ;;  %s6759_s4 = inlined_call_operand.vmem [shape: f32[1,4], index: 4, kind: input, shape index: {}]   ;;  %s6760_s5 = inlined_call_operand.vmem [shape: f32[1,4], index: 5, kind: input, shape index: {}]   ;;  %s6761_s6 = inlined_call_operand.vmem [shape: f32[1,4], index: 6, kind: input, shape index: {}]   ;;  %s6762_s7 = inlined_call_operand.vmem [shape: f32[288,4], index: 7, kind: input, shape index: {}]   ;;  %s6763_s8 = inlined_call_operand.vmem [shape: bf16[2,288,4], index: 8, kind: output, shape index: {}]  }
   0x1 LB: > { %s4207_s28 = sadd.s32 4294967295, %s4956_s27   ;;  %p4211_p0 = scmp.ge.s32.totalorder %s4956_s27, 1  ;;  %s4956_s27 = sphi %s5006_s27, %s18_s27  }
   0x2   : > { %p262_p1 = scmp.lt.s32.totalorder %s4956_s27, 3 }
   0x4   : > { %p263_p2 = pnand %p4211_p0, %p262_p1 }
   0x5   : > { %p296_p3 = scmp.lt.s32.totalorder (!%p263_p2), %s4207_s28, 1  ;;  %s4958_s11 = smov (!%p263_p2), 8  }
   0x6   : > { %266 = sbr.rel (%p263_p2) target bundleno = 1131 (0x46b), region = 52  ;;  %s4959_s12 = smov (!%p263_p2), 4  }
   0xb   : > { %s6767_s28 = smov (!%p296_p3, %s4207_s28), 1  ;;  %vm669_vm0 = vcmask 1046528   ;;  %vm456_vm1 = vsmask.f32 7424  ;;  %vm753_vm2 = vcmask 31744   ;;  %vm797_vm3 = vcmask 64512  }
   0xc   : > { %s4927_s29 = smul.u32 172, %s6767_s28  ;;  %vm1262_vm4 = vcmask 1045504   ;;  %vm984_vm5 = vcmask 93184   ;;  %vm1207_vm6 = vcmask 97280   ;;  %vm2387_vm7 = vcmask 1040384  }
   0xd   : > { %vm2429_vm8 = vsmask.f32 256  ;;  %vm2221_vm10 = vsmask.f32 1280  ;;  %vm2384_vm11 = vcmask 1041408   ;;  %vm1025_vm13 = vcmask 91136  }
   0xe   : > { %s5020_s10 = scalar_lea.vmem %s6755_s0, %s4927_s29  ;;  %vm5576_vm9 = vmand %vm2387_vm7, %vm2429_vm8  ;;  %vm3897_vm14 = vcmask 1044480   ;;  %s4928_s15 = smul.u32 144, %s6767_s28  ;;  %vm4115_vm15 = vcmask 27648  }
   0xf   : > { %v5023_v0 = vld [vmem:[%s5020_s10 + $0x50] sm:$0xff]  ;;  %v5026_v1 = vld [vmem:[%s5020_s10 + $0x58] sm:$0xff]  ;;  %v5029_v2 = vld [vmem:[%s5020_s10 + $0x60] sm:$0xff] }
  0x10   : > { %v5032_v3 = vld [vmem:[%s5020_s10 + $0x68] sm:$0xff]  ;;  %v537_v4 = vshll.u32 %v5023_v0, 16  ;;  %v541_v5 = vshrl.u32 %v5023_v0, 16  ;;  %v545_v6 = vshll.u32 %v5026_v1, 16  ;;  %v689_v7 = vrot.slane %v5023_v0, 1  ;;  %v5054_v23 = vld [vmem:[%s5020_s10 + $0x70] sm:$0xff]  ;;  %vm2385_vm12 = vmand %vm2384_vm11, %vm2221_vm10  ;;  %s6333_s18 = scalar_lea.vmem %s6763_s8, %s4928_s15 }
  0x11   : > { %v691_v8 = vrot.slane %v5026_v1, 1  ;;  %v553_v9 = vshll.u32 %v5029_v2, 16  ;;  %v561_v13 = vshll.u32 %v5032_v3, 16  ;;  %v549_v15 = vshrl.u32 %v5026_v1, 16  ;;  %v5058_v25 = vld [vmem:[%s5020_s10 + $0x78] sm:$0xff]  ;;  %v5069_v32 = vld [vmem:[%s5020_s10 + $0x80] sm:$0xff] }
  0x12   : > { %v5040_v10 = vrot.slane %v537_v4, 1  ;;  %v547_v11 = vrot.slane %v545_v6, 1  ;;  %v693_v17 = vrot.slane %v5029_v2, 1  ;;  %v557_v18 = vshrl.u32 %v5029_v2, 16  ;;  %v5085_v48 = vld [vmem:[%s5020_s10 + $0x88] sm:$0xff]  ;;  %v5089_v50 = vld [vmem:[%s5020_s10 + $0x90] sm:$0xff] }
  0x13   : > { %v692_v12 = vsel %vm669_vm0, %v689_v7, %v691_v8  ;;  %v555_v16 = vrot.slane %v553_v9, 1  ;;  %v563_v20 = vrot.slane %v561_v13, 1  ;;  %v565_v28 = vshrl.u32 %v5032_v3, 16  ;;  %v5099_v56 = vld [vmem:[%s5020_s10 + $0x98] sm:$0xff]  ;;  %v348_v6 = vld [vmem:[%s5020_s10 + $0xa0] sm:$0x7] }
  0x14   : > { %v543_v14 = vor.u32 %v541_v5, %v5040_v10  ;;  %731 = vrot.lane.b32.xlu1 %v692_v12, %s4958_s11  ;;  %v551_v22 = vor.u32 %v549_v15, %v547_v11  ;;  %v694_v24 = vsel %vm669_vm0, %v691_v8, %v693_v17  ;;  %v569_v29 = vshll.u32 %v5054_v23, 16 }
  0x15   : > { %v559_v21 = vor.u32 %v557_v18, %v555_v16  ;;  %v695_v30 = vrot.slane %v5032_v3, 1  ;;  %v697_v31 = vrot.slane %v5054_v23, 1  ;;  %v577_v33 = vshll.u32 %v5058_v25, 16  ;;  %v5120_v18 = vld [vmem:[%s5020_s10 + $0x10] sm:$0xff] }
  0x16   : > { %v548_v19 = vsel %vm456_vm1, %v543_v14, %v547_v11  ;;  %v556_v27 = vsel %vm456_vm1, %v551_v22, %v555_v16  ;;  %v573_v35 = vshrl.u32 %v5054_v23, 16  ;;  %v567_v36 = vor.u32 %v565_v28, %v563_v20  ;;  %v5127_v22 = vld [vmem:[%s5020_s10 + $0x18] sm:$0xff] }
  0x17   : > { %644 = vrot.lane.b32.xlu0 %v548_v19, %s4959_s12  ;;  %v564_v26 = vsel %vm456_vm1, %v559_v21, %v563_v20  ;;  %v696_v34 = vsel %vm669_vm0, %v693_v17, %v695_v30  ;;  %v571_v37 = vrot.slane %v569_v29, 1  ;;  %v698_v38 = vsel %vm669_vm0, %v695_v30, %v697_v31 }
  0x18   : > { %648 = vrot.lane.b32.xlu2 %v564_v26, %s4959_s12  ;;  %v579_v39 = vrot.slane %v577_v33, 1  ;;  %v581_v40 = vshrl.u32 %v5058_v25, 16  ;;  %v585_v41 = vshll.u32 %v5069_v32, 16  ;;  %v699_v47 = vrot.slane %v5058_v25, 1  ;;  %v5138_v33 = vld [vmem:[%s5020_s10 + $0x20] sm:$0xff] }
  0x19   : > { %v575_v42 = vor.u32 %v573_v35, %v571_v37  ;;  %v572_v43 = vsel %vm456_vm1, %v567_v36, %v571_v37  ;;  %v589_v52 = vshrl.u32 %v5069_v32, 16  ;;  %v593_v53 = vshll.u32 %v5085_v48, 16 }
  0x1a   : > { %v583_v44 = vor.u32 %v581_v40, %v579_v39  ;;  %v587_v45 = vrot.slane %v585_v41, 1  ;;  %v700_v51 = vsel %vm669_vm0, %v697_v31, %v699_v47  ;;  %v701_v54 = vrot.slane %v5069_v32, 1 }
  0x1b   : > { %v580_v46 = vsel %vm456_vm1, %v575_v42, %v579_v39  ;;  %v703_v55 = vrot.slane %v5085_v48, 1  ;;  %v601_v57 = vshll.u32 %v5089_v50, 16  ;;  %v597_v59 = vshrl.u32 %v5085_v48, 16  ;;  %v5151_v42 = vld [vmem:[%s5020_s10 + $0x8] sm:$0xff] }
  0x1c   : > { %733 = vrot.lane.b32.xlu1 %v694_v24, %s4958_s11  ;;  %v588_v49 = vsel %vm456_vm1, %v583_v44, %v587_v45  ;;  %v702_v58 = vsel %vm669_vm0, %v699_v47, %v701_v54  ;;  %v591_v60 = vor.u32 %v589_v52, %v587_v45  ;;  %v595_v61 = vrot.slane %v593_v53, 1 }
  0x1d   : > { %v704_v62 = vsel %vm669_vm0, %v701_v54, %v703_v55  ;;  %v603_v63 = vrot.slane %v601_v57, 1  ;;  %v605_v4 = vshrl.u32 %v5089_v50, 16  ;;  %v609_v5 = vshll.u32 %v5099_v56, 16 }
  0x1e   : > { %v599_v8 = vor.u32 %v597_v59, %v595_v61  ;;  %v596_v9 = vsel %vm456_vm1, %v591_v60, %v595_v61  ;;  %v454_v11 = vunpack.c.l.b16 %v348_v6  ;;  %v705_v15 = vrot.slane %v5089_v50, 1  ;;  %v5170_v59 = vld [vmem:[%s5020_s10 + $0x28] sm:$0xff]  ;;  %v4898_v6 = vld [vmem:[%s5020_s10] sm:$0xe] }
  0x1f   : > { %646 = vrot.lane.b32.xlu0 %v556_v27, %s4959_s12  ;;  %v607_v12 = vor.u32 %v605_v4, %v603_v63  ;;  %v611_v13 = vrot.slane %v609_v5, 1  ;;  %v613_v20 = vshrl.u32 %v5099_v56, 16  ;;  %v707_v24 = vrot.slane %v5099_v56, 1  ;;  %v4897_v5 = vld [vmem:[%s5020_s10] sm:$0xf0] }
  0x20   : > { %735 = vrot.lane.b32.xlu2 %v696_v34, %s4958_s11  ;;  %v604_v14 = vsel %vm456_vm1, %v599_v8, %v603_v63  ;;  %v5115_v16 = vpack.c.b16 %v454_v11, %v454_v11  ;;  %v706_v19 = vsel %vm669_vm0, %v703_v55, %v705_v15  ;;  %v473_v27 = vshll.u32 %v5120_v18, 16 }
  0x21   : > { %v612_v17 = vsel %vm456_vm1, %v607_v12, %v611_v13  ;;  %v708_v28 = vsel %vm669_vm0, %v705_v15, %v707_v24  ;;  %v477_v29 = vshrl.u32 %v5120_v18, 16  ;;  %v615_v30 = vor.u32 %v613_v20, %v611_v13 }
  0x22   : > { %v617_v21 = vshll.u32 %v5115_v16, 16  ;;  %v709_v26 = vrot.slane %v5115_v16, 1  ;;  %v481_v34 = vshll.u32 %v5127_v22, 16  ;;  %v475_v36 = vrot.slane %v473_v27, 1 }
  0x23   : > { %v485_v40 = vshrl.u32 %v5127_v22, 16  ;;  %v489_v41 = vshll.u32 %v5138_v33, 16  ;;  %v675_v44 = vrot.slane %v5127_v22, 1  ;;  %v677_v52 = vrot.slane %v5138_v33, 1 }
  0x24   : > { %737 = vrot.lane.b32.xlu1 %v698_v38, %s4958_s11  ;;  %v5135_v31 = vrot.slane %v617_v21, 1  ;;  %v710_v35 = vsel %vm669_vm0, %v707_v24, %v709_v26  ;;  %v479_v37 = vor.u32 %v477_v29, %v475_v36  ;;  %v483_v39 = vrot.slane %v481_v34, 1  ;;  %v5186_v21 = vld [vmem:[%s5020_s10 + $0x30] sm:$0xff]  ;;  %v5196_v34 = vld [vmem:[%s5020_s10 + $0x38] sm:$0xff] }
  0x25   : > { %v491_v47 = vrot.slane %v489_v41, 1  ;;  %v469_v55 = vshrl.u32 %v5151_v42, 16  ;;  %v671_v57 = vrot.slane %v5151_v42, 1  ;;  %v678_v60 = vsel %vm669_vm0, %v675_v44, %v677_v52 }
  0x26   : > { %v620_v38 = vsel %vm456_vm1, %v615_v30, %v5135_v31  ;;  %v484_v45 = vsel %vm456_vm1, %v479_v37, %v483_v39  ;;  %v497_v11 = vshll.u32 %v5170_v59, 16  ;;  %v679_v27 = vrot.slane %v5170_v59, 1 }
  0x27   : > { %650 = vrot.lane.b32.xlu0 %v572_v43, %s4959_s12  ;;  %v673_v43 = vrot.slane %v5120_v18, 1  ;;  %v501_v29 = vshrl.u32 %v5170_v59, 16  ;;  %v505_v30 = vshll.u32 %v5186_v21, 16  ;;  %v509_v37 = vshrl.u32 %v5186_v21, 16 }
  0x28   : > { %652 = vrot.lane.b32.xlu2 %v580_v46, %s4959_s12  ;;  %v487_v46 = vor.u32 %v485_v40, %v483_v39 }
  0x29   : > { %v674_v4 = vsel %vm669_vm0, %v671_v57, %v673_v43  ;;  %v507_v40 = vrot.slane %v505_v30, 1 }
  0x2a   : > { %v492_v53 = vsel %vm456_vm1, %v487_v46, %v491_v47  ;;  %v5207_v46 = vld [vmem:[%s5020_s10 + $0x40] sm:$0xff] }
  0x2c   : > { %654 = vrot.lane.b32.xlu1 %v588_v49, %s4959_s12  ;;  %v465_v49 = vshll.u32 %v5151_v42, 16 }
  0x2e   : > { %v467_v54 = vrot.slane %v465_v49, 1 }
  0x2f   : > { %739 = vrot.lane.b32.xlu0 %v700_v51, %s4958_s11  ;;  %v676_v51 = vsel %vm669_vm0, %v673_v43, %v675_v44  ;;  %v511_v43 = vor.u32 %v509_v37, %v507_v40  ;;  %v4777_v37 = vld [vmem:[%s6756_s1 + $0x10] sm:$0x30] }
  0x30   : > { %741 = vrot.lane.b32.xlu2 %v702_v58, %s4958_s11  ;;  %v5166_v58 = vld [vmem:[%s5020_s10] sm:$0xff]   ;;  %v471_v63 = vor.u32 %v469_v55, %v467_v54  ;;  %v525_v55 = vshrl.u32 %v5207_v46, 16 }
  0x31   : > { %v458_v61 = vshrl.u32 %v5166_v58, 16 }
  0x32   : > { %v476_v13 = vsel %vm456_vm1, %v471_v63, %v475_v36  ;;  %v680_v36 = vsel %vm669_vm0, %v677_v52, %v679_v27  ;;  %v521_v52 = vshll.u32 %v5207_v46, 16 }
  0x34   : > { %743 = vrot.lane.b32.xlu1 %v704_v62, %s4958_s11  ;;  %v460_v62 = vshll.u32 %v5166_v58, 16 }
  0x36   : > { %v462_v8 = vrot.slane %v460_v62, 1 }
  0x37   : > { %656 = vrot.lane.b32.xlu0 %v596_v9, %s4959_s12  ;;  %v493_v9 = vshrl.u32 %v5138_v33, 16 }
  0x38   : > { %658 = vrot.lane.b32.xlu2 %v604_v14, %s4959_s12  ;;  %v463_v12 = vor.u32 %v462_v8, %v458_v61  ;;  %v4899_v14 = vor.u32 %v4898_v6, %v4897_v5 }
  0x39   : > { %v495_v15 = vor.u32 %v493_v9, %v491_v47  ;;  %v683_v47 = vrot.slane %v5196_v34, 1 }
  0x3a   : > { %v670_v20 = vrot.slane %v4899_v14, 1 }
  0x3c   : > { %660 = vrot.lane.b32.xlu1 %v612_v17, %s4959_s12  ;;  %v499_v17 = vrot.slane %v497_v11, 1 }
  0x3e   : > { %v500_v24 = vsel %vm456_vm1, %v495_v15, %v499_v17  ;;  %v503_v39 = vor.u32 %v501_v29, %v499_v17 }
  0x3f   : > { %745 = vrot.lane.b32.xlu0 %v706_v19, %s4958_s11  ;;  %v468_v19 = vsel %vm456_vm1, %v463_v12, %v467_v54  ;;  %v523_v54 = vrot.slane %v521_v52, 1 }
  0x40   : > { %747 = vrot.lane.b32.xlu2 %v708_v28, %s4958_s11  ;;  %v672_v28 = vsel %vm669_vm0, %v670_v20, %v671_v57 }
  0x41   : > { %v527_v62 = vor.u32 %v525_v55, %v523_v54 }
  0x44   : > { %749 = vrot.lane.b32.xlu1 %v710_v35, %s4958_s11  ;;  %v681_v35 = vrot.slane %v5186_v21, 1 }
  0x46   : > { %v682_v41 = vsel %vm669_vm0, %v679_v27, %v681_v35 }
  0x47   : > { %662 = vrot.lane.b32.xlu0 %v620_v38, %s4959_s12  ;;  %v513_v38 = vshll.u32 %v5196_v34, 16 }
  0x48   : > { %628 = vrot.lane.b32.xlu2 %v484_v45, %s4959_s12  ;;  %v508_v45 = vsel %vm456_vm1, %v503_v39, %v507_v40 }
  0x49   : > { %v515_v44 = vrot.slane %v513_v38, 1 }
  0x4b   : > { %v516_v49 = vsel %vm456_vm1, %v511_v43, %v515_v44 }
  0x4c   : > { %715 = vrot.lane.b32.xlu1 %v676_v51, %s4958_s11  ;;  %v5214_v51 = vld [vmem:[%s5020_s10 + $0x48] sm:$0xff] }
  0x4d   : > { %v529_v57 = vshll.u32 %v5214_v51, 16  ;;  %v687_v11 = vrot.slane %v5214_v51, 1 }
  0x4f   : > { %630 = vrot.lane.b32.xlu0 %v492_v53, %s4959_s12  ;;  %v684_v53 = vsel %vm669_vm0, %v681_v35, %v683_v47  ;;  %v531_v63 = vrot.slane %v529_v57, 1 }
  0x50   : > { %717 = vrot.lane.b32.xlu2 %v678_v60, %s4958_s11  ;;  %v685_v60 = vrot.slane %v5207_v46, 1 }
  0x51   : > { %v532_v5 = vsel %vm456_vm1, %v527_v62, %v531_v63 }
  0x52   : > { %v686_v61 = vsel %vm669_vm0, %v683_v47, %v685_v60 }
  0x54   : > { %713 = vrot.lane.b32.xlu1 %v674_v4, %s4958_s11  ;;  %v533_v4 = vshrl.u32 %v5214_v51, 16 }
  0x56   : > { %v535_v8 = vor.u32 %v533_v4, %v531_v63 }
  0x57   : > { %626 = vrot.lane.b32.xlu0 %v476_v13, %s4959_s12  ;;  %v690_v13 = vsel %vm669_vm0, %v687_v11, %v689_v7 }
  0x58   : > { %624 = vrot.lane.b32.xlu2 %v468_v19, %s4959_s12  ;;  %v540_v9 = vsel %vm456_vm1, %v535_v8, %v5040_v10  ;;  %v4362_v10 = vld [vmem:[%s6756_s1 + $0x8] sm:$0xf] }
  0x5c   : > { %632 = vrot.lane.b32.xlu1 %v500_v24, %s4959_s12 }
  0x5f   : > { %711 = vrot.lane.b32.xlu0 %v672_v28, %s4958_s11  ;;  %v517_v28 = vshrl.u32 %v5196_v34, 16 }
  0x60   : > { %719 = vrot.lane.b32.xlu2 %v680_v36, %s4958_s11  ;;  %v4484_v36 = vld [vmem:[%s6756_s1 + $0x10] sm:$0xf] }
  0x61   : > { %v519_v30 = vor.u32 %v517_v28, %v515_v44  ;;  %v4485_v40 = vor.u32 %v4777_v37, %v4484_v36 }
  0x63   : > { %v524_v38 = vsel %vm456_vm1, %v519_v30, %v523_v54  ;;  %v1765_v44 = vsel %vm1262_vm4, %v4485_v40, 0  ;;  %vm2830_vm1 = vmand %vm1025_vm13, %vm2221_vm10 }
  0x64   : > { %721 = vrot.lane.b32.xlu1 %v682_v41, %s4958_s11 }
  0x67   : > { %634 = vrot.lane.b32.xlu0 %v508_v45, %s4959_s12 }
  0x68   : > { %636 = vrot.lane.b32.xlu2 %v516_v49, %s4959_s12 }
  0x6c   : > { %638 = vrot.lane.b32.xlu1 %v524_v38, %s4959_s12 }
  0x6f   : > { %723 = vrot.lane.b32.xlu0 %v684_v53, %s4958_s11 }
  0x70   : > { %725 = vrot.lane.b32.xlu2 %v686_v61, %s4958_s11 }
  0x72   : > { %v649_v6 = vpop.permute.xlu2 %648 }
  0x73   : > { %v779_v12 = vsel %vm753_vm2, %v5029_v2, %v649_v6  ;;  %v4758_v2 = vld [vmem:[%s6756_s1 + $0x8] sm:$0x30]  ;;  %v688_v6 = vsel %vm669_vm0, %v685_v60, %v687_v11 }
  0x74   : > { %v4363_v20 = vor.u32 %v4758_v2, %v4362_v10  ;;  %727 = vrot.lane.b32.xlu1 %v688_v6, %s4958_s11 }
  0x76   : > { %v1264_v7 = vsel %vm1262_vm4, %v4363_v20, 0 }
  0x77   : > { %640 = vrot.lane.b32.xlu0 %v532_v5, %s4959_s12  ;;  %4925 = vmatpush.bf16.msra.mxu2 %v1264_v7 }
  0x78   : > { %642 = vrot.lane.b32.xlu2 %v540_v9, %s4959_s12  ;;  %1273 = vmatpush.bf16.msra.mxu0 %v1264_v7 }
  0x7a   : > { %v736_v14 = vpop.permute.xlu2 %735 }
  0x7b   : > { %v823_v15 = vsel %vm797_vm3, %v779_v12, %v736_v14  ;;  %1774 = vmatpush.bf16.msrb.mxu2 %v1765_v44 }
  0x7c   : > { %v885_v17 = vunpack.c.l.b16 %v823_v15  ;;  %v886_v19 = vunpack.c.h.b16 %v823_v15 }
  0x7e   : > { %v926_v24 = vpack.c.b16 %v885_v17, %v885_v17  ;;  %v927_v27 = vpack.c.b16 %v886_v19, %v886_v19 }
  0x7f   : > { %729 = vrot.lane.b32.xlu0 %v690_v13, %s4958_s11 }
  0x80   : > { %1009 = vst.msk [vmem:[#allocation2 + $0x60] sm:$0xf] %vm984_vm5, %v926_v24 }
  0x81   : > { %1010 = vst.msk [vmem:[#allocation2 + $0x64] sm:$0xf] %vm984_vm5, %v927_v27 }
  0x82   : > { %v653_v35 = vpop.permute.xlu2 %652 }
  0x83   : > { %v783_v60 = vsel %vm753_vm2, %v5054_v23, %v653_v35 }
  0x86   : > { %v732_v29 = vpop.permute.xlu1 %731 }
  0x89   : > { %v645_v39 = vpop.permute.xlu0 %644 }
  0x8a   : > { %v775_v41 = vsel %vm753_vm2, %v5023_v0, %v645_v39  ;;  %v742_v57 = vpop.permute.xlu2 %741 }
  0x8b   : > { %v819_v43 = vsel %vm797_vm3, %v775_v41, %v732_v29 }
  0x8c   : > { %v881_v45 = vunpack.c.l.b16 %v819_v43  ;;  %v882_v47 = vunpack.c.h.b16 %v819_v43 }
  0x8e   : > { %v922_v49 = vpack.c.b16 %v881_v45, %v881_v45  ;;  %v923_v52 = vpack.c.b16 %v882_v47, %v882_v47  ;;  %v734_v53 = vpop.permute.xlu1 %733 }
  0x90   : > { %1005 = vst.msk [vmem:[#allocation2 + $0x50] sm:$0xf] %vm984_vm5, %v922_v49  ;;  %v5302_v49 = vld [vmem:[#allocation2 + $0x60] sm:$0xff] }
  0x91   : > { %1006 = vst.msk [vmem:[#allocation2 + $0x54] sm:$0xf] %vm984_vm5, %v923_v52  ;;  %v647_v54 = vpop.permute.xlu0 %646 }
  0x92   : > { %v777_v55 = vsel %vm753_vm2, %v5026_v1, %v647_v54  ;;  %v659_v14 = vpop.permute.xlu2 %658 }
  0x93   : > { %v821_v0 = vsel %vm797_vm3, %v777_v55, %v734_v53  ;;  %v789_v55 = vsel %vm753_vm2, %v5085_v48, %v659_v14 }
  0x94   : > { %v883_v61 = vunpack.c.l.b16 %v821_v0  ;;  %v884_v62 = vunpack.c.h.b16 %v821_v0  ;;  %v1186_v0 = vrot.slane %v5302_v49, 1 }
  0x96   : > { %v924_v63 = vpack.c.b16 %v883_v61, %v883_v61  ;;  %v925_v4 = vpack.c.b16 %v884_v62, %v884_v62  ;;  %v738_v5 = vpop.permute.xlu1 %737 }
  0x98   : > { %1007 = vst.msk [vmem:[#allocation2 + $0x58] sm:$0xf] %vm984_vm5, %v924_v63  ;;  %v5277_v10 = vld [vmem:[#allocation2 + $0x50] sm:$0xff] }
  0x99   : > { %1008 = vst.msk [vmem:[#allocation2 + $0x5c] sm:$0xf] %vm984_vm5, %v925_v4  ;;  %v651_v8 = vpop.permute.xlu0 %650  ;;  %v1182_v28 = vrot.slane %v5277_v10, 1 }
  0x9a   : > { %v781_v1 = vsel %vm753_vm2, %v5032_v3, %v651_v8  ;;  %v748_v40 = vpop.permute.xlu2 %747 }
  0x9b   : > { %v825_v9 = vsel %vm797_vm3, %v781_v1, %v738_v5 }
  0x9c   : > { %v887_v12 = vunpack.c.l.b16 %v825_v9  ;;  %v888_v13 = vunpack.c.h.b16 %v825_v9 }
  0x9e   : > { %v928_v15 = vpack.c.b16 %v887_v12, %v887_v12  ;;  %v929_v17 = vpack.c.b16 %v888_v13, %v888_v13  ;;  %v655_v19 = vpop.permute.xlu1 %654 }
  0x9f   : > { %v785_v11 = vsel %vm753_vm2, %v5058_v25, %v655_v19  ;;  %v4388_v19 = vld [vmem:[%s6756_s1] sm:$0xf] }
  0xa0   : > { %1011 = vst.msk [vmem:[#allocation2 + $0x68] sm:$0xf] %vm984_vm5, %v928_v15  ;;  %v5284_v2 = vld [vmem:[#allocation2 + $0x58] sm:$0xff]  ;;  %v829_v3 = vsel %vm797_vm3, %v785_v11, %v742_v57 }
  0xa1   : > { %1012 = vst.msk [vmem:[#allocation2 + $0x6c] sm:$0xf] %vm984_vm5, %v929_v17  ;;  %v740_v20 = vpop.permute.xlu0 %739  ;;  %v891_v24 = vunpack.c.l.b16 %v829_v3  ;;  %v892_v27 = vunpack.c.h.b16 %v829_v3  ;;  %v1184_v23 = vrot.slane %v5284_v2, 1 }
  0xa2   : > { %v827_v7 = vsel %vm797_vm3, %v783_v60, %v740_v20  ;;  %v629_v61 = vpop.permute.xlu2 %628  ;;  %v4756_v60 = vld [vmem:[%s6756_s1] sm:$0x30] }
  0xa3   : > { %v889_v29 = vunpack.c.l.b16 %v827_v7  ;;  %v890_v25 = vunpack.c.h.b16 %v827_v7  ;;  %v932_v30 = vpack.c.b16 %v891_v24, %v891_v24  ;;  %v933_v35 = vpack.c.b16 %v892_v27, %v892_v27 }
  0xa4   : > { %v1185_v36 = vsel %vm669_vm0, %v1182_v28, %v1184_v23  ;;  %v4389_v3 = vor.u32 %v4756_v60, %v4388_v19  ;;  %v759_v27 = vsel %vm753_vm2, %v5120_v18, %v629_v61 }
  0xa5   : > { %v930_v37 = vpack.c.b16 %v889_v29, %v889_v29  ;;  %v931_v38 = vpack.c.b16 %v890_v25, %v890_v25  ;;  %4373 = vmatmul.msk.bf16.vlgmr.msra.gmra.mxu2 %vm1207_vm6, %v1185_v36  ;;  %1015 = vst.msk [vmem:[#allocation2 + $0x78] sm:$0xf] %vm984_vm5, %v932_v30 }
  0xa6   : > { %1016 = vst.msk [vmem:[#allocation2 + $0x7c] sm:$0xf] %vm984_vm5, %v933_v35  ;;  %v744_v39 = vpop.permute.xlu1 %743 }
  0xa7   : > { %1013 = vst.msk [vmem:[#allocation2 + $0x70] sm:$0xf] %vm984_vm5, %v930_v37 }
  0xa8   : > { %1014 = vst.msk [vmem:[#allocation2 + $0x74] sm:$0xf] %vm984_vm5, %v931_v38  ;;  %v5330_v7 = vld [vmem:[#allocation2 + $0x68] sm:$0xff] }
  0xa9   : > { %v657_v41 = vpop.permute.xlu0 %656  ;;  %v1188_v37 = vrot.slane %v5330_v7, 1 }
  0xaa   : > { %v787_v43 = vsel %vm753_vm2, %v5069_v32, %v657_v41  ;;  %v718_v17 = vpop.permute.xlu2 %717 }
  0xab   : > { %v831_v44 = vsel %vm797_vm3, %v787_v43, %v744_v39  ;;  %v1189_v43 = vsel %vm669_vm0, %v1186_v0, %v1188_v37 }
  0xac   : > { %v893_v45 = vunpack.c.l.b16 %v831_v44  ;;  %v894_v47 = vunpack.c.h.b16 %v831_v44 }
  0xae   : > { %v934_v52 = vpack.c.b16 %v893_v45, %v893_v45  ;;  %v935_v53 = vpack.c.b16 %v894_v47, %v894_v47  ;;  %v661_v54 = vpop.permute.xlu1 %660 }
  0xaf   : > { %v791_v57 = vsel %vm753_vm2, %v5089_v50, %v661_v54  ;;  %v1187_v50 = vsel %vm669_vm0, %v1184_v23, %v1186_v0 }
  0xb0   : > { %1017 = vst.msk [vmem:[#allocation2 + $0x80] sm:$0xf] %vm984_vm5, %v934_v52  ;;  %v835_v32 = vsel %vm797_vm3, %v791_v57, %v748_v40 }
  0xb1   : > { %1018 = vst.msk [vmem:[#allocation2 + $0x84] sm:$0xf] %vm984_vm5, %v935_v53  ;;  %v746_v62 = vpop.permute.xlu0 %745  ;;  %v897_v63 = vunpack.c.l.b16 %v835_v32  ;;  %v898_v4 = vunpack.c.h.b16 %v835_v32 }
  0xb2   : > { %v833_v5 = vsel %vm797_vm3, %v789_v55, %v746_v62  ;;  %v625_v47 = vpop.permute.xlu2 %624 }
  0xb3   : > { %v895_v6 = vunpack.c.l.b16 %v833_v5  ;;  %v896_v8 = vunpack.c.h.b16 %v833_v5  ;;  %v938_v48 = vpack.c.b16 %v897_v63, %v897_v63  ;;  %v939_v1 = vpack.c.b16 %v898_v4, %v898_v4  ;;  %v5353_v63 = vld [vmem:[#allocation2 + $0x70] sm:$0xff] }
  0xb5   : > { %v936_v9 = vpack.c.b16 %v895_v6, %v895_v6  ;;  %v937_v12 = vpack.c.b16 %v896_v8, %v896_v8  ;;  %4374 = vmatmul.msk.bf16.gmra.mxu2 %vm1207_vm6, %v1187_v50  ;;  %1021 = vst.msk [vmem:[#allocation2 + $0x90] sm:$0xf] %vm984_vm5, %v938_v48  ;;  %v755_v48 = vsel %vm753_vm2, %v5166_v58, %v625_v47 }
  0xb6   : > { %1022 = vst.msk [vmem:[#allocation2 + $0x94] sm:$0xf] %vm984_vm5, %v939_v1  ;;  %v750_v13 = vpop.permute.xlu1 %749 }
  0xb7   : > { %1019 = vst.msk [vmem:[#allocation2 + $0x88] sm:$0xf] %vm984_vm5, %v936_v9 }
  0xb8   : > { %1020 = vst.msk [vmem:[#allocation2 + $0x8c] sm:$0xf] %vm984_vm5, %v937_v12 }
  0xb9   : > { %v663_v14 = vpop.permute.xlu0 %662 }
  0xba   : > { %v793_v15 = vsel %vm753_vm2, %v5099_v56, %v663_v14  ;;  %v1433_v56 = vsel %vm1262_vm4, %v4389_v3, 0  ;;  %v720_v6 = vpop.permute.xlu2 %719 }
  0xbb   : > { %v837_v11 = vsel %vm797_vm3, %v793_v15, %v750_v13  ;;  %1442 = vmatpush.bf16.msra.mxu1 %v1433_v56  ;;  %4926 = vmatpush.bf16.msra.mxu3 %v1433_v56 }
  0xbc   : > { %v899_v20 = vunpack.c.l.b16 %v837_v11  ;;  %v900_v24 = vunpack.c.h.b16 %v837_v11 }
  0xbe   : > { %v940_v23 = vpack.c.b16 %v899_v20, %v899_v20  ;;  %v941_v29 = vpack.c.b16 %v900_v24, %v900_v24  ;;  %v716_v25 = vpop.permute.xlu1 %715 }
  0xbf   : > { %v803_v30 = vsel %vm797_vm3, %v759_v27, %v716_v25 }
  0xc0   : > { %1023 = vst.msk [vmem:[#allocation2 + $0x98] sm:$0xf] %vm984_vm5, %v940_v23  ;;  %v865_v35 = vunpack.c.l.b16 %v803_v30  ;;  %v866_v36 = vunpack.c.h.b16 %v803_v30 }
  0xc1   : > { %1024 = vst.msk [vmem:[#allocation2 + $0x9c] sm:$0xf] %vm984_vm5, %v941_v29  ;;  %v631_v18 = vpop.permute.xlu0 %630 }
  0xc2   : > { %v761_v38 = vsel %vm753_vm2, %v5127_v22, %v631_v18  ;;  %v906_v39 = vpack.c.b16 %v865_v35, %v865_v35  ;;  %v907_v40 = vpack.c.b16 %v866_v36, %v866_v36  ;;  %v4960_v22 = vmov 0   ;;  %v637_v27 = vpop.permute.xlu2 %636 }
  0xc3   : > { %v805_v41 = vsel %vm797_vm3, %v761_v38, %v718_v17 }
  0xc4   : > { %989 = vst.msk [vmem:[#allocation2 + $0x10] sm:$0xf] %vm984_vm5, %v906_v39  ;;  %v867_v44 = vunpack.c.l.b16 %v805_v41  ;;  %v868_v45 = vunpack.c.h.b16 %v805_v41 }
  0xc5   : > { %990 = vst.msk [vmem:[#allocation2 + $0x14] sm:$0xf] %vm984_vm5, %v907_v40  ;;  %4375 = vmatmul.msk.bf16.gmra.mxu2 %vm1207_vm6, %v1189_v43  ;;  %v767_v43 = vsel %vm753_vm2, %v5186_v21, %v637_v27 }
  0xc6   : > { %v908_v52 = vpack.c.b16 %v867_v44, %v867_v44  ;;  %v909_v53 = vpack.c.b16 %v868_v45, %v868_v45  ;;  %v714_v54 = vpop.permute.xlu1 %713 }
  0xc8   : > { %v5344_v55 = vld [vmem:[#allocation2 + $0x98] sm:$0xf0]  ;;  %991 = vst.msk [vmem:[#allocation2 + $0x18] sm:$0xf] %vm984_vm5, %v908_v52 }
  0xc9   : > { %2127 = vst.msk [vmem:[#allocation2 + $0x9c] sm:$0xf] %vm984_vm5, %v4960_v22  ;;  %v627_v57 = vpop.permute.xlu0 %626 }
  0xca   : > { %992 = vst.msk [vmem:[#allocation2 + $0x1c] sm:$0xf] %vm984_vm5, %v909_v53  ;;  %v757_v0 = vsel %vm753_vm2, %v5151_v42, %v627_v57  ;;  %v1190_v42 = vrot.slane %v5353_v63, 1  ;;  %v726_v52 = vpop.permute.xlu2 %725 }
  0xcb   : > { %v801_v32 = vsel %vm797_vm3, %v757_v0, %v714_v54 }
  0xcc   : > { %v863_v61 = vunpack.c.l.b16 %v801_v32  ;;  %v864_v62 = vunpack.c.h.b16 %v801_v32  ;;  %v1191_v60 = vsel %vm669_vm0, %v1188_v37, %v1190_v42  ;;  %v5366_v3 = vld [vmem:[#allocation2 + $0x10] sm:$0xff]  ;;  %v5378_v37 = vld [vmem:[#allocation2 + $0x78] sm:$0xff] }
  0xcd   : > { %v1166_v25 = vrot.slane %v5366_v3, 1 }
  0xce   : > { %v904_v4 = vpack.c.b16 %v863_v61, %v863_v61  ;;  %v905_v5 = vpack.c.b16 %v864_v62, %v864_v62  ;;  %v633_v8 = vpop.permute.xlu1 %632 }
  0xcf   : > { %v763_v1 = vsel %vm753_vm2, %v5138_v33, %v633_v8 }
  0xd0   : > { %987 = vst.msk [vmem:[#allocation2 + $0x8] sm:$0xf] %vm984_vm5, %v904_v4  ;;  %v807_v50 = vsel %vm797_vm3, %v763_v1, %v720_v6  ;;  %v5399_v6 = vld [vmem:[#allocation2 + $0x80] sm:$0xff] }
  0xd1   : > { %988 = vst.msk [vmem:[#allocation2 + $0xc] sm:$0xf] %vm984_vm5, %v905_v5  ;;  %v712_v9 = vpop.permute.xlu0 %711  ;;  %v869_v12 = vunpack.c.l.b16 %v807_v50  ;;  %v870_v13 = vunpack.c.h.b16 %v807_v50  ;;  %v5391_v57 = vld [vmem:[#allocation2 + $0x18] sm:$0xff]  ;;  %v1194_v1 = vrot.slane %v5399_v6, 1 }
  0xd2   : > { %v799_v14 = vsel %vm797_vm3, %v755_v48, %v712_v9  ;;  %v1168_v61 = vrot.slane %v5391_v57, 1  ;;  %v643_v5 = vpop.permute.xlu2 %642  ;;  %v5405_v50 = vld [vmem:[#allocation2 + $0x98] sm:$0xf] }
  0xd3   : > { %v861_v15 = vunpack.c.l.b16 %v799_v14  ;;  %v862_v17 = vunpack.c.h.b16 %v799_v14  ;;  %v910_v19 = vpack.c.b16 %v869_v12, %v869_v12  ;;  %v911_v58 = vpack.c.b16 %v870_v13, %v870_v13 }
  0xd4   : > { %v1169_v4 = vsel %vm669_vm0, %v1166_v25, %v1168_v61  ;;  %v773_v48 = vsel %vm753_vm2, %v5214_v51, %v643_v5  ;;  %v4759_v5 = vld [vmem:[#allocation2 + $0x10] sm:$0xf0] }
  0xd5   : > { %v902_v33 = vpack.c.b16 %v861_v15, %v861_v15  ;;  %v903_v11 = vpack.c.b16 %v862_v17, %v862_v17  ;;  %4376 = vmatmul.msk.bf16.gmra.mxu2 %vm1207_vm6, %v1191_v60  ;;  %993 = vst.msk [vmem:[#allocation2 + $0x20] sm:$0xf] %vm984_vm5, %v910_v19 }
  0xd6   : > { %994 = vst.msk [vmem:[#allocation2 + $0x24] sm:$0xf] %vm984_vm5, %v911_v58  ;;  %v722_v56 = vpop.permute.xlu1 %721 }
  0xd7   : > { %985 = vst.msk [vmem:[#allocation2] sm:$0xf] %vm984_vm5, %v902_v33  ;;  %v4920_v20 = vld [vmem:[#allocation2 + $0x8] sm:$0xe] }
  0xd8   : > { %986 = vst.msk [vmem:[#allocation2 + $0x4] sm:$0xf] %vm984_vm5, %v903_v11  ;;  %v4919_v24 = vld [vmem:[#allocation2 + $0x8] sm:$0xf0] }
  0xd9   : > { %v635_v23 = vpop.permute.xlu0 %634  ;;  %v4921_v29 = vor.u32 %v4920_v20, %v4919_v24  ;;  %2129 = vst.msk [vmem:[#allocation2] sm:$0xf] %vm984_vm5, %v4960_v22  ;;  %v4900_v8 = vld [vmem:[#allocation2 + $0x8] sm:$0xff]  }
  0xda   : > { %v765_v30 = vsel %vm753_vm2, %v5170_v59, %v635_v23  ;;  %v1192_v59 = vrot.slane %v5378_v37, 1  ;;  %v5416_v11 = vld [vmem:[#allocation2 + $0x88] sm:$0xff] }
  0xdb   : > { %v1165_v35 = vrot.slane %v4921_v29, 1  ;;  %v809_v36 = vsel %vm797_vm3, %v765_v30, %v722_v56  ;;  %v1196_v29 = vrot.slane %v5416_v11, 1 }
  0xdc   : > { %v871_v18 = vunpack.c.l.b16 %v809_v36  ;;  %v872_v38 = vunpack.c.h.b16 %v809_v36  ;;  %v1193_v21 = vsel %vm669_vm0, %v1190_v42, %v1192_v59  ;;  %v1068_v42 = vld [vmem:[#allocation2 + $0x98] sm:$0x1]  ;;  %v1195_v17 = vsel %vm669_vm0, %v1192_v59, %v1194_v1 }
  0xdd   : > { %v1167_v39 = vsel %vm669_vm0, %v1165_v35, %v1166_v25  ;;  %2126 = vst.msk [vmem:[#allocation2 + $0x98] sm:$0xf] %vm984_vm5, %v4960_v22  ;;  %v4742_v15 = vld [vmem:[#allocation2 + $0x20] sm:$0xff]  ;;  %v1197_v35 = vsel %vm669_vm0, %v1194_v1, %v1196_v29 }
  0xde   : > { %4364 = vmatmul.msk.bf16.vlgmr.msra.gmra.mxu0 %vm1207_vm6, %v1167_v39  ;;  %v912_v40 = vpack.c.b16 %v871_v18, %v871_v18  ;;  %v913_v41 = vpack.c.b16 %v872_v38, %v872_v38  ;;  %v1170_v58 = vrot.slane %v4742_v15, 1  ;;  %v639_v33 = vpop.permute.xlu1 %638 }
  0xdf   : > { %v769_v20 = vsel %vm753_vm2, %v5196_v34, %v639_v33 }
  0xe0   : > { %v4739_v44 = vld [vmem:[#allocation2] sm:$0xff]  ;;  %995 = vst.msk [vmem:[#allocation2 + $0x28] sm:$0xf] %vm984_vm5, %v912_v40  ;;  %v1171_v60 = vsel %vm669_vm0, %v1168_v61, %v1170_v58  ;;  %v813_v24 = vsel %vm797_vm3, %v769_v20, %v726_v52 }
  0xe1   : > { %2130 = vst.msk [vmem:[#allocation2 + $0x4] sm:$0xf] %vm984_vm5, %v4960_v22  ;;  %v724_v45 = vpop.permute.xlu0 %723  ;;  %4390 = vmatmul.msk.bf16.vlgmr.msra.gmra.mxu1 %vm1207_vm6, %v4739_v44  ;;  %v875_v27 = vunpack.c.l.b16 %v813_v24  ;;  %v876_v56 = vunpack.c.h.b16 %v813_v24 }
  0xe2   : > { %v811_v47 = vsel %vm797_vm3, %v767_v43, %v724_v45  ;;  %996 = vst.msk [vmem:[#allocation2 + $0x2c] sm:$0xf] %vm984_vm5, %v913_v41 }
  0xe3   : > { %v873_v53 = vunpack.c.l.b16 %v811_v47  ;;  %v874_v54 = vunpack.c.h.b16 %v811_v47  ;;  %v916_v25 = vpack.c.b16 %v875_v27, %v875_v27  ;;  %v917_v30 = vpack.c.b16 %v876_v56, %v876_v56 }
  0xe5   : > { %v914_v0 = vpack.c.b16 %v873_v53, %v873_v53  ;;  %v915_v32 = vpack.c.b16 %v874_v54, %v874_v54  ;;  %4377 = vmatmul.msk.bf16.gmra.mxu2 %vm1207_vm6, %v1193_v21  ;;  %999 = vst.msk [vmem:[#allocation2 + $0x38] sm:$0xf] %vm984_vm5, %v916_v25  ;;  %v1145_v53 = vunpack.c.l.b16 %v1068_v42 }
  0xe6   : > { %1000 = vst.msk [vmem:[#allocation2 + $0x3c] sm:$0xf] %vm984_vm5, %v917_v30  ;;  %v728_v39 = vpop.permute.xlu1 %727 }
  0xe7   : > { %997 = vst.msk [vmem:[#allocation2 + $0x30] sm:$0xf] %vm984_vm5, %v914_v0  ;;  %v1164_v21 = vpack.c.b16 %v1145_v53, %v1145_v53  ;;  %v4767_v53 = vld [vmem:[#allocation2 + $0x50] sm:$0xff] }
  0xe8   : > { %998 = vst.msk [vmem:[#allocation2 + $0x34] sm:$0xf] %vm984_vm5, %v915_v32 }
  0xe9   : > { %v641_v62 = vpop.permute.xlu0 %640  ;;  %v4743_v34 = vld [vmem:[#allocation2 + $0x28] sm:$0xff] }
  0xea   : > { %v1172_v36 = vrot.slane %v4743_v34, 1  ;;  %v771_v18 = vsel %vm753_vm2, %v5207_v46, %v641_v62  ;;  %v4762_v24 = vld [vmem:[#allocation2 + $0x28] sm:$0xff] }
  0xeb   : > { %v815_v40 = vsel %vm797_vm3, %v771_v18, %v728_v39  ;;  %v1673_v56 = vrot.slane %v4762_v24, 2 }
  0xec   : > { %v1173_v38 = vsel %vm669_vm0, %v1170_v58, %v1172_v36  ;;  %v877_v41 = vunpack.c.l.b16 %v815_v40  ;;  %v878_v43 = vunpack.c.h.b16 %v815_v40 }
  0xed   : > { %v4745_v0 = vld [vmem:[#allocation2 + $0x38] sm:$0xff] }
  0xee   : > { %4365 = vmatmul.msk.bf16.gmra.mxu0 %vm1207_vm6, %v1169_v4  ;;  %v918_v44 = vpack.c.b16 %v877_v41, %v877_v41  ;;  %v919_v59 = vpack.c.b16 %v878_v43, %v878_v43  ;;  %v1176_v61 = vrot.slane %v4745_v0, 1  ;;  %v4412_v4 = vld [vmem:[#allocation2 + $0x10] sm:$0xc] }
  0xef   : > { %v4744_v46 = vld [vmem:[#allocation2 + $0x30] sm:$0xff]  ;;  %v4413_v1 = vor.u32 %v4759_v5, %v4412_v4  ;;  %v4768_v4 = vld [vmem:[#allocation2 + $0x58] sm:$0xff] }
  0xf0   : > { %1001 = vst.msk [vmem:[#allocation2 + $0x40] sm:$0xf] %vm984_vm5, %v918_v44  ;;  %v1174_v52 = vrot.slane %v4744_v46, 1 }
  0xf1   : > { %v730_v9 = vpop.permute.xlu0 %729  ;;  %4391 = vmatmul.msk.bf16.gmra.mxu1 %vm1207_vm6, %v4900_v8  ;;  %1002 = vst.msk [vmem:[#allocation2 + $0x44] sm:$0xf] %vm984_vm5, %v919_v59 }
  0xf2   : > { %v817_v12 = vsel %vm797_vm3, %v773_v48, %v730_v9  ;;  %v1175_v54 = vsel %vm669_vm0, %v1172_v36, %v1174_v52  ;;  %v1177_v8 = vsel %vm669_vm0, %v1174_v52, %v1176_v61  ;;  %v4760_v48 = vld [vmem:[#allocation2 + $0x18] sm:$0xff]  ;;  %v1668_v9 = vrot.slane %v4413_v1, 2 }
  0xf3   : > { %v879_v13 = vunpack.c.l.b16 %v817_v12  ;;  %v880_v14 = vunpack.c.h.b16 %v817_v12  ;;  %v4764_v36 = vld [vmem:[#allocation2 + $0x38] sm:$0xff] }
  0xf5   : > { %v920_v19 = vpack.c.b16 %v879_v13, %v879_v13  ;;  %v921_v51 = vpack.c.b16 %v880_v14, %v880_v14  ;;  %4378 = vmatmul.msk.bf16.gmra.mxu2 %vm1207_vm6, %v1195_v17 }
  0xf7   : > { %1003 = vst.msk [vmem:[#allocation2 + $0x48] sm:$0xf] %vm984_vm5, %v920_v19  ;;  %v4761_v19 = vld [vmem:[#allocation2 + $0x20] sm:$0xff] }
  0xf8   : > { %1004 = vst.msk [vmem:[#allocation2 + $0x4c] sm:$0xf] %vm984_vm5, %v921_v51  ;;  %v4746_v12 = vld [vmem:[#allocation2 + $0x40] sm:$0xff]  ;;  %v1671_v58 = vrot.slane %v4761_v19, 2 }
  0xf9   : > { %v1178_v14 = vrot.slane %v4746_v12, 1 }
  0xfb   : > { %v1179_v17 = vsel %vm669_vm0, %v1176_v61, %v1178_v14 }
  0xfe   : > { %4366 = vmatmul.msk.bf16.gmra.mxu0 %vm1207_vm6, %v1171_v60 }
  0xff   : > { %v5422_v23 = vld [vmem:[#allocation2 + $0x48] sm:$0xff] }
 0x100   : > { %4399 = vmatmul.msk.bf16.vlgmr.msra.gmra.mxu3 %vm1207_vm6, %v5422_v23  ;;  %v1180_v33 = vrot.slane %v5422_v23, 1  ;;  %v4763_v23 = vld [vmem:[#allocation2 + $0x30] sm:$0xff] }
 0x101   : > { %4392 = vmatmul.msk.bf16.gmra.mxu1 %vm1207_vm6, %v5366_v3  ;;  %v4757_v3 = vld [vmem:[#allocation2 + $0x90] sm:$0xff] }
 0x102   : > { %v1198_v45 = vrot.slane %v4757_v3, 1  ;;  %v1181_v20 = vsel %vm669_vm0, %v1178_v14, %v1180_v33  ;;  %v1183_v25 = vsel %vm669_vm0, %v1180_v33, %v1182_v28  ;;  %v1677_v28 = vrot.slane %v4764_v36, 2  ;;  %v4769_v33 = vld [vmem:[#allocation2 + $0x60] sm:$0xff] }
 0x104   : > { %v1199_v47 = vsel %vm669_vm0, %v1196_v29, %v1198_v45 }
 0x105   : > { %4379 = vmatmul.msk.bf16.gmra.mxu2 %vm1207_vm6, %v1197_v35 }
 0x10e   : > { %4367 = vmatmul.msk.bf16.gmra.mxu0 %vm1207_vm6, %v1173_v38 }
 0x110   : > { %4400 = vmatmul.msk.bf16.gmra.mxu3 %vm1207_vm6, %v5277_v10 }
 0x111   : > { %4393 = vmatmul.msk.bf16.gmra.mxu1 %vm1207_vm6, %v5391_v57  ;;  %v1200_v57 = vrot.slane %v1164_v21, 1  ;;  %v1683_v21 = vrot.slane %v4767_v53, 2 }
 0x113   : > { %v1201_v32 = vsel %vm669_vm0, %v1198_v45, %v1200_v57 }
 0x115   : > { %4380 = vmatmul.msk.bf16.gmra.mxu2 %vm1207_vm6, %v1199_v47 }
 0x11e   : > { %4368 = vmatmul.msk.bf16.gmra.mxu0 %vm1207_vm6, %v1175_v54 }
 0x120   : > { %4401 = vmatmul.msk.bf16.gmra.mxu3 %vm1207_vm6, %v5284_v2  ;;  %v1669_v2 = vrot.slane %v4760_v48, 2  ;;  %v1685_v48 = vrot.slane %v4768_v4, 2 }
 0x121   : > { %4394 = vmatmul.msk.bf16.gmra.mxu1 %vm1207_vm6, %v4742_v15 }
 0x122   : > { %v1670_v13 = vsel %vm1262_vm4, %v1668_v9, %v1669_v2  ;;  %v1686_v9 = vsel %vm1262_vm4, %v1683_v21, %v1685_v48 }
 0x125   : > { %4381 = vmatmul.msk.bf16.gmra.mxu2 %vm1207_vm6, %v1201_v32 }
 0x128   : > { %v5453_v62 = vpop.f32.mrf.mxu2 }
 0x12e   : > { %4369 = vmatmul.msk.bf16.gmra.mxu0 %vm1207_vm6, %v1177_v8 }
 0x130   : > { %v5457_v42 = vpop.f32.mrf.mxu2  ;;  %4402 = vmatmul.msk.bf16.gmra.mxu3 %vm1207_vm6, %v5302_v49  ;;  %v1672_v49 = vsel %vm1262_vm4, %v1669_v2, %v1671_v58 }
 0x131   : > { %4395 = vmatmul.msk.bf16.gmra.mxu1 %vm1207_vm6, %v4743_v34  ;;  %v1675_v34 = vrot.slane %v4763_v23, 2 }
 0x133   : > { %v1678_v18 = vsel %vm1262_vm4, %v1675_v34, %v1677_v28 }
 0x135   : > { %4486 = vmatmul.msk.bf16.vlgmr.msrb.gmra.mxu2 %vm1207_vm6, %v1670_v13 }
 0x138   : > { %v5464_v15 = vpop.f32.mrf.mxu2 }
 0x13e   : > { %4370 = vmatmul.msk.bf16.gmra.mxu0 %vm1207_vm6, %v1179_v17  ;;  %v5542_v17 = vld [vmem:[%s6759_s4] ss:$0 sm:$0xff] }
 0x140   : > { %v5468_v51 = vpop.f32.mrf.mxu2  ;;  %4403 = vmatmul.msk.bf16.gmra.mxu3 %vm1207_vm6, %v5330_v7  ;;  %v1674_v7 = vsel %vm1262_vm4, %v1671_v58, %v1673_v56 }
 0x141   : > { %4396 = vmatmul.msk.bf16.gmra.mxu1 %vm1207_vm6, %v4744_v46 }
 0x145   : > { %4487 = vmatmul.msk.bf16.gmra.mxu2 %vm1207_vm6, %v1672_v49 }
 0x148   : > { %v5475_v60 = vpop.f32.mrf.mxu2 }
 0x14e   : > { %4371 = vmatmul.msk.bf16.gmra.mxu0 %vm1207_vm6, %v1181_v20 }
 0x150   : > { %v5480_v27 = vpop.f32.mrf.mxu2  ;;  %4404 = vmatmul.msk.bf16.gmra.mxu3 %vm1207_vm6, %v5353_v63  ;;  %v1676_v63 = vsel %vm1262_vm4, %v1673_v56, %v1675_v34  ;;  %v2018_v34 = vld [vmem:[%s6762_s7] sm:$0xff] }
 0x151   : > { %4397 = vmatmul.msk.bf16.gmra.mxu1 %vm1207_vm6, %v4745_v0 }
 0x155   : > { %4488 = vmatmul.msk.bf16.gmra.mxu2 %vm1207_vm6, %v1674_v7  ;;  %v1687_v7 = vrot.slane %v4769_v33, 2 }
 0x158   : > { %v5487_v29 = vpop.f32.mrf.mxu2 }
 0x15b   : > { %v1275_v46 = vpop.f32.mrf.mxu0 }
 0x15e   : > { %4372 = vmatmul.msk.bf16.gmra.mxu0 %vm1207_vm6, %v1183_v25  ;;  %v1444_v59 = vpop.f32.mrf.mxu1 }
 0x15f   : > { %v1445_v2 = vadd.f32 %v1444_v59, %v1275_v46 }
 0x160   : > { %v5493_v30 = vpop.f32.mrf.mxu2  ;;  %4405 = vmatmul.msk.bf16.gmra.mxu3 %vm1207_vm6, %v5378_v37  ;;  %v4765_v37 = vld [vmem:[#allocation2 + $0x40] sm:$0xff] }
 0x161   : > { %4398 = vmatmul.msk.bf16.gmra.mxu1 %vm1207_vm6, %v4746_v12  ;;  %v1679_v39 = vrot.slane %v4765_v37, 2  ;;  %v5537_v12 = vld [vmem:[%s6758_s3] ss:$0 sm:$0xff] }
 0x163   : > { %v1680_v40 = vsel %vm1262_vm4, %v1677_v28, %v1679_v39  ;;  %v1688_v28 = vsel %vm1262_vm4, %v1685_v48, %v1687_v7 }
 0x165   : > { %4489 = vmatmul.msk.bf16.gmra.mxu2 %vm1207_vm6, %v1676_v63 }
 0x166   : > { %v1446_v52 = vpop.f32.mrf.mxu1 }
 0x168   : > { %v5500_v35 = vpop.f32.mrf.mxu2 }
 0x16e   : > { %v1449_v0 = vpop.f32.mrf.mxu1 }
 0x170   : > { %v5502_v10 = vpop.f32.mrf.mxu2  ;;  %4406 = vmatmul.msk.bf16.gmra.mxu3 %vm1207_vm6, %v5399_v6  ;;  %v4766_v6 = vld [vmem:[#allocation2 + $0x48] sm:$0xff] }
 0x171   : > { %v1681_v44 = vrot.slane %v4766_v6, 2 }
 0x173   : > { %v1682_v45 = vsel %vm1262_vm4, %v1679_v39, %v1681_v44  ;;  %v1684_v57 = vsel %vm1262_vm4, %v1681_v44, %v1683_v21  ;;  %v5559_v21 = vld [vmem:[#allocation2 + $0x68] sm:$0xff] }
 0x175   : > { %4490 = vmatmul.msk.bf16.gmra.mxu2 %vm1207_vm6, %v1678_v18 }
 0x176   : > { %v1451_v5 = vpop.f32.mrf.mxu1 }
 0x178   : > { %v5508_v38 = vpop.f32.mrf.mxu2 }
 0x17e   : > { %v1454_v19 = vpop.f32.mrf.mxu1 }
 0x180   : > { %v5510_v3 = vpop.f32.mrf.mxu2  ;;  %4407 = vmatmul.msk.bf16.gmra.mxu3 %vm1207_vm6, %v5416_v11  ;;  %v1277_v11 = vpop.f32.mrf.mxu0 }
 0x181   : > { %v1447_v24 = vadd.f32 %v1446_v52, %v1277_v11 }
 0x185   : > { %4491 = vmatmul.msk.bf16.gmra.mxu2 %vm1207_vm6, %v1680_v40  ;;  %v2019_v40 = vld [vmem:[%s6762_s7 + $0x8] sm:$0xff] }
 0x186   : > { %v5550_v36 = vpop.f32.mrf.mxu1 }
 0x188   : > { %v5516_v41 = vpop.f32.mrf.mxu2  ;;  %v1280_v32 = vpop.f32.mrf.mxu0 }
 0x189   : > { %v1450_v6 = vadd.f32 %v1449_v0, %v1280_v32  ;;  %v1689_v32 = vrot.slane %v5559_v21, 2 }
 0x190   : > { %v5518_v43 = vpop.f32.mrf.mxu2  ;;  %v1282_v1 = vpop.f32.mrf.mxu0 }
 0x195   : > { %4492 = vmatmul.msk.bf16.gmra.mxu2 %vm1207_vm6, %v1682_v45 }
 0x198   : > { %v5522_v47 = vpop.f32.mrf.mxu2  ;;  %v1285_v49 = vpop.f32.mrf.mxu0 }
 0x1a0   : > { %v5524_v54 = vpop.f32.mrf.mxu2  ;;  %v1287_v39 = vpop.f32.mrf.mxu0 }
 0x1a5   : > { %4493 = vmatmul.msk.bf16.gmra.mxu2 %vm1207_vm6, %v1684_v57 }
 0x1a8   : > { %v5528_v61 = vpop.f32.mrf.mxu2 }
 0x1b0   : > { %v5530_v8 = vpop.f32.mrf.mxu2 }
 0x1b5   : > { %4494 = vmatmul.msk.bf16.gmra.mxu2 %vm1207_vm6, %v1686_v9  ;;  %v5562_v9 = vpop.f32.mrf.mxu1 }
 0x1b8   : > { %v1776_v13 = vpop.f32.mrf.mxu2 }
 0x1b9   : > { %v1866_v14 = vadd.f32 %v1776_v13, %v1445_v2  ;;  %v1452_v2 = vadd.f32 %v1451_v5, %v1282_v1 }
 0x1bb   : > { %v1906_v58 = vmul.f32 %v5537_v12, %v1866_v14  ;;  %v5564_v14 = vpop.f32.mrf.mxu0 }
 0x1bd   : > { %v1946_v20 = vadd.f32 %v5542_v17, %v1906_v58 }
 0x1bf   : > { %v1982_v23 = vmax.f32 %v1946_v20, 0.0 }
 0x1c0   : > { %v1778_v56 = vpop.f32.mrf.mxu2 }
 0x1c1   : > { %v1867_v25 = vadd.f32 %v1778_v56, %v1447_v24  ;;  %v2054_v18 = vmul.f32 %v2018_v34, %v1982_v23  ;;  %v2020_v56 = vld [vmem:[%s6762_s7 + $0x10] sm:$0xff]  ;;  %v1690_v34 = vsel %vm1262_vm4, %v1687_v7, %v1689_v32  ;;  %v1455_v7 = vadd.f32 %v1454_v19, %v1285_v49 }
 0x1c2   : > { %v1457_v49 = vadd.f32 %v5550_v36, %v1287_v39 }
 0x1c3   : > { %v1907_v63 = vmul.f32 %v5537_v12, %v1867_v25  ;;  %v2090_v45 = vpack.c.bf16 %v2054_v18, %v2054_v18 }
 0x1c5   : > { %v1947_v37 = vadd.f32 %v5542_v17, %v1907_v63  ;;  %4495 = vmatmul.msk.bf16.gmra.mxu2 %vm1207_vm6, %v1688_v28  ;;  %v2167_v57 = vunpack.c.l.b16 %v2090_v45 }
 0x1c7   : > { %v1983_v44 = vmax.f32 %v1947_v37, 0.0 }
 0x1c8   : > { %v1781_v59 = vpop.f32.mrf.mxu2 }
 0x1c9   : > { %v2055_v46 = vmul.f32 %v2019_v40, %v1983_v44  ;;  %v1868_v52 = vadd.f32 %v1781_v59, %v1450_v6  ;;  %v2021_v44 = vld [vmem:[%s6762_s7 + $0x18] sm:$0xff] }
 0x1cb   : > { %v2091_v11 = vpack.c.bf16 %v2055_v46, %v2055_v46  ;;  %v1908_v53 = vmul.f32 %v5537_v12, %v1868_v52  ;;  %v1461_v52 = vpop.f32.mrf.mxu1 }
 0x1cd   : > { %v2168_v4 = vunpack.c.l.b16 %v2091_v11  ;;  %v1948_v48 = vadd.f32 %v5542_v17, %v1908_v53 }
 0x1cf   : > { %v2203_v13 = vpack.c.b16 %v2168_v4, %v2167_v57  ;;  %v1984_v58 = vmax.f32 %v1948_v48, 0.0  ;;  %v1292_v4 = vpop.f32.mrf.mxu0 }
 0x1d0   : > { %v1783_v0 = vpop.f32.mrf.mxu2 }
 0x1d1   : > { %v1869_v33 = vadd.f32 %v1783_v0, %v1452_v2  ;;  %v2388_v20 = vrot.slane %v2203_v13, 7  ;;  %v2223_v24 = vshrl.u32 %v2203_v13, 16  ;;  %v2226_v23 = vshll.u32 %v2203_v13, 16  ;;  %v5591_v13 = vld [vmem:[#allocation2 + $0x70] sm:$0xff] }
 0x1d2   : > { %v2056_v37 = vmul.f32 %v2020_v56, %v1984_v58  ;;  %v1691_v56 = vrot.slane %v5591_v13, 2 }
 0x1d3   : > { %v1909_v25 = vmul.f32 %v5537_v12, %v1869_v33  ;;  %v2426_v5 = vsel %vm2387_vm7, 0, %v2388_v20  ;;  %v2430_v1 = vrot.slane %v2223_v24, 7  ;;  %v2228_v63 = vrot.slane %v2226_v23, 7 }
 0x1d4   : > { %2490 = vrot.lane.b32.xlu1 %v2426_v5, %s4959_s12  ;;  %v2225_v18 = vrot.slane %v2223_v24, 6  ;;  %v2092_v53 = vpack.c.bf16 %v2056_v37, %v2056_v37  ;;  %v1692_v39 = vsel %vm1262_vm4, %v1689_v32, %v1691_v56 }
 0x1d5   : > { %v1949_v40 = vadd.f32 %v5542_v17, %v1909_v25  ;;  %4496 = vmatmul.msk.bf16.gmra.mxu2 %vm1207_vm6, %v1690_v34  ;;  %v2431_v6 = vor.u32 %v2430_v1, %v2226_v23 }
 0x1d6   : > { %v5585_v59 = vor.u32 %v2228_v63, %v2225_v18  ;;  %v2169_v0 = vunpack.c.l.b16 %v2092_v53  ;;  %v1464_v63 = vpop.f32.mrf.mxu1  ;;  %v2022_v18 = vld [vmem:[%s6762_s7 + $0x20] sm:$0xff] }
 0x1d7   : > { %v1985_v45 = vmax.f32 %v1949_v40, 0.0  ;;  %v2486_v46 = vsel %vm5576_vm9, 0, %v2431_v6  ;;  %v1295_v36 = vpop.f32.mrf.mxu0 }
 0x1d8   : > { %2530 = vrot.lane.b32.xlu0 %v2486_v46, %s4958_s11  ;;  %v1786_v11 = vpop.f32.mrf.mxu2 }
 0x1d9   : > { %v2057_v21 = vmul.f32 %v2021_v44, %v1985_v45  ;;  %v1870_v57 = vadd.f32 %v1786_v11, %v1455_v7 }
 0x1db   : > { %v2093_v48 = vpack.c.bf16 %v2057_v21, %v2057_v21  ;;  %v1910_v2 = vmul.f32 %v5537_v12, %v1870_v57  ;;  %v2023_v21 = vld [vmem:[%s6762_s7 + $0x28] sm:$0xff] }
 0x1dd   : > { %v2170_v58 = vunpack.c.l.b16 %v2093_v48  ;;  %v1950_v19 = vadd.f32 %v5542_v17, %v1910_v2 }
 0x1df   : > { %v2204_v33 = vpack.c.b16 %v2170_v58, %v2169_v0  ;;  %v1986_v23 = vmax.f32 %v1950_v19, 0.0 }
 0x1e0   : > { %v1788_v24 = vpop.f32.mrf.mxu2 }
 0x1e1   : > { %v1871_v25 = vadd.f32 %v1788_v24, %v1457_v49  ;;  %v2389_v5 = vrot.slane %v2204_v33, 7  ;;  %v2231_v34 = vshrl.u32 %v2204_v33, 16  ;;  %v2234_v37 = vshll.u32 %v2204_v33, 16  ;;  %v1466_v24 = vpop.f32.mrf.mxu1 }
 0x1e2   : > { %v2058_v46 = vmul.f32 %v2022_v18, %v1986_v23  ;;  %v5617_v23 = vld [vmem:[#allocation2 + $0x78] sm:$0xff] }
 0x1e3   : > { %v1911_v40 = vmul.f32 %v5537_v12, %v1871_v25  ;;  %v2390_v6 = vsel %vm2387_vm7, %v2388_v20, %v2389_v5  ;;  %v2432_v44 = vrot.slane %v2231_v34, 7  ;;  %v2236_v7 = vrot.slane %v2234_v37, 7  ;;  %v1297_v25 = vpop.f32.mrf.mxu0 }
 0x1e4   : > { %2492 = vrot.lane.b32.xlu2 %v2390_v6, %s4959_s12  ;;  %v2233_v45 = vrot.slane %v2231_v34, 6  ;;  %v1460_v20 = vadd.f32 %v5562_v9, %v5564_v14  ;;  %v2094_v0 = vpack.c.bf16 %v2058_v46, %v2058_v46  ;;  %v1462_v34 = vadd.f32 %v1461_v52, %v1292_v4  ;;  %v2024_v46 = vld [vmem:[%s6762_s7 + $0x30] sm:$0xff] }
 0x1e5   : > { %v1951_v11 = vadd.f32 %v5542_v17, %v1911_v40  ;;  %4497 = vmatmul.msk.bf16.gmra.mxu2 %vm1207_vm6, %v1692_v39  ;;  %v2433_v53 = vor.u32 %v2432_v44, %v2234_v37  ;;  %v1693_v40 = vrot.slane %v5617_v23, 2 }
 0x1e6   : > { %v2237_v57 = vor.u32 %v2236_v7, %v2233_v45  ;;  %v2171_v9 = vunpack.c.l.b16 %v2094_v0 }
 0x1e7   : > { %v1987_v48 = vmax.f32 %v1951_v11, 0.0  ;;  %v2434_v2 = vsel %vm2429_vm8, %v2430_v1, %v2433_v53  ;;  %v1694_v52 = vsel %vm1262_vm4, %v1691_v56, %v1693_v40 }
 0x1e8   : > { %2532 = vrot.lane.b32.xlu1 %v2434_v2, %s4958_s11  ;;  %v1791_v32 = vpop.f32.mrf.mxu2  ;;  %v5614_v13 = vsel %vm2221_vm10, %v5585_v59, %v2237_v57 }
 0x1e9   : > { %v2059_v58 = vmul.f32 %v2023_v21, %v1987_v48  ;;  %v1872_v19 = vadd.f32 %v1791_v32, %v1460_v20 }
 0x1eb   : > { %v2095_v49 = vpack.c.bf16 %v2059_v58, %v2059_v58  ;;  %v1912_v33 = vmul.f32 %v5537_v12, %v1872_v19  ;;  %v1469_v58 = vpop.f32.mrf.mxu1  ;;  %v2025_v19 = vld [vmem:[%s6762_s7 + $0x38] sm:$0xff] }
 0x1ed   : > { %v2172_v14 = vunpack.c.l.b16 %v2095_v49  ;;  %v1952_v1 = vadd.f32 %v5542_v17, %v1912_v33 }
 0x1ef   : > { %v2205_v18 = vpack.c.b16 %v2172_v14, %v2171_v9  ;;  %v1988_v6 = vmax.f32 %v1952_v1, 0.0  ;;  %v1300_v9 = vpop.f32.mrf.mxu0  ;;  %v621_v14 = vshrl.u32 %v5115_v16, 16  ;;  %v2028_v16 = vld [vmem:[%s6762_s7 + $0x50] sm:$0xff] }
 0x1f0   : > { %v1793_v37 = vpop.f32.mrf.mxu2 }
 0x1f1   : > { %v1873_v39 = vadd.f32 %v1793_v37, %v1462_v34  ;;  %v2391_v7 = vrot.slane %v2205_v18, 7  ;;  %v2240_v45 = vshrl.u32 %v2205_v18, 16  ;;  %v2243_v11 = vshll.u32 %v2205_v18, 16 }
 0x1f2   : > { %v2060_v2 = vmul.f32 %v2024_v46, %v1988_v6 }
 0x1f3   : > { %v1913_v53 = vmul.f32 %v5537_v12, %v1873_v39  ;;  %v2392_v21 = vsel %vm2387_vm7, %v2389_v5, %v2391_v7  ;;  %v2435_v20 = vrot.slane %v2240_v45, 7  ;;  %v2245_v4 = vrot.slane %v2243_v11, 7 }
 0x1f4   : > { %2494 = vrot.lane.b32.xlu2 %v2392_v21, %s4959_s12  ;;  %v2242_v48 = vrot.slane %v2240_v45, 6  ;;  %v1465_v5 = vadd.f32 %v1464_v63, %v1295_v36  ;;  %v2096_v34 = vpack.c.bf16 %v2060_v2, %v2060_v2  ;;  %v5640_v45 = vld [vmem:[#allocation2 + $0x80] sm:$0xff]  ;;  %v623_v63 = vor.u32 %v621_v14, %v5135_v31  ;;  %v1471_v21 = vpop.f32.mrf.mxu1 }
 0x1f5   : > { %v1953_v32 = vadd.f32 %v5542_v17, %v1913_v53  ;;  %4498 = vmatmul.msk.bf16.gmra.mxu2 %vm1207_vm6, %v1694_v52  ;;  %v2436_v0 = vor.u32 %v2435_v20, %v2243_v11  ;;  %v1467_v11 = vadd.f32 %v1466_v24, %v1297_v25  ;;  %v2026_v31 = vld [vmem:[%s6762_s7 + $0x40] sm:$0xff] }
 0x1f6   : > { %v2246_v49 = vor.u32 %v2245_v4, %v2242_v48 }
 0x1f7   : > { %v1989_v33 = vmax.f32 %v1953_v32, 0.0  ;;  %v2437_v23 = vsel %vm2429_vm8, %v2432_v44, %v2436_v0  ;;  %v2173_v44 = vunpack.c.l.b16 %v2096_v34  ;;  %v1302_v0 = vpop.f32.mrf.mxu0 }
 0x1f8   : > { %2534 = vrot.lane.b32.xlu0 %v2437_v23, %s4958_s11  ;;  %v1796_v56 = vpop.f32.mrf.mxu2  ;;  %v5637_v1 = vsel %vm2221_vm10, %v2237_v57, %v2246_v49  ;;  %v1695_v57 = vrot.slane %v5640_v45, 2 }
 0x1f9   : > { %v2061_v18 = vmul.f32 %v2025_v19, %v1989_v33  ;;  %v1874_v37 = vadd.f32 %v1796_v56, %v1465_v5 }
 0x1fa   : > { %v1696_v33 = vsel %vm1262_vm4, %v1693_v40, %v1695_v57 }
 0x1fb   : > { %v2097_v6 = vpack.c.bf16 %v2061_v18, %v2061_v18  ;;  %v1914_v39 = vmul.f32 %v5537_v12, %v1874_v37  ;;  %v2027_v37 = vld [vmem:[%s6762_s7 + $0x48] sm:$0xff] }
 0x1fd   : > { %v2174_v36 = vunpack.c.l.b16 %v2097_v6  ;;  %v1954_v46 = vadd.f32 %v5542_v17, %v1914_v39  ;;  %v1470_v39 = vadd.f32 %v1469_v58, %v1300_v9  ;;  %v4774_v58 = vld [vmem:[#allocation2 + $0x88] sm:$0xff] }
 0x1ff   : > { %v2206_v53 = vpack.c.b16 %v2174_v36, %v2173_v44  ;;  %v1990_v4 = vmax.f32 %v1954_v46, 0.0 }
 0x200   : > { %v1798_v52 = vpop.f32.mrf.mxu2  ;;  %664 = vrot.lane.b32.xlu0 %v623_v63, %s4959_s12 }
 0x201   : > { %v1875_v48 = vadd.f32 %v1798_v52, %v1467_v11  ;;  %v2393_v2 = vrot.slane %v2206_v53, 7  ;;  %v2249_v32 = vshrl.u32 %v2206_v53, 16  ;;  %v2252_v19 = vshll.u32 %v2206_v53, 16  ;;  %v1474_v11 = vpop.f32.mrf.mxu1 }
 0x202   : > { %v2062_v14 = vmul.f32 %v2026_v31, %v1990_v4  ;;  %v1305_v4 = vpop.f32.mrf.mxu0 }
 0x203   : > { %v1915_v5 = vmul.f32 %v5537_v12, %v1875_v48  ;;  %v2394_v24 = vsel %vm2387_vm7, %v2391_v7, %v2393_v2  ;;  %v2438_v25 = vrot.slane %v2249_v32, 7  ;;  %v2254_v23 = vrot.slane %v2252_v19, 7 }
 0x204   : > { %2496 = vrot.lane.b32.xlu1 %v2394_v24, %s4959_s12  ;;  %v2251_v56 = vrot.slane %v2249_v32, 6  ;;  %v2098_v44 = vpack.c.bf16 %v2062_v14, %v2062_v14  ;;  %v1472_v32 = vadd.f32 %v1471_v21, %v1302_v0 }
 0x205   : > { %v1955_v34 = vadd.f32 %v5542_v17, %v1915_v5  ;;  %4499 = vmatmul.msk.bf16.gmra.mxu2 %vm1207_vm6, %v1696_v33  ;;  %v2439_v18 = vor.u32 %v2438_v25, %v2252_v19  ;;  %v1697_v19 = vrot.slane %v4774_v58, 2 }
 0x206   : > { %v2255_v6 = vor.u32 %v2254_v23, %v2251_v56 }
 0x207   : > { %v1991_v7 = vmax.f32 %v1955_v34, 0.0  ;;  %v2440_v45 = vsel %vm2429_vm8, %v2435_v20, %v2439_v18  ;;  %v2175_v20 = vunpack.c.l.b16 %v2098_v44  ;;  %v1698_v34 = vsel %vm1262_vm4, %v1695_v57, %v1697_v19 }
 0x208   : > { %2536 = vrot.lane.b32.xlu2 %v2440_v45, %s4958_s11  ;;  %v1801_v40 = vpop.f32.mrf.mxu2  ;;  %v5661_v63 = vsel %vm2221_vm10, %v2246_v49, %v2255_v6 }
 0x209   : > { %v2063_v36 = vmul.f32 %v2027_v37, %v1991_v7  ;;  %v1876_v46 = vadd.f32 %v1801_v40, %v1470_v39  ;;  %v1476_v14 = vpop.f32.mrf.mxu1 }
 0x20a   : > { %v1307_v40 = vpop.f32.mrf.mxu0 }
 0x20b   : > { %v2099_v53 = vpack.c.bf16 %v2063_v36, %v2063_v36  ;;  %v1916_v52 = vmul.f32 %v5537_v12, %v1876_v46  ;;  %v1475_v36 = vadd.f32 %v1474_v11, %v1305_v4 }
 0x20c   : > { %751 = vrot.lane.b32.xlu1 %v709_v26, %s4958_s11 }
 0x20d   : > { %v2176_v9 = vunpack.c.l.b16 %v2099_v53  ;;  %v1956_v48 = vadd.f32 %v5542_v17, %v1916_v52  ;;  %v5692_v52 = vld [vmem:[#allocation2 + $0x90] sm:$0xff] }
 0x20e   : > { %v1699_v11 = vrot.slane %v5692_v52, 2 }
 0x20f   : > { %v5668_v49 = vpack.c.b16 %v2176_v9, %v2175_v20  ;;  %v1992_v5 = vmax.f32 %v1956_v48, 0.0 }
 0x210   : > { %v1803_v31 = vpop.f32.mrf.mxu2 }
 0x211   : > { %v1877_v24 = vadd.f32 %v1803_v31, %v1472_v32  ;;  %v2395_v33 = vrot.slane %v5668_v49, 7  ;;  %v2258_v23 = vshrl.u32 %v5668_v49, 16  ;;  %v2261_v26 = vshll.u32 %v5668_v49, 16 }
 0x212   : > { %v2064_v39 = vmul.f32 %v2028_v16, %v1992_v5  ;;  %v1479_v5 = vpop.f32.mrf.mxu1  ;;  %v4797_v16 = vld [vmem:[%s6757_s2 + $0x8] sm:$0x30] }
 0x213   : > { %v1917_v56 = vmul.f32 %v5537_v12, %v1877_v24  ;;  %v2396_v21 = vsel %vm2387_vm7, %v2393_v2, %v2395_v33  ;;  %v5678_v0 = vrot.slane %v2258_v23, 7  ;;  %v2263_v18 = vrot.slane %v2261_v26, 7  ;;  %v2029_v2 = vld [vmem:[%s6762_s7 + $0x58] sm:$0xff] }
 0x214   : > { %2498 = vrot.lane.b32.xlu2 %v2396_v21, %s4959_s12  ;;  %v2260_v37 = vrot.slane %v2258_v23, 6  ;;  %v2100_v20 = vpack.c.bf16 %v2064_v39, %v2064_v39  ;;  %v1477_v24 = vadd.f32 %v1476_v14, %v1307_v40  ;;  %v1700_v21 = vsel %vm1262_vm4, %v1697_v19, %v1699_v11  ;;  %v4602_v14 = vld [vmem:[%s6757_s2] sm:$0xf]  ;;  %v4816_v19 = vld [vmem:[%s6757_s2 + $0x10] sm:$0x30] }
 0x215   : > { %v1957_v7 = vadd.f32 %v5542_v17, %v1917_v56  ;;  %4500 = vmatmul.msk.bf16.gmra.mxu2 %vm1207_vm6, %v1698_v34  ;;  %v2442_v45 = vor.u32 %v5678_v0, %v2261_v26  ;;  %v1310_v26 = vpop.f32.mrf.mxu0 }
 0x216   : > { %v5688_v44 = vor.u32 %v2263_v18, %v2260_v37  ;;  %v2177_v4 = vunpack.c.l.b16 %v2100_v20  ;;  %v4795_v18 = vld [vmem:[%s6757_s2] sm:$0x30]  ;;  %v4698_v37 = vld [vmem:[%s6757_s2 + $0x10] sm:$0xf]  ;;  %v1480_v20 = vadd.f32 %v1479_v5, %v1310_v26 }
 0x217   : > { %v1993_v46 = vmax.f32 %v1957_v7, 0.0  ;;  %v2443_v57 = vsel %vm2429_vm8, %v2438_v25, %v2442_v45 }
 0x218   : > { %2538 = vrot.lane.b32.xlu0 %v2443_v57, %s4958_s11  ;;  %v1806_v53 = vpop.f32.mrf.mxu2  ;;  %v5696_v58 = vsel %vm2221_vm10, %v2255_v6, %v5688_v44  ;;  %v4576_v6 = vld [vmem:[%s6757_s2 + $0x8] sm:$0xf]  ;;  %v4603_v57 = vor.u32 %v4795_v18, %v4602_v14 }
 0x219   : > { %v2065_v9 = vmul.f32 %v2029_v2, %v1993_v46  ;;  %v1878_v48 = vadd.f32 %v1806_v53, %v1475_v36  ;;  %v4577_v34 = vor.u32 %v4797_v16, %v4576_v6  ;;  %v2030_v2 = vld [vmem:[%s6762_s7 + $0x60] sm:$0xff]  ;;  %v4699_v53 = vor.u32 %v4816_v19, %v4698_v37  ;;  %v2031_v6 = vld [vmem:[%s6762_s7 + $0x68] sm:$0xff] }
 0x21a   : > { %v1481_v14 = vpop.f32.mrf.mxu1 }
 0x21b   : > { %v2101_v32 = vpack.c.bf16 %v2065_v9, %v2065_v9  ;;  %v1918_v49 = vmul.f32 %v5537_v12, %v1878_v48  ;;  %v3069_v46 = vsel %vm1262_vm4, %v4577_v34, 0  ;;  %v4778_v34 = vld [vmem:[#allocation2] sm:$0xff] }
 0x21c   : > { %3078 = vmatpush.bf16.msrb.mxu3 %v3069_v46 }
 0x21d   : > { %v2178_v31 = vunpack.c.l.b16 %v2101_v32  ;;  %v1958_v25 = vadd.f32 %v5542_v17, %v1918_v49 }
 0x21f   : > { %v5701_v23 = vpack.c.b16 %v2178_v31, %v2177_v4  ;;  %v1994_v39 = vmax.f32 %v1958_v25, 0.0  ;;  %v3238_v4 = vsel %vm1262_vm4, %v4603_v57, 0  ;;  %v3569_v31 = vsel %vm1262_vm4, %v4699_v53, 0 }
 0x220   : > { %v1808_v56 = vpop.f32.mrf.mxu2  ;;  %3247 = vmatpush.bf16.msrb.mxu0 %v3238_v4  ;;  %3578 = vmatpush.bf16.msrb.mxu1 %v3569_v31 }
 0x221   : > { %v1879_v7 = vadd.f32 %v1808_v56, %v1477_v24  ;;  %v2397_v45 = vrot.slane %v5701_v23, 7  ;;  %v2267_v40 = vshrl.u32 %v5701_v23, 16  ;;  %v2270_v36 = vshll.u32 %v5701_v23, 16 }
 0x222   : > { %v2066_v24 = vmul.f32 %v2030_v2, %v1994_v39 }
 0x223   : > { %v1919_v9 = vmul.f32 %v5537_v12, %v1879_v7  ;;  %v2398_v48 = vsel %vm2387_vm7, %v2395_v33, %v2397_v45  ;;  %v5733_v32 = vrot.slane %v2267_v40, 7  ;;  %v2272_v49 = vrot.slane %v2270_v36, 7  ;;  %v5741_v33 = vpop.f32.mrf.mxu3  ;;  %4604 = vmatmul.msk.bf16.vlgmr.msrb.gmra.mxu0 %vm1207_vm6, %v4778_v34 }
 0x224   : > { %2500 = vrot.lane.b32.xlu1 %v2398_v48, %s4959_s12  ;;  %v2269_v25 = vrot.slane %v2267_v40, 6  ;;  %v2102_v37 = vpack.c.bf16 %v2066_v24, %v2066_v24  ;;  %v1312_v40 = vpop.f32.mrf.mxu0  ;;  %v1484_v24 = vpop.f32.mrf.mxu1 }
 0x225   : > { %v1959_v23 = vadd.f32 %v5542_v17, %v1919_v9  ;;  %4501 = vmatmul.msk.bf16.gmra.mxu2 %vm1207_vm6, %v1700_v21  ;;  %v2445_v5 = vor.u32 %v5733_v32, %v2270_v36  ;;  %v1482_v36 = vadd.f32 %v1481_v14, %v1312_v40 }
 0x226   : > { %v2273_v16 = vor.u32 %v2272_v49, %v2269_v25  ;;  %v2179_v46 = vunpack.c.l.b16 %v2102_v37 }
 0x227   : > { %v1995_v26 = vmax.f32 %v1959_v23, 0.0  ;;  %v2446_v56 = vsel %vm2429_vm8, %v5678_v0, %v2445_v5  ;;  %v4481_v0 = vor.u32 %v5344_v55, %v5405_v50  ;;  %v2032_v55 = vld [vmem:[%s6762_s7 + $0x70] sm:$0xff] }
 0x228   : > { %2540 = vrot.lane.b32.xlu2 %v2446_v56, %s4958_s11  ;;  %v1811_v21 = vpop.f32.mrf.mxu2  ;;  %v5751_v18 = vsel %vm2221_vm10, %v5688_v44, %v2273_v16 }
 0x229   : > { %v2067_v39 = vmul.f32 %v2031_v6, %v1995_v26  ;;  %v1880_v7 = vadd.f32 %v1811_v21, %v1480_v20  ;;  %v5760_v49 = vrot.slane %v4481_v0, 2 }
 0x22b   : > { %v2103_v19 = vpack.c.bf16 %v2067_v39, %v2067_v39  ;;  %v1920_v2 = vmul.f32 %v5537_v12, %v1880_v7  ;;  %v5758_v44 = vpop.f32.mrf.mxu3  ;;  %v1702_v56 = vsel %vm1262_vm4, %v1699_v11, %v5760_v49 }
 0x22c   : > { %v1315_v26 = vpop.f32.mrf.mxu0 }
 0x22d   : > { %v2180_v57 = vunpack.c.l.b16 %v2103_v19  ;;  %v1960_v53 = vadd.f32 %v5542_v17, %v1920_v2  ;;  %v1485_v40 = vadd.f32 %v1484_v24, %v1315_v26 }
 0x22f   : > { %v2209_v9 = vpack.c.b16 %v2180_v57, %v2179_v46  ;;  %v1996_v20 = vmax.f32 %v1960_v53, 0.0 }
 0x230   : > { %v1813_v48 = vpop.f32.mrf.mxu2 }
 0x231   : > { %v1881_v4 = vadd.f32 %v1813_v48, %v1482_v36  ;;  %v2399_v31 = vrot.slane %v2209_v9, 7  ;;  %v2276_v25 = vshrl.u32 %v2209_v9, 16  ;;  %v2279_v50 = vshll.u32 %v2209_v9, 16  ;;  %v1486_v48 = vpop.f32.mrf.mxu1 }
 0x232   : > { %v2068_v21 = vmul.f32 %v2032_v55, %v1996_v20 }
 0x233   : > { %v1921_v23 = vmul.f32 %v5537_v12, %v1881_v4  ;;  %v2400_v5 = vsel %vm2387_vm7, %v2397_v45, %v2399_v31  ;;  %v2447_v6 = vrot.slane %v2276_v25, 7  ;;  %v2281_v34 = vrot.slane %v2279_v50, 7  ;;  %v2033_v45 = vld [vmem:[%s6762_s7 + $0x78] sm:$0xff]  ;;  %v5783_v57 = vpop.f32.mrf.mxu3 }
 0x234   : > { %2502 = vrot.lane.b32.xlu0 %v2400_v5, %s4959_s12  ;;  %v2278_v14 = vrot.slane %v2276_v25, 6  ;;  %v2104_v0 = vpack.c.bf16 %v2068_v21, %v2068_v21 }
 0x235   : > { %v1961_v37 = vadd.f32 %v5542_v17, %v1921_v23  ;;  %4502 = vmatmul.msk.bf16.gmra.mxu2 %vm1207_vm6, %v1702_v56  ;;  %v2448_v39 = vor.u32 %v2447_v6, %v2279_v50  ;;  %v2034_v56 = vld [vmem:[%s6762_s7 + $0x80] sm:$0xff] }
 0x236   : > { %v2282_v7 = vor.u32 %v2281_v34, %v2278_v14  ;;  %v2181_v20 = vunpack.c.l.b16 %v2104_v0  ;;  %v2035_v0 = vld [vmem:[%s6762_s7 + $0x88] sm:$0xff] }
 0x237   : > { %v1997_v19 = vmax.f32 %v1961_v37, 0.0  ;;  %v2449_v52 = vsel %vm2429_vm8, %v5733_v32, %v2448_v39  ;;  %v1317_v32 = vpop.f32.mrf.mxu0 }
 0x238   : > { %2542 = vrot.lane.b32.xlu1 %v2449_v52, %s4958_s11  ;;  %v1816_v11 = vpop.f32.mrf.mxu2  ;;  %v5781_v2 = vsel %vm2221_vm10, %v2273_v16, %v2282_v7  ;;  %v1487_v24 = vadd.f32 %v1486_v48, %v1317_v32  ;;  %v2386_v32 = vsel %vm2385_vm12, 0, %v5585_v59  ;;  %v1492_v59 = vadd.f32 %v5758_v44, %v5457_v42 }
 0x239   : > { %v2069_v36 = vmul.f32 %v2033_v45, %v1997_v19  ;;  %v1882_v46 = vadd.f32 %v1816_v11, %v1485_v40 }
 0x23b   : > { %v2105_v53 = vpack.c.bf16 %v2069_v36, %v2069_v36  ;;  %v1922_v9 = vmul.f32 %v5537_v12, %v1882_v46  ;;  %v5792_v39 = vpop.f32.mrf.mxu3 }
 0x23d   : > { %v2182_v4 = vunpack.c.l.b16 %v2105_v53  ;;  %v1962_v25 = vadd.f32 %v5542_v17, %v1922_v9 }
 0x23f   : > { %v2210_v55 = vpack.c.b16 %v2182_v4, %v2181_v20  ;;  %v1998_v23 = vmax.f32 %v1962_v25, 0.0 }
 0x240   : > { %v1818_v50 = vpop.f32.mrf.mxu2 }
 0x241   : > { %v1883_v16 = vadd.f32 %v1818_v50, %v1487_v24  ;;  %v2401_v5 = vrot.slane %v2210_v55, 7  ;;  %v2285_v26 = vshrl.u32 %v2210_v55, 16  ;;  %v2288_v34 = vshll.u32 %v2210_v55, 16 }
 0x242   : > { %v2070_v19 = vmul.f32 %v2034_v56, %v1998_v23 }
 0x243   : > { %v1923_v14 = vmul.f32 %v5537_v12, %v1883_v16  ;;  %v2402_v21 = vsel %vm2387_vm7, %v2399_v31, %v2401_v5  ;;  %v2450_v37 = vrot.slane %v2285_v26, 7  ;;  %v2290_v45 = vrot.slane %v2288_v34, 7 }
 0x244   : > { %2504 = vrot.lane.b32.xlu2 %v2402_v21, %s4959_s12  ;;  %v2287_v40 = vrot.slane %v2285_v26, 6  ;;  %v1490_v31 = vadd.f32 %v5741_v33, %v5453_v62  ;;  %v2106_v4 = vpack.c.bf16 %v2070_v19, %v2070_v19 }
 0x245   : > { %v1963_v52 = vadd.f32 %v5542_v17, %v1923_v14  ;;  %v2451_v11 = vor.u32 %v2450_v37, %v2288_v34  ;;  %v5812_v34 = vpop.f32.mrf.mxu3 }
 0x246   : > { %v2291_v36 = vor.u32 %v2290_v45, %v2287_v40  ;;  %v2491_v53 = vpop.permute.xlu1 %2490  ;;  %v2183_v26 = vunpack.c.l.b16 %v2106_v4 }
 0x247   : > { %v1999_v46 = vmax.f32 %v1963_v52, 0.0  ;;  %v2452_v9 = vsel %vm2429_vm8, %v2447_v6, %v2451_v11  ;;  %v2570_v55 = vsel %vm753_vm2, %v2386_v32, %v2491_v53 }
 0x248   : > { %v1821_v48 = vpop.f32.mrf.mxu2  ;;  %2544 = vrot.lane.b32.xlu0 %v2452_v9, %s4958_s11  ;;  %v5805_v20 = vsel %vm2221_vm10, %v2282_v7, %v2291_v36 }
 0x249   : > { %v2071_v25 = vmul.f32 %v2035_v0, %v1999_v46  ;;  %v1884_v24 = vadd.f32 %v1821_v48, %v1490_v31  ;;  %v2036_v31 = vld [vmem:[%s6762_s7 + $0x90] sm:$0xff] }
 0x24a   : > { %v2531_v50 = vpop.permute.xlu0 %2530 }
 0x24b   : > { %v2107_v23 = vpack.c.bf16 %v2071_v25, %v2071_v25  ;;  %v1924_v62 = vmul.f32 %v5537_v12, %v1884_v24  ;;  %v2626_v33 = vsel %vm797_vm3, %v2570_v55, %v2531_v50  ;;  %v2037_v24 = vld [vmem:[%s6762_s7 + $0x98] sm:$0xff]  ;;  %v1495_v50 = vadd.f32 %v5783_v57, %v5464_v15 }
 0x24c   : > { %v2682_v6 = vunpack.c.l.b16 %v2626_v33  ;;  %v2683_v16 = vunpack.c.h.b16 %v2626_v33 }
 0x24d   : > { %v2184_v56 = vunpack.c.l.b16 %v2107_v23  ;;  %v1964_v7 = vadd.f32 %v5542_v17, %v1924_v62  ;;  %v5834_v33 = vpop.f32.mrf.mxu3 }
 0x24e   : > { %v2719_v14 = vpack.c.b16 %v2682_v6, %v2682_v6  ;;  %v2720_v21 = vpack.c.b16 %v2683_v16, %v2683_v16 }
 0x24f   : > { %v2211_v45 = vpack.c.b16 %v2184_v56, %v2183_v26  ;;  %v2000_v19 = vmax.f32 %v1964_v7, 0.0 }
 0x250   : > { %2793 = vst.msk [vmem:[#allocation2 + $0x8] sm:$0xf] %vm984_vm5, %v2719_v14  ;;  %v1823_v40 = vpop.f32.mrf.mxu2 }
 0x251   : > { %2794 = vst.msk [vmem:[#allocation2 + $0xc] sm:$0xf] %vm984_vm5, %v2720_v21  ;;  %v1885_v52 = vadd.f32 %v1823_v40, %v1492_v59  ;;  %v2403_v11 = vrot.slane %v2211_v45, 7  ;;  %v2294_v0 = vshrl.u32 %v2211_v45, 16  ;;  %v2297_v46 = vshll.u32 %v2211_v45, 16 }
 0x252   : > { %v2072_v4 = vmul.f32 %v2036_v31, %v2000_v19 }
 0x253   : > { %v1925_v53 = vmul.f32 %v5537_v12, %v1885_v52  ;;  %v2404_v9 = vsel %vm2387_vm7, %v2401_v5, %v2403_v11  ;;  %v5823_v42 = vrot.slane %v2294_v0, 7  ;;  %v2299_v44 = vrot.slane %v2297_v46, 7  ;;  %v2493_v5 = vpop.permute.xlu2 %2492 }
 0x254   : > { %2506 = vrot.lane.b32.xlu1 %v2404_v9, %s4959_s12  ;;  %v2296_v48 = vrot.slane %v2294_v0, 6  ;;  %v2108_v56 = vpack.c.bf16 %v2072_v4, %v2072_v4  ;;  %v2573_v15 = vsel %vm753_vm2, %v5614_v13, %v2493_v5 }
 0x255   : > { %v1965_v25 = vadd.f32 %v5542_v17, %v1925_v53  ;;  %v2454_v32 = vor.u32 %v5823_v42, %v2297_v46  ;;  %v1497_v46 = vadd.f32 %v5792_v39, %v5468_v51 }
 0x256   : > { %v2300_v55 = vor.u32 %v2299_v44, %v2296_v48  ;;  %v2185_v19 = vunpack.c.l.b16 %v2108_v56 }
 0x257   : > { %v2001_v23 = vmax.f32 %v1965_v25, 0.0  ;;  %v2455_v62 = vsel %vm2429_vm8, %v2450_v37, %v2454_v32  ;;  %v5854_v25 = vpop.f32.mrf.mxu3  ;;  %v2038_v32 = vld [vmem:[%s6762_s7 + $0xa0] sm:$0xff] }
 0x258   : > { %v1826_v6 = vpop.f32.mrf.mxu2  ;;  %v4901_v16 = vld [vmem:[#allocation2 + $0x8] sm:$0xff]   ;;  %2546 = vrot.lane.b32.xlu2 %v2455_v62, %s4958_s11  ;;  %v5838_v26 = vsel %vm2221_vm10, %v2291_v36, %v2300_v55 }
 0x259   : > { %v2073_v7 = vmul.f32 %v2037_v24, %v2001_v23  ;;  %v1886_v14 = vadd.f32 %v1826_v6, %v1495_v50  ;;  %4605 = vmatmul.msk.bf16.gmra.mxu0 %vm1207_vm6, %v4901_v16  ;;  %v4922_v5 = vld [vmem:[#allocation2 + $0x8] sm:$0xf0]  ;;  %v4923_v23 = vld [vmem:[#allocation2 + $0x8] sm:$0xe] }
 0x25a   : > { %v2533_v57 = vpop.permute.xlu1 %2532 }
 0x25b   : > { %v2109_v21 = vpack.c.bf16 %v2073_v7, %v2073_v7  ;;  %v1926_v37 = vmul.f32 %v5537_v12, %v1886_v14  ;;  %v2628_v59 = vsel %vm797_vm3, %v2573_v15, %v2533_v57  ;;  %v2039_v14 = vld [vmem:[%s6762_s7 + $0xa8] sm:$0xff]  ;;  %v4924_v15 = vor.u32 %v4923_v23, %v4922_v5 }
 0x25c   : > { %v2684_v45 = vunpack.c.l.b16 %v2628_v59  ;;  %v2685_v40 = vunpack.c.h.b16 %v2628_v59 }
 0x25d   : > { %v2186_v52 = vunpack.c.l.b16 %v2109_v21  ;;  %v1966_v36 = vadd.f32 %v5542_v17, %v1926_v37  ;;  %v2495_v21 = vpop.permute.xlu2 %2494 }
 0x25e   : > { %v2721_v0 = vpack.c.b16 %v2684_v45, %v2684_v45  ;;  %v2722_v31 = vpack.c.b16 %v2685_v40, %v2685_v40 }
 0x25f   : > { %v5848_v53 = vpack.c.b16 %v2186_v52, %v2185_v19  ;;  %v2002_v9 = vmax.f32 %v1966_v36, 0.0 }
 0x260   : > { %2795 = vst.msk [vmem:[#allocation2 + $0x10] sm:$0xf] %vm984_vm5, %v2721_v0  ;;  %v1828_v13 = vpop.f32.mrf.mxu2 }
 0x261   : > { %2796 = vst.msk [vmem:[#allocation2 + $0x14] sm:$0xf] %vm984_vm5, %v2722_v31  ;;  %v1887_v44 = vadd.f32 %v1828_v13, %v1497_v46  ;;  %v2405_v48 = vrot.slane %v5848_v53, 7  ;;  %v2303_v4 = vshrl.u32 %v5848_v53, 16  ;;  %v2306_v51 = vshll.u32 %v5848_v53, 16 }
 0x262   : > { %v2074_v16 = vmul.f32 %v2038_v32, %v2002_v9 }
 0x263   : > { %v1927_v39 = vmul.f32 %v5537_v12, %v1887_v44  ;;  %v2406_v24 = vsel %vm2387_vm7, %v2403_v11, %v2405_v48  ;;  %v5864_v50 = vrot.slane %v2303_v4, 7  ;;  %v2308_v62 = vrot.slane %v2306_v51, 7 }
 0x264   : > { %2508 = vrot.lane.b32.xlu0 %v2406_v24, %s4959_s12  ;;  %v2305_v6 = vrot.slane %v2303_v4, 6  ;;  %v1500_v11 = vadd.f32 %v5812_v34, %v5475_v60  ;;  %v2110_v52 = vpack.c.bf16 %v2074_v16, %v2074_v16  ;;  %v2576_v60 = vsel %vm753_vm2, %v5637_v1, %v2495_v21 }
 0x265   : > { %v1967_v56 = vadd.f32 %v5542_v17, %v1927_v39  ;;  %v2457_v7 = vor.u32 %v5864_v50, %v2306_v51 }
 0x266   : > { %v5872_v57 = vor.u32 %v2308_v62, %v2305_v6  ;;  %v2187_v32 = vunpack.c.l.b16 %v2110_v52  ;;  %v2040_v6 = vld [vmem:[%s6762_s7 + $0xb0] sm:$0xff] }
 0x267   : > { %v2003_v37 = vmax.f32 %v1967_v56, 0.0  ;;  %v2458_v59 = vsel %vm2429_vm8, %v5823_v42, %v2457_v7  ;;  %v2972_v42 = vrot.slane %v4924_v15, 1 }
 0x268   : > { %v1831_v45 = vpop.f32.mrf.mxu2  ;;  %2548 = vrot.lane.b32.xlu1 %v2458_v59, %s4958_s11  ;;  %v5879_v40 = vld [vmem:[#allocation2 + $0x10] sm:$0xff]  ;;  %v5883_v19 = vsel %vm2221_vm10, %v2300_v55, %v5872_v57  ;;  %v5892_v55 = vpop.f32.mrf.mxu3 }
 0x269   : > { %v2075_v36 = vmul.f32 %v2039_v14, %v2003_v37  ;;  %v1888_v0 = vadd.f32 %v1831_v45, %v1500_v11  ;;  %v2973_v31 = vrot.slane %v5879_v40, 1  ;;  %4606 = vmatmul.msk.bf16.gmra.mxu0 %vm1207_vm6, %v5879_v40  ;;  %v347_v14 = vld [vmem:[%s5020_s10 + $0xa0] sm:$0x3]  ;;  %v4626_v37 = vld [vmem:[#allocation2 + $0x10] sm:$0xc]  ;;  %v1507_v40 = vadd.f32 %v5892_v55, %v5493_v30 }
 0x26a   : > { %v2535_v34 = vpop.permute.xlu0 %2534  ;;  %v4798_v59 = vld [vmem:[#allocation2 + $0x10] sm:$0xf0] }
 0x26b   : > { %v2111_v46 = vpack.c.bf16 %v2075_v36, %v2075_v36  ;;  %v1928_v13 = vmul.f32 %v5537_v12, %v1888_v0  ;;  %v2630_v9 = vsel %vm797_vm3, %v2576_v60, %v2535_v34  ;;  %v2974_v1 = vsel %vm669_vm0, %v2972_v42, %v2973_v31  ;;  %v5929_v60 = vld [vmem:[%s6759_s4] ss:$0 sm:$0xff]  ;;  %v2041_v42 = vld [vmem:[%s6762_s7 + $0xb8] sm:$0xff] }
 0x26c   : > { %v2686_v44 = vunpack.c.l.b16 %v2630_v9  ;;  %v2687_v4 = vunpack.c.h.b16 %v2630_v9  ;;  %4578 = vmatmul.msk.bf16.vlgmr.msrb.gmra.mxu3 %vm1207_vm6, %v2974_v1  ;;  %v1502_v12 = vadd.f32 %v5834_v33, %v5480_v27  ;;  %v5915_v33 = vld [vmem:[%s6758_s3] ss:$0 sm:$0xff]  ;;  %v431_v36 = vunpack.c.l.b16 %v347_v14 }
 0x26d   : > { %v2188_v51 = vunpack.c.l.b16 %v2111_v46  ;;  %v1968_v39 = vadd.f32 %v5542_v17, %v1928_v13  ;;  %v4627_v13 = vor.u32 %v4798_v59, %v4626_v37 }
 0x26e   : > { %v2723_v24 = vpack.c.b16 %v2686_v44, %v2686_v44  ;;  %v2724_v5 = vpack.c.b16 %v2687_v4, %v2687_v4  ;;  %v1505_v44 = vadd.f32 %v5854_v25, %v5487_v29  ;;  %v2537_v4 = vpop.permute.xlu2 %2536 }
 0x26f   : > { %v5901_v23 = vpack.c.b16 %v2188_v51, %v2187_v32  ;;  %v2004_v62 = vmax.f32 %v1968_v39, 0.0  ;;  %v3472_v14 = vrot.slane %v4627_v13, 2 }
 0x270   : > { %2797 = vst.msk [vmem:[#allocation2 + $0x18] sm:$0xf] %vm984_vm5, %v2723_v24  ;;  %v1833_v16 = vpop.f32.mrf.mxu2 }
 0x271   : > { %2798 = vst.msk [vmem:[#allocation2 + $0x1c] sm:$0xf] %vm984_vm5, %v2724_v5  ;;  %v1889_v17 = vadd.f32 %v1833_v16, %v1502_v12  ;;  %v2407_v56 = vrot.slane %v5901_v23, 7  ;;  %v2312_v7 = vshrl.u32 %v5901_v23, 16  ;;  %v2315_v27 = vshll.u32 %v5901_v23, 16  ;;  %v2043_v23 = vld [vmem:[%s6762_s7 + $0xc8] sm:$0xff] }
 0x272   : > { %v2076_v45 = vmul.f32 %v2040_v6, %v2004_v62  ;;  %v452_v62 = vpack.c.b16 %v431_v36, %v431_v36 }
 0x273   : > { %v1929_v15 = vmul.f32 %v5915_v33, %v1889_v17  ;;  %v2408_v11 = vsel %vm2387_vm7, %v2405_v48, %v2407_v56  ;;  %v5923_v21 = vrot.slane %v2312_v7, 7  ;;  %v2317_v52 = vrot.slane %v2315_v27, 7  ;;  %v5933_v48 = vpop.f32.mrf.mxu3  ;;  %v665_v17 = vpop.permute.xlu0 %664 }
 0x274   : > { %2510 = vrot.lane.b32.xlu2 %v2408_v11, %s4959_s12  ;;  %v2314_v0 = vrot.slane %v2312_v7, 6  ;;  %v2112_v39 = vpack.c.bf16 %v2076_v45, %v2076_v45 }
 0x275   : > { %v1969_v34 = vadd.f32 %v5929_v60, %v1929_v15  ;;  %v2460_v53 = vor.u32 %v5923_v21, %v2315_v27 }
 0x276   : > { %v2497_v46 = vpop.permute.xlu1 %2496  ;;  %v5938_v9 = vor.u32 %v2317_v52, %v2314_v0  ;;  %v2189_v36 = vunpack.c.l.b16 %v2112_v39  ;;  %v2042_v39 = vld [vmem:[%s6762_s7 + $0xc0] sm:$0xff] }
 0x277   : > { %v2005_v1 = vmax.f32 %v1969_v34, 0.0  ;;  %v2579_v32 = vsel %vm753_vm2, %v5661_v63, %v2497_v46  ;;  %v2461_v51 = vsel %vm2429_vm8, %v5864_v50, %v2460_v53 }
 0x278   : > { %v2632_v24 = vsel %vm797_vm3, %v2579_v32, %v2537_v4  ;;  %v1836_v5 = vpop.f32.mrf.mxu2  ;;  %2550 = vrot.lane.b32.xlu0 %v2461_v51, %s4958_s11  ;;  %v5948_v12 = vld [vmem:[#allocation2 + $0x18] sm:$0xff]  ;;  %v5955_v29 = vsel %vm2221_vm10, %v5872_v57, %v5938_v9  ;;  %v796_v57 = vsel %vm753_vm2, %v452_v62, %v665_v17 }
 0x279   : > { %v5950_v6 = vld [vmem:[#allocation2 + $0x18] sm:$0xff]  ;;  %v2077_v63 = vmul.f32 %v2041_v42, %v2005_v1  ;;  %v2688_v25 = vunpack.c.l.b16 %v2632_v24  ;;  %v2689_v16 = vunpack.c.h.b16 %v2632_v24  ;;  %v1890_v50 = vadd.f32 %v1836_v5, %v1505_v44  ;;  %4607 = vmatmul.msk.bf16.gmra.mxu0 %vm1207_vm6, %v5948_v12 }
 0x27a   : > { %v2975_v7 = vrot.slane %v5948_v12, 1  ;;  %v3473_v27 = vrot.slane %v5950_v6, 2 }
 0x27b   : > { %v2113_v15 = vpack.c.bf16 %v2077_v63, %v2077_v63  ;;  %v2725_v11 = vpack.c.b16 %v2688_v25, %v2688_v25  ;;  %v2726_v37 = vpack.c.b16 %v2689_v16, %v2689_v16  ;;  %v1930_v59 = vmul.f32 %v5915_v33, %v1890_v50  ;;  %v1511_v46 = vpop.f32.mrf.mxu3 }
 0x27c   : > { %v2976_v45 = vsel %vm669_vm0, %v2973_v31, %v2975_v7  ;;  %v3474_v52 = vsel %vm1262_vm4, %v3472_v14, %v3473_v27 }
 0x27d   : > { %v2190_v0 = vunpack.c.l.b16 %v2113_v15  ;;  %2799 = vst.msk [vmem:[#allocation2 + $0x20] sm:$0xf] %vm984_vm5, %v2725_v11  ;;  %v1970_v34 = vadd.f32 %v5929_v60, %v1930_v59  ;;  %4579 = vmatmul.msk.bf16.gmra.mxu3 %vm1207_vm6, %v2976_v45  ;;  %4700 = vmatmul.msk.bf16.vlgmr.msrb.gmra.mxu1 %vm1207_vm6, %v3474_v52  ;;  %v1510_v11 = vadd.f32 %v5933_v48, %v5500_v35 }
 0x27e   : > { %2800 = vst.msk [vmem:[#allocation2 + $0x24] sm:$0xf] %vm984_vm5, %v2726_v37  ;;  %v752_v53 = vpop.permute.xlu1 %751  ;;  %v2499_v37 = vpop.permute.xlu2 %2498 }
 0x27f   : > { %v5978_v31 = vpack.c.b16 %v2190_v0, %v2189_v36  ;;  %v839_v42 = vsel %vm797_vm3, %v796_v57, %v752_v53  ;;  %v2006_v4 = vmax.f32 %v1970_v34, 0.0 }
 0x280   : > { %v901_v13 = vunpack.c.l.b16 %v839_v42  ;;  %v1838_v44 = vpop.f32.mrf.mxu2 }
 0x281   : > { %v1891_v1 = vadd.f32 %v1838_v44, %v1507_v40  ;;  %v2409_v32 = vrot.slane %v5978_v31, 7  ;;  %v2321_v51 = vshrl.u32 %v5978_v31, 16  ;;  %v2324_v30 = vshll.u32 %v5978_v31, 16 }
 0x282   : > { %v942_v24 = vpack.c.b16 %v901_v13, %v901_v13  ;;  %v2078_v16 = vmul.f32 %v2042_v39, %v2006_v4  ;;  %v2582_v40 = vsel %vm753_vm2, %v5696_v58, %v2499_v37 }
 0x283   : > { %v1931_v55 = vmul.f32 %v5915_v33, %v1891_v1  ;;  %v2410_v5 = vsel %vm2387_vm7, %v2407_v56, %v2409_v32  ;;  %v5993_v62 = vrot.slane %v2321_v51, 7  ;;  %v2326_v63 = vrot.slane %v2324_v30, 7  ;;  %v1514_v48 = vpop.f32.mrf.mxu3 }
 0x284   : > { %1026 = vst.msk [vmem:[#allocation2 + $0xa0] sm:$0x3] %vm1025_vm13, %v942_v24  ;;  %2512 = vrot.lane.b32.xlu1 %v2410_v5, %s4959_s12  ;;  %v2323_v25 = vrot.slane %v2321_v51, 6  ;;  %v2114_v34 = vpack.c.bf16 %v2078_v16, %v2078_v16  ;;  %v1512_v5 = vadd.f32 %v1511_v46, %v5502_v10  ;;  %v2044_v16 = vld [vmem:[%s6762_s7 + $0xd0] sm:$0xff] }
 0x285   : > { %v1971_v50 = vadd.f32 %v5929_v60, %v1931_v55  ;;  %v2463_v17 = vor.u32 %v5993_v62, %v2324_v30  ;;  %v5999_v14 = vld [vmem:[#allocation2 + $0x20] sm:$0xff] }
 0x286   : > { %v6001_v15 = vld [vmem:[#allocation2 + $0x20] sm:$0xff]  ;;  %v6006_v56 = vor.u32 %v2326_v63, %v2323_v25  ;;  %v2977_v45 = vrot.slane %v5999_v14, 1  ;;  %v2191_v24 = vunpack.c.l.b16 %v2114_v34 }
 0x287   : > { %v2007_v59 = vmax.f32 %v1971_v50, 0.0  ;;  %v2464_v57 = vsel %vm2429_vm8, %v5923_v21, %v2463_v17  ;;  %v3475_v36 = vrot.slane %v6001_v15, 2 }
 0x288   : > { %v1841_v52 = vpop.f32.mrf.mxu2  ;;  %2552 = vrot.lane.b32.xlu2 %v2464_v57, %s4958_s11  ;;  %v6018_v0 = vsel %vm2221_vm10, %v5938_v9, %v6006_v56  ;;  %v2978_v9 = vsel %vm669_vm0, %v2975_v7, %v2977_v45 }
 0x289   : > { %v2079_v53 = vmul.f32 %v2043_v23, %v2007_v59  ;;  %v1892_v35 = vadd.f32 %v1841_v52, %v1510_v11  ;;  %4608 = vmatmul.msk.bf16.gmra.mxu0 %vm1207_vm6, %v5999_v14  ;;  %v3476_v51 = vsel %vm1262_vm4, %v3473_v27, %v3475_v36 }
 0x28a   : > { %v2539_v21 = vpop.permute.xlu0 %2538 }
 0x28b   : > { %v1570_v42 = vld [vmem:[#allocation2 + $0xa0] sm:$0x3]  ;;  %v2115_v13 = vpack.c.bf16 %v2079_v53, %v2079_v53  ;;  %v1932_v44 = vmul.f32 %v5915_v33, %v1892_v35  ;;  %v2634_v4 = vsel %vm797_vm3, %v2582_v40, %v2539_v21  ;;  %v1516_v57 = vpop.f32.mrf.mxu3  ;;  %v2045_v40 = vld [vmem:[%s6762_s7 + $0xd8] sm:$0xff] }
 0x28c   : > { %2128 = vst.msk [vmem:[#allocation2 + $0xa0] sm:$0x3] %vm1025_vm13, %v4960_v22  ;;  %v2690_v58 = vunpack.c.l.b16 %v2634_v4  ;;  %v2691_v1 = vunpack.c.h.b16 %v2634_v4  ;;  %v1647_v39 = vunpack.c.l.b16 %v1570_v42  ;;  %v2541_v42 = vpop.permute.xlu2 %2540  ;;  %v1517_v14 = vadd.f32 %v1516_v57, %v5510_v3 }
 0x28d   : > { %v2192_v30 = vunpack.c.l.b16 %v2115_v13  ;;  %v1972_v55 = vadd.f32 %v5929_v60, %v1932_v44  ;;  %4580 = vmatmul.msk.bf16.gmra.mxu3 %vm1207_vm6, %v2978_v9  ;;  %4701 = vmatmul.msk.bf16.gmra.mxu1 %vm1207_vm6, %v3476_v51 }
 0x28e   : > { %v2727_v12 = vpack.c.b16 %v2690_v58, %v2690_v58  ;;  %v2728_v7 = vpack.c.b16 %v2691_v1, %v2691_v1  ;;  %v1666_v22 = vpack.c.b16 %v1647_v39, %v1647_v39 }
 0x28f   : > { %v6042_v63 = vpack.c.b16 %v2192_v30, %v2191_v24  ;;  %v2008_v25 = vmax.f32 %v1972_v55, 0.0 }
 0x290   : > { %2801 = vst.msk [vmem:[#allocation2 + $0x28] sm:$0xf] %vm984_vm5, %v2727_v12  ;;  %v1843_v6 = vpop.f32.mrf.mxu2  ;;  %v1703_v27 = vrot.slane %v1666_v22, 2 }
 0x291   : > { %2802 = vst.msk [vmem:[#allocation2 + $0x2c] sm:$0xf] %vm984_vm5, %v2728_v7  ;;  %v1893_v50 = vadd.f32 %v1843_v6, %v1512_v5  ;;  %v2411_v17 = vrot.slane %v6042_v63, 7  ;;  %v2330_v23 = vshrl.u32 %v6042_v63, 16  ;;  %v2333_v46 = vshll.u32 %v6042_v63, 16 }
 0x292   : > { %v1704_v10 = vsel %vm1262_vm4, %v5760_v49, %v1703_v27  ;;  %v2080_v52 = vmul.f32 %v2044_v16, %v2008_v25 }
 0x293   : > { %v1933_v11 = vmul.f32 %v5915_v33, %v1893_v50  ;;  %4503 = vmatmul.msk.bf16.gmra.mxu2 %vm1207_vm6, %v1704_v10  ;;  %v2412_v37 = vsel %vm2387_vm7, %v2409_v32, %v2411_v17  ;;  %v6059_v59 = vrot.slane %v2330_v23, 7  ;;  %v2335_v34 = vrot.slane %v2333_v46, 7  ;;  %v1519_v16 = vpop.f32.mrf.mxu3 }
 0x294   : > { %2514 = vrot.lane.b32.xlu0 %v2412_v37, %s4959_s12  ;;  %v2332_v53 = vrot.slane %v2330_v23, 6  ;;  %v1515_v32 = vadd.f32 %v1514_v48, %v5508_v38  ;;  %v2116_v9 = vpack.c.bf16 %v2080_v52, %v2080_v52 }
 0x295   : > { %v1973_v49 = vadd.f32 %v5929_v60, %v1933_v11  ;;  %v2466_v35 = vor.u32 %v6059_v59, %v2333_v46  ;;  %v2046_v46 = vld [vmem:[%s6762_s7 + $0xe0] sm:$0xff] }
 0x296   : > { %v2501_v21 = vpop.permute.xlu1 %2500  ;;  %v6067_v31 = vor.u32 %v2335_v34, %v2332_v53  ;;  %v2193_v25 = vunpack.c.l.b16 %v2116_v9 }
 0x297   : > { %v2009_v13 = vmax.f32 %v1973_v49, 0.0  ;;  %v2585_v44 = vsel %vm753_vm2, %v5751_v18, %v2501_v21  ;;  %v2467_v4 = vsel %vm2429_vm8, %v5993_v62, %v2466_v35 }
 0x298   : > { %v2636_v58 = vsel %vm797_vm3, %v2585_v44, %v2541_v42  ;;  %v1846_v1 = vpop.f32.mrf.mxu2  ;;  %2554 = vrot.lane.b32.xlu1 %v2467_v4, %s4958_s11  ;;  %v6076_v51 = vld [vmem:[#allocation2 + $0x28] sm:$0xff]  ;;  %v6083_v38 = vsel %vm2221_vm10, %v6006_v56, %v6067_v31  ;;  %v1520_v42 = vadd.f32 %v1519_v16, %v5516_v41 }
 0x299   : > { %v6078_v39 = vld [vmem:[#allocation2 + $0x28] sm:$0xff]  ;;  %v2081_v48 = vmul.f32 %v2045_v40, %v2009_v13  ;;  %v2692_v18 = vunpack.c.l.b16 %v2636_v58  ;;  %v2693_v24 = vunpack.c.h.b16 %v2636_v58  ;;  %v1894_v30 = vadd.f32 %v1846_v1, %v1515_v32  ;;  %4609 = vmatmul.msk.bf16.gmra.mxu0 %vm1207_vm6, %v6076_v51 }
 0x29a   : > { %v2979_v62 = vrot.slane %v6076_v51, 1  ;;  %v3477_v55 = vrot.slane %v6078_v39, 2  ;;  %v2047_v32 = vld [vmem:[%s6762_s7 + $0xe8] sm:$0xff] }
 0x29b   : > { %v2117_v12 = vpack.c.bf16 %v2081_v48, %v2081_v48  ;;  %v2729_v7 = vpack.c.b16 %v2692_v18, %v2692_v18  ;;  %v2730_v22 = vpack.c.b16 %v2693_v24, %v2693_v24  ;;  %v1934_v5 = vmul.f32 %v5915_v33, %v1894_v30  ;;  %v1521_v9 = vpop.f32.mrf.mxu3 }
 0x29c   : > { %v2980_v56 = vsel %vm669_vm0, %v2977_v45, %v2979_v62  ;;  %v3478_v63 = vsel %vm1262_vm4, %v3475_v36, %v3477_v55  ;;  %v1522_v16 = vadd.f32 %v1521_v9, %v5518_v43 }
 0x29d   : > { %v2194_v6 = vunpack.c.l.b16 %v2117_v12  ;;  %2803 = vst.msk [vmem:[#allocation2 + $0x30] sm:$0xf] %vm984_vm5, %v2729_v7  ;;  %v1974_v27 = vadd.f32 %v5929_v60, %v1934_v5  ;;  %4581 = vmatmul.msk.bf16.gmra.mxu3 %vm1207_vm6, %v2980_v56  ;;  %4702 = vmatmul.msk.bf16.gmra.mxu1 %vm1207_vm6, %v3478_v63 }
 0x29e   : > { %2804 = vst.msk [vmem:[#allocation2 + $0x34] sm:$0xf] %vm984_vm5, %v2730_v22 }
 0x29f   : > { %v6102_v45 = vpack.c.b16 %v2194_v6, %v2193_v25  ;;  %v2010_v50 = vmax.f32 %v1974_v27, 0.0 }
 0x2a0   : > { %v1848_v15 = vpop.f32.mrf.mxu2 }
 0x2a1   : > { %v1895_v36 = vadd.f32 %v1848_v15, %v1517_v14  ;;  %v2413_v23 = vrot.slane %v6102_v45, 7  ;;  %v2339_v10 = vshrl.u32 %v6102_v45, 16  ;;  %v2342_v11 = vshll.u32 %v6102_v45, 16 }
 0x2a2   : > { %v2082_v53 = vmul.f32 %v2046_v46, %v2010_v50 }
 0x2a3   : > { %v1935_v37 = vmul.f32 %v5915_v33, %v1895_v36  ;;  %v2414_v52 = vsel %vm2387_vm7, %v2411_v17, %v2413_v23  ;;  %v6112_v3 = vrot.slane %v2339_v10, 7  ;;  %v2344_v57 = vrot.slane %v2342_v11, 7  ;;  %v1524_v36 = vpop.f32.mrf.mxu3 }
 0x2a4   : > { %2516 = vrot.lane.b32.xlu2 %v2414_v52, %s4959_s12  ;;  %v2341_v34 = vrot.slane %v2339_v10, 6  ;;  %v2118_v48 = vpack.c.bf16 %v2082_v53, %v2082_v53  ;;  %v2048_v10 = vld [vmem:[%s6762_s7 + $0xf0] sm:$0xff] }
 0x2a5   : > { %v1975_v49 = vadd.f32 %v5929_v60, %v1935_v37  ;;  %v2469_v35 = vor.u32 %v6112_v3, %v2342_v11  ;;  %v6117_v40 = vld [vmem:[#allocation2 + $0x30] sm:$0xff] }
 0x2a6   : > { %v6119_v21 = vld [vmem:[#allocation2 + $0x30] sm:$0xff]  ;;  %v6124_v17 = vor.u32 %v2344_v57, %v2341_v34  ;;  %v2503_v44 = vpop.permute.xlu0 %2502  ;;  %v2981_v1 = vrot.slane %v6117_v40, 1 }
 0x2a7   : > { %v2011_v13 = vmax.f32 %v1975_v49, 0.0  ;;  %v2470_v4 = vsel %vm2429_vm8, %v6059_v59, %v2469_v35  ;;  %v3479_v51 = vrot.slane %v6119_v21, 2  ;;  %v2588_v24 = vsel %vm753_vm2, %v5781_v2, %v2503_v44  ;;  %v2049_v35 = vld [vmem:[%s6762_s7 + $0xf8] sm:$0xff] }
 0x2a8   : > { %v1851_v58 = vpop.f32.mrf.mxu2  ;;  %2556 = vrot.lane.b32.xlu0 %v2470_v4, %s4958_s11  ;;  %v6135_v39 = vsel %vm2221_vm10, %v6067_v31, %v6124_v17  ;;  %v2982_v31 = vsel %vm669_vm0, %v2979_v62, %v2981_v1  ;;  %v2195_v2 = vunpack.c.l.b16 %v2118_v48 }
 0x2a9   : > { %v2083_v41 = vmul.f32 %v2047_v32, %v2011_v13  ;;  %v1896_v18 = vadd.f32 %v1851_v58, %v1520_v42  ;;  %4610 = vmatmul.msk.bf16.gmra.mxu0 %vm1207_vm6, %v6117_v40  ;;  %v3480_v56 = vsel %vm1262_vm4, %v3477_v55, %v3479_v51  ;;  %v1525_v42 = vadd.f32 %v1524_v36, %v5522_v47 }
 0x2aa   : > { %v2543_v59 = vpop.permute.xlu1 %2542 }
 0x2ab   : > { %v2119_v30 = vpack.c.bf16 %v2083_v41, %v2083_v41  ;;  %v1936_v12 = vmul.f32 %v5915_v33, %v1896_v18  ;;  %v2638_v7 = vsel %vm797_vm3, %v2588_v24, %v2543_v59 }
 0x2ac   : > { %v2694_v22 = vunpack.c.l.b16 %v2638_v7  ;;  %v2695_v5 = vunpack.c.h.b16 %v2638_v7 }
 0x2ad   : > { %v2196_v63 = vunpack.c.l.b16 %v2119_v30  ;;  %v1976_v25 = vadd.f32 %v5929_v60, %v1936_v12  ;;  %4582 = vmatmul.msk.bf16.gmra.mxu3 %vm1207_vm6, %v2982_v31  ;;  %4703 = vmatmul.msk.bf16.gmra.mxu1 %vm1207_vm6, %v3480_v56 }
 0x2ae   : > { %v2731_v6 = vpack.c.b16 %v2694_v22, %v2694_v22  ;;  %v2732_v27 = vpack.c.b16 %v2695_v5, %v2695_v5  ;;  %v1526_v22 = vpop.f32.mrf.mxu3 }
 0x2af   : > { %v6153_v14 = vpack.c.b16 %v2196_v63, %v2195_v2  ;;  %v2012_v45 = vmax.f32 %v1976_v25, 0.0 }
 0x2b0   : > { %2805 = vst.msk [vmem:[#allocation2 + $0x38] sm:$0xf] %vm984_vm5, %v2731_v6  ;;  %v1853_v62 = vpop.f32.mrf.mxu2 }
 0x2b1   : > { %2806 = vst.msk [vmem:[#allocation2 + $0x3c] sm:$0xf] %vm984_vm5, %v2732_v27  ;;  %v1897_v55 = vadd.f32 %v1853_v62, %v1522_v16  ;;  %v2415_v15 = vrot.slane %v6153_v14, 7  ;;  %v2348_v50 = vshrl.u32 %v6153_v14, 16  ;;  %v2351_v43 = vshll.u32 %v6153_v14, 16 }
 0x2b2   : > { %v2084_v34 = vmul.f32 %v2048_v10, %v2012_v45  ;;  %v1527_v16 = vadd.f32 %v1526_v22, %v5524_v54  ;;  %v2050_v45 = vld [vmem:[%s6762_s7 + $0x100] sm:$0xff] }
 0x2b3   : > { %v1937_v46 = vmul.f32 %v5915_v33, %v1897_v55  ;;  %v2416_v11 = vsel %vm2387_vm7, %v2413_v23, %v2415_v15  ;;  %v6165_v37 = vrot.slane %v2348_v50, 7  ;;  %v2353_v52 = vrot.slane %v2351_v43, 7  ;;  %v2505_v23 = vpop.permute.xlu2 %2504  ;;  %v6211_v55 = vpop.f32.mrf.mxu0 }
 0x2b4   : > { %2518 = vrot.lane.b32.xlu1 %v2416_v11, %s4959_s12  ;;  %v2350_v57 = vrot.slane %v2348_v50, 6  ;;  %v2120_v41 = vpack.c.bf16 %v2084_v34, %v2084_v34  ;;  %v2591_v24 = vsel %vm753_vm2, %v5805_v20, %v2505_v23  ;;  %v2051_v34 = vld [vmem:[%s6762_s7 + $0x108] sm:$0xff] }
 0x2b5   : > { %v1977_v53 = vadd.f32 %v5929_v60, %v1937_v46  ;;  %v2472_v49 = vor.u32 %v6165_v37, %v2351_v43 }
 0x2b6   : > { %v6173_v32 = vor.u32 %v2353_v52, %v2350_v57  ;;  %v2197_v2 = vunpack.c.l.b16 %v2120_v41 }
 0x2b7   : > { %v2013_v13 = vmax.f32 %v1977_v53, 0.0  ;;  %v2473_v44 = vsel %vm2429_vm8, %v6112_v3, %v2472_v49 }
 0x2b8   : > { %v1856_v4 = vpop.f32.mrf.mxu2  ;;  %2558 = vrot.lane.b32.xlu2 %v2473_v44, %s4958_s11  ;;  %v6179_v9 = vld [vmem:[#allocation2 + $0x38] sm:$0xff]  ;;  %v6186_v48 = vsel %vm2221_vm10, %v6124_v17, %v6173_v32 }
 0x2b9   : > { %v6181_v58 = vld [vmem:[#allocation2 + $0x38] sm:$0xff]  ;;  %v2085_v18 = vmul.f32 %v2049_v35, %v2013_v13  ;;  %v1898_v47 = vadd.f32 %v1856_v4, %v1525_v42  ;;  %4611 = vmatmul.msk.bf16.gmra.mxu0 %vm1207_vm6, %v6179_v9  ;;  %v2983_v3 = vrot.slane %v6179_v9, 1 }
 0x2ba   : > { %v2545_v59 = vpop.permute.xlu0 %2544  ;;  %v3481_v30 = vrot.slane %v6181_v58, 2 }
 0x2bb   : > { %v2121_v12 = vpack.c.bf16 %v2085_v18, %v2085_v18  ;;  %v1938_v7 = vmul.f32 %v5915_v33, %v1898_v47  ;;  %v2640_v17 = vsel %vm797_vm3, %v2591_v24, %v2545_v59  ;;  %v2984_v20 = vsel %vm669_vm0, %v2981_v1, %v2983_v3  ;;  %v2547_v35 = vpop.permute.xlu2 %2546 }
 0x2bc   : > { %v2696_v5 = vunpack.c.l.b16 %v2640_v17  ;;  %v2697_v31 = vunpack.c.h.b16 %v2640_v17  ;;  %v3482_v56 = vsel %vm1262_vm4, %v3479_v51, %v3481_v30  ;;  %v6235_v17 = vpop.f32.mrf.mxu0 }
 0x2bd   : > { %v2198_v63 = vunpack.c.l.b16 %v2121_v12  ;;  %v1978_v25 = vadd.f32 %v5929_v60, %v1938_v7  ;;  %4583 = vmatmul.msk.bf16.gmra.mxu3 %vm1207_vm6, %v2984_v20  ;;  %4704 = vmatmul.msk.bf16.gmra.mxu1 %vm1207_vm6, %v3482_v56 }
 0x2be   : > { %v2733_v6 = vpack.c.b16 %v2696_v5, %v2696_v5  ;;  %v2734_v27 = vpack.c.b16 %v2697_v31, %v2697_v31 }
 0x2bf   : > { %v2218_v14 = vpack.c.b16 %v2198_v63, %v2197_v2  ;;  %v2014_v1 = vmax.f32 %v1978_v25, 0.0 }
 0x2c0   : > { %2807 = vst.msk [vmem:[#allocation2 + $0x40] sm:$0xf] %vm984_vm5, %v2733_v6  ;;  %v1858_v40 = vpop.f32.mrf.mxu2 }
 0x2c1   : > { %2808 = vst.msk [vmem:[#allocation2 + $0x44] sm:$0xf] %vm984_vm5, %v2734_v27  ;;  %v1899_v21 = vadd.f32 %v1858_v40, %v1527_v16  ;;  %v2417_v51 = vrot.slane %v2218_v14, 7  ;;  %v2357_v62 = vshrl.u32 %v2218_v14, 16  ;;  %v2360_v50 = vshll.u32 %v2218_v14, 16 }
 0x2c2   : > { %v2086_v11 = vmul.f32 %v2050_v45, %v2014_v1 }
 0x2c3   : > { %v1939_v36 = vmul.f32 %v5915_v33, %v1899_v21  ;;  %v2418_v54 = vsel %vm2387_vm7, %v2415_v15, %v2417_v51  ;;  %v2474_v10 = vrot.slane %v2357_v62, 7  ;;  %v2362_v43 = vrot.slane %v2360_v50, 7 }
 0x2c4   : > { %2520 = vrot.lane.b32.xlu0 %v2418_v54, %s4959_s12  ;;  %v2359_v46 = vrot.slane %v2357_v62, 6  ;;  %v2122_v58 = vpack.c.bf16 %v2086_v11, %v2086_v11 }
 0x2c5   : > { %v1979_v52 = vadd.f32 %v5929_v60, %v1939_v36  ;;  %v2475_v57 = vor.u32 %v2474_v10, %v2360_v50 }
 0x2c6   : > { %v2507_v53 = vpop.permute.xlu1 %2506  ;;  %v6220_v49 = vor.u32 %v2362_v43, %v2359_v46  ;;  %v2199_v5 = vunpack.c.l.b16 %v2122_v58 }
 0x2c7   : > { %v2015_v42 = vmax.f32 %v1979_v52, 0.0  ;;  %v2594_v15 = vsel %vm753_vm2, %v5838_v26, %v2507_v53  ;;  %v2476_v23 = vsel %vm2429_vm8, %v6165_v37, %v2475_v57 }
 0x2c8   : > { %v2642_v13 = vsel %vm797_vm3, %v2594_v15, %v2547_v35  ;;  %2560 = vrot.lane.b32.xlu1 %v2476_v23, %s4958_s11  ;;  %v4785_v44 = vld [vmem:[#allocation2 + $0x40] sm:$0xff]  ;;  %v6231_v9 = vsel %vm2221_vm10, %v6173_v32, %v6220_v49 }
 0x2c9   : > { %v4804_v4 = vld [vmem:[#allocation2 + $0x40] sm:$0xff]  ;;  %v2087_v41 = vmul.f32 %v2051_v34, %v2015_v42  ;;  %v2698_v18 = vunpack.c.l.b16 %v2642_v13  ;;  %v2699_v47 = vunpack.c.h.b16 %v2642_v13  ;;  %4612 = vmatmul.msk.bf16.gmra.mxu0 %vm1207_vm6, %v4785_v44  ;;  %v2985_v26 = vrot.slane %v4785_v44, 1 }
 0x2ca   : > { %v3483_v24 = vrot.slane %v4804_v4, 2 }
 0x2cb   : > { %v2123_v37 = vpack.c.bf16 %v2087_v41, %v2087_v41  ;;  %v2735_v59 = vpack.c.b16 %v2698_v18, %v2698_v18  ;;  %v2736_v12 = vpack.c.b16 %v2699_v47, %v2699_v47  ;;  %v2986_v7 = vsel %vm669_vm0, %v2983_v3, %v2985_v26 }
 0x2cc   : > { %v3484_v22 = vsel %vm1262_vm4, %v3481_v30, %v3483_v24 }
 0x2cd   : > { %v2200_v32 = vunpack.c.l.b16 %v2123_v37  ;;  %2809 = vst.msk [vmem:[#allocation2 + $0x48] sm:$0xf] %vm984_vm5, %v2735_v59  ;;  %4584 = vmatmul.msk.bf16.gmra.mxu3 %vm1207_vm6, %v2986_v7  ;;  %4705 = vmatmul.msk.bf16.gmra.mxu1 %vm1207_vm6, %v3484_v22  ;;  %v3707_v7 = vld [vmem:[%s5020_s10 + $0xc] sm:$0xf] }
 0x2ce   : > { %2810 = vst.msk [vmem:[#allocation2 + $0x4c] sm:$0xf] %vm984_vm5, %v2736_v12  ;;  %v2511_v34 = vpop.permute.xlu2 %2510  ;;  %v3706_v12 = vld [vmem:[%s5020_s10 + $0x8] sm:$0xe] }
 0x2cf   : > { %v6242_v31 = vpack.c.b16 %v2200_v32, %v2199_v5  ;;  %v2600_v23 = vsel %vm753_vm2, %v5955_v29, %v2511_v34  ;;  %v3743_v5 = vunpack.c.l.bf16 %v3706_v12  ;;  %v3744_v32 = vunpack.c.l.bf16 %v3707_v7 }
 0x2d1   : > { %v2419_v20 = vrot.slane %v6242_v31, 7  ;;  %v2366_v3 = vshrl.u32 %v6242_v31, 16  ;;  %v2369_v56 = vshll.u32 %v6242_v31, 16 }
 0x2d3   : > { %v2420_v30 = vsel %vm2387_vm7, %v2417_v51, %v2419_v20  ;;  %v2371_v2 = vrot.slane %v2369_v56, 7  ;;  %v6250_v63 = vrot.slane %v2366_v3, 7  ;;  %v2368_v25 = vrot.slane %v2366_v3, 6 }
 0x2d4   : > { %2522 = vrot.lane.b32.xlu2 %v2420_v30, %s4959_s12 }
 0x2d5   : > { %v2478_v6 = vor.u32 %v6250_v63, %v2369_v56  ;;  %v4786_v27 = vld [vmem:[#allocation2 + $0x48] sm:$0xff]  ;;  %v6254_v14 = vor.u32 %v2371_v2, %v2368_v25 }
 0x2d6   : > { %v4805_v16 = vld [vmem:[#allocation2 + $0x48] sm:$0xff]  ;;  %v6256_v40 = vpop.f32.mrf.mxu0  ;;  %v2509_v1 = vpop.permute.xlu0 %2508  ;;  %v2987_v51 = vrot.slane %v4786_v27, 1 }
 0x2d7   : > { %v2479_v21 = vsel %vm2429_vm8, %v2474_v10, %v2478_v6  ;;  %v3485_v62 = vrot.slane %v4805_v16, 2  ;;  %v2597_v45 = vsel %vm753_vm2, %v5883_v19, %v2509_v1  ;;  %v6268_v10 = vpop.f32.mrf.mxu3 }
 0x2d8   : > { %2562 = vrot.lane.b32.xlu0 %v2479_v21, %s4958_s11  ;;  %v2988_v46 = vsel %vm669_vm0, %v2985_v26, %v2987_v51 }
 0x2d9   : > { %4613 = vmatmul.msk.bf16.gmra.mxu0 %vm1207_vm6, %v4786_v27  ;;  %v3486_v11 = vsel %vm1262_vm4, %v3483_v24, %v3485_v62 }
 0x2da   : > { %v2549_v50 = vpop.permute.xlu1 %2548 }
 0x2db   : > { %v2644_v36 = vsel %vm797_vm3, %v2597_v45, %v2549_v50  ;;  %v3899_v45 = vrot.slane %v3744_v32, 3 }
 0x2dc   : > { %v2700_v54 = vunpack.c.l.b16 %v2644_v36  ;;  %v2701_v43 = vunpack.c.h.b16 %v2644_v36 }
 0x2dd   : > { %4585 = vmatmul.msk.bf16.gmra.mxu3 %vm1207_vm6, %v2988_v46  ;;  %4706 = vmatmul.msk.bf16.gmra.mxu1 %vm1207_vm6, %v3486_v11  ;;  %v6314_v46 = vld [vmem:[%s6761_s6] ss:$0 sm:$0xff]  ;;  %v4902_v11 = vld [vmem:[%s5020_s10 + $0x10] sm:$0xff]  }
 0x2de   : > { %v2737_v52 = vpack.c.b16 %v2700_v54, %v2700_v54  ;;  %v2738_v57 = vpack.c.b16 %v2701_v43, %v2701_v43  ;;  %v6270_v19 = vpop.f32.mrf.mxu0  ;;  %v4832_v7 = vunpack.c.h.bf16 %v4902_v11 }
 0x2df   : > { %v6276_v35 = vpop.f32.mrf.mxu3 }
 0x2e0   : > { %2811 = vst.msk [vmem:[#allocation2 + $0x50] sm:$0xf] %vm984_vm5, %v2737_v52 }
 0x2e1   : > { %2812 = vst.msk [vmem:[#allocation2 + $0x54] sm:$0xf] %vm984_vm5, %v2738_v57 }
 0x2e2   : > { %v2553_v3 = vpop.permute.xlu2 %2552 }
 0x2e6   : > { %v6274_v53 = vpop.f32.mrf.mxu0 }
 0x2e8   : > { %v4787_v42 = vld [vmem:[#allocation2 + $0x50] sm:$0xff] }
 0x2e9   : > { %v4806_v15 = vld [vmem:[#allocation2 + $0x50] sm:$0xff]  ;;  %4614 = vmatmul.msk.bf16.gmra.mxu0 %vm1207_vm6, %v4787_v42  ;;  %v2989_v44 = vrot.slane %v4787_v42, 1 }
 0x2ea   : > { %v2551_v13 = vpop.permute.xlu0 %2550  ;;  %v3487_v4 = vrot.slane %v4806_v15, 2  ;;  %v4831_v15 = vunpack.c.l.bf16 %v4902_v11 }
 0x2eb   : > { %v2646_v58 = vsel %vm797_vm3, %v2600_v23, %v2551_v13  ;;  %v2990_v47 = vsel %vm669_vm0, %v2987_v51, %v2989_v44  ;;  %v6305_v51 = vld [vmem:[%s6760_s5] ss:$0 sm:$0xff] }
 0x2ec   : > { %v2702_v41 = vunpack.c.l.b16 %v2646_v58  ;;  %v2703_v18 = vunpack.c.h.b16 %v2646_v58  ;;  %v3488_v26 = vsel %vm1262_vm4, %v3485_v62, %v3487_v4  ;;  %v3898_v62 = vrot.slane %v3743_v5, 3 }
 0x2ed   : > { %4586 = vmatmul.msk.bf16.gmra.mxu3 %vm1207_vm6, %v2990_v47  ;;  %4707 = vmatmul.msk.bf16.gmra.mxu1 %vm1207_vm6, %v3488_v26 }
 0x2ee   : > { %v2739_v29 = vpack.c.b16 %v2702_v41, %v2702_v41  ;;  %v2740_v24 = vpack.c.b16 %v2703_v18, %v2703_v18  ;;  %v6286_v37 = vpop.f32.mrf.mxu0  ;;  %v3900_v42 = vsel %vm3897_vm14, %v3898_v62, %v3899_v45  ;;  %v3901_v41 = vrot.slane %v4831_v15, 3 }
 0x2ef   : > { %v3080_v59 = vpop.f32.mrf.mxu3 }
 0x2f0   : > { %2813 = vst.msk [vmem:[#allocation2 + $0x58] sm:$0xf] %vm984_vm5, %v2739_v29  ;;  %v3250_v27 = vadd.f32 %v6211_v55, %v3080_v59  ;;  %v3902_v12 = vsel %vm3897_vm14, %v3899_v45, %v3901_v41  ;;  %v4903_v45 = vld [vmem:[%s5020_s10 + $0x18] sm:$0xff]  }
 0x2f1   : > { %2814 = vst.msk [vmem:[#allocation2 + $0x5c] sm:$0xf] %vm984_vm5, %v2740_v24  ;;  %v4835_v15 = vunpack.c.l.bf16 %v4903_v45 }
 0x2f6   : > { %v2513_v22 = vpop.permute.xlu1 %2512  ;;  %v6300_v21 = vpop.f32.mrf.mxu0 }
 0x2f7   : > { %v2603_v56 = vsel %vm753_vm2, %v6018_v0, %v2513_v22  ;;  %v3082_v2 = vpop.f32.mrf.mxu3 }
 0x2f8   : > { %v2648_v30 = vsel %vm797_vm3, %v2603_v56, %v2553_v3  ;;  %v6295_v25 = vld [vmem:[#allocation2 + $0x58] sm:$0xff] }
 0x2f9   : > { %v6297_v6 = vld [vmem:[#allocation2 + $0x58] sm:$0xff]  ;;  %v2704_v16 = vunpack.c.l.b16 %v2648_v30  ;;  %v2705_v1 = vunpack.c.h.b16 %v2648_v30  ;;  %4615 = vmatmul.msk.bf16.gmra.mxu0 %vm1207_vm6, %v6295_v25  ;;  %v2991_v50 = vrot.slane %v6295_v25, 1 }
 0x2fa   : > { %v3580_v0 = vpop.f32.mrf.mxu1  ;;  %v3489_v55 = vrot.slane %v6297_v6, 2 }
 0x2fb   : > { %v2741_v36 = vpack.c.b16 %v2704_v16, %v2704_v16  ;;  %v2742_v54 = vpack.c.b16 %v2705_v1, %v2705_v1  ;;  %v3670_v43 = vadd.f32 %v3580_v0, %v3250_v27  ;;  %v2992_v52 = vsel %vm669_vm0, %v2989_v44, %v2991_v50 }
 0x2fc   : > { %v3490_v57 = vsel %vm1262_vm4, %v3487_v4, %v3489_v55  ;;  %v3252_v44 = vadd.f32 %v6235_v17, %v3082_v2  ;;  %v3903_v16 = vrot.slane %v4832_v7, 3 }
 0x2fd   : > { %2815 = vst.msk [vmem:[#allocation2 + $0x60] sm:$0xf] %vm984_vm5, %v2741_v36  ;;  %v3784_v34 = vmul.f32 %v6305_v51, %v3670_v43  ;;  %4587 = vmatmul.msk.bf16.gmra.mxu3 %vm1207_vm6, %v2992_v52  ;;  %4708 = vmatmul.msk.bf16.gmra.mxu1 %vm1207_vm6, %v3490_v57 }
 0x2fe   : > { %2816 = vst.msk [vmem:[#allocation2 + $0x64] sm:$0xf] %vm984_vm5, %v2742_v54  ;;  %v6328_v47 = vpop.f32.mrf.mxu0 }
 0x2ff   : > { %v3824_v23 = vadd.f32 %v6314_v46, %v3784_v34 }
 0x300   : > { %v3085_v13 = vpop.f32.mrf.mxu3 }
 0x301   : > { %v4007_v4 = vadd.f32 %v3900_v42, %v3824_v23  ;;  %v3255_v30 = vadd.f32 %v6256_v40, %v3085_v13  ;;  %v3904_v42 = vsel %vm3897_vm14, %v3901_v41, %v3903_v16  ;;  %v1530_v41 = vadd.f32 %v6268_v10, %v5528_v61 }
 0x302   : > { %v3582_v58 = vpop.f32.mrf.mxu1 }
 0x303   : > { %v4043_v18 = vmax.f32 %v4007_v4, 0.0  ;;  %v3671_v26 = vadd.f32 %v3582_v58, %v3252_v44  ;;  %v3905_v4 = vrot.slane %v4835_v15, 3 }
 0x305   : > { %v4079_v29 = vpack.c.bf16 %v4043_v18, %v4043_v18  ;;  %v3785_v24 = vmul.f32 %v6305_v51, %v3671_v26  ;;  %v6336_v59 = vld [vmem:[#allocation2 + $0x60] sm:$0xff] }
 0x306   : > { %v6338_v17 = vld [vmem:[#allocation2 + $0x60] sm:$0xff]  ;;  %v2515_v5 = vpop.permute.xlu0 %2514  ;;  %v2993_v3 = vrot.slane %v6336_v59, 1  ;;  %v6359_v11 = vpop.f32.mrf.mxu0 }
 0x307   : > { %4116 = vst.msk [vmem:[%s6333_s18] sm:$0xf] %vm4115_vm15, %v4079_v29  ;;  %v3825_v22 = vadd.f32 %v6314_v46, %v3785_v24  ;;  %v3491_v56 = vrot.slane %v6338_v17, 2  ;;  %v2606_v25 = vsel %vm753_vm2, %v6083_v38, %v2515_v5  ;;  %v4836_v24 = vunpack.c.h.bf16 %v4903_v45  ;;  %v2052_v17 = vld [vmem:[%s6762_s7 + $0x110] sm:$0xff] }
 0x308   : > { %v3087_v32 = vpop.f32.mrf.mxu3  ;;  %v2994_v40 = vsel %vm669_vm0, %v2991_v50, %v2993_v3 }
 0x309   : > { %v4008_v2 = vadd.f32 %v3902_v12, %v3825_v22  ;;  %4616 = vmatmul.msk.bf16.gmra.mxu0 %vm1207_vm6, %v6336_v59  ;;  %v3492_v38 = vsel %vm1262_vm4, %v3489_v55, %v3491_v56  ;;  %v3257_v23 = vadd.f32 %v6270_v19, %v3087_v32  ;;  %v3906_v12 = vsel %vm3897_vm14, %v3903_v16, %v3905_v4  ;;  %v2517_v22 = vpop.permute.xlu2 %2516 }
 0x30a   : > { %v2555_v6 = vpop.permute.xlu1 %2554  ;;  %v3585_v27 = vpop.f32.mrf.mxu1  ;;  %v1532_v16 = vadd.f32 %v6276_v35, %v5530_v8  ;;  %v4904_v8 = vld [vmem:[%s5020_s10 + $0x20] sm:$0xff]  }
 0x30b   : > { %v4044_v1 = vmax.f32 %v4008_v2, 0.0  ;;  %v2650_v0 = vsel %vm797_vm3, %v2606_v25, %v2555_v6  ;;  %v3672_v62 = vadd.f32 %v3585_v27, %v3255_v30  ;;  %v3907_v27 = vrot.slane %v4836_v24, 3  ;;  %v4947_v24 = vld [vmem:[%s6759_s4] ss:$0 sm:$0xff] }
 0x30c   : > { %v2706_v36 = vunpack.c.l.b16 %v2650_v0  ;;  %v2707_v54 = vunpack.c.h.b16 %v2650_v0 }
 0x30d   : > { %v4080_v43 = vpack.c.bf16 %v4044_v1, %v4044_v1  ;;  %v3786_v52 = vmul.f32 %v6305_v51, %v3672_v62  ;;  %4588 = vmatmul.msk.bf16.gmra.mxu3 %vm1207_vm6, %v2994_v40  ;;  %4709 = vmatmul.msk.bf16.gmra.mxu1 %vm1207_vm6, %v3492_v38  ;;  %v2609_v1 = vsel %vm753_vm2, %v6135_v39, %v2517_v22  ;;  %v4840_v22 = vunpack.c.h.bf16 %v4904_v8 }
 0x30e   : > { %v2743_v57 = vpack.c.b16 %v2706_v36, %v2706_v36  ;;  %v2744_v34 = vpack.c.b16 %v2707_v54, %v2707_v54  ;;  %v6377_v19 = vpop.f32.mrf.mxu0 }
 0x30f   : > { %4117 = vst.msk [vmem:[%s6333_s18 + $0x4] sm:$0xf] %vm4115_vm15, %v4080_v43  ;;  %v3826_v50 = vadd.f32 %v6314_v46, %v3786_v52 }
 0x310   : > { %2817 = vst.msk [vmem:[#allocation2 + $0x68] sm:$0xf] %vm984_vm5, %v2743_v57  ;;  %v3090_v55 = vpop.f32.mrf.mxu3  ;;  %v3908_v57 = vsel %vm3897_vm14, %v3905_v4, %v3907_v27  ;;  %v4946_v4 = vld [vmem:[%s6758_s3] ss:$0 sm:$0xff] }
 0x311   : > { %2818 = vst.msk [vmem:[#allocation2 + $0x6c] sm:$0xf] %vm984_vm5, %v2744_v34  ;;  %v4009_v13 = vadd.f32 %v3904_v42, %v3826_v50  ;;  %v3260_v61 = vadd.f32 %v6274_v53, %v3090_v55 }
 0x312   : > { %v3587_v44 = vpop.f32.mrf.mxu1 }
 0x313   : > { %v4045_v58 = vmax.f32 %v4009_v13, 0.0  ;;  %v3673_v18 = vadd.f32 %v3587_v44, %v3257_v23 }
 0x315   : > { %v4081_v26 = vpack.c.bf16 %v4045_v58, %v4045_v58  ;;  %v3787_v29 = vmul.f32 %v6305_v51, %v3673_v18 }
 0x316   : > { %v1861_v7 = vpop.f32.mrf.mxu2  ;;  %v6418_v23 = vpop.f32.mrf.mxu0 }
 0x317   : > { %4118 = vst.msk [vmem:[%s6333_s18 + $0x8] sm:$0xf] %vm4115_vm15, %v4081_v26  ;;  %v3827_v5 = vadd.f32 %v6314_v46, %v3787_v29  ;;  %v1900_v32 = vadd.f32 %v1861_v7, %v1530_v41 }
 0x318   : > { %v3092_v30 = vpop.f32.mrf.mxu3  ;;  %v6380_v2 = vld [vmem:[#allocation2 + $0x68] sm:$0xff] }
 0x319   : > { %v6382_v25 = vld [vmem:[#allocation2 + $0x68] sm:$0xff]  ;;  %v4010_v10 = vadd.f32 %v3906_v12, %v3827_v5  ;;  %v1940_v6 = vmul.f32 %v5915_v33, %v1900_v32  ;;  %4617 = vmatmul.msk.bf16.gmra.mxu0 %vm1207_vm6, %v6380_v2  ;;  %v2995_v45 = vrot.slane %v6380_v2, 1  ;;  %v3262_v13 = vadd.f32 %v6286_v37, %v3092_v30  ;;  %v2053_v37 = vld [vmem:[%s6762_s7 + $0x118] sm:$0xff] }
 0x31a   : > { %v2557_v0 = vpop.permute.xlu0 %2556  ;;  %v3590_v62 = vpop.f32.mrf.mxu1  ;;  %v3493_v36 = vrot.slane %v6382_v25, 2 }
 0x31b   : > { %v4046_v53 = vmax.f32 %v4010_v10, 0.0  ;;  %v1980_v54 = vadd.f32 %v5929_v60, %v1940_v6  ;;  %v2652_v33 = vsel %vm797_vm3, %v2609_v1, %v2557_v0  ;;  %v3674_v40 = vadd.f32 %v3590_v62, %v3260_v61 }
 0x31c   : > { %v2708_v35 = vunpack.c.l.b16 %v2652_v33  ;;  %v2709_v38 = vunpack.c.h.b16 %v2652_v33  ;;  %v2996_v39 = vsel %vm669_vm0, %v2993_v3, %v2995_v45  ;;  %v3494_v43 = vsel %vm1262_vm4, %v3491_v56, %v3493_v36 }
 0x31d   : > { %v4082_v60 = vpack.c.bf16 %v4046_v53, %v4046_v53  ;;  %v3788_v52 = vmul.f32 %v6305_v51, %v3674_v40  ;;  %4589 = vmatmul.msk.bf16.gmra.mxu3 %vm1207_vm6, %v2996_v39  ;;  %4710 = vmatmul.msk.bf16.gmra.mxu1 %vm1207_vm6, %v3494_v43  ;;  %v2016_v34 = vmax.f32 %v1980_v54, 0.0  ;;  %v4839_v3 = vunpack.c.l.bf16 %v4904_v8 }
 0x31e   : > { %v2745_v42 = vpack.c.b16 %v2708_v35, %v2708_v35  ;;  %v2746_v59 = vpack.c.b16 %v2709_v38, %v2709_v38  ;;  %v1863_v15 = vpop.f32.mrf.mxu2  ;;  %v3911_v40 = vrot.slane %v4840_v22, 3 }
 0x31f   : > { %4119 = vst.msk [vmem:[%s6333_s18 + $0xc] sm:$0xf] %vm4115_vm15, %v4082_v60  ;;  %v3828_v56 = vadd.f32 %v6314_v46, %v3788_v52  ;;  %v1901_v50 = vadd.f32 %v1863_v15, %v1532_v16  ;;  %v2088_v18 = vmul.f32 %v2052_v17, %v2016_v34  ;;  %v3909_v26 = vrot.slane %v4839_v3, 3  ;;  %v2559_v16 = vpop.permute.xlu2 %2558  ;;  %v4905_v17 = vld [vmem:[%s5020_s10 + $0x28] sm:$0xff]  }
 0x320   : > { %2819 = vst.msk [vmem:[#allocation2 + $0x70] sm:$0xf] %vm984_vm5, %v2745_v42  ;;  %v3095_v55 = vpop.f32.mrf.mxu3  ;;  %v6448_v42 = vpop.f32.mrf.mxu0 }
 0x321   : > { %2820 = vst.msk [vmem:[#allocation2 + $0x74] sm:$0xf] %vm984_vm5, %v2746_v59  ;;  %v4011_v44 = vadd.f32 %v3908_v57, %v3828_v56  ;;  %v1941_v58 = vmul.f32 %v4946_v4, %v1901_v50  ;;  %v2124_v61 = vpack.c.bf16 %v2088_v18, %v2088_v18  ;;  %v3910_v10 = vsel %vm3897_vm14, %v3907_v27, %v3909_v26 }
 0x322   : > { %v3592_v41 = vpop.f32.mrf.mxu1  ;;  %v3265_v60 = vadd.f32 %v6300_v21, %v3095_v55 }
 0x323   : > { %v4047_v29 = vmax.f32 %v4011_v44, 0.0  ;;  %v1981_v12 = vadd.f32 %v4947_v24, %v1941_v58  ;;  %v3675_v7 = vadd.f32 %v3592_v41, %v3262_v13  ;;  %v2201_v43 = vunpack.c.l.b16 %v2124_v61 }
 0x324   : > { %v4843_v44 = vunpack.c.l.bf16 %v4905_v17 }
 0x325   : > { %v4083_v5 = vpack.c.bf16 %v4047_v29, %v4047_v29  ;;  %v2017_v32 = vmax.f32 %v1981_v12, 0.0  ;;  %v3789_v30 = vmul.f32 %v6305_v51, %v3675_v7 }
 0x326   : > { %v2519_v6 = vpop.permute.xlu1 %2518 }
 0x327   : > { %4120 = vst.msk [vmem:[%s6333_s18 + $0x10] sm:$0xf] %vm4115_vm15, %v4083_v5  ;;  %v2089_v1 = vmul.f32 %v2053_v37, %v2017_v32  ;;  %v3829_v0 = vadd.f32 %v6314_v46, %v3789_v30  ;;  %v2612_v62 = vsel %vm753_vm2, %v6186_v48, %v2519_v6  ;;  %v3913_v37 = vrot.slane %v4843_v44, 3 }
 0x328   : > { %v2654_v53 = vsel %vm797_vm3, %v2612_v62, %v2559_v16  ;;  %v3097_v54 = vpop.f32.mrf.mxu3  ;;  %v6439_v33 = vld [vmem:[#allocation2 + $0x70] sm:$0xff]  ;;  %v4844_v62 = vunpack.c.h.bf16 %v4905_v17 }
 0x329   : > { %v6441_v8 = vld [vmem:[#allocation2 + $0x70] sm:$0xff]  ;;  %v2125_v27 = vpack.c.bf16 %v2089_v1, %v2089_v1  ;;  %v4012_v35 = vadd.f32 %v3910_v10, %v3829_v0  ;;  %v2710_v38 = vunpack.c.l.b16 %v2654_v53  ;;  %v2711_v39 = vunpack.c.h.b16 %v2654_v53  ;;  %4618 = vmatmul.msk.bf16.gmra.mxu0 %vm1207_vm6, %v6439_v33  ;;  %v6479_v10 = vpop.f32.mrf.mxu0 }
 0x32a   : > { %v3595_v48 = vpop.f32.mrf.mxu1  ;;  %v2997_v52 = vrot.slane %v6439_v33, 1  ;;  %v3495_v57 = vrot.slane %v6441_v8, 2  ;;  %v3267_v41 = vadd.f32 %v6328_v47, %v3097_v54  ;;  %v3914_v0 = vsel %vm3897_vm14, %v3911_v40, %v3913_v37 }
 0x32b   : > { %v2202_v34 = vunpack.c.l.b16 %v2125_v27  ;;  %v4048_v59 = vmax.f32 %v4012_v35, 0.0  ;;  %v2747_v15 = vpack.c.b16 %v2710_v38, %v2710_v38  ;;  %v2748_v3 = vpack.c.b16 %v2711_v39, %v2711_v39 }
 0x32c   : > { %v3676_v56 = vadd.f32 %v3595_v48, %v3265_v60  ;;  %v2998_v21 = vsel %vm669_vm0, %v2995_v45, %v2997_v52  ;;  %v3496_v50 = vsel %vm1262_vm4, %v3493_v36, %v3495_v57  ;;  %v3912_v45 = vsel %vm3897_vm14, %v3909_v26, %v3911_v40 }
 0x32d   : > { %v4084_v55 = vpack.c.bf16 %v4048_v59, %v4048_v59  ;;  %2821 = vst.msk [vmem:[#allocation2 + $0x78] sm:$0xf] %vm984_vm5, %v2747_v15  ;;  %4590 = vmatmul.msk.bf16.gmra.mxu3 %vm1207_vm6, %v2998_v21  ;;  %4711 = vmatmul.msk.bf16.gmra.mxu1 %vm1207_vm6, %v3496_v50  ;;  %v2220_v13 = vpack.c.b16 %v2202_v34, %v2201_v43  ;;  %v3915_v34 = vrot.slane %v4844_v62, 3 }
 0x32e   : > { %2822 = vst.msk [vmem:[#allocation2 + $0x7c] sm:$0xf] %vm984_vm5, %v2748_v3  ;;  %v3790_v2 = vmul.f32 %v6305_v51, %v3676_v56  ;;  %v4906_v3 = vld [vmem:[%s5020_s10 + $0x30] sm:$0xff]  }
 0x32f   : > { %4121 = vst.msk [vmem:[%s6333_s18 + $0x14] sm:$0xf] %vm4115_vm15, %v4084_v55  ;;  %v2421_v25 = vrot.slane %v2220_v13, 7  ;;  %v2375_v4 = vshrl.u32 %v2220_v13, 16  ;;  %v2378_v36 = vshll.u32 %v2220_v13, 16  ;;  %v4847_v33 = vunpack.c.l.bf16 %v4906_v3 }
 0x330   : > { %v3830_v58 = vadd.f32 %v6314_v46, %v3790_v2  ;;  %v3100_v18 = vpop.f32.mrf.mxu3  ;;  %v3916_v2 = vsel %vm3897_vm14, %v3913_v37, %v3915_v34 }
 0x331   : > { %v2428_v29 = vsel %vm2387_vm7, %v2421_v25, 0  ;;  %v2422_v24 = vsel %vm2387_vm7, %v2419_v20, %v2421_v25  ;;  %v2480_v12 = vrot.slane %v2375_v4, 7  ;;  %v2377_v22 = vrot.slane %v2375_v4, 6  ;;  %v6519_v44 = vpop.f32.mrf.mxu0 }
 0x332   : > { %v4013_v7 = vadd.f32 %v3912_v45, %v3830_v58  ;;  %2526 = vrot.lane.b32.xlu0 %v2428_v29, %s4959_s12  ;;  %2524 = vrot.lane.b32.xlu1 %v2422_v24, %s4959_s12  ;;  %v3597_v26 = vpop.f32.mrf.mxu1  ;;  %v2380_v5 = vrot.slane %v2378_v36, 7  ;;  %v3270_v38 = vadd.f32 %v6359_v11, %v3100_v18  ;;  %v3917_v4 = vrot.slane %v4847_v33, 3 }
 0x333   : > { %v3677_v32 = vadd.f32 %v3597_v26, %v3267_v41  ;;  %v2481_v30 = vor.u32 %v2480_v12, %v2378_v36  ;;  %v2487_v40 = vsel %vm5576_vm9, %v2480_v12, 0  ;;  %v4848_v24 = vunpack.c.h.bf16 %v4906_v3  ;;  %v2523_v12 = vpop.permute.xlu2 %2522 }
 0x334   : > { %v4049_v47 = vmax.f32 %v4013_v7, 0.0  ;;  %v6477_v61 = vor.u32 %v2380_v5, %v2377_v22  ;;  %v3918_v29 = vsel %vm3897_vm14, %v3915_v34, %v3917_v4  ;;  %v2373_v22 = vsel %vm2221_vm10, %v6220_v49, %v6254_v14  ;;  %v4907_v49 = vld [vmem:[%s5020_s10 + $0x38] sm:$0xff]  }
 0x335   : > { %v3791_v31 = vmul.f32 %v6305_v51, %v3677_v32  ;;  %v2482_v20 = vsel %vm2429_vm8, %v6250_v63, %v2481_v30  ;;  %v6484_v6 = vld [vmem:[#allocation2 + $0x78] sm:$0xff] }
 0x336   : > { %v6486_v16 = vld [vmem:[#allocation2 + $0x78] sm:$0xff]  ;;  %v4085_v1 = vpack.c.bf16 %v4049_v47, %v4049_v47  ;;  %2564 = vrot.lane.b32.xlu2 %v2482_v20, %s4958_s11  ;;  %v2521_v54 = vpop.permute.xlu0 %2520  ;;  %v2999_v35 = vrot.slane %v6484_v6, 1  ;;  %v2618_v47 = vsel %vm753_vm2, %v2373_v22, %v2523_v12 }
 0x337   : > { %v3831_v53 = vadd.f32 %v6314_v46, %v3791_v31  ;;  %v3497_v63 = vrot.slane %v6486_v16, 2  ;;  %v2615_v43 = vsel %vm753_vm2, %v6231_v9, %v2521_v54 }
 0x338   : > { %4122 = vst.msk [vmem:[%s6333_s18 + $0x18] sm:$0xf] %vm4115_vm15, %v4085_v1  ;;  %v3102_v27 = vpop.f32.mrf.mxu3  ;;  %v3000_v9 = vsel %vm669_vm0, %v2997_v52, %v2999_v35  ;;  %v3919_v1 = vrot.slane %v4848_v24, 3 }
 0x339   : > { %v4014_v39 = vadd.f32 %v3914_v0, %v3831_v53  ;;  %4619 = vmatmul.msk.bf16.gmra.mxu0 %vm1207_vm6, %v6484_v6  ;;  %v3498_v56 = vsel %vm1262_vm4, %v3495_v57, %v3497_v63  ;;  %v3272_v57 = vadd.f32 %v6377_v19, %v3102_v27  ;;  %v6535_v5 = vpop.f32.mrf.mxu0 }
 0x33a   : > { %2566 = vrot.lane.b32.xlu1 %v2487_v40, %s4958_s11  ;;  %v2561_v60 = vpop.permute.xlu1 %2560  ;;  %v3600_v48 = vpop.f32.mrf.mxu1 }
 0x33b   : > { %v4050_v59 = vmax.f32 %v4014_v39, 0.0  ;;  %v2656_v15 = vsel %vm797_vm3, %v2615_v43, %v2561_v60  ;;  %v3678_v11 = vadd.f32 %v3600_v48, %v3270_v38 }
 0x33c   : > { %v2712_v17 = vunpack.c.l.b16 %v2656_v15  ;;  %v2713_v28 = vunpack.c.h.b16 %v2656_v15  ;;  %v4851_v15 = vunpack.c.l.bf16 %v4907_v49 }
 0x33d   : > { %v4086_v21 = vpack.c.bf16 %v4050_v59, %v4050_v59  ;;  %v3792_v50 = vmul.f32 %v6305_v51, %v3678_v11  ;;  %4591 = vmatmul.msk.bf16.gmra.mxu3 %vm1207_vm6, %v3000_v9  ;;  %4712 = vmatmul.msk.bf16.gmra.mxu1 %vm1207_vm6, %v3498_v56  ;;  %v3920_v59 = vsel %vm3897_vm14, %v3917_v4, %v3919_v1 }
 0x33e   : > { %v2749_v55 = vpack.c.b16 %v2712_v17, %v2712_v17  ;;  %v2750_v13 = vpack.c.b16 %v2713_v28, %v2713_v28  ;;  %v3921_v3 = vrot.slane %v4851_v15, 3 }
 0x33f   : > { %4123 = vst.msk [vmem:[%s6333_s18 + $0x1c] sm:$0xf] %vm4115_vm15, %v4086_v21  ;;  %v3832_v8 = vadd.f32 %v6314_v46, %v3792_v50 }
 0x340   : > { %2823 = vst.msk [vmem:[#allocation2 + $0x80] sm:$0xf] %vm984_vm5, %v2749_v55  ;;  %v3105_v52 = vpop.f32.mrf.mxu3  ;;  %v3922_v50 = vsel %vm3897_vm14, %v3919_v1, %v3921_v3  ;;  %v4852_v55 = vunpack.c.h.bf16 %v4907_v49 }
 0x341   : > { %2824 = vst.msk [vmem:[#allocation2 + $0x84] sm:$0xf] %vm984_vm5, %v2750_v13  ;;  %v4015_v45 = vadd.f32 %v3916_v2, %v3832_v8  ;;  %v3275_v32 = vadd.f32 %v6418_v23, %v3105_v52  ;;  %v3286_v9 = vpop.f32.mrf.mxu0 }
 0x342   : > { %v3602_v25 = vpop.f32.mrf.mxu1 }
 0x343   : > { %v4051_v36 = vmax.f32 %v4015_v45, 0.0  ;;  %v3679_v58 = vadd.f32 %v3602_v25, %v3272_v57  ;;  %v3923_v45 = vrot.slane %v4852_v55, 3 }
 0x345   : > { %v4087_v18 = vpack.c.bf16 %v4051_v36, %v4051_v36  ;;  %v3793_v41 = vmul.f32 %v6305_v51, %v3679_v58 }
 0x347   : > { %4124 = vst.msk [vmem:[%s6333_s18 + $0x20] sm:$0xf] %vm4115_vm15, %v4087_v18  ;;  %v3833_v7 = vadd.f32 %v6314_v46, %v3793_v41  ;;  %v4908_v18 = vld [vmem:[%s5020_s10 + $0x40] sm:$0xff]  }
 0x348   : > { %v3107_v26 = vpop.f32.mrf.mxu3  ;;  %v4793_v19 = vld [vmem:[#allocation2 + $0x80] sm:$0xff] }
 0x349   : > { %v4812_v37 = vld [vmem:[#allocation2 + $0x80] sm:$0xff]  ;;  %v4016_v30 = vadd.f32 %v3918_v29, %v3833_v7  ;;  %4620 = vmatmul.msk.bf16.gmra.mxu0 %vm1207_vm6, %v4793_v19  ;;  %v3001_v0 = vrot.slane %v4793_v19, 1  ;;  %v3289_v12 = vpop.f32.mrf.mxu0  ;;  %v3924_v7 = vsel %vm3897_vm14, %v3921_v3, %v3923_v45 }
 0x34a   : > { %v2563_v31 = vpop.permute.xlu0 %2562  ;;  %v3605_v20 = vpop.f32.mrf.mxu1  ;;  %v3499_v62 = vrot.slane %v4812_v37, 2 }
 0x34b   : > { %v4052_v53 = vmax.f32 %v4016_v30, 0.0  ;;  %v2658_v54 = vsel %vm797_vm3, %v2618_v47, %v2563_v31  ;;  %v3680_v27 = vadd.f32 %v3605_v20, %v3275_v32  ;;  %v3002_v23 = vsel %vm669_vm0, %v2999_v35, %v3001_v0 }
 0x34c   : > { %v2714_v38 = vunpack.c.l.b16 %v2658_v54  ;;  %v2715_v39 = vunpack.c.h.b16 %v2658_v54  ;;  %v3500_v40 = vsel %vm1262_vm4, %v3497_v63, %v3499_v62  ;;  %v3277_v35 = vadd.f32 %v6448_v42, %v3107_v26 }
 0x34d   : > { %v4088_v43 = vpack.c.bf16 %v4052_v53, %v4052_v53  ;;  %v3794_v60 = vmul.f32 %v6305_v51, %v3680_v27  ;;  %4592 = vmatmul.msk.bf16.gmra.mxu3 %vm1207_vm6, %v3002_v23  ;;  %4713 = vmatmul.msk.bf16.gmra.mxu1 %vm1207_vm6, %v3500_v40  ;;  %v4855_v26 = vunpack.c.l.bf16 %v4908_v18  ;;  %v4856_v53 = vunpack.c.h.bf16 %v4908_v18 }
 0x34e   : > { %v2751_v48 = vpack.c.b16 %v2714_v38, %v2714_v38  ;;  %v2752_v34 = vpack.c.b16 %v2715_v39, %v2715_v39 }
 0x34f   : > { %4125 = vst.msk [vmem:[%s6333_s18 + $0x24] sm:$0xf] %vm4115_vm15, %v4088_v43  ;;  %v3834_v6 = vadd.f32 %v6314_v46, %v3794_v60  ;;  %v3925_v47 = vrot.slane %v4855_v26, 3  ;;  %v3927_v23 = vrot.slane %v4856_v53, 3  ;;  %v4909_v60 = vld [vmem:[%s5020_s10 + $0x48] sm:$0xff]  }
 0x350   : > { %2825 = vst.msk [vmem:[#allocation2 + $0x88] sm:$0xf] %vm984_vm5, %v2751_v48  ;;  %v3110_v16 = vpop.f32.mrf.mxu3  ;;  %v4859_v15 = vunpack.c.l.bf16 %v4909_v60  ;;  %v4860_v55 = vunpack.c.h.bf16 %v4909_v60 }
 0x351   : > { %2826 = vst.msk [vmem:[#allocation2 + $0x8c] sm:$0xf] %vm984_vm5, %v2752_v34  ;;  %v4017_v63 = vadd.f32 %v3920_v59, %v3834_v6  ;;  %v3280_v8 = vadd.f32 %v6479_v10, %v3110_v16  ;;  %v3291_v27 = vpop.f32.mrf.mxu0  ;;  %v3928_v59 = vsel %vm3897_vm14, %v3925_v47, %v3927_v23 }
 0x352   : > { %v3607_v11 = vpop.f32.mrf.mxu1  ;;  %v3929_v3 = vrot.slane %v4859_v15, 3 }
 0x353   : > { %v4053_v17 = vmax.f32 %v4017_v63, 0.0  ;;  %v3681_v28 = vadd.f32 %v3607_v11, %v3277_v35 }
 0x355   : > { %v4089_v56 = vpack.c.bf16 %v4053_v17, %v4053_v17  ;;  %v3795_v21 = vmul.f32 %v6305_v51, %v3681_v28 }
 0x357   : > { %4126 = vst.msk [vmem:[%s6333_s18 + $0x28] sm:$0xf] %vm4115_vm15, %v4089_v56  ;;  %v3835_v13 = vadd.f32 %v6314_v46, %v3795_v21 }
 0x358   : > { %v3112_v42 = vpop.f32.mrf.mxu3  ;;  %v6563_v2 = vld [vmem:[#allocation2 + $0x88] sm:$0xff] }
 0x359   : > { %v6565_v33 = vld [vmem:[#allocation2 + $0x88] sm:$0xff]  ;;  %v4018_v52 = vadd.f32 %v3922_v50, %v3835_v13  ;;  %4621 = vmatmul.msk.bf16.gmra.mxu0 %vm1207_vm6, %v6563_v2  ;;  %v3003_v25 = vrot.slane %v6563_v2, 1  ;;  %v3282_v22 = vadd.f32 %v6519_v44, %v3112_v42  ;;  %v3294_v63 = vpop.f32.mrf.mxu0  ;;  %v3930_v50 = vsel %vm3897_vm14, %v3927_v23, %v3929_v3  ;;  %v4911_v23 = vld [vmem:[%s5020_s10 + $0x58] sm:$0xff]  }
 0x35a   : > { %v3610_v57 = vpop.f32.mrf.mxu1  ;;  %v3501_v4 = vrot.slane %v6565_v33, 2 }
 0x35b   : > { %v4054_v36 = vmax.f32 %v4018_v52, 0.0  ;;  %v3682_v58 = vadd.f32 %v3610_v57, %v3280_v8  ;;  %v3004_v41 = vsel %vm669_vm0, %v3001_v0, %v3003_v25  ;;  %v3931_v57 = vrot.slane %v4860_v55, 3 }
 0x35c   : > { %v3502_v10 = vsel %vm1262_vm4, %v3499_v62, %v3501_v4  ;;  %v3926_v62 = vsel %vm3897_vm14, %v3923_v45, %v3925_v47 }
 0x35d   : > { %v4090_v29 = vpack.c.bf16 %v4054_v36, %v4054_v36  ;;  %v3796_v24 = vmul.f32 %v6305_v51, %v3682_v58  ;;  %4593 = vmatmul.msk.bf16.gmra.mxu3 %vm1207_vm6, %v3004_v41  ;;  %4714 = vmatmul.msk.bf16.gmra.mxu1 %vm1207_vm6, %v3502_v10  ;;  %v4910_v58 = vld [vmem:[%s5020_s10 + $0x50] sm:$0xff]  }
 0x35f   : > { %4127 = vst.msk [vmem:[%s6333_s18 + $0x2c] sm:$0xf] %vm4115_vm15, %v4090_v29  ;;  %v3836_v19 = vadd.f32 %v6314_v46, %v3796_v24  ;;  %v3932_v29 = vsel %vm3897_vm14, %v3929_v3, %v3931_v57  ;;  %v4863_v24 = vunpack.c.l.bf16 %v4910_v58 }
 0x360   : > { %v3115_v37 = vpop.f32.mrf.mxu3 }
 0x361   : > { %v4019_v32 = vadd.f32 %v3924_v7, %v3836_v19  ;;  %v3285_v44 = vadd.f32 %v6535_v5, %v3115_v37  ;;  %v3296_v18 = vpop.f32.mrf.mxu0 }
 0x362   : > { %v3612_v30 = vpop.f32.mrf.mxu1 }
 0x363   : > { %v4055_v31 = vmax.f32 %v4019_v32, 0.0  ;;  %v3683_v20 = vadd.f32 %v3612_v30, %v3282_v22  ;;  %v3933_v22 = vrot.slane %v4863_v24, 3 }
 0x365   : > { %v4091_v1 = vpack.c.bf16 %v4055_v31, %v4055_v31  ;;  %v3797_v0 = vmul.f32 %v6305_v51, %v3683_v20 }
 0x367   : > { %4128 = vst.msk [vmem:[%s6333_s18 + $0x30] sm:$0xf] %vm4115_vm15, %v4091_v1  ;;  %v3837_v54 = vadd.f32 %v6314_v46, %v3797_v0  ;;  %v3934_v1 = vsel %vm3897_vm14, %v3931_v57, %v3933_v22  ;;  %v4864_v0 = vunpack.c.h.bf16 %v4910_v58 }
 0x368   : > { %v3117_v49 = vpop.f32.mrf.mxu3 }
 0x369   : > { %v4020_v38 = vadd.f32 %v3926_v62, %v3837_v54  ;;  %v3287_v35 = vadd.f32 %v3286_v9, %v3117_v49  ;;  %v3299_v20 = vpop.f32.mrf.mxu0 }
 0x36a   : > { %v3615_v39 = vpop.f32.mrf.mxu1 }
 0x36b   : > { %v4056_v40 = vmax.f32 %v4020_v38, 0.0  ;;  %v3684_v43 = vadd.f32 %v3615_v39, %v3285_v44  ;;  %v3935_v44 = vrot.slane %v4864_v0, 3 }
 0x36d   : > { %v4092_v48 = vpack.c.bf16 %v4056_v40, %v4056_v40  ;;  %v3798_v34 = vmul.f32 %v6305_v51, %v3684_v43  ;;  %v3936_v60 = vsel %vm3897_vm14, %v3933_v22, %v3935_v44 }
 0x36f   : > { %4129 = vst.msk [vmem:[%s6333_s18 + $0x34] sm:$0xf] %vm4115_vm15, %v4092_v48  ;;  %v3838_v6 = vadd.f32 %v6314_v46, %v3798_v34  ;;  %v4867_v48 = vunpack.c.l.bf16 %v4911_v23 }
 0x370   : > { %v3120_v16 = vpop.f32.mrf.mxu3 }
 0x371   : > { %v4021_v5 = vadd.f32 %v3928_v59, %v3838_v6  ;;  %v3290_v9 = vadd.f32 %v3289_v12, %v3120_v16  ;;  %v3301_v59 = vpop.f32.mrf.mxu0 }
 0x372   : > { %v3617_v11 = vpop.f32.mrf.mxu1 }
 0x373   : > { %v4057_v17 = vmax.f32 %v4021_v5, 0.0  ;;  %v3685_v28 = vadd.f32 %v3617_v11, %v3287_v35  ;;  %v3937_v5 = vrot.slane %v4867_v48, 3 }
 0x375   : > { %v4093_v56 = vpack.c.bf16 %v4057_v17, %v4057_v17  ;;  %v3799_v21 = vmul.f32 %v6305_v51, %v3685_v28  ;;  %v3938_v28 = vsel %vm3897_vm14, %v3935_v44, %v3937_v5 }
 0x377   : > { %4130 = vst.msk [vmem:[%s6333_s18 + $0x38] sm:$0xf] %vm4115_vm15, %v4093_v56  ;;  %v3839_v13 = vadd.f32 %v6314_v46, %v3799_v21  ;;  %v4868_v56 = vunpack.c.h.bf16 %v4911_v23 }
 0x378   : > { %v3122_v42 = vpop.f32.mrf.mxu3 }
 0x379   : > { %v4022_v8 = vadd.f32 %v3930_v50, %v3839_v13  ;;  %v3292_v12 = vadd.f32 %v3291_v27, %v3122_v42  ;;  %v3304_v42 = vpop.f32.mrf.mxu0 }
 0x37a   : > { %v3620_v52 = vpop.f32.mrf.mxu1 }
 0x37b   : > { %v4058_v45 = vmax.f32 %v4022_v8, 0.0  ;;  %v3686_v36 = vadd.f32 %v3620_v52, %v3290_v9  ;;  %v3939_v8 = vrot.slane %v4868_v56, 3 }
 0x37d   : > { %v4094_v41 = vpack.c.bf16 %v4058_v45, %v4058_v45  ;;  %v3800_v10 = vmul.f32 %v6305_v51, %v3686_v36  ;;  %v4912_v45 = vld [vmem:[%s5020_s10 + $0x60] sm:$0xff]  }
 0x37f   : > { %4131 = vst.msk [vmem:[%s6333_s18 + $0x3c] sm:$0xf] %vm4115_vm15, %v4094_v41  ;;  %v3840_v7 = vadd.f32 %v6314_v46, %v3800_v10  ;;  %v4871_v41 = vunpack.c.l.bf16 %v4912_v45 }
 0x380   : > { %v3125_v26 = vpop.f32.mrf.mxu3 }
 0x381   : > { %v4023_v19 = vadd.f32 %v3932_v29, %v3840_v7  ;;  %v3295_v54 = vadd.f32 %v3294_v63, %v3125_v26  ;;  %v3306_v22 = vpop.f32.mrf.mxu0 }
 0x382   : > { %v3622_v37 = vpop.f32.mrf.mxu1 }
 0x383   : > { %v4059_v32 = vmax.f32 %v4023_v19, 0.0  ;;  %v3687_v30 = vadd.f32 %v3622_v37, %v3292_v12  ;;  %v3941_v12 = vrot.slane %v4871_v41, 3 }
 0x385   : > { %v4095_v47 = vpack.c.bf16 %v4059_v32, %v4059_v32  ;;  %v3801_v31 = vmul.f32 %v6305_v51, %v3687_v30  ;;  %v2382_v32 = vsel %vm2221_vm10, %v6254_v14, %v6477_v61  ;;  %v3942_v0 = vsel %vm3897_vm14, %v3939_v8, %v3941_v12 }
 0x387   : > { %4132 = vst.msk [vmem:[%s6333_s18 + $0x40] sm:$0xf] %vm4115_vm15, %v4095_v47  ;;  %v3841_v62 = vadd.f32 %v6314_v46, %v3801_v31 }
 0x388   : > { %v3127_v53 = vpop.f32.mrf.mxu3 }
 0x389   : > { %v4024_v27 = vadd.f32 %v3934_v1, %v3841_v62  ;;  %v3297_v6 = vadd.f32 %v3296_v18, %v3127_v53  ;;  %v3940_v18 = vsel %vm3897_vm14, %v3937_v5, %v3939_v8  ;;  %v4872_v53 = vunpack.c.h.bf16 %v4912_v45 }
 0x38a   : > { %v3625_v49 = vpop.f32.mrf.mxu1 }
 0x38b   : > { %v4060_v38 = vmax.f32 %v4024_v27, 0.0  ;;  %v3688_v39 = vadd.f32 %v3625_v49, %v3295_v54 }
 0x38d   : > { %v4096_v40 = vpack.c.bf16 %v4060_v38, %v4060_v38  ;;  %v3802_v43 = vmul.f32 %v6305_v51, %v3688_v39 }
 0x38f   : > { %4133 = vst.msk [vmem:[%s6333_s18 + $0x44] sm:$0xf] %vm4115_vm15, %v4096_v40  ;;  %v3842_v34 = vadd.f32 %v6314_v46, %v3802_v43 }
 0x390   : > { %v3130_v15 = vpop.f32.mrf.mxu3  ;;  %v2565_v47 = vpop.permute.xlu2 %2564 }
 0x391   : > { %v4025_v16 = vadd.f32 %v3936_v60, %v3842_v34  ;;  %v3300_v55 = vadd.f32 %v3299_v20, %v3130_v15  ;;  %v3943_v60 = vrot.slane %v4872_v53, 3 }
 0x392   : > { %v3627_v35 = vpop.f32.mrf.mxu1 }
 0x393   : > { %v4061_v63 = vmax.f32 %v4025_v16, 0.0  ;;  %v3689_v11 = vadd.f32 %v3627_v35, %v3297_v6 }
 0x395   : > { %v4097_v3 = vpack.c.bf16 %v4061_v63, %v4061_v63  ;;  %v3803_v17 = vmul.f32 %v6305_v51, %v3689_v11  ;;  %v3309_v63 = vpop.f32.mrf.mxu0  ;;  %v3944_v11 = vsel %vm3897_vm14, %v3941_v12, %v3943_v60 }
 0x397   : > { %4134 = vst.msk [vmem:[%s6333_s18 + $0x48] sm:$0xf] %vm4115_vm15, %v4097_v3  ;;  %v3843_v21 = vadd.f32 %v6314_v46, %v3803_v17 }
 0x398   : > { %v3132_v50 = vpop.f32.mrf.mxu3 }
 0x399   : > { %v4026_v13 = vadd.f32 %v3938_v28, %v3843_v21  ;;  %v3302_v24 = vadd.f32 %v3301_v59, %v3132_v50  ;;  %v4913_v59 = vld [vmem:[%s5020_s10 + $0x68] sm:$0xff]   ;;  %v2831_v28 = vld [vmem:[#allocation2 + $0x98] sm:$0x3] }
 0x39a   : > { %v3630_v9 = vpop.f32.mrf.mxu1  ;;  %v4875_v17 = vunpack.c.l.bf16 %v4913_v59 }
 0x39b   : > { %v4062_v52 = vmax.f32 %v4026_v13, 0.0  ;;  %v3690_v57 = vadd.f32 %v3630_v9, %v3300_v55 }
 0x39d   : > { %v4098_v36 = vpack.c.bf16 %v4062_v52, %v4062_v52  ;;  %v3804_v58 = vmul.f32 %v6305_v51, %v3690_v57  ;;  %v3311_v12 = vpop.f32.mrf.mxu0 }
 0x39f   : > { %4135 = vst.msk [vmem:[%s6333_s18 + $0x4c] sm:$0xf] %vm4115_vm15, %v4098_v36  ;;  %v3844_v10 = vadd.f32 %v6314_v46, %v3804_v58  ;;  %v6658_v36 = vld [vmem:[%s6760_s5] ss:$0 sm:$0xff] }
 0x3a0   : > { %v3135_v29 = vpop.f32.mrf.mxu3 }
 0x3a1   : > { %v4027_v7 = vadd.f32 %v3940_v18, %v3844_v10  ;;  %v3305_v44 = vadd.f32 %v3304_v42, %v3135_v29  ;;  %v3945_v42 = vrot.slane %v4875_v17, 3  ;;  %v4876_v29 = vunpack.c.h.bf16 %v4913_v59 }
 0x3a2   : > { %v3632_v26 = vpop.f32.mrf.mxu1 }
 0x3a3   : > { %v4063_v19 = vmax.f32 %v4027_v7, 0.0  ;;  %v3691_v37 = vadd.f32 %v3632_v26, %v3302_v24  ;;  %v3946_v10 = vsel %vm3897_vm14, %v3943_v60, %v3945_v42 }
 0x3a4   : > { %v2525_v30 = vpop.permute.xlu1 %2524  ;;  %v2527_v39 = vpop.permute.xlu0 %2526 }
 0x3a5   : > { %v4099_v31 = vpack.c.bf16 %v4063_v19, %v4063_v19  ;;  %v3805_v20 = vmul.f32 %v6305_v51, %v3691_v37  ;;  %v2621_v1 = vsel %vm753_vm2, %v2382_v32, %v2525_v30  ;;  %v2624_v15 = vsel %vm753_vm2, %v6477_v61, %v2527_v39 }
 0x3a6   : > { %v2660_v62 = vsel %vm797_vm3, %v2621_v1, %v2565_v47  ;;  %v3947_v30 = vrot.slane %v4876_v29, 3 }
 0x3a7   : > { %4136 = vst.msk [vmem:[%s6333_s18 + $0x50] sm:$0xf] %vm4115_vm15, %v4099_v31  ;;  %v3845_v54 = vadd.f32 %v6314_v46, %v3805_v20  ;;  %v2716_v27 = vunpack.c.l.b16 %v2660_v62  ;;  %v2717_v49 = vunpack.c.h.b16 %v2660_v62  ;;  %v4914_v31 = vld [vmem:[%s5020_s10 + $0x70] sm:$0xff]  }
 0x3a8   : > { %v3137_v14 = vpop.f32.mrf.mxu3  ;;  %v4879_v1 = vunpack.c.l.bf16 %v4914_v31 }
 0x3a9   : > { %v4028_v38 = vadd.f32 %v3942_v0, %v3845_v54  ;;  %v2753_v23 = vpack.c.b16 %v2716_v27, %v2716_v27  ;;  %v2754_v40 = vpack.c.b16 %v2717_v49, %v2717_v49  ;;  %v3307_v50 = vadd.f32 %v3306_v22, %v3137_v14  ;;  %v6681_v0 = vld [vmem:[%s6761_s6] ss:$0 sm:$0xff] }
 0x3aa   : > { %v3635_v43 = vpop.f32.mrf.mxu1  ;;  %v3949_v39 = vrot.slane %v4879_v1, 3 }
 0x3ab   : > { %v4064_v48 = vmax.f32 %v4028_v38, 0.0  ;;  %2827 = vst.msk [vmem:[#allocation2 + $0x90] sm:$0xf] %vm984_vm5, %v2753_v23  ;;  %v3692_v34 = vadd.f32 %v3635_v43, %v3305_v44  ;;  %v3314_v44 = vpop.f32.mrf.mxu0 }
 0x3ac   : > { %2828 = vst.msk [vmem:[#allocation2 + $0x94] sm:$0xf] %vm984_vm5, %v2754_v40  ;;  %v2567_v6 = vpop.permute.xlu1 %2566  ;;  %v3950_v59 = vsel %vm3897_vm14, %v3947_v30, %v3949_v39 }
 0x3ad   : > { %v4100_v16 = vpack.c.bf16 %v4064_v48, %v4064_v48  ;;  %v3806_v35 = vmul.f32 %v6305_v51, %v3692_v34  ;;  %v2662_v5 = vsel %vm797_vm3, %v2624_v15, %v2567_v6  ;;  %v4880_v15 = vunpack.c.h.bf16 %v4914_v31 }
 0x3ae   : > { %v2718_v3 = vunpack.c.l.b16 %v2662_v5  ;;  %v3375_v5 = vld [vmem:[#allocation2 + $0xa0] sm:$0x3] }
 0x3af   : > { %4137 = vst.msk [vmem:[%s6333_s18 + $0x54] sm:$0xf] %vm4115_vm15, %v4100_v16  ;;  %v3846_v61 = vadd.f32 %v6314_v46, %v3806_v35 }
 0x3b0   : > { %v2755_v56 = vpack.c.b16 %v2718_v3, %v2718_v3  ;;  %v3140_v21 = vpop.f32.mrf.mxu3 }
 0x3b1   : > { %v4029_v55 = vadd.f32 %v3944_v11, %v3846_v61  ;;  %v3310_v37 = vadd.f32 %v3309_v63, %v3140_v21  ;;  %v3951_v61 = vrot.slane %v4880_v15, 3  ;;  %v4915_v21 = vld [vmem:[%s5020_s10 + $0x78] sm:$0xff]  }
 0x3b2   : > { %v2832_v51 = vsel %vm2830_vm1, %v2755_v56, %v2831_v28  ;;  %v3637_v13 = vpop.f32.mrf.mxu1 }
 0x3b3   : > { %v4065_v9 = vmax.f32 %v4029_v55, 0.0  ;;  %2833 = vst [vmem:[#allocation2 + $0x98] sm:$0x3] %v2832_v51  ;;  %v3693_v8 = vadd.f32 %v3637_v13, %v3307_v50  ;;  %v4796_v52 = vld [vmem:[#allocation2 + $0x90] sm:$0xff]  ;;  %v3452_v50 = vunpack.c.l.b16 %v3375_v5  ;;  %v3316_v55 = vpop.f32.mrf.mxu0 }
 0x3b4   : > { %v4814_v57 = vld [vmem:[#allocation2 + $0x90] sm:$0xff]  ;;  %v3005_v18 = vrot.slane %v4796_v52, 1 }
 0x3b5   : > { %v4101_v45 = vpack.c.bf16 %v4065_v9, %v4065_v9  ;;  %v3807_v58 = vmul.f32 %v6658_v36, %v3693_v8  ;;  %v3503_v41 = vrot.slane %v4814_v57, 2  ;;  %v4883_v9 = vunpack.c.l.bf16 %v4915_v21 }
 0x3b6   : > { %v3006_v7 = vsel %vm669_vm0, %v3003_v25, %v3005_v18  ;;  %v3471_v52 = vpack.c.b16 %v3452_v50, %v3452_v50 }
 0x3b7   : > { %4138 = vst.msk [vmem:[%s6333_s18 + $0x58] sm:$0xf] %vm4115_vm15, %v4101_v45  ;;  %v3847_v24 = vadd.f32 %v6314_v46, %v3807_v58  ;;  %v3504_v26 = vsel %vm1262_vm4, %v3501_v4, %v3503_v41  ;;  %4594 = vmatmul.msk.bf16.gmra.mxu3 %vm1207_vm6, %v3006_v7  ;;  %v3948_v4 = vsel %vm3897_vm14, %v3945_v42, %v3947_v30 }
 0x3b8   : > { %v3142_v19 = vpop.f32.mrf.mxu3  ;;  %4715 = vmatmul.msk.bf16.gmra.mxu1 %vm1207_vm6, %v3504_v26  ;;  %v3952_v42 = vsel %vm3897_vm14, %v3949_v39, %v3951_v61  ;;  %v3507_v29 = vrot.slane %v3471_v52, 2 }
 0x3b9   : > { %v4030_v22 = vadd.f32 %v3946_v10, %v3847_v24  ;;  %v3312_v49 = vadd.f32 %v3311_v12, %v3142_v19 }
 0x3ba   : > { %v3640_v32 = vpop.f32.mrf.mxu1  ;;  %v2875_v46 = vld [vmem:[#allocation2 + $0x98] sm:$0x1] }
 0x3bb   : > { %v4066_v47 = vmax.f32 %v4030_v22, 0.0  ;;  %v3694_v2 = vadd.f32 %v3640_v32, %v3310_v37  ;;  %v2952_v25 = vunpack.c.l.b16 %v2875_v46  ;;  %v4815_v54 = vld [vmem:[#allocation2 + $0x98] sm:$0xff]  ;;  %v3319_v12 = vpop.f32.mrf.mxu0  ;;  %v4884_v37 = vunpack.c.h.bf16 %v4915_v21 }
 0x3bc   : > { %v3505_v60 = vrot.slane %v4815_v54, 2 }
 0x3bd   : > { %v4102_v20 = vpack.c.bf16 %v4066_v47, %v4066_v47  ;;  %v3808_v33 = vmul.f32 %v6658_v36, %v3694_v2  ;;  %v2971_v53 = vpack.c.b16 %v2952_v25, %v2952_v25  ;;  %v3955_v2 = vrot.slane %v4884_v37, 3 }
 0x3be   : > { %v3506_v35 = vsel %vm1262_vm4, %v3503_v41, %v3505_v60  ;;  %v3508_v32 = vsel %vm1262_vm4, %v3505_v60, %v3507_v29 }
 0x3bf   : > { %4139 = vst.msk [vmem:[%s6333_s18 + $0x5c] sm:$0xf] %vm4115_vm15, %v4102_v20  ;;  %v3848_v62 = vadd.f32 %v6681_v0, %v3808_v33  ;;  %v3007_v43 = vrot.slane %v2971_v53, 1  ;;  %v4916_v20 = vld [vmem:[%s5020_s10 + $0x80] sm:$0xff]  }
 0x3c0   : > { %v3145_v27 = vpop.f32.mrf.mxu3  ;;  %v4887_v53 = vunpack.c.l.bf16 %v4916_v20 }
 0x3c1   : > { %v4031_v14 = vadd.f32 %v3948_v4, %v3848_v62  ;;  %v3008_v16 = vsel %vm669_vm0, %v3005_v18, %v3007_v43  ;;  %v3315_v63 = vadd.f32 %v3314_v44, %v3145_v27  ;;  %v3953_v18 = vrot.slane %v4883_v9, 3 }
 0x3c2   : > { %v3642_v38 = vpop.f32.mrf.mxu1 }
 0x3c3   : > { %v4067_v23 = vmax.f32 %v4031_v14, 0.0  ;;  %v3695_v40 = vadd.f32 %v3642_v38, %v3312_v49  ;;  %v3954_v19 = vsel %vm3897_vm14, %v3951_v61, %v3953_v18  ;;  %v3956_v62 = vsel %vm3897_vm14, %v3953_v18, %v3955_v2  ;;  %v3321_v27 = vpop.f32.mrf.mxu0 }
 0x3c4   : > { %v3957_v38 = vrot.slane %v4887_v53, 3 }
 0x3c5   : > { %v4103_v48 = vpack.c.bf16 %v4067_v23, %v4067_v23  ;;  %v3809_v34 = vmul.f32 %v6658_v36, %v3695_v40 }
 0x3c6   : > { %v3958_v60 = vsel %vm3897_vm14, %v3955_v2, %v3957_v38 }
 0x3c7   : > { %4140 = vst.msk [vmem:[%s6333_s18 + $0x60] sm:$0xf] %vm4115_vm15, %v4103_v48  ;;  %v3849_v6 = vadd.f32 %v6681_v0, %v3809_v34  ;;  %4595 = vmatmul.msk.bf16.gmra.mxu3 %vm1207_vm6, %v3008_v16 }
 0x3c8   : > { %4716 = vmatmul.msk.bf16.gmra.mxu1 %vm1207_vm6, %v3506_v35  ;;  %v3147_v3 = vpop.f32.mrf.mxu3  ;;  %v4888_v35 = vunpack.c.h.bf16 %v4916_v20 }
 0x3c9   : > { %v4032_v11 = vadd.f32 %v3950_v59, %v3849_v6  ;;  %v3317_v57 = vadd.f32 %v3316_v55, %v3147_v3 }
 0x3ca   : > { %v3645_v17 = vpop.f32.mrf.mxu1 }
 0x3cb   : > { %v4068_v28 = vmax.f32 %v4032_v11, 0.0  ;;  %v3696_v56 = vadd.f32 %v3645_v17, %v3315_v63  ;;  %v3324_v6 = vpop.f32.mrf.mxu0  ;;  %v3959_v17 = vrot.slane %v4888_v35, 3 }
 0x3cd   : > { %v4104_v51 = vpack.c.bf16 %v4068_v28, %v4068_v28  ;;  %v3810_v13 = vmul.f32 %v6658_v36, %v3696_v56  ;;  %v4917_v28 = vld [vmem:[%s5020_s10 + $0x88] sm:$0xff]   ;;  %v3960_v21 = vsel %vm3897_vm14, %v3957_v38, %v3959_v17 }
 0x3ce   : > { %v4891_v50 = vunpack.c.l.bf16 %v4917_v28 }
 0x3cf   : > { %4141 = vst.msk [vmem:[%s6333_s18 + $0x64] sm:$0xf] %vm4115_vm15, %v4104_v51  ;;  %v3850_v8 = vadd.f32 %v6681_v0, %v3810_v13 }
 0x3d0   : > { %v3150_v24 = vpop.f32.mrf.mxu3  ;;  %v3961_v52 = vrot.slane %v4891_v50, 3 }
 0x3d1   : > { %v4033_v45 = vadd.f32 %v3952_v42, %v3850_v8  ;;  %v3320_v30 = vadd.f32 %v3319_v12, %v3150_v24 }
 0x3d2   : > { %v3647_v58 = vpop.f32.mrf.mxu1 }
 0x3d3   : > { %v4069_v41 = vmax.f32 %v4033_v45, 0.0  ;;  %v3697_v10 = vadd.f32 %v3647_v58, %v3317_v57  ;;  %v3326_v5 = vpop.f32.mrf.mxu0 }
 0x3d5   : > { %v4105_v7 = vpack.c.bf16 %v4069_v41, %v4069_v41  ;;  %v3811_v26 = vmul.f32 %v6658_v36, %v3697_v10  ;;  %v3962_v41 = vsel %vm3897_vm14, %v3959_v17, %v3961_v52  ;;  %v4892_v10 = vunpack.c.h.bf16 %v4917_v28 }
 0x3d7   : > { %4142 = vst.msk [vmem:[%s6333_s18 + $0x68] sm:$0xf] %vm4115_vm15, %v4105_v7  ;;  %v3851_v22 = vadd.f32 %v6681_v0, %v3811_v26 }
 0x3d8   : > { %4717 = vmatmul.msk.bf16.gmra.mxu1 %vm1207_vm6, %v3508_v32  ;;  %v3152_v1 = vpop.f32.mrf.mxu3  ;;  %v4918_v32 = vld [vmem:[%s5020_s10 + $0x90] sm:$0xff]  }
 0x3d9   : > { %v4034_v46 = vadd.f32 %v3954_v19, %v3851_v22  ;;  %v3322_v49 = vadd.f32 %v3321_v27, %v3152_v1  ;;  %v3963_v19 = vrot.slane %v4892_v10, 3  ;;  %v4896_v38 = vunpack.c.h.bf16 %v4918_v32 }
 0x3da   : > { %v3650_v47 = vpop.f32.mrf.mxu1 }
 0x3db   : > { %v4070_v31 = vmax.f32 %v4034_v46, 0.0  ;;  %v3698_v25 = vadd.f32 %v3650_v47, %v3320_v30  ;;  %v3329_v9 = vpop.f32.mrf.mxu0  ;;  %v3964_v2 = vsel %vm3897_vm14, %v3961_v52, %v3963_v19 }
 0x3dd   : > { %v4106_v33 = vpack.c.bf16 %v4070_v31, %v4070_v31  ;;  %v3812_v4 = vmul.f32 %v6658_v36, %v3698_v25  ;;  %v4895_v31 = vunpack.c.l.bf16 %v4918_v32 }
 0x3df   : > { %4143 = vst.msk [vmem:[%s6333_s18 + $0x6c] sm:$0xf] %vm4115_vm15, %v4106_v33  ;;  %v3852_v54 = vadd.f32 %v6681_v0, %v3812_v4  ;;  %v3965_v1 = vrot.slane %v4895_v31, 3 }
 0x3e0   : > { %v3155_v16 = vpop.f32.mrf.mxu3 }
 0x3e1   : > { %v4035_v14 = vadd.f32 %v3956_v62, %v3852_v54  ;;  %v3325_v11 = vadd.f32 %v3324_v6, %v3155_v16 }
 0x3e2   : > { %v3652_v44 = vpop.f32.mrf.mxu1 }
 0x3e3   : > { %v4071_v39 = vmax.f32 %v4035_v14, 0.0  ;;  %v3699_v23 = vadd.f32 %v3652_v44, %v3322_v49  ;;  %v3331_v30 = vpop.f32.mrf.mxu0  ;;  %v3966_v44 = vsel %vm3897_vm14, %v3963_v19, %v3965_v1 }
 0x3e5   : > { %v4107_v40 = vpack.c.bf16 %v4071_v39, %v4071_v39  ;;  %v3813_v43 = vmul.f32 %v6658_v36, %v3699_v23 }
 0x3e7   : > { %4144 = vst.msk [vmem:[%s6333_s18 + $0x70] sm:$0xf] %vm4115_vm15, %v4107_v40  ;;  %v3853_v48 = vadd.f32 %v6681_v0, %v3813_v43 }
 0x3e8   : > { %v3157_v63 = vpop.f32.mrf.mxu3 }
 0x3e9   : > { %v4036_v34 = vadd.f32 %v3958_v60, %v3853_v48  ;;  %v3327_v13 = vadd.f32 %v3326_v5, %v3157_v63  ;;  %v3967_v60 = vrot.slane %v4896_v38, 3 }
 0x3eb   : > { %v4072_v59 = vmax.f32 %v4036_v34, 0.0  ;;  %v3334_v14 = vpop.f32.mrf.mxu0  ;;  %v3968_v35 = vsel %vm3897_vm14, %v3965_v1, %v3967_v60 }
 0x3ed   : > { %v4108_v15 = vpack.c.bf16 %v4072_v59, %v4072_v59  ;;  %v3742_v59 = vld [vmem:[%s5020_s10 + $0x98] sm:$0x3] }
 0x3ee   : > { %v3779_v5 = vunpack.c.l.bf16 %v3742_v59 }
 0x3ef   : > { %4145 = vst.msk [vmem:[%s6333_s18 + $0x74] sm:$0xf] %vm4115_vm15, %v4108_v15 }
 0x3f0   : > { %v3969_v28 = vrot.slane %v3779_v5, 3 }
 0x435   : > { %v3655_v3 = vpop.f32.mrf.mxu1 }
 0x436   : > { %v3700_v61 = vadd.f32 %v3655_v3, %v3325_v11  ;;  %v3336_v11 = vpop.f32.mrf.mxu0 }
 0x438   : > { %v3814_v56 = vmul.f32 %v6658_v36, %v3700_v61 }
 0x43a   : > { %v3854_v55 = vadd.f32 %v6681_v0, %v3814_v56  ;;  %v3160_v51 = vpop.f32.mrf.mxu3 }
 0x43b   : > { %v3330_v24 = vadd.f32 %v3329_v9, %v3160_v51  ;;  %v3970_v51 = vsel %vm3897_vm14, %v3967_v60, %v3969_v28 }
 0x43c   : > { %v4037_v42 = vadd.f32 %v3960_v21, %v3854_v55 }
 0x43d   : > { %v3657_v8 = vpop.f32.mrf.mxu1 }
 0x43e   : > { %v4073_v57 = vmax.f32 %v4037_v42, 0.0  ;;  %v3701_v45 = vadd.f32 %v3657_v8, %v3327_v13 }
 0x440   : > { %v4109_v58 = vpack.c.bf16 %v4073_v57, %v4073_v57  ;;  %v3815_v18 = vmul.f32 %v6658_v36, %v3701_v45 }
 0x442   : > { %4146 = vst.msk [vmem:[%s6333_s18 + $0x78] sm:$0xf] %vm4115_vm15, %v4109_v58  ;;  %v3855_v29 = vadd.f32 %v6681_v0, %v3815_v18  ;;  %v3162_v26 = vpop.f32.mrf.mxu3 }
 0x443   : > { %v3332_v20 = vadd.f32 %v3331_v30, %v3162_v26 }
 0x444   : > { %v4038_v7 = vadd.f32 %v3962_v41, %v3855_v29 }
 0x445   : > { %v3660_v12 = vpop.f32.mrf.mxu1 }
 0x446   : > { %v4074_v37 = vmax.f32 %v4038_v7, 0.0  ;;  %v3702_v22 = vadd.f32 %v3660_v12, %v3330_v24 }
 0x448   : > { %v4110_v46 = vpack.c.bf16 %v4074_v37, %v4074_v37  ;;  %v3816_v47 = vmul.f32 %v6658_v36, %v3702_v22 }
 0x44a   : > { %4147 = vst.msk [vmem:[%s6333_s18 + $0x7c] sm:$0xf] %vm4115_vm15, %v4110_v46  ;;  %v3856_v25 = vadd.f32 %v6681_v0, %v3816_v47  ;;  %v3165_v54 = vpop.f32.mrf.mxu3 }
 0x44b   : > { %v3335_v23 = vadd.f32 %v3334_v14, %v3165_v54 }
 0x44c   : > { %v4039_v33 = vadd.f32 %v3964_v2, %v3856_v25 }
 0x44d   : > { %v3662_v4 = vpop.f32.mrf.mxu1 }
 0x44e   : > { %v4075_v62 = vmax.f32 %v4039_v33, 0.0  ;;  %v3703_v53 = vadd.f32 %v3662_v4, %v3332_v20 }
 0x450   : > { %v4111_v27 = vpack.c.bf16 %v4075_v62, %v4075_v62  ;;  %v3817_v49 = vmul.f32 %v6658_v36, %v3703_v53 }
 0x452   : > { %4148 = vst.msk [vmem:[%s6333_s18 + $0x80] sm:$0xf] %vm4115_vm15, %v4111_v27  ;;  %v3857_v39 = vadd.f32 %v6681_v0, %v3817_v49  ;;  %v3167_v16 = vpop.f32.mrf.mxu3 }
 0x453   : > { %v3337_v3 = vadd.f32 %v3336_v11, %v3167_v16 }
 0x454   : > { %v4040_v40 = vadd.f32 %v3966_v44, %v3857_v39 }
 0x455   : > { %v3665_v43 = vpop.f32.mrf.mxu1 }
 0x456   : > { %v4076_v48 = vmax.f32 %v4040_v40, 0.0  ;;  %v3704_v34 = vadd.f32 %v3665_v43, %v3335_v23 }
 0x458   : > { %v4112_v15 = vpack.c.bf16 %v4076_v48, %v4076_v48  ;;  %v3818_v6 = vmul.f32 %v6658_v36, %v3704_v34 }
 0x45a   : > { %4149 = vst.msk [vmem:[%s6333_s18 + $0x84] sm:$0xf] %vm4115_vm15, %v4112_v15  ;;  %v3858_v63 = vadd.f32 %v6681_v0, %v3818_v6 }
 0x45c   : > { %v4041_v17 = vadd.f32 %v3968_v35, %v3858_v63 }
 0x45d   : > { %v3667_v61 = vpop.f32.mrf.mxu1 }
 0x45e   : > { %v4077_v56 = vmax.f32 %v4041_v17, 0.0  ;;  %v3705_v21 = vadd.f32 %v3667_v61, %v3337_v3 }
 0x460   : > { %v4113_v50 = vpack.c.bf16 %v4077_v56, %v4077_v56  ;;  %v3819_v55 = vmul.f32 %v6658_v36, %v3705_v21 }
 0x462   : > { %4150 = vst.msk [vmem:[%s6333_s18 + $0x88] sm:$0xf] %vm4115_vm15, %v4113_v50  ;;  %v3859_v13 = vadd.f32 %v6681_v0, %v3819_v55 }
 0x464   : > { %v4042_v42 = vadd.f32 %v3970_v51, %v3859_v13 }
 0x466   : > { %v4078_v9 = vmax.f32 %v4042_v42, 0.0 }
 0x468   : > { %v4114_v8 = vpack.c.bf16 %v4078_v9, %v4078_v9 }
 0x46a   : > { %4151 = vst.msk [vmem:[%s6333_s18 + $0x8c] sm:$0xf] %vm4115_vm15, %v4114_v8 }
 0x46b PF: > { %s18_s27 = sadd.s32 1, %s4956_s27  }
 0x46c   : > { %p15_p4 = scmp.ge.s32.totalorder %s18_s27, 4  }
 0x46e   :  { %17 = sbr.rel (!%p15_p4) target bundleno = 1 (0x1), region = 86 }

// kernel: tpu_custom_call.1
= control target key start
LH: loop header
LB: loop body
LE: loop exit
PB: predicated region body
PF: predicated region fallthrough
CT: control target
= control target key end

     0   :  { %s5006_s27 = smov 0   ;;  %s6755_s0 = inlined_call_operand.vmem [shape: bf16[2,342,4], index: 0, kind: input, shape index: {}]   ;;  %s6756_s1 = inlined_call_operand.vmem [shape: bf16[3,12,4], index: 1, kind: input, shape index: {}]   ;;  %s6757_s2 = inlined_call_operand.vmem [shape: bf16[3,12,4], index: 2, kind: input, shape index: {}]   ;;  %s6758_s3 = inlined_call_operand.vmem [shape: f32[1,4], index: 3, kind: input, shape index: {}]   ;;  %s6759_s4 = inlined_call_operand.vmem [shape: f32[1,4], index: 4, kind: input, shape index: {}]   ;;  %s6760_s5 = inlined_call_operand.vmem [shape: f32[1,4], index: 5, kind: input, shape index: {}]   ;;  %s6761_s6 = inlined_call_operand.vmem [shape: f32[1,4], index: 6, kind: input, shape index: {}]   ;;  %s6762_s7 = inlined_call_operand.vmem [shape: f32[288,4], index: 7, kind: input, shape index: {}]   ;;  %s6763_s8 = inlined_call_operand.vmem [shape: bf16[2,288,4], index: 8, kind: output, shape index: {}]  }
   0x1 LB: > { %s4207_s28 = sadd.s32 4294967295, %s4956_s27   ;;  %p4211_p0 = scmp.ge.s32.totalorder %s4956_s27, 1  ;;  %s4956_s27 = sphi %s5006_s27, %s18_s27  }
   0x2   : > { %p262_p1 = scmp.lt.s32.totalorder %s4956_s27, 3 }
   0x4   : > { %p263_p2 = pnand %p4211_p0, %p262_p1 }
   0x5   : > { %p296_p3 = scmp.lt.s32.totalorder (!%p263_p2), %s4207_s28, 1  ;;  %s4958_s11 = smov (!%p263_p2), 8  }
   0x6   : > { %266 = sbr.rel (%p263_p2) target bundleno = 1131 (0x46b), region = 52  ;;  %s4959_s12 = smov (!%p263_p2), 4  }
   0xb   : > { %s6767_s28 = smov (!%p296_p3, %s4207_s28), 1  ;;  %vm669_vm0 = vcmask 1046528   ;;  %vm456_vm1 = vsmask.f32 7424  ;;  %vm753_vm2 = vcmask 31744   ;;  %vm797_vm3 = vcmask 64512  }
   0xc   : > { %s4927_s29 = smul.u32 172, %s6767_s28  ;;  %vm1262_vm4 = vcmask 1045504   ;;  %vm984_vm5 = vcmask 93184   ;;  %vm1207_vm6 = vcmask 97280   ;;  %vm2387_vm7 = vcmask 1040384  }
   0xd   : > { %vm2429_vm8 = vsmask.f32 256  ;;  %vm2221_vm10 = vsmask.f32 1280  ;;  %vm2384_vm11 = vcmask 1041408   ;;  %vm1025_vm13 = vcmask 91136  }
   0xe   : > { %s5020_s10 = scalar_lea.vmem %s6755_s0, %s4927_s29  ;;  %vm5576_vm9 = vmand %vm2387_vm7, %vm2429_vm8  ;;  %vm3897_vm14 = vcmask 1044480   ;;  %s4928_s15 = smul.u32 144, %s6767_s28  ;;  %vm4115_vm15 = vcmask 27648  }
   0xf   : > { %v5023_v0 = vld [vmem:[%s5020_s10 + $0x50] sm:$0xff]  ;;  %v5026_v1 = vld [vmem:[%s5020_s10 + $0x58] sm:$0xff]  ;;  %v5029_v2 = vld [vmem:[%s5020_s10 + $0x60] sm:$0xff] }
  0x10   : > { %v5032_v3 = vld [vmem:[%s5020_s10 + $0x68] sm:$0xff]  ;;  %v537_v4 = vshll.u32 %v5023_v0, 16  ;;  %v541_v5 = vshrl.u32 %v5023_v0, 16  ;;  %v545_v6 = vshll.u32 %v5026_v1, 16  ;;  %v689_v7 = vrot.slane %v5023_v0, 1  ;;  %v5054_v23 = vld [vmem:[%s5020_s10 + $0x70] sm:$0xff]  ;;  %vm2385_vm12 = vmand %vm2384_vm11, %vm2221_vm10  ;;  %s6333_s18 = scalar_lea.vmem %s6763_s8, %s4928_s15 }
  0x11   : > { %v691_v8 = vrot.slane %v5026_v1, 1  ;;  %v553_v9 = vshll.u32 %v5029_v2, 16  ;;  %v561_v13 = vshll.u32 %v5032_v3, 16  ;;  %v549_v15 = vshrl.u32 %v5026_v1, 16  ;;  %v5058_v25 = vld [vmem:[%s5020_s10 + $0x78] sm:$0xff]  ;;  %v5069_v32 = vld [vmem:[%s5020_s10 + $0x80] sm:$0xff] }
  0x12   : > { %v5040_v10 = vrot.slane %v537_v4, 1  ;;  %v547_v11 = vrot.slane %v545_v6, 1  ;;  %v693_v17 = vrot.slane %v5029_v2, 1  ;;  %v557_v18 = vshrl.u32 %v5029_v2, 16  ;;  %v5085_v48 = vld [vmem:[%s5020_s10 + $0x88] sm:$0xff]  ;;  %v5089_v50 = vld [vmem:[%s5020_s10 + $0x90] sm:$0xff] }
  0x13   : > { %v692_v12 = vsel %vm669_vm0, %v689_v7, %v691_v8  ;;  %v555_v16 = vrot.slane %v553_v9, 1  ;;  %v563_v20 = vrot.slane %v561_v13, 1  ;;  %v565_v28 = vshrl.u32 %v5032_v3, 16  ;;  %v5099_v56 = vld [vmem:[%s5020_s10 + $0x98] sm:$0xff]  ;;  %v348_v6 = vld [vmem:[%s5020_s10 + $0xa0] sm:$0x7] }
  0x14   : > { %v543_v14 = vor.u32 %v541_v5, %v5040_v10  ;;  %731 = vrot.lane.b32.xlu1 %v692_v12, %s4958_s11  ;;  %v551_v22 = vor.u32 %v549_v15, %v547_v11  ;;  %v694_v24 = vsel %vm669_vm0, %v691_v8, %v693_v17  ;;  %v569_v29 = vshll.u32 %v5054_v23, 16 }
  0x15   : > { %v559_v21 = vor.u32 %v557_v18, %v555_v16  ;;  %v695_v30 = vrot.slane %v5032_v3, 1  ;;  %v697_v31 = vrot.slane %v5054_v23, 1  ;;  %v577_v33 = vshll.u32 %v5058_v25, 16  ;;  %v5120_v18 = vld [vmem:[%s5020_s10 + $0x10] sm:$0xff] }
  0x16   : > { %v548_v19 = vsel %vm456_vm1, %v543_v14, %v547_v11  ;;  %v556_v27 = vsel %vm456_vm1, %v551_v22, %v555_v16  ;;  %v573_v35 = vshrl.u32 %v5054_v23, 16  ;;  %v567_v36 = vor.u32 %v565_v28, %v563_v20  ;;  %v5127_v22 = vld [vmem:[%s5020_s10 + $0x18] sm:$0xff] }
  0x17   : > { %644 = vrot.lane.b32.xlu0 %v548_v19, %s4959_s12  ;;  %v564_v26 = vsel %vm456_vm1, %v559_v21, %v563_v20  ;;  %v696_v34 = vsel %vm669_vm0, %v693_v17, %v695_v30  ;;  %v571_v37 = vrot.slane %v569_v29, 1  ;;  %v698_v38 = vsel %vm669_vm0, %v695_v30, %v697_v31 }
  0x18   : > { %648 = vrot.lane.b32.xlu2 %v564_v26, %s4959_s12  ;;  %v579_v39 = vrot.slane %v577_v33, 1  ;;  %v581_v40 = vshrl.u32 %v5058_v25, 16  ;;  %v585_v41 = vshll.u32 %v5069_v32, 16  ;;  %v699_v47 = vrot.slane %v5058_v25, 1  ;;  %v5138_v33 = vld [vmem:[%s5020_s10 + $0x20] sm:$0xff] }
  0x19   : > { %v575_v42 = vor.u32 %v573_v35, %v571_v37  ;;  %v572_v43 = vsel %vm456_vm1, %v567_v36, %v571_v37  ;;  %v589_v52 = vshrl.u32 %v5069_v32, 16  ;;  %v593_v53 = vshll.u32 %v5085_v48, 16 }
  0x1a   : > { %v583_v44 = vor.u32 %v581_v40, %v579_v39  ;;  %v587_v45 = vrot.slane %v585_v41, 1  ;;  %v700_v51 = vsel %vm669_vm0, %v697_v31, %v699_v47  ;;  %v701_v54 = vrot.slane %v5069_v32, 1 }
  0x1b   : > { %v580_v46 = vsel %vm456_vm1, %v575_v42, %v579_v39  ;;  %v703_v55 = vrot.slane %v5085_v48, 1  ;;  %v601_v57 = vshll.u32 %v5089_v50, 16  ;;  %v597_v59 = vshrl.u32 %v5085_v48, 16  ;;  %v5151_v42 = vld [vmem:[%s5020_s10 + $0x8] sm:$0xff] }
  0x1c   : > { %733 = vrot.lane.b32.xlu1 %v694_v24, %s4958_s11  ;;  %v588_v49 = vsel %vm456_vm1, %v583_v44, %v587_v45  ;;  %v702_v58 = vsel %vm669_vm0, %v699_v47, %v701_v54  ;;  %v591_v60 = vor.u32 %v589_v52, %v587_v45  ;;  %v595_v61 = vrot.slane %v593_v53, 1 }
  0x1d   : > { %v704_v62 = vsel %vm669_vm0, %v701_v54, %v703_v55  ;;  %v603_v63 = vrot.slane %v601_v57, 1  ;;  %v605_v4 = vshrl.u32 %v5089_v50, 16  ;;  %v609_v5 = vshll.u32 %v5099_v56, 16 }
  0x1e   : > { %v599_v8 = vor.u32 %v597_v59, %v595_v61  ;;  %v596_v9 = vsel %vm456_vm1, %v591_v60, %v595_v61  ;;  %v454_v11 = vunpack.c.l.b16 %v348_v6  ;;  %v705_v15 = vrot.slane %v5089_v50, 1  ;;  %v5170_v59 = vld [vmem:[%s5020_s10 + $0x28] sm:$0xff]  ;;  %v4898_v6 = vld [vmem:[%s5020_s10] sm:$0xe] }
  0x1f   : > { %646 = vrot.lane.b32.xlu0 %v556_v27, %s4959_s12  ;;  %v607_v12 = vor.u32 %v605_v4, %v603_v63  ;;  %v611_v13 = vrot.slane %v609_v5, 1  ;;  %v613_v20 = vshrl.u32 %v5099_v56, 16  ;;  %v707_v24 = vrot.slane %v5099_v56, 1  ;;  %v4897_v5 = vld [vmem:[%s5020_s10] sm:$0xf0] }
  0x20   : > { %735 = vrot.lane.b32.xlu2 %v696_v34, %s4958_s11  ;;  %v604_v14 = vsel %vm456_vm1, %v599_v8, %v603_v63  ;;  %v5115_v16 = vpack.c.b16 %v454_v11, %v454_v11  ;;  %v706_v19 = vsel %vm669_vm0, %v703_v55, %v705_v15  ;;  %v473_v27 = vshll.u32 %v5120_v18, 16 }
  0x21   : > { %v612_v17 = vsel %vm456_vm1, %v607_v12, %v611_v13  ;;  %v708_v28 = vsel %vm669_vm0, %v705_v15, %v707_v24  ;;  %v477_v29 = vshrl.u32 %v5120_v18, 16  ;;  %v615_v30 = vor.u32 %v613_v20, %v611_v13 }
  0x22   : > { %v617_v21 = vshll.u32 %v5115_v16, 16  ;;  %v709_v26 = vrot.slane %v5115_v16, 1  ;;  %v481_v34 = vshll.u32 %v5127_v22, 16  ;;  %v475_v36 = vrot.slane %v473_v27, 1 }
  0x23   : > { %v485_v40 = vshrl.u32 %v5127_v22, 16  ;;  %v489_v41 = vshll.u32 %v5138_v33, 16  ;;  %v675_v44 = vrot.slane %v5127_v22, 1  ;;  %v677_v52 = vrot.slane %v5138_v33, 1 }
  0x24   : > { %737 = vrot.lane.b32.xlu1 %v698_v38, %s4958_s11  ;;  %v5135_v31 = vrot.slane %v617_v21, 1  ;;  %v710_v35 = vsel %vm669_vm0, %v707_v24, %v709_v26  ;;  %v479_v37 = vor.u32 %v477_v29, %v475_v36  ;;  %v483_v39 = vrot.slane %v481_v34, 1  ;;  %v5186_v21 = vld [vmem:[%s5020_s10 + $0x30] sm:$0xff]  ;;  %v5196_v34 = vld [vmem:[%s5020_s10 + $0x38] sm:$0xff] }
  0x25   : > { %v491_v47 = vrot.slane %v489_v41, 1  ;;  %v469_v55 = vshrl.u32 %v5151_v42, 16  ;;  %v671_v57 = vrot.slane %v5151_v42, 1  ;;  %v678_v60 = vsel %vm669_vm0, %v675_v44, %v677_v52 }
  0x26   : > { %v620_v38 = vsel %vm456_vm1, %v615_v30, %v5135_v31  ;;  %v484_v45 = vsel %vm456_vm1, %v479_v37, %v483_v39  ;;  %v497_v11 = vshll.u32 %v5170_v59, 16  ;;  %v679_v27 = vrot.slane %v5170_v59, 1 }
  0x27   : > { %650 = vrot.lane.b32.xlu0 %v572_v43, %s4959_s12  ;;  %v673_v43 = vrot.slane %v5120_v18, 1  ;;  %v501_v29 = vshrl.u32 %v5170_v59, 16  ;;  %v505_v30 = vshll.u32 %v5186_v21, 16  ;;  %v509_v37 = vshrl.u32 %v5186_v21, 16 }
  0x28   : > { %652 = vrot.lane.b32.xlu2 %v580_v46, %s4959_s12  ;;  %v487_v46 = vor.u32 %v485_v40, %v483_v39 }
  0x29   : > { %v674_v4 = vsel %vm669_vm0, %v671_v57, %v673_v43  ;;  %v507_v40 = vrot.slane %v505_v30, 1 }
  0x2a   : > { %v492_v53 = vsel %vm456_vm1, %v487_v46, %v491_v47  ;;  %v5207_v46 = vld [vmem:[%s5020_s10 + $0x40] sm:$0xff] }
  0x2c   : > { %654 = vrot.lane.b32.xlu1 %v588_v49, %s4959_s12  ;;  %v465_v49 = vshll.u32 %v5151_v42, 16 }
  0x2e   : > { %v467_v54 = vrot.slane %v465_v49, 1 }
  0x2f   : > { %739 = vrot.lane.b32.xlu0 %v700_v51, %s4958_s11  ;;  %v676_v51 = vsel %vm669_vm0, %v673_v43, %v675_v44  ;;  %v511_v43 = vor.u32 %v509_v37, %v507_v40  ;;  %v4777_v37 = vld [vmem:[%s6756_s1 + $0x10] sm:$0x30] }
  0x30   : > { %741 = vrot.lane.b32.xlu2 %v702_v58, %s4958_s11  ;;  %v5166_v58 = vld [vmem:[%s5020_s10] sm:$0xff]   ;;  %v471_v63 = vor.u32 %v469_v55, %v467_v54  ;;  %v525_v55 = vshrl.u32 %v5207_v46, 16 }
  0x31   : > { %v458_v61 = vshrl.u32 %v5166_v58, 16 }
  0x32   : > { %v476_v13 = vsel %vm456_vm1, %v471_v63, %v475_v36  ;;  %v680_v36 = vsel %vm669_vm0, %v677_v52, %v679_v27  ;;  %v521_v52 = vshll.u32 %v5207_v46, 16 }
  0x34   : > { %743 = vrot.lane.b32.xlu1 %v704_v62, %s4958_s11  ;;  %v460_v62 = vshll.u32 %v5166_v58, 16 }
  0x36   : > { %v462_v8 = vrot.slane %v460_v62, 1 }
  0x37   : > { %656 = vrot.lane.b32.xlu0 %v596_v9, %s4959_s12  ;;  %v493_v9 = vshrl.u32 %v5138_v33, 16 }
  0x38   : > { %658 = vrot.lane.b32.xlu2 %v604_v14, %s4959_s12  ;;  %v463_v12 = vor.u32 %v462_v8, %v458_v61  ;;  %v4899_v14 = vor.u32 %v4898_v6, %v4897_v5 }
  0x39   : > { %v495_v15 = vor.u32 %v493_v9, %v491_v47  ;;  %v683_v47 = vrot.slane %v5196_v34, 1 }
  0x3a   : > { %v670_v20 = vrot.slane %v4899_v14, 1 }
  0x3c   : > { %660 = vrot.lane.b32.xlu1 %v612_v17, %s4959_s12  ;;  %v499_v17 = vrot.slane %v497_v11, 1 }
  0x3e   : > { %v500_v24 = vsel %vm456_vm1, %v495_v15, %v499_v17  ;;  %v503_v39 = vor.u32 %v501_v29, %v499_v17 }
  0x3f   : > { %745 = vrot.lane.b32.xlu0 %v706_v19, %s4958_s11  ;;  %v468_v19 = vsel %vm456_vm1, %v463_v12, %v467_v54  ;;  %v523_v54 = vrot.slane %v521_v52, 1 }
  0x40   : > { %747 = vrot.lane.b32.xlu2 %v708_v28, %s4958_s11  ;;  %v672_v28 = vsel %vm669_vm0, %v670_v20, %v671_v57 }
  0x41   : > { %v527_v62 = vor.u32 %v525_v55, %v523_v54 }
  0x44   : > { %749 = vrot.lane.b32.xlu1 %v710_v35, %s4958_s11  ;;  %v681_v35 = vrot.slane %v5186_v21, 1 }
  0x46   : > { %v682_v41 = vsel %vm669_vm0, %v679_v27, %v681_v35 }
  0x47   : > { %662 = vrot.lane.b32.xlu0 %v620_v38, %s4959_s12  ;;  %v513_v38 = vshll.u32 %v5196_v34, 16 }
  0x48   : > { %628 = vrot.lane.b32.xlu2 %v484_v45, %s4959_s12  ;;  %v508_v45 = vsel %vm456_vm1, %v503_v39, %v507_v40 }
  0x49   : > { %v515_v44 = vrot.slane %v513_v38, 1 }
  0x4b   : > { %v516_v49 = vsel %vm456_vm1, %v511_v43, %v515_v44 }
  0x4c   : > { %715 = vrot.lane.b32.xlu1 %v676_v51, %s4958_s11  ;;  %v5214_v51 = vld [vmem:[%s5020_s10 + $0x48] sm:$0xff] }
  0x4d   : > { %v529_v57 = vshll.u32 %v5214_v51, 16  ;;  %v687_v11 = vrot.slane %v5214_v51, 1 }
  0x4f   : > { %630 = vrot.lane.b32.xlu0 %v492_v53, %s4959_s12  ;;  %v684_v53 = vsel %vm669_vm0, %v681_v35, %v683_v47  ;;  %v531_v63 = vrot.slane %v529_v57, 1 }
  0x50   : > { %717 = vrot.lane.b32.xlu2 %v678_v60, %s4958_s11  ;;  %v685_v60 = vrot.slane %v5207_v46, 1 }
  0x51   : > { %v532_v5 = vsel %vm456_vm1, %v527_v62, %v531_v63 }
  0x52   : > { %v686_v61 = vsel %vm669_vm0, %v683_v47, %v685_v60 }
  0x54   : > { %713 = vrot.lane.b32.xlu1 %v674_v4, %s4958_s11  ;;  %v533_v4 = vshrl.u32 %v5214_v51, 16 }
  0x56   : > { %v535_v8 = vor.u32 %v533_v4, %v531_v63 }
  0x57   : > { %626 = vrot.lane.b32.xlu0 %v476_v13, %s4959_s12  ;;  %v690_v13 = vsel %vm669_vm0, %v687_v11, %v689_v7 }
  0x58   : > { %624 = vrot.lane.b32.xlu2 %v468_v19, %s4959_s12  ;;  %v540_v9 = vsel %vm456_vm1, %v535_v8, %v5040_v10  ;;  %v4362_v10 = vld [vmem:[%s6756_s1 + $0x8] sm:$0xf] }
  0x5c   : > { %632 = vrot.lane.b32.xlu1 %v500_v24, %s4959_s12 }
  0x5f   : > { %711 = vrot.lane.b32.xlu0 %v672_v28, %s4958_s11  ;;  %v517_v28 = vshrl.u32 %v5196_v34, 16 }
  0x60   : > { %719 = vrot.lane.b32.xlu2 %v680_v36, %s4958_s11  ;;  %v4484_v36 = vld [vmem:[%s6756_s1 + $0x10] sm:$0xf] }
  0x61   : > { %v519_v30 = vor.u32 %v517_v28, %v515_v44  ;;  %v4485_v40 = vor.u32 %v4777_v37, %v4484_v36 }
  0x63   : > { %v524_v38 = vsel %vm456_vm1, %v519_v30, %v523_v54  ;;  %v1765_v44 = vsel %vm1262_vm4, %v4485_v40, 0  ;;  %vm2830_vm1 = vmand %vm1025_vm13, %vm2221_vm10 }
  0x64   : > { %721 = vrot.lane.b32.xlu1 %v682_v41, %s4958_s11 }
  0x67   : > { %634 = vrot.lane.b32.xlu0 %v508_v45, %s4959_s12 }
  0x68   : > { %636 = vrot.lane.b32.xlu2 %v516_v49, %s4959_s12 }
  0x6c   : > { %638 = vrot.lane.b32.xlu1 %v524_v38, %s4959_s12 }
  0x6f   : > { %723 = vrot.lane.b32.xlu0 %v684_v53, %s4958_s11 }
  0x70   : > { %725 = vrot.lane.b32.xlu2 %v686_v61, %s4958_s11 }
  0x72   : > { %v649_v6 = vpop.permute.xlu2 %648 }
  0x73   : > { %v779_v12 = vsel %vm753_vm2, %v5029_v2, %v649_v6  ;;  %v4758_v2 = vld [vmem:[%s6756_s1 + $0x8] sm:$0x30]  ;;  %v688_v6 = vsel %vm669_vm0, %v685_v60, %v687_v11 }
  0x74   : > { %v4363_v20 = vor.u32 %v4758_v2, %v4362_v10  ;;  %727 = vrot.lane.b32.xlu1 %v688_v6, %s4958_s11 }
  0x76   : > { %v1264_v7 = vsel %vm1262_vm4, %v4363_v20, 0 }
  0x77   : > { %640 = vrot.lane.b32.xlu0 %v532_v5, %s4959_s12  ;;  %4925 = vmatpush.bf16.msra.mxu2 %v1264_v7 }
  0x78   : > { %642 = vrot.lane.b32.xlu2 %v540_v9, %s4959_s12  ;;  %1273 = vmatpush.bf16.msra.mxu0 %v1264_v7 }
  0x7a   : > { %v736_v14 = vpop.permute.xlu2 %735 }
  0x7b   : > { %v823_v15 = vsel %vm797_vm3, %v779_v12, %v736_v14  ;;  %1774 = vmatpush.bf16.msrb.mxu2 %v1765_v44 }
  0x7c   : > { %v885_v17 = vunpack.c.l.b16 %v823_v15  ;;  %v886_v19 = vunpack.c.h.b16 %v823_v15 }
  0x7e   : > { %v926_v24 = vpack.c.b16 %v885_v17, %v885_v17  ;;  %v927_v27 = vpack.c.b16 %v886_v19, %v886_v19 }
  0x7f   : > { %729 = vrot.lane.b32.xlu0 %v690_v13, %s4958_s11 }
  0x80   : > { %1009 = vst.msk [vmem:[#allocation2 + $0x60] sm:$0xf] %vm984_vm5, %v926_v24 }
  0x81   : > { %1010 = vst.msk [vmem:[#allocation2 + $0x64] sm:$0xf] %vm984_vm5, %v927_v27 }
  0x82   : > { %v653_v35 = vpop.permute.xlu2 %652 }
  0x83   : > { %v783_v60 = vsel %vm753_vm2, %v5054_v23, %v653_v35 }
  0x86   : > { %v732_v29 = vpop.permute.xlu1 %731 }
  0x89   : > { %v645_v39 = vpop.permute.xlu0 %644 }
  0x8a   : > { %v775_v41 = vsel %vm753_vm2, %v5023_v0, %v645_v39  ;;  %v742_v57 = vpop.permute.xlu2 %741 }
  0x8b   : > { %v819_v43 = vsel %vm797_vm3, %v775_v41, %v732_v29 }
  0x8c   : > { %v881_v45 = vunpack.c.l.b16 %v819_v43  ;;  %v882_v47 = vunpack.c.h.b16 %v819_v43 }
  0x8e   : > { %v922_v49 = vpack.c.b16 %v881_v45, %v881_v45  ;;  %v923_v52 = vpack.c.b16 %v882_v47, %v882_v47  ;;  %v734_v53 = vpop.permute.xlu1 %733 }
  0x90   : > { %1005 = vst.msk [vmem:[#allocation2 + $0x50] sm:$0xf] %vm984_vm5, %v922_v49  ;;  %v5302_v49 = vld [vmem:[#allocation2 + $0x60] sm:$0xff] }
  0x91   : > { %1006 = vst.msk [vmem:[#allocation2 + $0x54] sm:$0xf] %vm984_vm5, %v923_v52  ;;  %v647_v54 = vpop.permute.xlu0 %646 }
  0x92   : > { %v777_v55 = vsel %vm753_vm2, %v5026_v1, %v647_v54  ;;  %v659_v14 = vpop.permute.xlu2 %658 }
  0x93   : > { %v821_v0 = vsel %vm797_vm3, %v777_v55, %v734_v53  ;;  %v789_v55 = vsel %vm753_vm2, %v5085_v48, %v659_v14 }
  0x94   : > { %v883_v61 = vunpack.c.l.b16 %v821_v0  ;;  %v884_v62 = vunpack.c.h.b16 %v821_v0  ;;  %v1186_v0 = vrot.slane %v5302_v49, 1 }
  0x96   : > { %v924_v63 = vpack.c.b16 %v883_v61, %v883_v61  ;;  %v925_v4 = vpack.c.b16 %v884_v62, %v884_v62  ;;  %v738_v5 = vpop.permute.xlu1 %737 }
  0x98   : > { %1007 = vst.msk [vmem:[#allocation2 + $0x58] sm:$0xf] %vm984_vm5, %v924_v63  ;;  %v5277_v10 = vld [vmem:[#allocation2 + $0x50] sm:$0xff] }
  0x99   : > { %1008 = vst.msk [vmem:[#allocation2 + $0x5c] sm:$0xf] %vm984_vm5, %v925_v4  ;;  %v651_v8 = vpop.permute.xlu0 %650  ;;  %v1182_v28 = vrot.slane %v5277_v10, 1 }
  0x9a   : > { %v781_v1 = vsel %vm753_vm2, %v5032_v3, %v651_v8  ;;  %v748_v40 = vpop.permute.xlu2 %747 }
  0x9b   : > { %v825_v9 = vsel %vm797_vm3, %v781_v1, %v738_v5 }
  0x9c   : > { %v887_v12 = vunpack.c.l.b16 %v825_v9  ;;  %v888_v13 = vunpack.c.h.b16 %v825_v9 }
  0x9e   : > { %v928_v15 = vpack.c.b16 %v887_v12, %v887_v12  ;;  %v929_v17 = vpack.c.b16 %v888_v13, %v888_v13  ;;  %v655_v19 = vpop.permute.xlu1 %654 }
  0x9f   : > { %v785_v11 = vsel %vm753_vm2, %v5058_v25, %v655_v19  ;;  %v4388_v19 = vld [vmem:[%s6756_s1] sm:$0xf] }
  0xa0   : > { %1011 = vst.msk [vmem:[#allocation2 + $0x68] sm:$0xf] %vm984_vm5, %v928_v15  ;;  %v5284_v2 = vld [vmem:[#allocation2 + $0x58] sm:$0xff]  ;;  %v829_v3 = vsel %vm797_vm3, %v785_v11, %v742_v57 }
  0xa1   : > { %1012 = vst.msk [vmem:[#allocation2 + $0x6c] sm:$0xf] %vm984_vm5, %v929_v17  ;;  %v740_v20 = vpop.permute.xlu0 %739  ;;  %v891_v24 = vunpack.c.l.b16 %v829_v3  ;;  %v892_v27 = vunpack.c.h.b16 %v829_v3  ;;  %v1184_v23 = vrot.slane %v5284_v2, 1 }
  0xa2   : > { %v827_v7 = vsel %vm797_vm3, %v783_v60, %v740_v20  ;;  %v629_v61 = vpop.permute.xlu2 %628  ;;  %v4756_v60 = vld [vmem:[%s6756_s1] sm:$0x30] }
  0xa3   : > { %v889_v29 = vunpack.c.l.b16 %v827_v7  ;;  %v890_v25 = vunpack.c.h.b16 %v827_v7  ;;  %v932_v30 = vpack.c.b16 %v891_v24, %v891_v24  ;;  %v933_v35 = vpack.c.b16 %v892_v27, %v892_v27 }
  0xa4   : > { %v1185_v36 = vsel %vm669_vm0, %v1182_v28, %v1184_v23  ;;  %v4389_v3 = vor.u32 %v4756_v60, %v4388_v19  ;;  %v759_v27 = vsel %vm753_vm2, %v5120_v18, %v629_v61 }
  0xa5   : > { %v930_v37 = vpack.c.b16 %v889_v29, %v889_v29  ;;  %v931_v38 = vpack.c.b16 %v890_v25, %v890_v25  ;;  %4373 = vmatmul.msk.bf16.vlgmr.msra.gmra.mxu2 %vm1207_vm6, %v1185_v36  ;;  %1015 = vst.msk [vmem:[#allocation2 + $0x78] sm:$0xf] %vm984_vm5, %v932_v30 }
  0xa6   : > { %1016 = vst.msk [vmem:[#allocation2 + $0x7c] sm:$0xf] %vm984_vm5, %v933_v35  ;;  %v744_v39 = vpop.permute.xlu1 %743 }
  0xa7   : > { %1013 = vst.msk [vmem:[#allocation2 + $0x70] sm:$0xf] %vm984_vm5, %v930_v37 }
  0xa8   : > { %1014 = vst.msk [vmem:[#allocation2 + $0x74] sm:$0xf] %vm984_vm5, %v931_v38  ;;  %v5330_v7 = vld [vmem:[#allocation2 + $0x68] sm:$0xff] }
  0xa9   : > { %v657_v41 = vpop.permute.xlu0 %656  ;;  %v1188_v37 = vrot.slane %v5330_v7, 1 }
  0xaa   : > { %v787_v43 = vsel %vm753_vm2, %v5069_v32, %v657_v41  ;;  %v718_v17 = vpop.permute.xlu2 %717 }
  0xab   : > { %v831_v44 = vsel %vm797_vm3, %v787_v43, %v744_v39  ;;  %v1189_v43 = vsel %vm669_vm0, %v1186_v0, %v1188_v37 }
  0xac   : > { %v893_v45 = vunpack.c.l.b16 %v831_v44  ;;  %v894_v47 = vunpack.c.h.b16 %v831_v44 }
  0xae   : > { %v934_v52 = vpack.c.b16 %v893_v45, %v893_v45  ;;  %v935_v53 = vpack.c.b16 %v894_v47, %v894_v47  ;;  %v661_v54 = vpop.permute.xlu1 %660 }
  0xaf   : > { %v791_v57 = vsel %vm753_vm2, %v5089_v50, %v661_v54  ;;  %v1187_v50 = vsel %vm669_vm0, %v1184_v23, %v1186_v0 }
  0xb0   : > { %1017 = vst.msk [vmem:[#allocation2 + $0x80] sm:$0xf] %vm984_vm5, %v934_v52  ;;  %v835_v32 = vsel %vm797_vm3, %v791_v57, %v748_v40 }
  0xb1   : > { %1018 = vst.msk [vmem:[#allocation2 + $0x84] sm:$0xf] %vm984_vm5, %v935_v53  ;;  %v746_v62 = vpop.permute.xlu0 %745  ;;  %v897_v63 = vunpack.c.l.b16 %v835_v32  ;;  %v898_v4 = vunpack.c.h.b16 %v835_v32 }
  0xb2   : > { %v833_v5 = vsel %vm797_vm3, %v789_v55, %v746_v62  ;;  %v625_v47 = vpop.permute.xlu2 %624 }
  0xb3   : > { %v895_v6 = vunpack.c.l.b16 %v833_v5  ;;  %v896_v8 = vunpack.c.h.b16 %v833_v5  ;;  %v938_v48 = vpack.c.b16 %v897_v63, %v897_v63  ;;  %v939_v1 = vpack.c.b16 %v898_v4, %v898_v4  ;;  %v5353_v63 = vld [vmem:[#allocation2 + $0x70] sm:$0xff] }
  0xb5   : > { %v936_v9 = vpack.c.b16 %v895_v6, %v895_v6  ;;  %v937_v12 = vpack.c.b16 %v896_v8, %v896_v8  ;;  %4374 = vmatmul.msk.bf16.gmra.mxu2 %vm1207_vm6, %v1187_v50  ;;  %1021 = vst.msk [vmem:[#allocation2 + $0x90] sm:$0xf] %vm984_vm5, %v938_v48  ;;  %v755_v48 = vsel %vm753_vm2, %v5166_v58, %v625_v47 }
  0xb6   : > { %1022 = vst.msk [vmem:[#allocation2 + $0x94] sm:$0xf] %vm984_vm5, %v939_v1  ;;  %v750_v13 = vpop.permute.xlu1 %749 }
  0xb7   : > { %1019 = vst.msk [vmem:[#allocation2 + $0x88] sm:$0xf] %vm984_vm5, %v936_v9 }
  0xb8   : > { %1020 = vst.msk [vmem:[#allocation2 + $0x8c] sm:$0xf] %vm984_vm5, %v937_v12 }
  0xb9   : > { %v663_v14 = vpop.permute.xlu0 %662 }
  0xba   : > { %v793_v15 = vsel %vm753_vm2, %v5099_v56, %v663_v14  ;;  %v1433_v56 = vsel %vm1262_vm4, %v4389_v3, 0  ;;  %v720_v6 = vpop.permute.xlu2 %719 }
  0xbb   : > { %v837_v11 = vsel %vm797_vm3, %v793_v15, %v750_v13  ;;  %1442 = vmatpush.bf16.msra.mxu1 %v1433_v56  ;;  %4926 = vmatpush.bf16.msra.mxu3 %v1433_v56 }
  0xbc   : > { %v899_v20 = vunpack.c.l.b16 %v837_v11  ;;  %v900_v24 = vunpack.c.h.b16 %v837_v11 }
  0xbe   : > { %v940_v23 = vpack.c.b16 %v899_v20, %v899_v20  ;;  %v941_v29 = vpack.c.b16 %v900_v24, %v900_v24  ;;  %v716_v25 = vpop.permute.xlu1 %715 }
  0xbf   : > { %v803_v30 = vsel %vm797_vm3, %v759_v27, %v716_v25 }
  0xc0   : > { %1023 = vst.msk [vmem:[#allocation2 + $0x98] sm:$0xf] %vm984_vm5, %v940_v23  ;;  %v865_v35 = vunpack.c.l.b16 %v803_v30  ;;  %v866_v36 = vunpack.c.h.b16 %v803_v30 }
  0xc1   : > { %1024 = vst.msk [vmem:[#allocation2 + $0x9c] sm:$0xf] %vm984_vm5, %v941_v29  ;;  %v631_v18 = vpop.permute.xlu0 %630 }
  0xc2   : > { %v761_v38 = vsel %vm753_vm2, %v5127_v22, %v631_v18  ;;  %v906_v39 = vpack.c.b16 %v865_v35, %v865_v35  ;;  %v907_v40 = vpack.c.b16 %v866_v36, %v866_v36  ;;  %v4960_v22 = vmov 0   ;;  %v637_v27 = vpop.permute.xlu2 %636 }
  0xc3   : > { %v805_v41 = vsel %vm797_vm3, %v761_v38, %v718_v17 }
  0xc4   : > { %989 = vst.msk [vmem:[#allocation2 + $0x10] sm:$0xf] %vm984_vm5, %v906_v39  ;;  %v867_v44 = vunpack.c.l.b16 %v805_v41  ;;  %v868_v45 = vunpack.c.h.b16 %v805_v41 }
  0xc5   : > { %990 = vst.msk [vmem:[#allocation2 + $0x14] sm:$0xf] %vm984_vm5, %v907_v40  ;;  %4375 = vmatmul.msk.bf16.gmra.mxu2 %vm1207_vm6, %v1189_v43  ;;  %v767_v43 = vsel %vm753_vm2, %v5186_v21, %v637_v27 }
  0xc6   : > { %v908_v52 = vpack.c.b16 %v867_v44, %v867_v44  ;;  %v909_v53 = vpack.c.b16 %v868_v45, %v868_v45  ;;  %v714_v54 = vpop.permute.xlu1 %713 }
  0xc8   : > { %v5344_v55 = vld [vmem:[#allocation2 + $0x98] sm:$0xf0]  ;;  %991 = vst.msk [vmem:[#allocation2 + $0x18] sm:$0xf] %vm984_vm5, %v908_v52 }
  0xc9   : > { %2127 = vst.msk [vmem:[#allocation2 + $0x9c] sm:$0xf] %vm984_vm5, %v4960_v22  ;;  %v627_v57 = vpop.permute.xlu0 %626 }
  0xca   : > { %992 = vst.msk [vmem:[#allocation2 + $0x1c] sm:$0xf] %vm984_vm5, %v909_v53  ;;  %v757_v0 = vsel %vm753_vm2, %v5151_v42, %v627_v57  ;;  %v1190_v42 = vrot.slane %v5353_v63, 1  ;;  %v726_v52 = vpop.permute.xlu2 %725 }
  0xcb   : > { %v801_v32 = vsel %vm797_vm3, %v757_v0, %v714_v54 }
  0xcc   : > { %v863_v61 = vunpack.c.l.b16 %v801_v32  ;;  %v864_v62 = vunpack.c.h.b16 %v801_v32  ;;  %v1191_v60 = vsel %vm669_vm0, %v1188_v37, %v1190_v42  ;;  %v5366_v3 = vld [vmem:[#allocation2 + $0x10] sm:$0xff]  ;;  %v5378_v37 = vld [vmem:[#allocation2 + $0x78] sm:$0xff] }
  0xcd   : > { %v1166_v25 = vrot.slane %v5366_v3, 1 }
  0xce   : > { %v904_v4 = vpack.c.b16 %v863_v61, %v863_v61  ;;  %v905_v5 = vpack.c.b16 %v864_v62, %v864_v62  ;;  %v633_v8 = vpop.permute.xlu1 %632 }
  0xcf   : > { %v763_v1 = vsel %vm753_vm2, %v5138_v33, %v633_v8 }
  0xd0   : > { %987 = vst.msk [vmem:[#allocation2 + $0x8] sm:$0xf] %vm984_vm5, %v904_v4  ;;  %v807_v50 = vsel %vm797_vm3, %v763_v1, %v720_v6  ;;  %v5399_v6 = vld [vmem:[#allocation2 + $0x80] sm:$0xff] }
  0xd1   : > { %988 = vst.msk [vmem:[#allocation2 + $0xc] sm:$0xf] %vm984_vm5, %v905_v5  ;;  %v712_v9 = vpop.permute.xlu0 %711  ;;  %v869_v12 = vunpack.c.l.b16 %v807_v50  ;;  %v870_v13 = vunpack.c.h.b16 %v807_v50  ;;  %v5391_v57 = vld [vmem:[#allocation2 + $0x18] sm:$0xff]  ;;  %v1194_v1 = vrot.slane %v5399_v6, 1 }
  0xd2   : > { %v799_v14 = vsel %vm797_vm3, %v755_v48, %v712_v9  ;;  %v1168_v61 = vrot.slane %v5391_v57, 1  ;;  %v643_v5 = vpop.permute.xlu2 %642  ;;  %v5405_v50 = vld [vmem:[#allocation2 + $0x98] sm:$0xf] }
  0xd3   : > { %v861_v15 = vunpack.c.l.b16 %v799_v14  ;;  %v862_v17 = vunpack.c.h.b16 %v799_v14  ;;  %v910_v19 = vpack.c.b16 %v869_v12, %v869_v12  ;;  %v911_v58 = vpack.c.b16 %v870_v13, %v870_v13 }
  0xd4   : > { %v1169_v4 = vsel %vm669_vm0, %v1166_v25, %v1168_v61  ;;  %v773_v48 = vsel %vm753_vm2, %v5214_v51, %v643_v5  ;;  %v4759_v5 = vld [vmem:[#allocation2 + $0x10] sm:$0xf0] }
  0xd5   : > { %v902_v33 = vpack.c.b16 %v861_v15, %v861_v15  ;;  %v903_v11 = vpack.c.b16 %v862_v17, %v862_v17  ;;  %4376 = vmatmul.msk.bf16.gmra.mxu2 %vm1207_vm6, %v1191_v60  ;;  %993 = vst.msk [vmem:[#allocation2 + $0x20] sm:$0xf] %vm984_vm5, %v910_v19 }
  0xd6   : > { %994 = vst.msk [vmem:[#allocation2 + $0x24] sm:$0xf] %vm984_vm5, %v911_v58  ;;  %v722_v56 = vpop.permute.xlu1 %721 }
  0xd7   : > { %985 = vst.msk [vmem:[#allocation2] sm:$0xf] %vm984_vm5, %v902_v33  ;;  %v4920_v20 = vld [vmem:[#allocation2 + $0x8] sm:$0xe] }
  0xd8   : > { %986 = vst.msk [vmem:[#allocation2 + $0x4] sm:$0xf] %vm984_vm5, %v903_v11  ;;  %v4919_v24 = vld [vmem:[#allocation2 + $0x8] sm:$0xf0] }
  0xd9   : > { %v635_v23 = vpop.permute.xlu0 %634  ;;  %v4921_v29 = vor.u32 %v4920_v20, %v4919_v24  ;;  %2129 = vst.msk [vmem:[#allocation2] sm:$0xf] %vm984_vm5, %v4960_v22  ;;  %v4900_v8 = vld [vmem:[#allocation2 + $0x8] sm:$0xff]  }
  0xda   : > { %v765_v30 = vsel %vm753_vm2, %v5170_v59, %v635_v23  ;;  %v1192_v59 = vrot.slane %v5378_v37, 1  ;;  %v5416_v11 = vld [vmem:[#allocation2 + $0x88] sm:$0xff] }
  0xdb   : > { %v1165_v35 = vrot.slane %v4921_v29, 1  ;;  %v809_v36 = vsel %vm797_vm3, %v765_v30, %v722_v56  ;;  %v1196_v29 = vrot.slane %v5416_v11, 1 }
  0xdc   : > { %v871_v18 = vunpack.c.l.b16 %v809_v36  ;;  %v872_v38 = vunpack.c.h.b16 %v809_v36  ;;  %v1193_v21 = vsel %vm669_vm0, %v1190_v42, %v1192_v59  ;;  %v1068_v42 = vld [vmem:[#allocation2 + $0x98] sm:$0x1]  ;;  %v1195_v17 = vsel %vm669_vm0, %v1192_v59, %v1194_v1 }
  0xdd   : > { %v1167_v39 = vsel %vm669_vm0, %v1165_v35, %v1166_v25  ;;  %2126 = vst.msk [vmem:[#allocation2 + $0x98] sm:$0xf] %vm984_vm5, %v4960_v22  ;;  %v4742_v15 = vld [vmem:[#allocation2 + $0x20] sm:$0xff]  ;;  %v1197_v35 = vsel %vm669_vm0, %v1194_v1, %v1196_v29 }
  0xde   : > { %4364 = vmatmul.msk.bf16.vlgmr.msra.gmra.mxu0 %vm1207_vm6, %v1167_v39  ;;  %v912_v40 = vpack.c.b16 %v871_v18, %v871_v18  ;;  %v913_v41 = vpack.c.b16 %v872_v38, %v872_v38  ;;  %v1170_v58 = vrot.slane %v4742_v15, 1  ;;  %v639_v33 = vpop.permute.xlu1 %638 }
  0xdf   : > { %v769_v20 = vsel %vm753_vm2, %v5196_v34, %v639_v33 }
  0xe0   : > { %v4739_v44 = vld [vmem:[#allocation2] sm:$0xff]  ;;  %995 = vst.msk [vmem:[#allocation2 + $0x28] sm:$0xf] %vm984_vm5, %v912_v40  ;;  %v1171_v60 = vsel %vm669_vm0, %v1168_v61, %v1170_v58  ;;  %v813_v24 = vsel %vm797_vm3, %v769_v20, %v726_v52 }
  0xe1   : > { %2130 = vst.msk [vmem:[#allocation2 + $0x4] sm:$0xf] %vm984_vm5, %v4960_v22  ;;  %v724_v45 = vpop.permute.xlu0 %723  ;;  %4390 = vmatmul.msk.bf16.vlgmr.msra.gmra.mxu1 %vm1207_vm6, %v4739_v44  ;;  %v875_v27 = vunpack.c.l.b16 %v813_v24  ;;  %v876_v56 = vunpack.c.h.b16 %v813_v24 }
  0xe2   : > { %v811_v47 = vsel %vm797_vm3, %v767_v43, %v724_v45  ;;  %996 = vst.msk [vmem:[#allocation2 + $0x2c] sm:$0xf] %vm984_vm5, %v913_v41 }
  0xe3   : > { %v873_v53 = vunpack.c.l.b16 %v811_v47  ;;  %v874_v54 = vunpack.c.h.b16 %v811_v47  ;;  %v916_v25 = vpack.c.b16 %v875_v27, %v875_v27  ;;  %v917_v30 = vpack.c.b16 %v876_v56, %v876_v56 }
  0xe5   : > { %v914_v0 = vpack.c.b16 %v873_v53, %v873_v53  ;;  %v915_v32 = vpack.c.b16 %v874_v54, %v874_v54  ;;  %4377 = vmatmul.msk.bf16.gmra.mxu2 %vm1207_vm6, %v1193_v21  ;;  %999 = vst.msk [vmem:[#allocation2 + $0x38] sm:$0xf] %vm984_vm5, %v916_v25  ;;  %v1145_v53 = vunpack.c.l.b16 %v1068_v42 }
  0xe6   : > { %1000 = vst.msk [vmem:[#allocation2 + $0x3c] sm:$0xf] %vm984_vm5, %v917_v30  ;;  %v728_v39 = vpop.permute.xlu1 %727 }
  0xe7   : > { %997 = vst.msk [vmem:[#allocation2 + $0x30] sm:$0xf] %vm984_vm5, %v914_v0  ;;  %v1164_v21 = vpack.c.b16 %v1145_v53, %v1145_v53  ;;  %v4767_v53 = vld [vmem:[#allocation2 + $0x50] sm:$0xff] }
  0xe8   : > { %998 = vst.msk [vmem:[#allocation2 + $0x34] sm:$0xf] %vm984_vm5, %v915_v32 }
  0xe9   : > { %v641_v62 = vpop.permute.xlu0 %640  ;;  %v4743_v34 = vld [vmem:[#allocation2 + $0x28] sm:$0xff] }
  0xea   : > { %v1172_v36 = vrot.slane %v4743_v34, 1  ;;  %v771_v18 = vsel %vm753_vm2, %v5207_v46, %v641_v62  ;;  %v4762_v24 = vld [vmem:[#allocation2 + $0x28] sm:$0xff] }
  0xeb   : > { %v815_v40 = vsel %vm797_vm3, %v771_v18, %v728_v39  ;;  %v1673_v56 = vrot.slane %v4762_v24, 2 }
  0xec   : > { %v1173_v38 = vsel %vm669_vm0, %v1170_v58, %v1172_v36  ;;  %v877_v41 = vunpack.c.l.b16 %v815_v40  ;;  %v878_v43 = vunpack.c.h.b16 %v815_v40 }
  0xed   : > { %v4745_v0 = vld [vmem:[#allocation2 + $0x38] sm:$0xff] }
  0xee   : > { %4365 = vmatmul.msk.bf16.gmra.mxu0 %vm1207_vm6, %v1169_v4  ;;  %v918_v44 = vpack.c.b16 %v877_v41, %v877_v41  ;;  %v919_v59 = vpack.c.b16 %v878_v43, %v878_v43  ;;  %v1176_v61 = vrot.slane %v4745_v0, 1  ;;  %v4412_v4 = vld [vmem:[#allocation2 + $0x10] sm:$0xc] }
  0xef   : > { %v4744_v46 = vld [vmem:[#allocation2 + $0x30] sm:$0xff]  ;;  %v4413_v1 = vor.u32 %v4759_v5, %v4412_v4  ;;  %v4768_v4 = vld [vmem:[#allocation2 + $0x58] sm:$0xff] }
  0xf0   : > { %1001 = vst.msk [vmem:[#allocation2 + $0x40] sm:$0xf] %vm984_vm5, %v918_v44  ;;  %v1174_v52 = vrot.slane %v4744_v46, 1 }
  0xf1   : > { %v730_v9 = vpop.permute.xlu0 %729  ;;  %4391 = vmatmul.msk.bf16.gmra.mxu1 %vm1207_vm6, %v4900_v8  ;;  %1002 = vst.msk [vmem:[#allocation2 + $0x44] sm:$0xf] %vm984_vm5, %v919_v59 }
  0xf2   : > { %v817_v12 = vsel %vm797_vm3, %v773_v48, %v730_v9  ;;  %v1175_v54 = vsel %vm669_vm0, %v1172_v36, %v1174_v52  ;;  %v1177_v8 = vsel %vm669_vm0, %v1174_v52, %v1176_v61  ;;  %v4760_v48 = vld [vmem:[#allocation2 + $0x18] sm:$0xff]  ;;  %v1668_v9 = vrot.slane %v4413_v1, 2 }
  0xf3   : > { %v879_v13 = vunpack.c.l.b16 %v817_v12  ;;  %v880_v14 = vunpack.c.h.b16 %v817_v12  ;;  %v4764_v36 = vld [vmem:[#allocation2 + $0x38] sm:$0xff] }
  0xf5   : > { %v920_v19 = vpack.c.b16 %v879_v13, %v879_v13  ;;  %v921_v51 = vpack.c.b16 %v880_v14, %v880_v14  ;;  %4378 = vmatmul.msk.bf16.gmra.mxu2 %vm1207_vm6, %v1195_v17 }
  0xf7   : > { %1003 = vst.msk [vmem:[#allocation2 + $0x48] sm:$0xf] %vm984_vm5, %v920_v19  ;;  %v4761_v19 = vld [vmem:[#allocation2 + $0x20] sm:$0xff] }
  0xf8   : > { %1004 = vst.msk [vmem:[#allocation2 + $0x4c] sm:$0xf] %vm984_vm5, %v921_v51  ;;  %v4746_v12 = vld [vmem:[#allocation2 + $0x40] sm:$0xff]  ;;  %v1671_v58 = vrot.slane %v4761_v19, 2 }
  0xf9   : > { %v1178_v14 = vrot.slane %v4746_v12, 1 }
  0xfb   : > { %v1179_v17 = vsel %vm669_vm0, %v1176_v61, %v1178_v14 }
  0xfe   : > { %4366 = vmatmul.msk.bf16.gmra.mxu0 %vm1207_vm6, %v1171_v60 }
  0xff   : > { %v5422_v23 = vld [vmem:[#allocation2 + $0x48] sm:$0xff] }
 0x100   : > { %4399 = vmatmul.msk.bf16.vlgmr.msra.gmra.mxu3 %vm1207_vm6, %v5422_v23  ;;  %v1180_v33 = vrot.slane %v5422_v23, 1  ;;  %v4763_v23 = vld [vmem:[#allocation2 + $0x30] sm:$0xff] }
 0x101   : > { %4392 = vmatmul.msk.bf16.gmra.mxu1 %vm1207_vm6, %v5366_v3  ;;  %v4757_v3 = vld [vmem:[#allocation2 + $0x90] sm:$0xff] }
 0x102   : > { %v1198_v45 = vrot.slane %v4757_v3, 1  ;;  %v1181_v20 = vsel %vm669_vm0, %v1178_v14, %v1180_v33  ;;  %v1183_v25 = vsel %vm669_vm0, %v1180_v33, %v1182_v28  ;;  %v1677_v28 = vrot.slane %v4764_v36, 2  ;;  %v4769_v33 = vld [vmem:[#allocation2 + $0x60] sm:$0xff] }
 0x104   : > { %v1199_v47 = vsel %vm669_vm0, %v1196_v29, %v1198_v45 }
 0x105   : > { %4379 = vmatmul.msk.bf16.gmra.mxu2 %vm1207_vm6, %v1197_v35 }
 0x10e   : > { %4367 = vmatmul.msk.bf16.gmra.mxu0 %vm1207_vm6, %v1173_v38 }
 0x110   : > { %4400 = vmatmul.msk.bf16.gmra.mxu3 %vm1207_vm6, %v5277_v10 }
 0x111   : > { %4393 = vmatmul.msk.bf16.gmra.mxu1 %vm1207_vm6, %v5391_v57  ;;  %v1200_v57 = vrot.slane %v1164_v21, 1  ;;  %v1683_v21 = vrot.slane %v4767_v53, 2 }
 0x113   : > { %v1201_v32 = vsel %vm669_vm0, %v1198_v45, %v1200_v57 }
 0x115   : > { %4380 = vmatmul.msk.bf16.gmra.mxu2 %vm1207_vm6, %v1199_v47 }
 0x11e   : > { %4368 = vmatmul.msk.bf16.gmra.mxu0 %vm1207_vm6, %v1175_v54 }
 0x120   : > { %4401 = vmatmul.msk.bf16.gmra.mxu3 %vm1207_vm6, %v5284_v2  ;;  %v1669_v2 = vrot.slane %v4760_v48, 2  ;;  %v1685_v48 = vrot.slane %v4768_v4, 2 }
 0x121   : > { %4394 = vmatmul.msk.bf16.gmra.mxu1 %vm1207_vm6, %v4742_v15 }
 0x122   : > { %v1670_v13 = vsel %vm1262_vm4, %v1668_v9, %v1669_v2  ;;  %v1686_v9 = vsel %vm1262_vm4, %v1683_v21, %v1685_v48 }
 0x125   : > { %4381 = vmatmul.msk.bf16.gmra.mxu2 %vm1207_vm6, %v1201_v32 }
 0x128   : > { %v5453_v62 = vpop.f32.mrf.mxu2 }
 0x12e   : > { %4369 = vmatmul.msk.bf16.gmra.mxu0 %vm1207_vm6, %v1177_v8 }
 0x130   : > { %v5457_v42 = vpop.f32.mrf.mxu2  ;;  %4402 = vmatmul.msk.bf16.gmra.mxu3 %vm1207_vm6, %v5302_v49  ;;  %v1672_v49 = vsel %vm1262_vm4, %v1669_v2, %v1671_v58 }
 0x131   : > { %4395 = vmatmul.msk.bf16.gmra.mxu1 %vm1207_vm6, %v4743_v34  ;;  %v1675_v34 = vrot.slane %v4763_v23, 2 }
 0x133   : > { %v1678_v18 = vsel %vm1262_vm4, %v1675_v34, %v1677_v28 }
 0x135   : > { %4486 = vmatmul.msk.bf16.vlgmr.msrb.gmra.mxu2 %vm1207_vm6, %v1670_v13 }
 0x138   : > { %v5464_v15 = vpop.f32.mrf.mxu2 }
 0x13e   : > { %4370 = vmatmul.msk.bf16.gmra.mxu0 %vm1207_vm6, %v1179_v17  ;;  %v5542_v17 = vld [vmem:[%s6759_s4] ss:$0 sm:$0xff] }
 0x140   : > { %v5468_v51 = vpop.f32.mrf.mxu2  ;;  %4403 = vmatmul.msk.bf16.gmra.mxu3 %vm1207_vm6, %v5330_v7  ;;  %v1674_v7 = vsel %vm1262_vm4, %v1671_v58, %v1673_v56 }
 0x141   : > { %4396 = vmatmul.msk.bf16.gmra.mxu1 %vm1207_vm6, %v4744_v46 }
 0x145   : > { %4487 = vmatmul.msk.bf16.gmra.mxu2 %vm1207_vm6, %v1672_v49 }
 0x148   : > { %v5475_v60 = vpop.f32.mrf.mxu2 }
 0x14e   : > { %4371 = vmatmul.msk.bf16.gmra.mxu0 %vm1207_vm6, %v1181_v20 }
 0x150   : > { %v5480_v27 = vpop.f32.mrf.mxu2  ;;  %4404 = vmatmul.msk.bf16.gmra.mxu3 %vm1207_vm6, %v5353_v63  ;;  %v1676_v63 = vsel %vm1262_vm4, %v1673_v56, %v1675_v34  ;;  %v2018_v34 = vld [vmem:[%s6762_s7] sm:$0xff] }
 0x151   : > { %4397 = vmatmul.msk.bf16.gmra.mxu1 %vm1207_vm6, %v4745_v0 }
 0x155   : > { %4488 = vmatmul.msk.bf16.gmra.mxu2 %vm1207_vm6, %v1674_v7  ;;  %v1687_v7 = vrot.slane %v4769_v33, 2 }
 0x158   : > { %v5487_v29 = vpop.f32.mrf.mxu2 }
 0x15b   : > { %v1275_v46 = vpop.f32.mrf.mxu0 }
 0x15e   : > { %4372 = vmatmul.msk.bf16.gmra.mxu0 %vm1207_vm6, %v1183_v25  ;;  %v1444_v59 = vpop.f32.mrf.mxu1 }
 0x15f   : > { %v1445_v2 = vadd.f32 %v1444_v59, %v1275_v46 }
 0x160   : > { %v5493_v30 = vpop.f32.mrf.mxu2  ;;  %4405 = vmatmul.msk.bf16.gmra.mxu3 %vm1207_vm6, %v5378_v37  ;;  %v4765_v37 = vld [vmem:[#allocation2 + $0x40] sm:$0xff] }
 0x161   : > { %4398 = vmatmul.msk.bf16.gmra.mxu1 %vm1207_vm6, %v4746_v12  ;;  %v1679_v39 = vrot.slane %v4765_v37, 2  ;;  %v5537_v12 = vld [vmem:[%s6758_s3] ss:$0 sm:$0xff] }
 0x163   : > { %v1680_v40 = vsel %vm1262_vm4, %v1677_v28, %v1679_v39  ;;  %v1688_v28 = vsel %vm1262_vm4, %v1685_v48, %v1687_v7 }
 0x165   : > { %4489 = vmatmul.msk.bf16.gmra.mxu2 %vm1207_vm6, %v1676_v63 }
 0x166   : > { %v1446_v52 = vpop.f32.mrf.mxu1 }
 0x168   : > { %v5500_v35 = vpop.f32.mrf.mxu2 }
 0x16e   : > { %v1449_v0 = vpop.f32.mrf.mxu1 }
 0x170   : > { %v5502_v10 = vpop.f32.mrf.mxu2  ;;  %4406 = vmatmul.msk.bf16.gmra.mxu3 %vm1207_vm6, %v5399_v6  ;;  %v4766_v6 = vld [vmem:[#allocation2 + $0x48] sm:$0xff] }
 0x171   : > { %v1681_v44 = vrot.slane %v4766_v6, 2 }
 0x173   : > { %v1682_v45 = vsel %vm1262_vm4, %v1679_v39, %v1681_v44  ;;  %v1684_v57 = vsel %vm1262_vm4, %v1681_v44, %v1683_v21  ;;  %v5559_v21 = vld [vmem:[#allocation2 + $0x68] sm:$0xff] }
 0x175   : > { %4490 = vmatmul.msk.bf16.gmra.mxu2 %vm1207_vm6, %v1678_v18 }
 0x176   : > { %v1451_v5 = vpop.f32.mrf.mxu1 }
 0x178   : > { %v5508_v38 = vpop.f32.mrf.mxu2 }
 0x17e   : > { %v1454_v19 = vpop.f32.mrf.mxu1 }
 0x180   : > { %v5510_v3 = vpop.f32.mrf.mxu2  ;;  %4407 = vmatmul.msk.bf16.gmra.mxu3 %vm1207_vm6, %v5416_v11  ;;  %v1277_v11 = vpop.f32.mrf.mxu0 }
 0x181   : > { %v1447_v24 = vadd.f32 %v1446_v52, %v1277_v11 }
 0x185   : > { %4491 = vmatmul.msk.bf16.gmra.mxu2 %vm1207_vm6, %v1680_v40  ;;  %v2019_v40 = vld [vmem:[%s6762_s7 + $0x8] sm:$0xff] }
 0x186   : > { %v5550_v36 = vpop.f32.mrf.mxu1 }
 0x188   : > { %v5516_v41 = vpop.f32.mrf.mxu2  ;;  %v1280_v32 = vpop.f32.mrf.mxu0 }
 0x189   : > { %v1450_v6 = vadd.f32 %v1449_v0, %v1280_v32  ;;  %v1689_v32 = vrot.slane %v5559_v21, 2 }
 0x190   : > { %v5518_v43 = vpop.f32.mrf.mxu2  ;;  %v1282_v1 = vpop.f32.mrf.mxu0 }
 0x195   : > { %4492 = vmatmul.msk.bf16.gmra.mxu2 %vm1207_vm6, %v1682_v45 }
 0x198   : > { %v5522_v47 = vpop.f32.mrf.mxu2  ;;  %v1285_v49 = vpop.f32.mrf.mxu0 }
 0x1a0   : > { %v5524_v54 = vpop.f32.mrf.mxu2  ;;  %v1287_v39 = vpop.f32.mrf.mxu0 }
 0x1a5   : > { %4493 = vmatmul.msk.bf16.gmra.mxu2 %vm1207_vm6, %v1684_v57 }
 0x1a8   : > { %v5528_v61 = vpop.f32.mrf.mxu2 }
 0x1b0   : > { %v5530_v8 = vpop.f32.mrf.mxu2 }
 0x1b5   : > { %4494 = vmatmul.msk.bf16.gmra.mxu2 %vm1207_vm6, %v1686_v9  ;;  %v5562_v9 = vpop.f32.mrf.mxu1 }
 0x1b8   : > { %v1776_v13 = vpop.f32.mrf.mxu2 }
 0x1b9   : > { %v1866_v14 = vadd.f32 %v1776_v13, %v1445_v2  ;;  %v1452_v2 = vadd.f32 %v1451_v5, %v1282_v1 }
 0x1bb   : > { %v1906_v58 = vmul.f32 %v5537_v12, %v1866_v14  ;;  %v5564_v14 = vpop.f32.mrf.mxu0 }
 0x1bd   : > { %v1946_v20 = vadd.f32 %v5542_v17, %v1906_v58 }
 0x1bf   : > { %v1982_v23 = vmax.f32 %v1946_v20, 0.0 }
 0x1c0   : > { %v1778_v56 = vpop.f32.mrf.mxu2 }
 0x1c1   : > { %v1867_v25 = vadd.f32 %v1778_v56, %v1447_v24  ;;  %v2054_v18 = vmul.f32 %v2018_v34, %v1982_v23  ;;  %v2020_v56 = vld [vmem:[%s6762_s7 + $0x10] sm:$0xff]  ;;  %v1690_v34 = vsel %vm1262_vm4, %v1687_v7, %v1689_v32  ;;  %v1455_v7 = vadd.f32 %v1454_v19, %v1285_v49 }
 0x1c2   : > { %v1457_v49 = vadd.f32 %v5550_v36, %v1287_v39 }
 0x1c3   : > { %v1907_v63 = vmul.f32 %v5537_v12, %v1867_v25  ;;  %v2090_v45 = vpack.c.bf16 %v2054_v18, %v2054_v18 }
 0x1c5   : > { %v1947_v37 = vadd.f32 %v5542_v17, %v1907_v63  ;;  %4495 = vmatmul.msk.bf16.gmra.mxu2 %vm1207_vm6, %v1688_v28  ;;  %v2167_v57 = vunpack.c.l.b16 %v2090_v45 }
 0x1c7   : > { %v1983_v44 = vmax.f32 %v1947_v37, 0.0 }
 0x1c8   : > { %v1781_v59 = vpop.f32.mrf.mxu2 }
 0x1c9   : > { %v2055_v46 = vmul.f32 %v2019_v40, %v1983_v44  ;;  %v1868_v52 = vadd.f32 %v1781_v59, %v1450_v6  ;;  %v2021_v44 = vld [vmem:[%s6762_s7 + $0x18] sm:$0xff] }
 0x1cb   : > { %v2091_v11 = vpack.c.bf16 %v2055_v46, %v2055_v46  ;;  %v1908_v53 = vmul.f32 %v5537_v12, %v1868_v52  ;;  %v1461_v52 = vpop.f32.mrf.mxu1 }
 0x1cd   : > { %v2168_v4 = vunpack.c.l.b16 %v2091_v11  ;;  %v1948_v48 = vadd.f32 %v5542_v17, %v1908_v53 }
 0x1cf   : > { %v2203_v13 = vpack.c.b16 %v2168_v4, %v2167_v57  ;;  %v1984_v58 = vmax.f32 %v1948_v48, 0.0  ;;  %v1292_v4 = vpop.f32.mrf.mxu0 }
 0x1d0   : > { %v1783_v0 = vpop.f32.mrf.mxu2 }
 0x1d1   : > { %v1869_v33 = vadd.f32 %v1783_v0, %v1452_v2  ;;  %v2388_v20 = vrot.slane %v2203_v13, 7  ;;  %v2223_v24 = vshrl.u32 %v2203_v13, 16  ;;  %v2226_v23 = vshll.u32 %v2203_v13, 16  ;;  %v5591_v13 = vld [vmem:[#allocation2 + $0x70] sm:$0xff] }
 0x1d2   : > { %v2056_v37 = vmul.f32 %v2020_v56, %v1984_v58  ;;  %v1691_v56 = vrot.slane %v5591_v13, 2 }
 0x1d3   : > { %v1909_v25 = vmul.f32 %v5537_v12, %v1869_v33  ;;  %v2426_v5 = vsel %vm2387_vm7, 0, %v2388_v20  ;;  %v2430_v1 = vrot.slane %v2223_v24, 7  ;;  %v2228_v63 = vrot.slane %v2226_v23, 7 }
 0x1d4   : > { %2490 = vrot.lane.b32.xlu1 %v2426_v5, %s4959_s12  ;;  %v2225_v18 = vrot.slane %v2223_v24, 6  ;;  %v2092_v53 = vpack.c.bf16 %v2056_v37, %v2056_v37  ;;  %v1692_v39 = vsel %vm1262_vm4, %v1689_v32, %v1691_v56 }
 0x1d5   : > { %v1949_v40 = vadd.f32 %v5542_v17, %v1909_v25  ;;  %4496 = vmatmul.msk.bf16.gmra.mxu2 %vm1207_vm6, %v1690_v34  ;;  %v2431_v6 = vor.u32 %v2430_v1, %v2226_v23 }
 0x1d6   : > { %v5585_v59 = vor.u32 %v2228_v63, %v2225_v18  ;;  %v2169_v0 = vunpack.c.l.b16 %v2092_v53  ;;  %v1464_v63 = vpop.f32.mrf.mxu1  ;;  %v2022_v18 = vld [vmem:[%s6762_s7 + $0x20] sm:$0xff] }
 0x1d7   : > { %v1985_v45 = vmax.f32 %v1949_v40, 0.0  ;;  %v2486_v46 = vsel %vm5576_vm9, 0, %v2431_v6  ;;  %v1295_v36 = vpop.f32.mrf.mxu0 }
 0x1d8   : > { %2530 = vrot.lane.b32.xlu0 %v2486_v46, %s4958_s11  ;;  %v1786_v11 = vpop.f32.mrf.mxu2 }
 0x1d9   : > { %v2057_v21 = vmul.f32 %v2021_v44, %v1985_v45  ;;  %v1870_v57 = vadd.f32 %v1786_v11, %v1455_v7 }
 0x1db   : > { %v2093_v48 = vpack.c.bf16 %v2057_v21, %v2057_v21  ;;  %v1910_v2 = vmul.f32 %v5537_v12, %v1870_v57  ;;  %v2023_v21 = vld [vmem:[%s6762_s7 + $0x28] sm:$0xff] }
 0x1dd   : > { %v2170_v58 = vunpack.c.l.b16 %v2093_v48  ;;  %v1950_v19 = vadd.f32 %v5542_v17, %v1910_v2 }
 0x1df   : > { %v2204_v33 = vpack.c.b16 %v2170_v58, %v2169_v0  ;;  %v1986_v23 = vmax.f32 %v1950_v19, 0.0 }
 0x1e0   : > { %v1788_v24 = vpop.f32.mrf.mxu2 }
 0x1e1   : > { %v1871_v25 = vadd.f32 %v1788_v24, %v1457_v49  ;;  %v2389_v5 = vrot.slane %v2204_v33, 7  ;;  %v2231_v34 = vshrl.u32 %v2204_v33, 16  ;;  %v2234_v37 = vshll.u32 %v2204_v33, 16  ;;  %v1466_v24 = vpop.f32.mrf.mxu1 }
 0x1e2   : > { %v2058_v46 = vmul.f32 %v2022_v18, %v1986_v23  ;;  %v5617_v23 = vld [vmem:[#allocation2 + $0x78] sm:$0xff] }
 0x1e3   : > { %v1911_v40 = vmul.f32 %v5537_v12, %v1871_v25  ;;  %v2390_v6 = vsel %vm2387_vm7, %v2388_v20, %v2389_v5  ;;  %v2432_v44 = vrot.slane %v2231_v34, 7  ;;  %v2236_v7 = vrot.slane %v2234_v37, 7  ;;  %v1297_v25 = vpop.f32.mrf.mxu0 }
 0x1e4   : > { %2492 = vrot.lane.b32.xlu2 %v2390_v6, %s4959_s12  ;;  %v2233_v45 = vrot.slane %v2231_v34, 6  ;;  %v1460_v20 = vadd.f32 %v5562_v9, %v5564_v14  ;;  %v2094_v0 = vpack.c.bf16 %v2058_v46, %v2058_v46  ;;  %v1462_v34 = vadd.f32 %v1461_v52, %v1292_v4  ;;  %v2024_v46 = vld [vmem:[%s6762_s7 + $0x30] sm:$0xff] }
 0x1e5   : > { %v1951_v11 = vadd.f32 %v5542_v17, %v1911_v40  ;;  %4497 = vmatmul.msk.bf16.gmra.mxu2 %vm1207_vm6, %v1692_v39  ;;  %v2433_v53 = vor.u32 %v2432_v44, %v2234_v37  ;;  %v1693_v40 = vrot.slane %v5617_v23, 2 }
 0x1e6   : > { %v2237_v57 = vor.u32 %v2236_v7, %v2233_v45  ;;  %v2171_v9 = vunpack.c.l.b16 %v2094_v0 }
 0x1e7   : > { %v1987_v48 = vmax.f32 %v1951_v11, 0.0  ;;  %v2434_v2 = vsel %vm2429_vm8, %v2430_v1, %v2433_v53  ;;  %v1694_v52 = vsel %vm1262_vm4, %v1691_v56, %v1693_v40 }
 0x1e8   : > { %2532 = vrot.lane.b32.xlu1 %v2434_v2, %s4958_s11  ;;  %v1791_v32 = vpop.f32.mrf.mxu2  ;;  %v5614_v13 = vsel %vm2221_vm10, %v5585_v59, %v2237_v57 }
 0x1e9   : > { %v2059_v58 = vmul.f32 %v2023_v21, %v1987_v48  ;;  %v1872_v19 = vadd.f32 %v1791_v32, %v1460_v20 }
 0x1eb   : > { %v2095_v49 = vpack.c.bf16 %v2059_v58, %v2059_v58  ;;  %v1912_v33 = vmul.f32 %v5537_v12, %v1872_v19  ;;  %v1469_v58 = vpop.f32.mrf.mxu1  ;;  %v2025_v19 = vld [vmem:[%s6762_s7 + $0x38] sm:$0xff] }
 0x1ed   : > { %v2172_v14 = vunpack.c.l.b16 %v2095_v49  ;;  %v1952_v1 = vadd.f32 %v5542_v17, %v1912_v33 }
 0x1ef   : > { %v2205_v18 = vpack.c.b16 %v2172_v14, %v2171_v9  ;;  %v1988_v6 = vmax.f32 %v1952_v1, 0.0  ;;  %v1300_v9 = vpop.f32.mrf.mxu0  ;;  %v621_v14 = vshrl.u32 %v5115_v16, 16  ;;  %v2028_v16 = vld [vmem:[%s6762_s7 + $0x50] sm:$0xff] }
 0x1f0   : > { %v1793_v37 = vpop.f32.mrf.mxu2 }
 0x1f1   : > { %v1873_v39 = vadd.f32 %v1793_v37, %v1462_v34  ;;  %v2391_v7 = vrot.slane %v2205_v18, 7  ;;  %v2240_v45 = vshrl.u32 %v2205_v18, 16  ;;  %v2243_v11 = vshll.u32 %v2205_v18, 16 }
 0x1f2   : > { %v2060_v2 = vmul.f32 %v2024_v46, %v1988_v6 }
 0x1f3   : > { %v1913_v53 = vmul.f32 %v5537_v12, %v1873_v39  ;;  %v2392_v21 = vsel %vm2387_vm7, %v2389_v5, %v2391_v7  ;;  %v2435_v20 = vrot.slane %v2240_v45, 7  ;;  %v2245_v4 = vrot.slane %v2243_v11, 7 }
 0x1f4   : > { %2494 = vrot.lane.b32.xlu2 %v2392_v21, %s4959_s12  ;;  %v2242_v48 = vrot.slane %v2240_v45, 6  ;;  %v1465_v5 = vadd.f32 %v1464_v63, %v1295_v36  ;;  %v2096_v34 = vpack.c.bf16 %v2060_v2, %v2060_v2  ;;  %v5640_v45 = vld [vmem:[#allocation2 + $0x80] sm:$0xff]  ;;  %v623_v63 = vor.u32 %v621_v14, %v5135_v31  ;;  %v1471_v21 = vpop.f32.mrf.mxu1 }
 0x1f5   : > { %v1953_v32 = vadd.f32 %v5542_v17, %v1913_v53  ;;  %4498 = vmatmul.msk.bf16.gmra.mxu2 %vm1207_vm6, %v1694_v52  ;;  %v2436_v0 = vor.u32 %v2435_v20, %v2243_v11  ;;  %v1467_v11 = vadd.f32 %v1466_v24, %v1297_v25  ;;  %v2026_v31 = vld [vmem:[%s6762_s7 + $0x40] sm:$0xff] }
 0x1f6   : > { %v2246_v49 = vor.u32 %v2245_v4, %v2242_v48 }
 0x1f7   : > { %v1989_v33 = vmax.f32 %v1953_v32, 0.0  ;;  %v2437_v23 = vsel %vm2429_vm8, %v2432_v44, %v2436_v0  ;;  %v2173_v44 = vunpack.c.l.b16 %v2096_v34  ;;  %v1302_v0 = vpop.f32.mrf.mxu0 }
 0x1f8   : > { %2534 = vrot.lane.b32.xlu0 %v2437_v23, %s4958_s11  ;;  %v1796_v56 = vpop.f32.mrf.mxu2  ;;  %v5637_v1 = vsel %vm2221_vm10, %v2237_v57, %v2246_v49  ;;  %v1695_v57 = vrot.slane %v5640_v45, 2 }
 0x1f9   : > { %v2061_v18 = vmul.f32 %v2025_v19, %v1989_v33  ;;  %v1874_v37 = vadd.f32 %v1796_v56, %v1465_v5 }
 0x1fa   : > { %v1696_v33 = vsel %vm1262_vm4, %v1693_v40, %v1695_v57 }
 0x1fb   : > { %v2097_v6 = vpack.c.bf16 %v2061_v18, %v2061_v18  ;;  %v1914_v39 = vmul.f32 %v5537_v12, %v1874_v37  ;;  %v2027_v37 = vld [vmem:[%s6762_s7 + $0x48] sm:$0xff] }
 0x1fd   : > { %v2174_v36 = vunpack.c.l.b16 %v2097_v6  ;;  %v1954_v46 = vadd.f32 %v5542_v17, %v1914_v39  ;;  %v1470_v39 = vadd.f32 %v1469_v58, %v1300_v9  ;;  %v4774_v58 = vld [vmem:[#allocation2 + $0x88] sm:$0xff] }
 0x1ff   : > { %v2206_v53 = vpack.c.b16 %v2174_v36, %v2173_v44  ;;  %v1990_v4 = vmax.f32 %v1954_v46, 0.0 }
 0x200   : > { %v1798_v52 = vpop.f32.mrf.mxu2  ;;  %664 = vrot.lane.b32.xlu0 %v623_v63, %s4959_s12 }
 0x201   : > { %v1875_v48 = vadd.f32 %v1798_v52, %v1467_v11  ;;  %v2393_v2 = vrot.slane %v2206_v53, 7  ;;  %v2249_v32 = vshrl.u32 %v2206_v53, 16  ;;  %v2252_v19 = vshll.u32 %v2206_v53, 16  ;;  %v1474_v11 = vpop.f32.mrf.mxu1 }
 0x202   : > { %v2062_v14 = vmul.f32 %v2026_v31, %v1990_v4  ;;  %v1305_v4 = vpop.f32.mrf.mxu0 }
 0x203   : > { %v1915_v5 = vmul.f32 %v5537_v12, %v1875_v48  ;;  %v2394_v24 = vsel %vm2387_vm7, %v2391_v7, %v2393_v2  ;;  %v2438_v25 = vrot.slane %v2249_v32, 7  ;;  %v2254_v23 = vrot.slane %v2252_v19, 7 }
 0x204   : > { %2496 = vrot.lane.b32.xlu1 %v2394_v24, %s4959_s12  ;;  %v2251_v56 = vrot.slane %v2249_v32, 6  ;;  %v2098_v44 = vpack.c.bf16 %v2062_v14, %v2062_v14  ;;  %v1472_v32 = vadd.f32 %v1471_v21, %v1302_v0 }
 0x205   : > { %v1955_v34 = vadd.f32 %v5542_v17, %v1915_v5  ;;  %4499 = vmatmul.msk.bf16.gmra.mxu2 %vm1207_vm6, %v1696_v33  ;;  %v2439_v18 = vor.u32 %v2438_v25, %v2252_v19  ;;  %v1697_v19 = vrot.slane %v4774_v58, 2 }
 0x206   : > { %v2255_v6 = vor.u32 %v2254_v23, %v2251_v56 }
 0x207   : > { %v1991_v7 = vmax.f32 %v1955_v34, 0.0  ;;  %v2440_v45 = vsel %vm2429_vm8, %v2435_v20, %v2439_v18  ;;  %v2175_v20 = vunpack.c.l.b16 %v2098_v44  ;;  %v1698_v34 = vsel %vm1262_vm4, %v1695_v57, %v1697_v19 }
 0x208   : > { %2536 = vrot.lane.b32.xlu2 %v2440_v45, %s4958_s11  ;;  %v1801_v40 = vpop.f32.mrf.mxu2  ;;  %v5661_v63 = vsel %vm2221_vm10, %v2246_v49, %v2255_v6 }
 0x209   : > { %v2063_v36 = vmul.f32 %v2027_v37, %v1991_v7  ;;  %v1876_v46 = vadd.f32 %v1801_v40, %v1470_v39  ;;  %v1476_v14 = vpop.f32.mrf.mxu1 }
 0x20a   : > { %v1307_v40 = vpop.f32.mrf.mxu0 }
 0x20b   : > { %v2099_v53 = vpack.c.bf16 %v2063_v36, %v2063_v36  ;;  %v1916_v52 = vmul.f32 %v5537_v12, %v1876_v46  ;;  %v1475_v36 = vadd.f32 %v1474_v11, %v1305_v4 }
 0x20c   : > { %751 = vrot.lane.b32.xlu1 %v709_v26, %s4958_s11 }
 0x20d   : > { %v2176_v9 = vunpack.c.l.b16 %v2099_v53  ;;  %v1956_v48 = vadd.f32 %v5542_v17, %v1916_v52  ;;  %v5692_v52 = vld [vmem:[#allocation2 + $0x90] sm:$0xff] }
 0x20e   : > { %v1699_v11 = vrot.slane %v5692_v52, 2 }
 0x20f   : > { %v5668_v49 = vpack.c.b16 %v2176_v9, %v2175_v20  ;;  %v1992_v5 = vmax.f32 %v1956_v48, 0.0 }
 0x210   : > { %v1803_v31 = vpop.f32.mrf.mxu2 }
 0x211   : > { %v1877_v24 = vadd.f32 %v1803_v31, %v1472_v32  ;;  %v2395_v33 = vrot.slane %v5668_v49, 7  ;;  %v2258_v23 = vshrl.u32 %v5668_v49, 16  ;;  %v2261_v26 = vshll.u32 %v5668_v49, 16 }
 0x212   : > { %v2064_v39 = vmul.f32 %v2028_v16, %v1992_v5  ;;  %v1479_v5 = vpop.f32.mrf.mxu1  ;;  %v4797_v16 = vld [vmem:[%s6757_s2 + $0x8] sm:$0x30] }
 0x213   : > { %v1917_v56 = vmul.f32 %v5537_v12, %v1877_v24  ;;  %v2396_v21 = vsel %vm2387_vm7, %v2393_v2, %v2395_v33  ;;  %v5678_v0 = vrot.slane %v2258_v23, 7  ;;  %v2263_v18 = vrot.slane %v2261_v26, 7  ;;  %v2029_v2 = vld [vmem:[%s6762_s7 + $0x58] sm:$0xff] }
 0x214   : > { %2498 = vrot.lane.b32.xlu2 %v2396_v21, %s4959_s12  ;;  %v2260_v37 = vrot.slane %v2258_v23, 6  ;;  %v2100_v20 = vpack.c.bf16 %v2064_v39, %v2064_v39  ;;  %v1477_v24 = vadd.f32 %v1476_v14, %v1307_v40  ;;  %v1700_v21 = vsel %vm1262_vm4, %v1697_v19, %v1699_v11  ;;  %v4602_v14 = vld [vmem:[%s6757_s2] sm:$0xf]  ;;  %v4816_v19 = vld [vmem:[%s6757_s2 + $0x10] sm:$0x30] }
 0x215   : > { %v1957_v7 = vadd.f32 %v5542_v17, %v1917_v56  ;;  %4500 = vmatmul.msk.bf16.gmra.mxu2 %vm1207_vm6, %v1698_v34  ;;  %v2442_v45 = vor.u32 %v5678_v0, %v2261_v26  ;;  %v1310_v26 = vpop.f32.mrf.mxu0 }
 0x216   : > { %v5688_v44 = vor.u32 %v2263_v18, %v2260_v37  ;;  %v2177_v4 = vunpack.c.l.b16 %v2100_v20  ;;  %v4795_v18 = vld [vmem:[%s6757_s2] sm:$0x30]  ;;  %v4698_v37 = vld [vmem:[%s6757_s2 + $0x10] sm:$0xf]  ;;  %v1480_v20 = vadd.f32 %v1479_v5, %v1310_v26 }
 0x217   : > { %v1993_v46 = vmax.f32 %v1957_v7, 0.0  ;;  %v2443_v57 = vsel %vm2429_vm8, %v2438_v25, %v2442_v45 }
 0x218   : > { %2538 = vrot.lane.b32.xlu0 %v2443_v57, %s4958_s11  ;;  %v1806_v53 = vpop.f32.mrf.mxu2  ;;  %v5696_v58 = vsel %vm2221_vm10, %v2255_v6, %v5688_v44  ;;  %v4576_v6 = vld [vmem:[%s6757_s2 + $0x8] sm:$0xf]  ;;  %v4603_v57 = vor.u32 %v4795_v18, %v4602_v14 }
 0x219   : > { %v2065_v9 = vmul.f32 %v2029_v2, %v1993_v46  ;;  %v1878_v48 = vadd.f32 %v1806_v53, %v1475_v36  ;;  %v4577_v34 = vor.u32 %v4797_v16, %v4576_v6  ;;  %v2030_v2 = vld [vmem:[%s6762_s7 + $0x60] sm:$0xff]  ;;  %v4699_v53 = vor.u32 %v4816_v19, %v4698_v37  ;;  %v2031_v6 = vld [vmem:[%s6762_s7 + $0x68] sm:$0xff] }
 0x21a   : > { %v1481_v14 = vpop.f32.mrf.mxu1 }
 0x21b   : > { %v2101_v32 = vpack.c.bf16 %v2065_v9, %v2065_v9  ;;  %v1918_v49 = vmul.f32 %v5537_v12, %v1878_v48  ;;  %v3069_v46 = vsel %vm1262_vm4, %v4577_v34, 0  ;;  %v4778_v34 = vld [vmem:[#allocation2] sm:$0xff] }
 0x21c   : > { %3078 = vmatpush.bf16.msrb.mxu3 %v3069_v46 }
 0x21d   : > { %v2178_v31 = vunpack.c.l.b16 %v2101_v32  ;;  %v1958_v25 = vadd.f32 %v5542_v17, %v1918_v49 }
 0x21f   : > { %v5701_v23 = vpack.c.b16 %v2178_v31, %v2177_v4  ;;  %v1994_v39 = vmax.f32 %v1958_v25, 0.0  ;;  %v3238_v4 = vsel %vm1262_vm4, %v4603_v57, 0  ;;  %v3569_v31 = vsel %vm1262_vm4, %v4699_v53, 0 }
 0x220   : > { %v1808_v56 = vpop.f32.mrf.mxu2  ;;  %3247 = vmatpush.bf16.msrb.mxu0 %v3238_v4  ;;  %3578 = vmatpush.bf16.msrb.mxu1 %v3569_v31 }
 0x221   : > { %v1879_v7 = vadd.f32 %v1808_v56, %v1477_v24  ;;  %v2397_v45 = vrot.slane %v5701_v23, 7  ;;  %v2267_v40 = vshrl.u32 %v5701_v23, 16  ;;  %v2270_v36 = vshll.u32 %v5701_v23, 16 }
 0x222   : > { %v2066_v24 = vmul.f32 %v2030_v2, %v1994_v39 }
 0x223   : > { %v1919_v9 = vmul.f32 %v5537_v12, %v1879_v7  ;;  %v2398_v48 = vsel %vm2387_vm7, %v2395_v33, %v2397_v45  ;;  %v5733_v32 = vrot.slane %v2267_v40, 7  ;;  %v2272_v49 = vrot.slane %v2270_v36, 7  ;;  %v5741_v33 = vpop.f32.mrf.mxu3  ;;  %4604 = vmatmul.msk.bf16.vlgmr.msrb.gmra.mxu0 %vm1207_vm6, %v4778_v34 }
 0x224   : > { %2500 = vrot.lane.b32.xlu1 %v2398_v48, %s4959_s12  ;;  %v2269_v25 = vrot.slane %v2267_v40, 6  ;;  %v2102_v37 = vpack.c.bf16 %v2066_v24, %v2066_v24  ;;  %v1312_v40 = vpop.f32.mrf.mxu0  ;;  %v1484_v24 = vpop.f32.mrf.mxu1 }
 0x225   : > { %v1959_v23 = vadd.f32 %v5542_v17, %v1919_v9  ;;  %4501 = vmatmul.msk.bf16.gmra.mxu2 %vm1207_vm6, %v1700_v21  ;;  %v2445_v5 = vor.u32 %v5733_v32, %v2270_v36  ;;  %v1482_v36 = vadd.f32 %v1481_v14, %v1312_v40 }
 0x226   : > { %v2273_v16 = vor.u32 %v2272_v49, %v2269_v25  ;;  %v2179_v46 = vunpack.c.l.b16 %v2102_v37 }
 0x227   : > { %v1995_v26 = vmax.f32 %v1959_v23, 0.0  ;;  %v2446_v56 = vsel %vm2429_vm8, %v5678_v0, %v2445_v5  ;;  %v4481_v0 = vor.u32 %v5344_v55, %v5405_v50  ;;  %v2032_v55 = vld [vmem:[%s6762_s7 + $0x70] sm:$0xff] }
 0x228   : > { %2540 = vrot.lane.b32.xlu2 %v2446_v56, %s4958_s11  ;;  %v1811_v21 = vpop.f32.mrf.mxu2  ;;  %v5751_v18 = vsel %vm2221_vm10, %v5688_v44, %v2273_v16 }
 0x229   : > { %v2067_v39 = vmul.f32 %v2031_v6, %v1995_v26  ;;  %v1880_v7 = vadd.f32 %v1811_v21, %v1480_v20  ;;  %v5760_v49 = vrot.slane %v4481_v0, 2 }
 0x22b   : > { %v2103_v19 = vpack.c.bf16 %v2067_v39, %v2067_v39  ;;  %v1920_v2 = vmul.f32 %v5537_v12, %v1880_v7  ;;  %v5758_v44 = vpop.f32.mrf.mxu3  ;;  %v1702_v56 = vsel %vm1262_vm4, %v1699_v11, %v5760_v49 }
 0x22c   : > { %v1315_v26 = vpop.f32.mrf.mxu0 }
 0x22d   : > { %v2180_v57 = vunpack.c.l.b16 %v2103_v19  ;;  %v1960_v53 = vadd.f32 %v5542_v17, %v1920_v2  ;;  %v1485_v40 = vadd.f32 %v1484_v24, %v1315_v26 }
 0x22f   : > { %v2209_v9 = vpack.c.b16 %v2180_v57, %v2179_v46  ;;  %v1996_v20 = vmax.f32 %v1960_v53, 0.0 }
 0x230   : > { %v1813_v48 = vpop.f32.mrf.mxu2 }
 0x231   : > { %v1881_v4 = vadd.f32 %v1813_v48, %v1482_v36  ;;  %v2399_v31 = vrot.slane %v2209_v9, 7  ;;  %v2276_v25 = vshrl.u32 %v2209_v9, 16  ;;  %v2279_v50 = vshll.u32 %v2209_v9, 16  ;;  %v1486_v48 = vpop.f32.mrf.mxu1 }
 0x232   : > { %v2068_v21 = vmul.f32 %v2032_v55, %v1996_v20 }
 0x233   : > { %v1921_v23 = vmul.f32 %v5537_v12, %v1881_v4  ;;  %v2400_v5 = vsel %vm2387_vm7, %v2397_v45, %v2399_v31  ;;  %v2447_v6 = vrot.slane %v2276_v25, 7  ;;  %v2281_v34 = vrot.slane %v2279_v50, 7  ;;  %v2033_v45 = vld [vmem:[%s6762_s7 + $0x78] sm:$0xff]  ;;  %v5783_v57 = vpop.f32.mrf.mxu3 }
 0x234   : > { %2502 = vrot.lane.b32.xlu0 %v2400_v5, %s4959_s12  ;;  %v2278_v14 = vrot.slane %v2276_v25, 6  ;;  %v2104_v0 = vpack.c.bf16 %v2068_v21, %v2068_v21 }
 0x235   : > { %v1961_v37 = vadd.f32 %v5542_v17, %v1921_v23  ;;  %4502 = vmatmul.msk.bf16.gmra.mxu2 %vm1207_vm6, %v1702_v56  ;;  %v2448_v39 = vor.u32 %v2447_v6, %v2279_v50  ;;  %v2034_v56 = vld [vmem:[%s6762_s7 + $0x80] sm:$0xff] }
 0x236   : > { %v2282_v7 = vor.u32 %v2281_v34, %v2278_v14  ;;  %v2181_v20 = vunpack.c.l.b16 %v2104_v0  ;;  %v2035_v0 = vld [vmem:[%s6762_s7 + $0x88] sm:$0xff] }
 0x237   : > { %v1997_v19 = vmax.f32 %v1961_v37, 0.0  ;;  %v2449_v52 = vsel %vm2429_vm8, %v5733_v32, %v2448_v39  ;;  %v1317_v32 = vpop.f32.mrf.mxu0 }
 0x238   : > { %2542 = vrot.lane.b32.xlu1 %v2449_v52, %s4958_s11  ;;  %v1816_v11 = vpop.f32.mrf.mxu2  ;;  %v5781_v2 = vsel %vm2221_vm10, %v2273_v16, %v2282_v7  ;;  %v1487_v24 = vadd.f32 %v1486_v48, %v1317_v32  ;;  %v2386_v32 = vsel %vm2385_vm12, 0, %v5585_v59  ;;  %v1492_v59 = vadd.f32 %v5758_v44, %v5457_v42 }
 0x239   : > { %v2069_v36 = vmul.f32 %v2033_v45, %v1997_v19  ;;  %v1882_v46 = vadd.f32 %v1816_v11, %v1485_v40 }
 0x23b   : > { %v2105_v53 = vpack.c.bf16 %v2069_v36, %v2069_v36  ;;  %v1922_v9 = vmul.f32 %v5537_v12, %v1882_v46  ;;  %v5792_v39 = vpop.f32.mrf.mxu3 }
 0x23d   : > { %v2182_v4 = vunpack.c.l.b16 %v2105_v53  ;;  %v1962_v25 = vadd.f32 %v5542_v17, %v1922_v9 }
 0x23f   : > { %v2210_v55 = vpack.c.b16 %v2182_v4, %v2181_v20  ;;  %v1998_v23 = vmax.f32 %v1962_v25, 0.0 }
 0x240   : > { %v1818_v50 = vpop.f32.mrf.mxu2 }
 0x241   : > { %v1883_v16 = vadd.f32 %v1818_v50, %v1487_v24  ;;  %v2401_v5 = vrot.slane %v2210_v55, 7  ;;  %v2285_v26 = vshrl.u32 %v2210_v55, 16  ;;  %v2288_v34 = vshll.u32 %v2210_v55, 16 }
 0x242   : > { %v2070_v19 = vmul.f32 %v2034_v56, %v1998_v23 }
 0x243   : > { %v1923_v14 = vmul.f32 %v5537_v12, %v1883_v16  ;;  %v2402_v21 = vsel %vm2387_vm7, %v2399_v31, %v2401_v5  ;;  %v2450_v37 = vrot.slane %v2285_v26, 7  ;;  %v2290_v45 = vrot.slane %v2288_v34, 7 }
 0x244   : > { %2504 = vrot.lane.b32.xlu2 %v2402_v21, %s4959_s12  ;;  %v2287_v40 = vrot.slane %v2285_v26, 6  ;;  %v1490_v31 = vadd.f32 %v5741_v33, %v5453_v62  ;;  %v2106_v4 = vpack.c.bf16 %v2070_v19, %v2070_v19 }
 0x245   : > { %v1963_v52 = vadd.f32 %v5542_v17, %v1923_v14  ;;  %v2451_v11 = vor.u32 %v2450_v37, %v2288_v34  ;;  %v5812_v34 = vpop.f32.mrf.mxu3 }
 0x246   : > { %v2291_v36 = vor.u32 %v2290_v45, %v2287_v40  ;;  %v2491_v53 = vpop.permute.xlu1 %2490  ;;  %v2183_v26 = vunpack.c.l.b16 %v2106_v4 }
 0x247   : > { %v1999_v46 = vmax.f32 %v1963_v52, 0.0  ;;  %v2452_v9 = vsel %vm2429_vm8, %v2447_v6, %v2451_v11  ;;  %v2570_v55 = vsel %vm753_vm2, %v2386_v32, %v2491_v53 }
 0x248   : > { %v1821_v48 = vpop.f32.mrf.mxu2  ;;  %2544 = vrot.lane.b32.xlu0 %v2452_v9, %s4958_s11  ;;  %v5805_v20 = vsel %vm2221_vm10, %v2282_v7, %v2291_v36 }
 0x249   : > { %v2071_v25 = vmul.f32 %v2035_v0, %v1999_v46  ;;  %v1884_v24 = vadd.f32 %v1821_v48, %v1490_v31  ;;  %v2036_v31 = vld [vmem:[%s6762_s7 + $0x90] sm:$0xff] }
 0x24a   : > { %v2531_v50 = vpop.permute.xlu0 %2530 }
 0x24b   : > { %v2107_v23 = vpack.c.bf16 %v2071_v25, %v2071_v25  ;;  %v1924_v62 = vmul.f32 %v5537_v12, %v1884_v24  ;;  %v2626_v33 = vsel %vm797_vm3, %v2570_v55, %v2531_v50  ;;  %v2037_v24 = vld [vmem:[%s6762_s7 + $0x98] sm:$0xff]  ;;  %v1495_v50 = vadd.f32 %v5783_v57, %v5464_v15 }
 0x24c   : > { %v2682_v6 = vunpack.c.l.b16 %v2626_v33  ;;  %v2683_v16 = vunpack.c.h.b16 %v2626_v33 }
 0x24d   : > { %v2184_v56 = vunpack.c.l.b16 %v2107_v23  ;;  %v1964_v7 = vadd.f32 %v5542_v17, %v1924_v62  ;;  %v5834_v33 = vpop.f32.mrf.mxu3 }
 0x24e   : > { %v2719_v14 = vpack.c.b16 %v2682_v6, %v2682_v6  ;;  %v2720_v21 = vpack.c.b16 %v2683_v16, %v2683_v16 }
 0x24f   : > { %v2211_v45 = vpack.c.b16 %v2184_v56, %v2183_v26  ;;  %v2000_v19 = vmax.f32 %v1964_v7, 0.0 }
 0x250   : > { %2793 = vst.msk [vmem:[#allocation2 + $0x8] sm:$0xf] %vm984_vm5, %v2719_v14  ;;  %v1823_v40 = vpop.f32.mrf.mxu2 }
 0x251   : > { %2794 = vst.msk [vmem:[#allocation2 + $0xc] sm:$0xf] %vm984_vm5, %v2720_v21  ;;  %v1885_v52 = vadd.f32 %v1823_v40, %v1492_v59  ;;  %v2403_v11 = vrot.slane %v2211_v45, 7  ;;  %v2294_v0 = vshrl.u32 %v2211_v45, 16  ;;  %v2297_v46 = vshll.u32 %v2211_v45, 16 }
 0x252   : > { %v2072_v4 = vmul.f32 %v2036_v31, %v2000_v19 }
 0x253   : > { %v1925_v53 = vmul.f32 %v5537_v12, %v1885_v52  ;;  %v2404_v9 = vsel %vm2387_vm7, %v2401_v5, %v2403_v11  ;;  %v5823_v42 = vrot.slane %v2294_v0, 7  ;;  %v2299_v44 = vrot.slane %v2297_v46, 7  ;;  %v2493_v5 = vpop.permute.xlu2 %2492 }
 0x254   : > { %2506 = vrot.lane.b32.xlu1 %v2404_v9, %s4959_s12  ;;  %v2296_v48 = vrot.slane %v2294_v0, 6  ;;  %v2108_v56 = vpack.c.bf16 %v2072_v4, %v2072_v4  ;;  %v2573_v15 = vsel %vm753_vm2, %v5614_v13, %v2493_v5 }
 0x255   : > { %v1965_v25 = vadd.f32 %v5542_v17, %v1925_v53  ;;  %v2454_v32 = vor.u32 %v5823_v42, %v2297_v46  ;;  %v1497_v46 = vadd.f32 %v5792_v39, %v5468_v51 }
 0x256   : > { %v2300_v55 = vor.u32 %v2299_v44, %v2296_v48  ;;  %v2185_v19 = vunpack.c.l.b16 %v2108_v56 }
 0x257   : > { %v2001_v23 = vmax.f32 %v1965_v25, 0.0  ;;  %v2455_v62 = vsel %vm2429_vm8, %v2450_v37, %v2454_v32  ;;  %v5854_v25 = vpop.f32.mrf.mxu3  ;;  %v2038_v32 = vld [vmem:[%s6762_s7 + $0xa0] sm:$0xff] }
 0x258   : > { %v1826_v6 = vpop.f32.mrf.mxu2  ;;  %v4901_v16 = vld [vmem:[#allocation2 + $0x8] sm:$0xff]   ;;  %2546 = vrot.lane.b32.xlu2 %v2455_v62, %s4958_s11  ;;  %v5838_v26 = vsel %vm2221_vm10, %v2291_v36, %v2300_v55 }
 0x259   : > { %v2073_v7 = vmul.f32 %v2037_v24, %v2001_v23  ;;  %v1886_v14 = vadd.f32 %v1826_v6, %v1495_v50  ;;  %4605 = vmatmul.msk.bf16.gmra.mxu0 %vm1207_vm6, %v4901_v16  ;;  %v4922_v5 = vld [vmem:[#allocation2 + $0x8] sm:$0xf0]  ;;  %v4923_v23 = vld [vmem:[#allocation2 + $0x8] sm:$0xe] }
 0x25a   : > { %v2533_v57 = vpop.permute.xlu1 %2532 }
 0x25b   : > { %v2109_v21 = vpack.c.bf16 %v2073_v7, %v2073_v7  ;;  %v1926_v37 = vmul.f32 %v5537_v12, %v1886_v14  ;;  %v2628_v59 = vsel %vm797_vm3, %v2573_v15, %v2533_v57  ;;  %v2039_v14 = vld [vmem:[%s6762_s7 + $0xa8] sm:$0xff]  ;;  %v4924_v15 = vor.u32 %v4923_v23, %v4922_v5 }
 0x25c   : > { %v2684_v45 = vunpack.c.l.b16 %v2628_v59  ;;  %v2685_v40 = vunpack.c.h.b16 %v2628_v59 }
 0x25d   : > { %v2186_v52 = vunpack.c.l.b16 %v2109_v21  ;;  %v1966_v36 = vadd.f32 %v5542_v17, %v1926_v37  ;;  %v2495_v21 = vpop.permute.xlu2 %2494 }
 0x25e   : > { %v2721_v0 = vpack.c.b16 %v2684_v45, %v2684_v45  ;;  %v2722_v31 = vpack.c.b16 %v2685_v40, %v2685_v40 }
 0x25f   : > { %v5848_v53 = vpack.c.b16 %v2186_v52, %v2185_v19  ;;  %v2002_v9 = vmax.f32 %v1966_v36, 0.0 }
 0x260   : > { %2795 = vst.msk [vmem:[#allocation2 + $0x10] sm:$0xf] %vm984_vm5, %v2721_v0  ;;  %v1828_v13 = vpop.f32.mrf.mxu2 }
 0x261   : > { %2796 = vst.msk [vmem:[#allocation2 + $0x14] sm:$0xf] %vm984_vm5, %v2722_v31  ;;  %v1887_v44 = vadd.f32 %v1828_v13, %v1497_v46  ;;  %v2405_v48 = vrot.slane %v5848_v53, 7  ;;  %v2303_v4 = vshrl.u32 %v5848_v53, 16  ;;  %v2306_v51 = vshll.u32 %v5848_v53, 16 }
 0x262   : > { %v2074_v16 = vmul.f32 %v2038_v32, %v2002_v9 }
 0x263   : > { %v1927_v39 = vmul.f32 %v5537_v12, %v1887_v44  ;;  %v2406_v24 = vsel %vm2387_vm7, %v2403_v11, %v2405_v48  ;;  %v5864_v50 = vrot.slane %v2303_v4, 7  ;;  %v2308_v62 = vrot.slane %v2306_v51, 7 }
 0x264   : > { %2508 = vrot.lane.b32.xlu0 %v2406_v24, %s4959_s12  ;;  %v2305_v6 = vrot.slane %v2303_v4, 6  ;;  %v1500_v11 = vadd.f32 %v5812_v34, %v5475_v60  ;;  %v2110_v52 = vpack.c.bf16 %v2074_v16, %v2074_v16  ;;  %v2576_v60 = vsel %vm753_vm2, %v5637_v1, %v2495_v21 }
 0x265   : > { %v1967_v56 = vadd.f32 %v5542_v17, %v1927_v39  ;;  %v2457_v7 = vor.u32 %v5864_v50, %v2306_v51 }
 0x266   : > { %v5872_v57 = vor.u32 %v2308_v62, %v2305_v6  ;;  %v2187_v32 = vunpack.c.l.b16 %v2110_v52  ;;  %v2040_v6 = vld [vmem:[%s6762_s7 + $0xb0] sm:$0xff] }
 0x267   : > { %v2003_v37 = vmax.f32 %v1967_v56, 0.0  ;;  %v2458_v59 = vsel %vm2429_vm8, %v5823_v42, %v2457_v7  ;;  %v2972_v42 = vrot.slane %v4924_v15, 1 }
 0x268   : > { %v1831_v45 = vpop.f32.mrf.mxu2  ;;  %2548 = vrot.lane.b32.xlu1 %v2458_v59, %s4958_s11  ;;  %v5879_v40 = vld [vmem:[#allocation2 + $0x10] sm:$0xff]  ;;  %v5883_v19 = vsel %vm2221_vm10, %v2300_v55, %v5872_v57  ;;  %v5892_v55 = vpop.f32.mrf.mxu3 }
 0x269   : > { %v2075_v36 = vmul.f32 %v2039_v14, %v2003_v37  ;;  %v1888_v0 = vadd.f32 %v1831_v45, %v1500_v11  ;;  %v2973_v31 = vrot.slane %v5879_v40, 1  ;;  %4606 = vmatmul.msk.bf16.gmra.mxu0 %vm1207_vm6, %v5879_v40  ;;  %v347_v14 = vld [vmem:[%s5020_s10 + $0xa0] sm:$0x3]  ;;  %v4626_v37 = vld [vmem:[#allocation2 + $0x10] sm:$0xc]  ;;  %v1507_v40 = vadd.f32 %v5892_v55, %v5493_v30 }
 0x26a   : > { %v2535_v34 = vpop.permute.xlu0 %2534  ;;  %v4798_v59 = vld [vmem:[#allocation2 + $0x10] sm:$0xf0] }
 0x26b   : > { %v2111_v46 = vpack.c.bf16 %v2075_v36, %v2075_v36  ;;  %v1928_v13 = vmul.f32 %v5537_v12, %v1888_v0  ;;  %v2630_v9 = vsel %vm797_vm3, %v2576_v60, %v2535_v34  ;;  %v2974_v1 = vsel %vm669_vm0, %v2972_v42, %v2973_v31  ;;  %v5929_v60 = vld [vmem:[%s6759_s4] ss:$0 sm:$0xff]  ;;  %v2041_v42 = vld [vmem:[%s6762_s7 + $0xb8] sm:$0xff] }
 0x26c   : > { %v2686_v44 = vunpack.c.l.b16 %v2630_v9  ;;  %v2687_v4 = vunpack.c.h.b16 %v2630_v9  ;;  %4578 = vmatmul.msk.bf16.vlgmr.msrb.gmra.mxu3 %vm1207_vm6, %v2974_v1  ;;  %v1502_v12 = vadd.f32 %v5834_v33, %v5480_v27  ;;  %v5915_v33 = vld [vmem:[%s6758_s3] ss:$0 sm:$0xff]  ;;  %v431_v36 = vunpack.c.l.b16 %v347_v14 }
 0x26d   : > { %v2188_v51 = vunpack.c.l.b16 %v2111_v46  ;;  %v1968_v39 = vadd.f32 %v5542_v17, %v1928_v13  ;;  %v4627_v13 = vor.u32 %v4798_v59, %v4626_v37 }
 0x26e   : > { %v2723_v24 = vpack.c.b16 %v2686_v44, %v2686_v44  ;;  %v2724_v5 = vpack.c.b16 %v2687_v4, %v2687_v4  ;;  %v1505_v44 = vadd.f32 %v5854_v25, %v5487_v29  ;;  %v2537_v4 = vpop.permute.xlu2 %2536 }
 0x26f   : > { %v5901_v23 = vpack.c.b16 %v2188_v51, %v2187_v32  ;;  %v2004_v62 = vmax.f32 %v1968_v39, 0.0  ;;  %v3472_v14 = vrot.slane %v4627_v13, 2 }
 0x270   : > { %2797 = vst.msk [vmem:[#allocation2 + $0x18] sm:$0xf] %vm984_vm5, %v2723_v24  ;;  %v1833_v16 = vpop.f32.mrf.mxu2 }
 0x271   : > { %2798 = vst.msk [vmem:[#allocation2 + $0x1c] sm:$0xf] %vm984_vm5, %v2724_v5  ;;  %v1889_v17 = vadd.f32 %v1833_v16, %v1502_v12  ;;  %v2407_v56 = vrot.slane %v5901_v23, 7  ;;  %v2312_v7 = vshrl.u32 %v5901_v23, 16  ;;  %v2315_v27 = vshll.u32 %v5901_v23, 16  ;;  %v2043_v23 = vld [vmem:[%s6762_s7 + $0xc8] sm:$0xff] }
 0x272   : > { %v2076_v45 = vmul.f32 %v2040_v6, %v2004_v62  ;;  %v452_v62 = vpack.c.b16 %v431_v36, %v431_v36 }
 0x273   : > { %v1929_v15 = vmul.f32 %v5915_v33, %v1889_v17  ;;  %v2408_v11 = vsel %vm2387_vm7, %v2405_v48, %v2407_v56  ;;  %v5923_v21 = vrot.slane %v2312_v7, 7  ;;  %v2317_v52 = vrot.slane %v2315_v27, 7  ;;  %v5933_v48 = vpop.f32.mrf.mxu3  ;;  %v665_v17 = vpop.permute.xlu0 %664 }
 0x274   : > { %2510 = vrot.lane.b32.xlu2 %v2408_v11, %s4959_s12  ;;  %v2314_v0 = vrot.slane %v2312_v7, 6  ;;  %v2112_v39 = vpack.c.bf16 %v2076_v45, %v2076_v45 }
 0x275   : > { %v1969_v34 = vadd.f32 %v5929_v60, %v1929_v15  ;;  %v2460_v53 = vor.u32 %v5923_v21, %v2315_v27 }
 0x276   : > { %v2497_v46 = vpop.permute.xlu1 %2496  ;;  %v5938_v9 = vor.u32 %v2317_v52, %v2314_v0  ;;  %v2189_v36 = vunpack.c.l.b16 %v2112_v39  ;;  %v2042_v39 = vld [vmem:[%s6762_s7 + $0xc0] sm:$0xff] }
 0x277   : > { %v2005_v1 = vmax.f32 %v1969_v34, 0.0  ;;  %v2579_v32 = vsel %vm753_vm2, %v5661_v63, %v2497_v46  ;;  %v2461_v51 = vsel %vm2429_vm8, %v5864_v50, %v2460_v53 }
 0x278   : > { %v2632_v24 = vsel %vm797_vm3, %v2579_v32, %v2537_v4  ;;  %v1836_v5 = vpop.f32.mrf.mxu2  ;;  %2550 = vrot.lane.b32.xlu0 %v2461_v51, %s4958_s11  ;;  %v5948_v12 = vld [vmem:[#allocation2 + $0x18] sm:$0xff]  ;;  %v5955_v29 = vsel %vm2221_vm10, %v5872_v57, %v5938_v9  ;;  %v796_v57 = vsel %vm753_vm2, %v452_v62, %v665_v17 }
 0x279   : > { %v5950_v6 = vld [vmem:[#allocation2 + $0x18] sm:$0xff]  ;;  %v2077_v63 = vmul.f32 %v2041_v42, %v2005_v1  ;;  %v2688_v25 = vunpack.c.l.b16 %v2632_v24  ;;  %v2689_v16 = vunpack.c.h.b16 %v2632_v24  ;;  %v1890_v50 = vadd.f32 %v1836_v5, %v1505_v44  ;;  %4607 = vmatmul.msk.bf16.gmra.mxu0 %vm1207_vm6, %v5948_v12 }
 0x27a   : > { %v2975_v7 = vrot.slane %v5948_v12, 1  ;;  %v3473_v27 = vrot.slane %v5950_v6, 2 }
 0x27b   : > { %v2113_v15 = vpack.c.bf16 %v2077_v63, %v2077_v63  ;;  %v2725_v11 = vpack.c.b16 %v2688_v25, %v2688_v25  ;;  %v2726_v37 = vpack.c.b16 %v2689_v16, %v2689_v16  ;;  %v1930_v59 = vmul.f32 %v5915_v33, %v1890_v50  ;;  %v1511_v46 = vpop.f32.mrf.mxu3 }
 0x27c   : > { %v2976_v45 = vsel %vm669_vm0, %v2973_v31, %v2975_v7  ;;  %v3474_v52 = vsel %vm1262_vm4, %v3472_v14, %v3473_v27 }
 0x27d   : > { %v2190_v0 = vunpack.c.l.b16 %v2113_v15  ;;  %2799 = vst.msk [vmem:[#allocation2 + $0x20] sm:$0xf] %vm984_vm5, %v2725_v11  ;;  %v1970_v34 = vadd.f32 %v5929_v60, %v1930_v59  ;;  %4579 = vmatmul.msk.bf16.gmra.mxu3 %vm1207_vm6, %v2976_v45  ;;  %4700 = vmatmul.msk.bf16.vlgmr.msrb.gmra.mxu1 %vm1207_vm6, %v3474_v52  ;;  %v1510_v11 = vadd.f32 %v5933_v48, %v5500_v35 }
 0x27e   : > { %2800 = vst.msk [vmem:[#allocation2 + $0x24] sm:$0xf] %vm984_vm5, %v2726_v37  ;;  %v752_v53 = vpop.permute.xlu1 %751  ;;  %v2499_v37 = vpop.permute.xlu2 %2498 }
 0x27f   : > { %v5978_v31 = vpack.c.b16 %v2190_v0, %v2189_v36  ;;  %v839_v42 = vsel %vm797_vm3, %v796_v57, %v752_v53  ;;  %v2006_v4 = vmax.f32 %v1970_v34, 0.0 }
 0x280   : > { %v901_v13 = vunpack.c.l.b16 %v839_v42  ;;  %v1838_v44 = vpop.f32.mrf.mxu2 }
 0x281   : > { %v1891_v1 = vadd.f32 %v1838_v44, %v1507_v40  ;;  %v2409_v32 = vrot.slane %v5978_v31, 7  ;;  %v2321_v51 = vshrl.u32 %v5978_v31, 16  ;;  %v2324_v30 = vshll.u32 %v5978_v31, 16 }
 0x282   : > { %v942_v24 = vpack.c.b16 %v901_v13, %v901_v13  ;;  %v2078_v16 = vmul.f32 %v2042_v39, %v2006_v4  ;;  %v2582_v40 = vsel %vm753_vm2, %v5696_v58, %v2499_v37 }
 0x283   : > { %v1931_v55 = vmul.f32 %v5915_v33, %v1891_v1  ;;  %v2410_v5 = vsel %vm2387_vm7, %v2407_v56, %v2409_v32  ;;  %v5993_v62 = vrot.slane %v2321_v51, 7  ;;  %v2326_v63 = vrot.slane %v2324_v30, 7  ;;  %v1514_v48 = vpop.f32.mrf.mxu3 }
 0x284   : > { %1026 = vst.msk [vmem:[#allocation2 + $0xa0] sm:$0x3] %vm1025_vm13, %v942_v24  ;;  %2512 = vrot.lane.b32.xlu1 %v2410_v5, %s4959_s12  ;;  %v2323_v25 = vrot.slane %v2321_v51, 6  ;;  %v2114_v34 = vpack.c.bf16 %v2078_v16, %v2078_v16  ;;  %v1512_v5 = vadd.f32 %v1511_v46, %v5502_v10  ;;  %v2044_v16 = vld [vmem:[%s6762_s7 + $0xd0] sm:$0xff] }
 0x285   : > { %v1971_v50 = vadd.f32 %v5929_v60, %v1931_v55  ;;  %v2463_v17 = vor.u32 %v5993_v62, %v2324_v30  ;;  %v5999_v14 = vld [vmem:[#allocation2 + $0x20] sm:$0xff] }
 0x286   : > { %v6001_v15 = vld [vmem:[#allocation2 + $0x20] sm:$0xff]  ;;  %v6006_v56 = vor.u32 %v2326_v63, %v2323_v25  ;;  %v2977_v45 = vrot.slane %v5999_v14, 1  ;;  %v2191_v24 = vunpack.c.l.b16 %v2114_v34 }
 0x287   : > { %v2007_v59 = vmax.f32 %v1971_v50, 0.0  ;;  %v2464_v57 = vsel %vm2429_vm8, %v5923_v21, %v2463_v17  ;;  %v3475_v36 = vrot.slane %v6001_v15, 2 }
 0x288   : > { %v1841_v52 = vpop.f32.mrf.mxu2  ;;  %2552 = vrot.lane.b32.xlu2 %v2464_v57, %s4958_s11  ;;  %v6018_v0 = vsel %vm2221_vm10, %v5938_v9, %v6006_v56  ;;  %v2978_v9 = vsel %vm669_vm0, %v2975_v7, %v2977_v45 }
 0x289   : > { %v2079_v53 = vmul.f32 %v2043_v23, %v2007_v59  ;;  %v1892_v35 = vadd.f32 %v1841_v52, %v1510_v11  ;;  %4608 = vmatmul.msk.bf16.gmra.mxu0 %vm1207_vm6, %v5999_v14  ;;  %v3476_v51 = vsel %vm1262_vm4, %v3473_v27, %v3475_v36 }
 0x28a   : > { %v2539_v21 = vpop.permute.xlu0 %2538 }
 0x28b   : > { %v1570_v42 = vld [vmem:[#allocation2 + $0xa0] sm:$0x3]  ;;  %v2115_v13 = vpack.c.bf16 %v2079_v53, %v2079_v53  ;;  %v1932_v44 = vmul.f32 %v5915_v33, %v1892_v35  ;;  %v2634_v4 = vsel %vm797_vm3, %v2582_v40, %v2539_v21  ;;  %v1516_v57 = vpop.f32.mrf.mxu3  ;;  %v2045_v40 = vld [vmem:[%s6762_s7 + $0xd8] sm:$0xff] }
 0x28c   : > { %2128 = vst.msk [vmem:[#allocation2 + $0xa0] sm:$0x3] %vm1025_vm13, %v4960_v22  ;;  %v2690_v58 = vunpack.c.l.b16 %v2634_v4  ;;  %v2691_v1 = vunpack.c.h.b16 %v2634_v4  ;;  %v1647_v39 = vunpack.c.l.b16 %v1570_v42  ;;  %v2541_v42 = vpop.permute.xlu2 %2540  ;;  %v1517_v14 = vadd.f32 %v1516_v57, %v5510_v3 }
 0x28d   : > { %v2192_v30 = vunpack.c.l.b16 %v2115_v13  ;;  %v1972_v55 = vadd.f32 %v5929_v60, %v1932_v44  ;;  %4580 = vmatmul.msk.bf16.gmra.mxu3 %vm1207_vm6, %v2978_v9  ;;  %4701 = vmatmul.msk.bf16.gmra.mxu1 %vm1207_vm6, %v3476_v51 }
 0x28e   : > { %v2727_v12 = vpack.c.b16 %v2690_v58, %v2690_v58  ;;  %v2728_v7 = vpack.c.b16 %v2691_v1, %v2691_v1  ;;  %v1666_v22 = vpack.c.b16 %v1647_v39, %v1647_v39 }
 0x28f   : > { %v6042_v63 = vpack.c.b16 %v2192_v30, %v2191_v24  ;;  %v2008_v25 = vmax.f32 %v1972_v55, 0.0 }
 0x290   : > { %2801 = vst.msk [vmem:[#allocation2 + $0x28] sm:$0xf] %vm984_vm5, %v2727_v12  ;;  %v1843_v6 = vpop.f32.mrf.mxu2  ;;  %v1703_v27 = vrot.slane %v1666_v22, 2 }
 0x291   : > { %2802 = vst.msk [vmem:[#allocation2 + $0x2c] sm:$0xf] %vm984_vm5, %v2728_v7  ;;  %v1893_v50 = vadd.f32 %v1843_v6, %v1512_v5  ;;  %v2411_v17 = vrot.slane %v6042_v63, 7  ;;  %v2330_v23 = vshrl.u32 %v6042_v63, 16  ;;  %v2333_v46 = vshll.u32 %v6042_v63, 16 }
 0x292   : > { %v1704_v10 = vsel %vm1262_vm4, %v5760_v49, %v1703_v27  ;;  %v2080_v52 = vmul.f32 %v2044_v16, %v2008_v25 }
 0x293   : > { %v1933_v11 = vmul.f32 %v5915_v33, %v1893_v50  ;;  %4503 = vmatmul.msk.bf16.gmra.mxu2 %vm1207_vm6, %v1704_v10  ;;  %v2412_v37 = vsel %vm2387_vm7, %v2409_v32, %v2411_v17  ;;  %v6059_v59 = vrot.slane %v2330_v23, 7  ;;  %v2335_v34 = vrot.slane %v2333_v46, 7  ;;  %v1519_v16 = vpop.f32.mrf.mxu3 }
 0x294   : > { %2514 = vrot.lane.b32.xlu0 %v2412_v37, %s4959_s12  ;;  %v2332_v53 = vrot.slane %v2330_v23, 6  ;;  %v1515_v32 = vadd.f32 %v1514_v48, %v5508_v38  ;;  %v2116_v9 = vpack.c.bf16 %v2080_v52, %v2080_v52 }
 0x295   : > { %v1973_v49 = vadd.f32 %v5929_v60, %v1933_v11  ;;  %v2466_v35 = vor.u32 %v6059_v59, %v2333_v46  ;;  %v2046_v46 = vld [vmem:[%s6762_s7 + $0xe0] sm:$0xff] }
 0x296   : > { %v2501_v21 = vpop.permute.xlu1 %2500  ;;  %v6067_v31 = vor.u32 %v2335_v34, %v2332_v53  ;;  %v2193_v25 = vunpack.c.l.b16 %v2116_v9 }
 0x297   : > { %v2009_v13 = vmax.f32 %v1973_v49, 0.0  ;;  %v2585_v44 = vsel %vm753_vm2, %v5751_v18, %v2501_v21  ;;  %v2467_v4 = vsel %vm2429_vm8, %v5993_v62, %v2466_v35 }
 0x298   : > { %v2636_v58 = vsel %vm797_vm3, %v2585_v44, %v2541_v42  ;;  %v1846_v1 = vpop.f32.mrf.mxu2  ;;  %2554 = vrot.lane.b32.xlu1 %v2467_v4, %s4958_s11  ;;  %v6076_v51 = vld [vmem:[#allocation2 + $0x28] sm:$0xff]  ;;  %v6083_v38 = vsel %vm2221_vm10, %v6006_v56, %v6067_v31  ;;  %v1520_v42 = vadd.f32 %v1519_v16, %v5516_v41 }
 0x299   : > { %v6078_v39 = vld [vmem:[#allocation2 + $0x28] sm:$0xff]  ;;  %v2081_v48 = vmul.f32 %v2045_v40, %v2009_v13  ;;  %v2692_v18 = vunpack.c.l.b16 %v2636_v58  ;;  %v2693_v24 = vunpack.c.h.b16 %v2636_v58  ;;  %v1894_v30 = vadd.f32 %v1846_v1, %v1515_v32  ;;  %4609 = vmatmul.msk.bf16.gmra.mxu0 %vm1207_vm6, %v6076_v51 }
 0x29a   : > { %v2979_v62 = vrot.slane %v6076_v51, 1  ;;  %v3477_v55 = vrot.slane %v6078_v39, 2  ;;  %v2047_v32 = vld [vmem:[%s6762_s7 + $0xe8] sm:$0xff] }
 0x29b   : > { %v2117_v12 = vpack.c.bf16 %v2081_v48, %v2081_v48  ;;  %v2729_v7 = vpack.c.b16 %v2692_v18, %v2692_v18  ;;  %v2730_v22 = vpack.c.b16 %v2693_v24, %v2693_v24  ;;  %v1934_v5 = vmul.f32 %v5915_v33, %v1894_v30  ;;  %v1521_v9 = vpop.f32.mrf.mxu3 }
 0x29c   : > { %v2980_v56 = vsel %vm669_vm0, %v2977_v45, %v2979_v62  ;;  %v3478_v63 = vsel %vm1262_vm4, %v3475_v36, %v3477_v55  ;;  %v1522_v16 = vadd.f32 %v1521_v9, %v5518_v43 }
 0x29d   : > { %v2194_v6 = vunpack.c.l.b16 %v2117_v12  ;;  %2803 = vst.msk [vmem:[#allocation2 + $0x30] sm:$0xf] %vm984_vm5, %v2729_v7  ;;  %v1974_v27 = vadd.f32 %v5929_v60, %v1934_v5  ;;  %4581 = vmatmul.msk.bf16.gmra.mxu3 %vm1207_vm6, %v2980_v56  ;;  %4702 = vmatmul.msk.bf16.gmra.mxu1 %vm1207_vm6, %v3478_v63 }
 0x29e   : > { %2804 = vst.msk [vmem:[#allocation2 + $0x34] sm:$0xf] %vm984_vm5, %v2730_v22 }
 0x29f   : > { %v6102_v45 = vpack.c.b16 %v2194_v6, %v2193_v25  ;;  %v2010_v50 = vmax.f32 %v1974_v27, 0.0 }
 0x2a0   : > { %v1848_v15 = vpop.f32.mrf.mxu2 }
 0x2a1   : > { %v1895_v36 = vadd.f32 %v1848_v15, %v1517_v14  ;;  %v2413_v23 = vrot.slane %v6102_v45, 7  ;;  %v2339_v10 = vshrl.u32 %v6102_v45, 16  ;;  %v2342_v11 = vshll.u32 %v6102_v45, 16 }
 0x2a2   : > { %v2082_v53 = vmul.f32 %v2046_v46, %v2010_v50 }
 0x2a3   : > { %v1935_v37 = vmul.f32 %v5915_v33, %v1895_v36  ;;  %v2414_v52 = vsel %vm2387_vm7, %v2411_v17, %v2413_v23  ;;  %v6112_v3 = vrot.slane %v2339_v10, 7  ;;  %v2344_v57 = vrot.slane %v2342_v11, 7  ;;  %v1524_v36 = vpop.f32.mrf.mxu3 }
 0x2a4   : > { %2516 = vrot.lane.b32.xlu2 %v2414_v52, %s4959_s12  ;;  %v2341_v34 = vrot.slane %v2339_v10, 6  ;;  %v2118_v48 = vpack.c.bf16 %v2082_v53, %v2082_v53  ;;  %v2048_v10 = vld [vmem:[%s6762_s7 + $0xf0] sm:$0xff] }
 0x2a5   : > { %v1975_v49 = vadd.f32 %v5929_v60, %v1935_v37  ;;  %v2469_v35 = vor.u32 %v6112_v3, %v2342_v11  ;;  %v6117_v40 = vld [vmem:[#allocation2 + $0x30] sm:$0xff] }
 0x2a6   : > { %v6119_v21 = vld [vmem:[#allocation2 + $0x30] sm:$0xff]  ;;  %v6124_v17 = vor.u32 %v2344_v57, %v2341_v34  ;;  %v2503_v44 = vpop.permute.xlu0 %2502  ;;  %v2981_v1 = vrot.slane %v6117_v40, 1 }
 0x2a7   : > { %v2011_v13 = vmax.f32 %v1975_v49, 0.0  ;;  %v2470_v4 = vsel %vm2429_vm8, %v6059_v59, %v2469_v35  ;;  %v3479_v51 = vrot.slane %v6119_v21, 2  ;;  %v2588_v24 = vsel %vm753_vm2, %v5781_v2, %v2503_v44  ;;  %v2049_v35 = vld [vmem:[%s6762_s7 + $0xf8] sm:$0xff] }
 0x2a8   : > { %v1851_v58 = vpop.f32.mrf.mxu2  ;;  %2556 = vrot.lane.b32.xlu0 %v2470_v4, %s4958_s11  ;;  %v6135_v39 = vsel %vm2221_vm10, %v6067_v31, %v6124_v17  ;;  %v2982_v31 = vsel %vm669_vm0, %v2979_v62, %v2981_v1  ;;  %v2195_v2 = vunpack.c.l.b16 %v2118_v48 }
 0x2a9   : > { %v2083_v41 = vmul.f32 %v2047_v32, %v2011_v13  ;;  %v1896_v18 = vadd.f32 %v1851_v58, %v1520_v42  ;;  %4610 = vmatmul.msk.bf16.gmra.mxu0 %vm1207_vm6, %v6117_v40  ;;  %v3480_v56 = vsel %vm1262_vm4, %v3477_v55, %v3479_v51  ;;  %v1525_v42 = vadd.f32 %v1524_v36, %v5522_v47 }
 0x2aa   : > { %v2543_v59 = vpop.permute.xlu1 %2542 }
 0x2ab   : > { %v2119_v30 = vpack.c.bf16 %v2083_v41, %v2083_v41  ;;  %v1936_v12 = vmul.f32 %v5915_v33, %v1896_v18  ;;  %v2638_v7 = vsel %vm797_vm3, %v2588_v24, %v2543_v59 }
 0x2ac   : > { %v2694_v22 = vunpack.c.l.b16 %v2638_v7  ;;  %v2695_v5 = vunpack.c.h.b16 %v2638_v7 }
 0x2ad   : > { %v2196_v63 = vunpack.c.l.b16 %v2119_v30  ;;  %v1976_v25 = vadd.f32 %v5929_v60, %v1936_v12  ;;  %4582 = vmatmul.msk.bf16.gmra.mxu3 %vm1207_vm6, %v2982_v31  ;;  %4703 = vmatmul.msk.bf16.gmra.mxu1 %vm1207_vm6, %v3480_v56 }
 0x2ae   : > { %v2731_v6 = vpack.c.b16 %v2694_v22, %v2694_v22  ;;  %v2732_v27 = vpack.c.b16 %v2695_v5, %v2695_v5  ;;  %v1526_v22 = vpop.f32.mrf.mxu3 }
 0x2af   : > { %v6153_v14 = vpack.c.b16 %v2196_v63, %v2195_v2  ;;  %v2012_v45 = vmax.f32 %v1976_v25, 0.0 }
 0x2b0   : > { %2805 = vst.msk [vmem:[#allocation2 + $0x38] sm:$0xf] %vm984_vm5, %v2731_v6  ;;  %v1853_v62 = vpop.f32.mrf.mxu2 }
 0x2b1   : > { %2806 = vst.msk [vmem:[#allocation2 + $0x3c] sm:$0xf] %vm984_vm5, %v2732_v27  ;;  %v1897_v55 = vadd.f32 %v1853_v62, %v1522_v16  ;;  %v2415_v15 = vrot.slane %v6153_v14, 7  ;;  %v2348_v50 = vshrl.u32 %v6153_v14, 16  ;;  %v2351_v43 = vshll.u32 %v6153_v14, 16 }
 0x2b2   : > { %v2084_v34 = vmul.f32 %v2048_v10, %v2012_v45  ;;  %v1527_v16 = vadd.f32 %v1526_v22, %v5524_v54  ;;  %v2050_v45 = vld [vmem:[%s6762_s7 + $0x100] sm:$0xff] }
 0x2b3   : > { %v1937_v46 = vmul.f32 %v5915_v33, %v1897_v55  ;;  %v2416_v11 = vsel %vm2387_vm7, %v2413_v23, %v2415_v15  ;;  %v6165_v37 = vrot.slane %v2348_v50, 7  ;;  %v2353_v52 = vrot.slane %v2351_v43, 7  ;;  %v2505_v23 = vpop.permute.xlu2 %2504  ;;  %v6211_v55 = vpop.f32.mrf.mxu0 }
 0x2b4   : > { %2518 = vrot.lane.b32.xlu1 %v2416_v11, %s4959_s12  ;;  %v2350_v57 = vrot.slane %v2348_v50, 6  ;;  %v2120_v41 = vpack.c.bf16 %v2084_v34, %v2084_v34  ;;  %v2591_v24 = vsel %vm753_vm2, %v5805_v20, %v2505_v23  ;;  %v2051_v34 = vld [vmem:[%s6762_s7 + $0x108] sm:$0xff] }
 0x2b5   : > { %v1977_v53 = vadd.f32 %v5929_v60, %v1937_v46  ;;  %v2472_v49 = vor.u32 %v6165_v37, %v2351_v43 }
 0x2b6   : > { %v6173_v32 = vor.u32 %v2353_v52, %v2350_v57  ;;  %v2197_v2 = vunpack.c.l.b16 %v2120_v41 }
 0x2b7   : > { %v2013_v13 = vmax.f32 %v1977_v53, 0.0  ;;  %v2473_v44 = vsel %vm2429_vm8, %v6112_v3, %v2472_v49 }
 0x2b8   : > { %v1856_v4 = vpop.f32.mrf.mxu2  ;;  %2558 = vrot.lane.b32.xlu2 %v2473_v44, %s4958_s11  ;;  %v6179_v9 = vld [vmem:[#allocation2 + $0x38] sm:$0xff]  ;;  %v6186_v48 = vsel %vm2221_vm10, %v6124_v17, %v6173_v32 }
 0x2b9   : > { %v6181_v58 = vld [vmem:[#allocation2 + $0x38] sm:$0xff]  ;;  %v2085_v18 = vmul.f32 %v2049_v35, %v2013_v13  ;;  %v1898_v47 = vadd.f32 %v1856_v4, %v1525_v42  ;;  %4611 = vmatmul.msk.bf16.gmra.mxu0 %vm1207_vm6, %v6179_v9  ;;  %v2983_v3 = vrot.slane %v6179_v9, 1 }
 0x2ba   : > { %v2545_v59 = vpop.permute.xlu0 %2544  ;;  %v3481_v30 = vrot.slane %v6181_v58, 2 }
 0x2bb   : > { %v2121_v12 = vpack.c.bf16 %v2085_v18, %v2085_v18  ;;  %v1938_v7 = vmul.f32 %v5915_v33, %v1898_v47  ;;  %v2640_v17 = vsel %vm797_vm3, %v2591_v24, %v2545_v59  ;;  %v2984_v20 = vsel %vm669_vm0, %v2981_v1, %v2983_v3  ;;  %v2547_v35 = vpop.permute.xlu2 %2546 }
 0x2bc   : > { %v2696_v5 = vunpack.c.l.b16 %v2640_v17  ;;  %v2697_v31 = vunpack.c.h.b16 %v2640_v17  ;;  %v3482_v56 = vsel %vm1262_vm4, %v3479_v51, %v3481_v30  ;;  %v6235_v17 = vpop.f32.mrf.mxu0 }
 0x2bd   : > { %v2198_v63 = vunpack.c.l.b16 %v2121_v12  ;;  %v1978_v25 = vadd.f32 %v5929_v60, %v1938_v7  ;;  %4583 = vmatmul.msk.bf16.gmra.mxu3 %vm1207_vm6, %v2984_v20  ;;  %4704 = vmatmul.msk.bf16.gmra.mxu1 %vm1207_vm6, %v3482_v56 }
 0x2be   : > { %v2733_v6 = vpack.c.b16 %v2696_v5, %v2696_v5  ;;  %v2734_v27 = vpack.c.b16 %v2697_v31, %v2697_v31 }
 0x2bf   : > { %v2218_v14 = vpack.c.b16 %v2198_v63, %v2197_v2  ;;  %v2014_v1 = vmax.f32 %v1978_v25, 0.0 }
 0x2c0   : > { %2807 = vst.msk [vmem:[#allocation2 + $0x40] sm:$0xf] %vm984_vm5, %v2733_v6  ;;  %v1858_v40 = vpop.f32.mrf.mxu2 }
 0x2c1   : > { %2808 = vst.msk [vmem:[#allocation2 + $0x44] sm:$0xf] %vm984_vm5, %v2734_v27  ;;  %v1899_v21 = vadd.f32 %v1858_v40, %v1527_v16  ;;  %v2417_v51 = vrot.slane %v2218_v14, 7  ;;  %v2357_v62 = vshrl.u32 %v2218_v14, 16  ;;  %v2360_v50 = vshll.u32 %v2218_v14, 16 }
 0x2c2   : > { %v2086_v11 = vmul.f32 %v2050_v45, %v2014_v1 }
 0x2c3   : > { %v1939_v36 = vmul.f32 %v5915_v33, %v1899_v21  ;;  %v2418_v54 = vsel %vm2387_vm7, %v2415_v15, %v2417_v51  ;;  %v2474_v10 = vrot.slane %v2357_v62, 7  ;;  %v2362_v43 = vrot.slane %v2360_v50, 7 }
 0x2c4   : > { %2520 = vrot.lane.b32.xlu0 %v2418_v54, %s4959_s12  ;;  %v2359_v46 = vrot.slane %v2357_v62, 6  ;;  %v2122_v58 = vpack.c.bf16 %v2086_v11, %v2086_v11 }
 0x2c5   : > { %v1979_v52 = vadd.f32 %v5929_v60, %v1939_v36  ;;  %v2475_v57 = vor.u32 %v2474_v10, %v2360_v50 }
 0x2c6   : > { %v2507_v53 = vpop.permute.xlu1 %2506  ;;  %v6220_v49 = vor.u32 %v2362_v43, %v2359_v46  ;;  %v2199_v5 = vunpack.c.l.b16 %v2122_v58 }
 0x2c7   : > { %v2015_v42 = vmax.f32 %v1979_v52, 0.0  ;;  %v2594_v15 = vsel %vm753_vm2, %v5838_v26, %v2507_v53  ;;  %v2476_v23 = vsel %vm2429_vm8, %v6165_v37, %v2475_v57 }
 0x2c8   : > { %v2642_v13 = vsel %vm797_vm3, %v2594_v15, %v2547_v35  ;;  %2560 = vrot.lane.b32.xlu1 %v2476_v23, %s4958_s11  ;;  %v4785_v44 = vld [vmem:[#allocation2 + $0x40] sm:$0xff]  ;;  %v6231_v9 = vsel %vm2221_vm10, %v6173_v32, %v6220_v49 }
 0x2c9   : > { %v4804_v4 = vld [vmem:[#allocation2 + $0x40] sm:$0xff]  ;;  %v2087_v41 = vmul.f32 %v2051_v34, %v2015_v42  ;;  %v2698_v18 = vunpack.c.l.b16 %v2642_v13  ;;  %v2699_v47 = vunpack.c.h.b16 %v2642_v13  ;;  %4612 = vmatmul.msk.bf16.gmra.mxu0 %vm1207_vm6, %v4785_v44  ;;  %v2985_v26 = vrot.slane %v4785_v44, 1 }
 0x2ca   : > { %v3483_v24 = vrot.slane %v4804_v4, 2 }
 0x2cb   : > { %v2123_v37 = vpack.c.bf16 %v2087_v41, %v2087_v41  ;;  %v2735_v59 = vpack.c.b16 %v2698_v18, %v2698_v18  ;;  %v2736_v12 = vpack.c.b16 %v2699_v47, %v2699_v47  ;;  %v2986_v7 = vsel %vm669_vm0, %v2983_v3, %v2985_v26 }
 0x2cc   : > { %v3484_v22 = vsel %vm1262_vm4, %v3481_v30, %v3483_v24 }
 0x2cd   : > { %v2200_v32 = vunpack.c.l.b16 %v2123_v37  ;;  %2809 = vst.msk [vmem:[#allocation2 + $0x48] sm:$0xf] %vm984_vm5, %v2735_v59  ;;  %4584 = vmatmul.msk.bf16.gmra.mxu3 %vm1207_vm6, %v2986_v7  ;;  %4705 = vmatmul.msk.bf16.gmra.mxu1 %vm1207_vm6, %v3484_v22  ;;  %v3707_v7 = vld [vmem:[%s5020_s10 + $0xc] sm:$0xf] }
 0x2ce   : > { %2810 = vst.msk [vmem:[#allocation2 + $0x4c] sm:$0xf] %vm984_vm5, %v2736_v12  ;;  %v2511_v34 = vpop.permute.xlu2 %2510  ;;  %v3706_v12 = vld [vmem:[%s5020_s10 + $0x8] sm:$0xe] }
 0x2cf   : > { %v6242_v31 = vpack.c.b16 %v2200_v32, %v2199_v5  ;;  %v2600_v23 = vsel %vm753_vm2, %v5955_v29, %v2511_v34  ;;  %v3743_v5 = vunpack.c.l.bf16 %v3706_v12  ;;  %v3744_v32 = vunpack.c.l.bf16 %v3707_v7 }
 0x2d1   : > { %v2419_v20 = vrot.slane %v6242_v31, 7  ;;  %v2366_v3 = vshrl.u32 %v6242_v31, 16  ;;  %v2369_v56 = vshll.u32 %v6242_v31, 16 }
 0x2d3   : > { %v2420_v30 = vsel %vm2387_vm7, %v2417_v51, %v2419_v20  ;;  %v2371_v2 = vrot.slane %v2369_v56, 7  ;;  %v6250_v63 = vrot.slane %v2366_v3, 7  ;;  %v2368_v25 = vrot.slane %v2366_v3, 6 }
 0x2d4   : > { %2522 = vrot.lane.b32.xlu2 %v2420_v30, %s4959_s12 }
 0x2d5   : > { %v2478_v6 = vor.u32 %v6250_v63, %v2369_v56  ;;  %v4786_v27 = vld [vmem:[#allocation2 + $0x48] sm:$0xff]  ;;  %v6254_v14 = vor.u32 %v2371_v2, %v2368_v25 }
 0x2d6   : > { %v4805_v16 = vld [vmem:[#allocation2 + $0x48] sm:$0xff]  ;;  %v6256_v40 = vpop.f32.mrf.mxu0  ;;  %v2509_v1 = vpop.permute.xlu0 %2508  ;;  %v2987_v51 = vrot.slane %v4786_v27, 1 }
 0x2d7   : > { %v2479_v21 = vsel %vm2429_vm8, %v2474_v10, %v2478_v6  ;;  %v3485_v62 = vrot.slane %v4805_v16, 2  ;;  %v2597_v45 = vsel %vm753_vm2, %v5883_v19, %v2509_v1  ;;  %v6268_v10 = vpop.f32.mrf.mxu3 }
 0x2d8   : > { %2562 = vrot.lane.b32.xlu0 %v2479_v21, %s4958_s11  ;;  %v2988_v46 = vsel %vm669_vm0, %v2985_v26, %v2987_v51 }
 0x2d9   : > { %4613 = vmatmul.msk.bf16.gmra.mxu0 %vm1207_vm6, %v4786_v27  ;;  %v3486_v11 = vsel %vm1262_vm4, %v3483_v24, %v3485_v62 }
 0x2da   : > { %v2549_v50 = vpop.permute.xlu1 %2548 }
 0x2db   : > { %v2644_v36 = vsel %vm797_vm3, %v2597_v45, %v2549_v50  ;;  %v3899_v45 = vrot.slane %v3744_v32, 3 }
 0x2dc   : > { %v2700_v54 = vunpack.c.l.b16 %v2644_v36  ;;  %v2701_v43 = vunpack.c.h.b16 %v2644_v36 }
 0x2dd   : > { %4585 = vmatmul.msk.bf16.gmra.mxu3 %vm1207_vm6, %v2988_v46  ;;  %4706 = vmatmul.msk.bf16.gmra.mxu1 %vm1207_vm6, %v3486_v11  ;;  %v6314_v46 = vld [vmem:[%s6761_s6] ss:$0 sm:$0xff]  ;;  %v4902_v11 = vld [vmem:[%s5020_s10 + $0x10] sm:$0xff]  }
 0x2de   : > { %v2737_v52 = vpack.c.b16 %v2700_v54, %v2700_v54  ;;  %v2738_v57 = vpack.c.b16 %v2701_v43, %v2701_v43  ;;  %v6270_v19 = vpop.f32.mrf.mxu0  ;;  %v4832_v7 = vunpack.c.h.bf16 %v4902_v11 }
 0x2df   : > { %v6276_v35 = vpop.f32.mrf.mxu3 }
 0x2e0   : > { %2811 = vst.msk [vmem:[#allocation2 + $0x50] sm:$0xf] %vm984_vm5, %v2737_v52 }
 0x2e1   : > { %2812 = vst.msk [vmem:[#allocation2 + $0x54] sm:$0xf] %vm984_vm5, %v2738_v57 }
 0x2e2   : > { %v2553_v3 = vpop.permute.xlu2 %2552 }
 0x2e6   : > { %v6274_v53 = vpop.f32.mrf.mxu0 }
 0x2e8   : > { %v4787_v42 = vld [vmem:[#allocation2 + $0x50] sm:$0xff] }
 0x2e9   : > { %v4806_v15 = vld [vmem:[#allocation2 + $0x50] sm:$0xff]  ;;  %4614 = vmatmul.msk.bf16.gmra.mxu0 %vm1207_vm6, %v4787_v42  ;;  %v2989_v44 = vrot.slane %v4787_v42, 1 }
 0x2ea   : > { %v2551_v13 = vpop.permute.xlu0 %2550  ;;  %v3487_v4 = vrot.slane %v4806_v15, 2  ;;  %v4831_v15 = vunpack.c.l.bf16 %v4902_v11 }
 0x2eb   : > { %v2646_v58 = vsel %vm797_vm3, %v2600_v23, %v2551_v13  ;;  %v2990_v47 = vsel %vm669_vm0, %v2987_v51, %v2989_v44  ;;  %v6305_v51 = vld [vmem:[%s6760_s5] ss:$0 sm:$0xff] }
 0x2ec   : > { %v2702_v41 = vunpack.c.l.b16 %v2646_v58  ;;  %v2703_v18 = vunpack.c.h.b16 %v2646_v58  ;;  %v3488_v26 = vsel %vm1262_vm4, %v3485_v62, %v3487_v4  ;;  %v3898_v62 = vrot.slane %v3743_v5, 3 }
 0x2ed   : > { %4586 = vmatmul.msk.bf16.gmra.mxu3 %vm1207_vm6, %v2990_v47  ;;  %4707 = vmatmul.msk.bf16.gmra.mxu1 %vm1207_vm6, %v3488_v26 }
 0x2ee   : > { %v2739_v29 = vpack.c.b16 %v2702_v41, %v2702_v41  ;;  %v2740_v24 = vpack.c.b16 %v2703_v18, %v2703_v18  ;;  %v6286_v37 = vpop.f32.mrf.mxu0  ;;  %v3900_v42 = vsel %vm3897_vm14, %v3898_v62, %v3899_v45  ;;  %v3901_v41 = vrot.slane %v4831_v15, 3 }
 0x2ef   : > { %v3080_v59 = vpop.f32.mrf.mxu3 }
 0x2f0   : > { %2813 = vst.msk [vmem:[#allocation2 + $0x58] sm:$0xf] %vm984_vm5, %v2739_v29  ;;  %v3250_v27 = vadd.f32 %v6211_v55, %v3080_v59  ;;  %v3902_v12 = vsel %vm3897_vm14, %v3899_v45, %v3901_v41  ;;  %v4903_v45 = vld [vmem:[%s5020_s10 + $0x18] sm:$0xff]  }
 0x2f1   : > { %2814 = vst.msk [vmem:[#allocation2 + $0x5c] sm:$0xf] %vm984_vm5, %v2740_v24  ;;  %v4835_v15 = vunpack.c.l.bf16 %v4903_v45 }
 0x2f6   : > { %v2513_v22 = vpop.permute.xlu1 %2512  ;;  %v6300_v21 = vpop.f32.mrf.mxu0 }
 0x2f7   : > { %v2603_v56 = vsel %vm753_vm2, %v6018_v0, %v2513_v22  ;;  %v3082_v2 = vpop.f32.mrf.mxu3 }
 0x2f8   : > { %v2648_v30 = vsel %vm797_vm3, %v2603_v56, %v2553_v3  ;;  %v6295_v25 = vld [vmem:[#allocation2 + $0x58] sm:$0xff] }
 0x2f9   : > { %v6297_v6 = vld [vmem:[#allocation2 + $0x58] sm:$0xff]  ;;  %v2704_v16 = vunpack.c.l.b16 %v2648_v30  ;;  %v2705_v1 = vunpack.c.h.b16 %v2648_v30  ;;  %4615 = vmatmul.msk.bf16.gmra.mxu0 %vm1207_vm6, %v6295_v25  ;;  %v2991_v50 = vrot.slane %v6295_v25, 1 }
 0x2fa   : > { %v3580_v0 = vpop.f32.mrf.mxu1  ;;  %v3489_v55 = vrot.slane %v6297_v6, 2 }
 0x2fb   : > { %v2741_v36 = vpack.c.b16 %v2704_v16, %v2704_v16  ;;  %v2742_v54 = vpack.c.b16 %v2705_v1, %v2705_v1  ;;  %v3670_v43 = vadd.f32 %v3580_v0, %v3250_v27  ;;  %v2992_v52 = vsel %vm669_vm0, %v2989_v44, %v2991_v50 }
 0x2fc   : > { %v3490_v57 = vsel %vm1262_vm4, %v3487_v4, %v3489_v55  ;;  %v3252_v44 = vadd.f32 %v6235_v17, %v3082_v2  ;;  %v3903_v16 = vrot.slane %v4832_v7, 3 }
 0x2fd   : > { %2815 = vst.msk [vmem:[#allocation2 + $0x60] sm:$0xf] %vm984_vm5, %v2741_v36  ;;  %v3784_v34 = vmul.f32 %v6305_v51, %v3670_v43  ;;  %4587 = vmatmul.msk.bf16.gmra.mxu3 %vm1207_vm6, %v2992_v52  ;;  %4708 = vmatmul.msk.bf16.gmra.mxu1 %vm1207_vm6, %v3490_v57 }
 0x2fe   : > { %2816 = vst.msk [vmem:[#allocation2 + $0x64] sm:$0xf] %vm984_vm5, %v2742_v54  ;;  %v6328_v47 = vpop.f32.mrf.mxu0 }
 0x2ff   : > { %v3824_v23 = vadd.f32 %v6314_v46, %v3784_v34 }
 0x300   : > { %v3085_v13 = vpop.f32.mrf.mxu3 }
 0x301   : > { %v4007_v4 = vadd.f32 %v3900_v42, %v3824_v23  ;;  %v3255_v30 = vadd.f32 %v6256_v40, %v3085_v13  ;;  %v3904_v42 = vsel %vm3897_vm14, %v3901_v41, %v3903_v16  ;;  %v1530_v41 = vadd.f32 %v6268_v10, %v5528_v61 }
 0x302   : > { %v3582_v58 = vpop.f32.mrf.mxu1 }
 0x303   : > { %v4043_v18 = vmax.f32 %v4007_v4, 0.0  ;;  %v3671_v26 = vadd.f32 %v3582_v58, %v3252_v44  ;;  %v3905_v4 = vrot.slane %v4835_v15, 3 }
 0x305   : > { %v4079_v29 = vpack.c.bf16 %v4043_v18, %v4043_v18  ;;  %v3785_v24 = vmul.f32 %v6305_v51, %v3671_v26  ;;  %v6336_v59 = vld [vmem:[#allocation2 + $0x60] sm:$0xff] }
 0x306   : > { %v6338_v17 = vld [vmem:[#allocation2 + $0x60] sm:$0xff]  ;;  %v2515_v5 = vpop.permute.xlu0 %2514  ;;  %v2993_v3 = vrot.slane %v6336_v59, 1  ;;  %v6359_v11 = vpop.f32.mrf.mxu0 }
 0x307   : > { %4116 = vst.msk [vmem:[%s6333_s18] sm:$0xf] %vm4115_vm15, %v4079_v29  ;;  %v3825_v22 = vadd.f32 %v6314_v46, %v3785_v24  ;;  %v3491_v56 = vrot.slane %v6338_v17, 2  ;;  %v2606_v25 = vsel %vm753_vm2, %v6083_v38, %v2515_v5  ;;  %v4836_v24 = vunpack.c.h.bf16 %v4903_v45  ;;  %v2052_v17 = vld [vmem:[%s6762_s7 + $0x110] sm:$0xff] }
 0x308   : > { %v3087_v32 = vpop.f32.mrf.mxu3  ;;  %v2994_v40 = vsel %vm669_vm0, %v2991_v50, %v2993_v3 }
 0x309   : > { %v4008_v2 = vadd.f32 %v3902_v12, %v3825_v22  ;;  %4616 = vmatmul.msk.bf16.gmra.mxu0 %vm1207_vm6, %v6336_v59  ;;  %v3492_v38 = vsel %vm1262_vm4, %v3489_v55, %v3491_v56  ;;  %v3257_v23 = vadd.f32 %v6270_v19, %v3087_v32  ;;  %v3906_v12 = vsel %vm3897_vm14, %v3903_v16, %v3905_v4  ;;  %v2517_v22 = vpop.permute.xlu2 %2516 }
 0x30a   : > { %v2555_v6 = vpop.permute.xlu1 %2554  ;;  %v3585_v27 = vpop.f32.mrf.mxu1  ;;  %v1532_v16 = vadd.f32 %v6276_v35, %v5530_v8  ;;  %v4904_v8 = vld [vmem:[%s5020_s10 + $0x20] sm:$0xff]  }
 0x30b   : > { %v4044_v1 = vmax.f32 %v4008_v2, 0.0  ;;  %v2650_v0 = vsel %vm797_vm3, %v2606_v25, %v2555_v6  ;;  %v3672_v62 = vadd.f32 %v3585_v27, %v3255_v30  ;;  %v3907_v27 = vrot.slane %v4836_v24, 3  ;;  %v4947_v24 = vld [vmem:[%s6759_s4] ss:$0 sm:$0xff] }
 0x30c   : > { %v2706_v36 = vunpack.c.l.b16 %v2650_v0  ;;  %v2707_v54 = vunpack.c.h.b16 %v2650_v0 }
 0x30d   : > { %v4080_v43 = vpack.c.bf16 %v4044_v1, %v4044_v1  ;;  %v3786_v52 = vmul.f32 %v6305_v51, %v3672_v62  ;;  %4588 = vmatmul.msk.bf16.gmra.mxu3 %vm1207_vm6, %v2994_v40  ;;  %4709 = vmatmul.msk.bf16.gmra.mxu1 %vm1207_vm6, %v3492_v38  ;;  %v2609_v1 = vsel %vm753_vm2, %v6135_v39, %v2517_v22  ;;  %v4840_v22 = vunpack.c.h.bf16 %v4904_v8 }
 0x30e   : > { %v2743_v57 = vpack.c.b16 %v2706_v36, %v2706_v36  ;;  %v2744_v34 = vpack.c.b16 %v2707_v54, %v2707_v54  ;;  %v6377_v19 = vpop.f32.mrf.mxu0 }
 0x30f   : > { %4117 = vst.msk [vmem:[%s6333_s18 + $0x4] sm:$0xf] %vm4115_vm15, %v4080_v43  ;;  %v3826_v50 = vadd.f32 %v6314_v46, %v3786_v52 }
 0x310   : > { %2817 = vst.msk [vmem:[#allocation2 + $0x68] sm:$0xf] %vm984_vm5, %v2743_v57  ;;  %v3090_v55 = vpop.f32.mrf.mxu3  ;;  %v3908_v57 = vsel %vm3897_vm14, %v3905_v4, %v3907_v27  ;;  %v4946_v4 = vld [vmem:[%s6758_s3] ss:$0 sm:$0xff] }
 0x311   : > { %2818 = vst.msk [vmem:[#allocation2 + $0x6c] sm:$0xf] %vm984_vm5, %v2744_v34  ;;  %v4009_v13 = vadd.f32 %v3904_v42, %v3826_v50  ;;  %v3260_v61 = vadd.f32 %v6274_v53, %v3090_v55 }
 0x312   : > { %v3587_v44 = vpop.f32.mrf.mxu1 }
 0x313   : > { %v4045_v58 = vmax.f32 %v4009_v13, 0.0  ;;  %v3673_v18 = vadd.f32 %v3587_v44, %v3257_v23 }
 0x315   : > { %v4081_v26 = vpack.c.bf16 %v4045_v58, %v4045_v58  ;;  %v3787_v29 = vmul.f32 %v6305_v51, %v3673_v18 }
 0x316   : > { %v1861_v7 = vpop.f32.mrf.mxu2  ;;  %v6418_v23 = vpop.f32.mrf.mxu0 }
 0x317   : > { %4118 = vst.msk [vmem:[%s6333_s18 + $0x8] sm:$0xf] %vm4115_vm15, %v4081_v26  ;;  %v3827_v5 = vadd.f32 %v6314_v46, %v3787_v29  ;;  %v1900_v32 = vadd.f32 %v1861_v7, %v1530_v41 }
 0x318   : > { %v3092_v30 = vpop.f32.mrf.mxu3  ;;  %v6380_v2 = vld [vmem:[#allocation2 + $0x68] sm:$0xff] }
 0x319   : > { %v6382_v25 = vld [vmem:[#allocation2 + $0x68] sm:$0xff]  ;;  %v4010_v10 = vadd.f32 %v3906_v12, %v3827_v5  ;;  %v1940_v6 = vmul.f32 %v5915_v33, %v1900_v32  ;;  %4617 = vmatmul.msk.bf16.gmra.mxu0 %vm1207_vm6, %v6380_v2  ;;  %v2995_v45 = vrot.slane %v6380_v2, 1  ;;  %v3262_v13 = vadd.f32 %v6286_v37, %v3092_v30  ;;  %v2053_v37 = vld [vmem:[%s6762_s7 + $0x118] sm:$0xff] }
 0x31a   : > { %v2557_v0 = vpop.permute.xlu0 %2556  ;;  %v3590_v62 = vpop.f32.mrf.mxu1  ;;  %v3493_v36 = vrot.slane %v6382_v25, 2 }
 0x31b   : > { %v4046_v53 = vmax.f32 %v4010_v10, 0.0  ;;  %v1980_v54 = vadd.f32 %v5929_v60, %v1940_v6  ;;  %v2652_v33 = vsel %vm797_vm3, %v2609_v1, %v2557_v0  ;;  %v3674_v40 = vadd.f32 %v3590_v62, %v3260_v61 }
 0x31c   : > { %v2708_v35 = vunpack.c.l.b16 %v2652_v33  ;;  %v2709_v38 = vunpack.c.h.b16 %v2652_v33  ;;  %v2996_v39 = vsel %vm669_vm0, %v2993_v3, %v2995_v45  ;;  %v3494_v43 = vsel %vm1262_vm4, %v3491_v56, %v3493_v36 }
 0x31d   : > { %v4082_v60 = vpack.c.bf16 %v4046_v53, %v4046_v53  ;;  %v3788_v52 = vmul.f32 %v6305_v51, %v3674_v40  ;;  %4589 = vmatmul.msk.bf16.gmra.mxu3 %vm1207_vm6, %v2996_v39  ;;  %4710 = vmatmul.msk.bf16.gmra.mxu1 %vm1207_vm6, %v3494_v43  ;;  %v2016_v34 = vmax.f32 %v1980_v54, 0.0  ;;  %v4839_v3 = vunpack.c.l.bf16 %v4904_v8 }
 0x31e   : > { %v2745_v42 = vpack.c.b16 %v2708_v35, %v2708_v35  ;;  %v2746_v59 = vpack.c.b16 %v2709_v38, %v2709_v38  ;;  %v1863_v15 = vpop.f32.mrf.mxu2  ;;  %v3911_v40 = vrot.slane %v4840_v22, 3 }
 0x31f   : > { %4119 = vst.msk [vmem:[%s6333_s18 + $0xc] sm:$0xf] %vm4115_vm15, %v4082_v60  ;;  %v3828_v56 = vadd.f32 %v6314_v46, %v3788_v52  ;;  %v1901_v50 = vadd.f32 %v1863_v15, %v1532_v16  ;;  %v2088_v18 = vmul.f32 %v2052_v17, %v2016_v34  ;;  %v3909_v26 = vrot.slane %v4839_v3, 3  ;;  %v2559_v16 = vpop.permute.xlu2 %2558  ;;  %v4905_v17 = vld [vmem:[%s5020_s10 + $0x28] sm:$0xff]  }
 0x320   : > { %2819 = vst.msk [vmem:[#allocation2 + $0x70] sm:$0xf] %vm984_vm5, %v2745_v42  ;;  %v3095_v55 = vpop.f32.mrf.mxu3  ;;  %v6448_v42 = vpop.f32.mrf.mxu0 }
 0x321   : > { %2820 = vst.msk [vmem:[#allocation2 + $0x74] sm:$0xf] %vm984_vm5, %v2746_v59  ;;  %v4011_v44 = vadd.f32 %v3908_v57, %v3828_v56  ;;  %v1941_v58 = vmul.f32 %v4946_v4, %v1901_v50  ;;  %v2124_v61 = vpack.c.bf16 %v2088_v18, %v2088_v18  ;;  %v3910_v10 = vsel %vm3897_vm14, %v3907_v27, %v3909_v26 }
 0x322   : > { %v3592_v41 = vpop.f32.mrf.mxu1  ;;  %v3265_v60 = vadd.f32 %v6300_v21, %v3095_v55 }
 0x323   : > { %v4047_v29 = vmax.f32 %v4011_v44, 0.0  ;;  %v1981_v12 = vadd.f32 %v4947_v24, %v1941_v58  ;;  %v3675_v7 = vadd.f32 %v3592_v41, %v3262_v13  ;;  %v2201_v43 = vunpack.c.l.b16 %v2124_v61 }
 0x324   : > { %v4843_v44 = vunpack.c.l.bf16 %v4905_v17 }
 0x325   : > { %v4083_v5 = vpack.c.bf16 %v4047_v29, %v4047_v29  ;;  %v2017_v32 = vmax.f32 %v1981_v12, 0.0  ;;  %v3789_v30 = vmul.f32 %v6305_v51, %v3675_v7 }
 0x326   : > { %v2519_v6 = vpop.permute.xlu1 %2518 }
 0x327   : > { %4120 = vst.msk [vmem:[%s6333_s18 + $0x10] sm:$0xf] %vm4115_vm15, %v4083_v5  ;;  %v2089_v1 = vmul.f32 %v2053_v37, %v2017_v32  ;;  %v3829_v0 = vadd.f32 %v6314_v46, %v3789_v30  ;;  %v2612_v62 = vsel %vm753_vm2, %v6186_v48, %v2519_v6  ;;  %v3913_v37 = vrot.slane %v4843_v44, 3 }
 0x328   : > { %v2654_v53 = vsel %vm797_vm3, %v2612_v62, %v2559_v16  ;;  %v3097_v54 = vpop.f32.mrf.mxu3  ;;  %v6439_v33 = vld [vmem:[#allocation2 + $0x70] sm:$0xff]  ;;  %v4844_v62 = vunpack.c.h.bf16 %v4905_v17 }
 0x329   : > { %v6441_v8 = vld [vmem:[#allocation2 + $0x70] sm:$0xff]  ;;  %v2125_v27 = vpack.c.bf16 %v2089_v1, %v2089_v1  ;;  %v4012_v35 = vadd.f32 %v3910_v10, %v3829_v0  ;;  %v2710_v38 = vunpack.c.l.b16 %v2654_v53  ;;  %v2711_v39 = vunpack.c.h.b16 %v2654_v53  ;;  %4618 = vmatmul.msk.bf16.gmra.mxu0 %vm1207_vm6, %v6439_v33  ;;  %v6479_v10 = vpop.f32.mrf.mxu0 }
 0x32a   : > { %v3595_v48 = vpop.f32.mrf.mxu1  ;;  %v2997_v52 = vrot.slane %v6439_v33, 1  ;;  %v3495_v57 = vrot.slane %v6441_v8, 2  ;;  %v3267_v41 = vadd.f32 %v6328_v47, %v3097_v54  ;;  %v3914_v0 = vsel %vm3897_vm14, %v3911_v40, %v3913_v37 }
 0x32b   : > { %v2202_v34 = vunpack.c.l.b16 %v2125_v27  ;;  %v4048_v59 = vmax.f32 %v4012_v35, 0.0  ;;  %v2747_v15 = vpack.c.b16 %v2710_v38, %v2710_v38  ;;  %v2748_v3 = vpack.c.b16 %v2711_v39, %v2711_v39 }
 0x32c   : > { %v3676_v56 = vadd.f32 %v3595_v48, %v3265_v60  ;;  %v2998_v21 = vsel %vm669_vm0, %v2995_v45, %v2997_v52  ;;  %v3496_v50 = vsel %vm1262_vm4, %v3493_v36, %v3495_v57  ;;  %v3912_v45 = vsel %vm3897_vm14, %v3909_v26, %v3911_v40 }
 0x32d   : > { %v4084_v55 = vpack.c.bf16 %v4048_v59, %v4048_v59  ;;  %2821 = vst.msk [vmem:[#allocation2 + $0x78] sm:$0xf] %vm984_vm5, %v2747_v15  ;;  %4590 = vmatmul.msk.bf16.gmra.mxu3 %vm1207_vm6, %v2998_v21  ;;  %4711 = vmatmul.msk.bf16.gmra.mxu1 %vm1207_vm6, %v3496_v50  ;;  %v2220_v13 = vpack.c.b16 %v2202_v34, %v2201_v43  ;;  %v3915_v34 = vrot.slane %v4844_v62, 3 }
 0x32e   : > { %2822 = vst.msk [vmem:[#allocation2 + $0x7c] sm:$0xf] %vm984_vm5, %v2748_v3  ;;  %v3790_v2 = vmul.f32 %v6305_v51, %v3676_v56  ;;  %v4906_v3 = vld [vmem:[%s5020_s10 + $0x30] sm:$0xff]  }
 0x32f   : > { %4121 = vst.msk [vmem:[%s6333_s18 + $0x14] sm:$0xf] %vm4115_vm15, %v4084_v55  ;;  %v2421_v25 = vrot.slane %v2220_v13, 7  ;;  %v2375_v4 = vshrl.u32 %v2220_v13, 16  ;;  %v2378_v36 = vshll.u32 %v2220_v13, 16  ;;  %v4847_v33 = vunpack.c.l.bf16 %v4906_v3 }
 0x330   : > { %v3830_v58 = vadd.f32 %v6314_v46, %v3790_v2  ;;  %v3100_v18 = vpop.f32.mrf.mxu3  ;;  %v3916_v2 = vsel %vm3897_vm14, %v3913_v37, %v3915_v34 }
 0x331   : > { %v2428_v29 = vsel %vm2387_vm7, %v2421_v25, 0  ;;  %v2422_v24 = vsel %vm2387_vm7, %v2419_v20, %v2421_v25  ;;  %v2480_v12 = vrot.slane %v2375_v4, 7  ;;  %v2377_v22 = vrot.slane %v2375_v4, 6  ;;  %v6519_v44 = vpop.f32.mrf.mxu0 }
 0x332   : > { %v4013_v7 = vadd.f32 %v3912_v45, %v3830_v58  ;;  %2526 = vrot.lane.b32.xlu0 %v2428_v29, %s4959_s12  ;;  %2524 = vrot.lane.b32.xlu1 %v2422_v24, %s4959_s12  ;;  %v3597_v26 = vpop.f32.mrf.mxu1  ;;  %v2380_v5 = vrot.slane %v2378_v36, 7  ;;  %v3270_v38 = vadd.f32 %v6359_v11, %v3100_v18  ;;  %v3917_v4 = vrot.slane %v4847_v33, 3 }
 0x333   : > { %v3677_v32 = vadd.f32 %v3597_v26, %v3267_v41  ;;  %v2481_v30 = vor.u32 %v2480_v12, %v2378_v36  ;;  %v2487_v40 = vsel %vm5576_vm9, %v2480_v12, 0  ;;  %v4848_v24 = vunpack.c.h.bf16 %v4906_v3  ;;  %v2523_v12 = vpop.permute.xlu2 %2522 }
 0x334   : > { %v4049_v47 = vmax.f32 %v4013_v7, 0.0  ;;  %v6477_v61 = vor.u32 %v2380_v5, %v2377_v22  ;;  %v3918_v29 = vsel %vm3897_vm14, %v3915_v34, %v3917_v4  ;;  %v2373_v22 = vsel %vm2221_vm10, %v6220_v49, %v6254_v14  ;;  %v4907_v49 = vld [vmem:[%s5020_s10 + $0x38] sm:$0xff]  }
 0x335   : > { %v3791_v31 = vmul.f32 %v6305_v51, %v3677_v32  ;;  %v2482_v20 = vsel %vm2429_vm8, %v6250_v63, %v2481_v30  ;;  %v6484_v6 = vld [vmem:[#allocation2 + $0x78] sm:$0xff] }
 0x336   : > { %v6486_v16 = vld [vmem:[#allocation2 + $0x78] sm:$0xff]  ;;  %v4085_v1 = vpack.c.bf16 %v4049_v47, %v4049_v47  ;;  %2564 = vrot.lane.b32.xlu2 %v2482_v20, %s4958_s11  ;;  %v2521_v54 = vpop.permute.xlu0 %2520  ;;  %v2999_v35 = vrot.slane %v6484_v6, 1  ;;  %v2618_v47 = vsel %vm753_vm2, %v2373_v22, %v2523_v12 }
 0x337   : > { %v3831_v53 = vadd.f32 %v6314_v46, %v3791_v31  ;;  %v3497_v63 = vrot.slane %v6486_v16, 2  ;;  %v2615_v43 = vsel %vm753_vm2, %v6231_v9, %v2521_v54 }
 0x338   : > { %4122 = vst.msk [vmem:[%s6333_s18 + $0x18] sm:$0xf] %vm4115_vm15, %v4085_v1  ;;  %v3102_v27 = vpop.f32.mrf.mxu3  ;;  %v3000_v9 = vsel %vm669_vm0, %v2997_v52, %v2999_v35  ;;  %v3919_v1 = vrot.slane %v4848_v24, 3 }
 0x339   : > { %v4014_v39 = vadd.f32 %v3914_v0, %v3831_v53  ;;  %4619 = vmatmul.msk.bf16.gmra.mxu0 %vm1207_vm6, %v6484_v6  ;;  %v3498_v56 = vsel %vm1262_vm4, %v3495_v57, %v3497_v63  ;;  %v3272_v57 = vadd.f32 %v6377_v19, %v3102_v27  ;;  %v6535_v5 = vpop.f32.mrf.mxu0 }
 0x33a   : > { %2566 = vrot.lane.b32.xlu1 %v2487_v40, %s4958_s11  ;;  %v2561_v60 = vpop.permute.xlu1 %2560  ;;  %v3600_v48 = vpop.f32.mrf.mxu1 }
 0x33b   : > { %v4050_v59 = vmax.f32 %v4014_v39, 0.0  ;;  %v2656_v15 = vsel %vm797_vm3, %v2615_v43, %v2561_v60  ;;  %v3678_v11 = vadd.f32 %v3600_v48, %v3270_v38 }
 0x33c   : > { %v2712_v17 = vunpack.c.l.b16 %v2656_v15  ;;  %v2713_v28 = vunpack.c.h.b16 %v2656_v15  ;;  %v4851_v15 = vunpack.c.l.bf16 %v4907_v49 }
 0x33d   : > { %v4086_v21 = vpack.c.bf16 %v4050_v59, %v4050_v59  ;;  %v3792_v50 = vmul.f32 %v6305_v51, %v3678_v11  ;;  %4591 = vmatmul.msk.bf16.gmra.mxu3 %vm1207_vm6, %v3000_v9  ;;  %4712 = vmatmul.msk.bf16.gmra.mxu1 %vm1207_vm6, %v3498_v56  ;;  %v3920_v59 = vsel %vm3897_vm14, %v3917_v4, %v3919_v1 }
 0x33e   : > { %v2749_v55 = vpack.c.b16 %v2712_v17, %v2712_v17  ;;  %v2750_v13 = vpack.c.b16 %v2713_v28, %v2713_v28  ;;  %v3921_v3 = vrot.slane %v4851_v15, 3 }
 0x33f   : > { %4123 = vst.msk [vmem:[%s6333_s18 + $0x1c] sm:$0xf] %vm4115_vm15, %v4086_v21  ;;  %v3832_v8 = vadd.f32 %v6314_v46, %v3792_v50 }
 0x340   : > { %2823 = vst.msk [vmem:[#allocation2 + $0x80] sm:$0xf] %vm984_vm5, %v2749_v55  ;;  %v3105_v52 = vpop.f32.mrf.mxu3  ;;  %v3922_v50 = vsel %vm3897_vm14, %v3919_v1, %v3921_v3  ;;  %v4852_v55 = vunpack.c.h.bf16 %v4907_v49 }
 0x341   : > { %2824 = vst.msk [vmem:[#allocation2 + $0x84] sm:$0xf] %vm984_vm5, %v2750_v13  ;;  %v4015_v45 = vadd.f32 %v3916_v2, %v3832_v8  ;;  %v3275_v32 = vadd.f32 %v6418_v23, %v3105_v52  ;;  %v3286_v9 = vpop.f32.mrf.mxu0 }
 0x342   : > { %v3602_v25 = vpop.f32.mrf.mxu1 }
 0x343   : > { %v4051_v36 = vmax.f32 %v4015_v45, 0.0  ;;  %v3679_v58 = vadd.f32 %v3602_v25, %v3272_v57  ;;  %v3923_v45 = vrot.slane %v4852_v55, 3 }
 0x345   : > { %v4087_v18 = vpack.c.bf16 %v4051_v36, %v4051_v36  ;;  %v3793_v41 = vmul.f32 %v6305_v51, %v3679_v58 }
 0x347   : > { %4124 = vst.msk [vmem:[%s6333_s18 + $0x20] sm:$0xf] %vm4115_vm15, %v4087_v18  ;;  %v3833_v7 = vadd.f32 %v6314_v46, %v3793_v41  ;;  %v4908_v18 = vld [vmem:[%s5020_s10 + $0x40] sm:$0xff]  }
 0x348   : > { %v3107_v26 = vpop.f32.mrf.mxu3  ;;  %v4793_v19 = vld [vmem:[#allocation2 + $0x80] sm:$0xff] }
 0x349   : > { %v4812_v37 = vld [vmem:[#allocation2 + $0x80] sm:$0xff]  ;;  %v4016_v30 = vadd.f32 %v3918_v29, %v3833_v7  ;;  %4620 = vmatmul.msk.bf16.gmra.mxu0 %vm1207_vm6, %v4793_v19  ;;  %v3001_v0 = vrot.slane %v4793_v19, 1  ;;  %v3289_v12 = vpop.f32.mrf.mxu0  ;;  %v3924_v7 = vsel %vm3897_vm14, %v3921_v3, %v3923_v45 }
 0x34a   : > { %v2563_v31 = vpop.permute.xlu0 %2562  ;;  %v3605_v20 = vpop.f32.mrf.mxu1  ;;  %v3499_v62 = vrot.slane %v4812_v37, 2 }
 0x34b   : > { %v4052_v53 = vmax.f32 %v4016_v30, 0.0  ;;  %v2658_v54 = vsel %vm797_vm3, %v2618_v47, %v2563_v31  ;;  %v3680_v27 = vadd.f32 %v3605_v20, %v3275_v32  ;;  %v3002_v23 = vsel %vm669_vm0, %v2999_v35, %v3001_v0 }
 0x34c   : > { %v2714_v38 = vunpack.c.l.b16 %v2658_v54  ;;  %v2715_v39 = vunpack.c.h.b16 %v2658_v54  ;;  %v3500_v40 = vsel %vm1262_vm4, %v3497_v63, %v3499_v62  ;;  %v3277_v35 = vadd.f32 %v6448_v42, %v3107_v26 }
 0x34d   : > { %v4088_v43 = vpack.c.bf16 %v4052_v53, %v4052_v53  ;;  %v3794_v60 = vmul.f32 %v6305_v51, %v3680_v27  ;;  %4592 = vmatmul.msk.bf16.gmra.mxu3 %vm1207_vm6, %v3002_v23  ;;  %4713 = vmatmul.msk.bf16.gmra.mxu1 %vm1207_vm6, %v3500_v40  ;;  %v4855_v26 = vunpack.c.l.bf16 %v4908_v18  ;;  %v4856_v53 = vunpack.c.h.bf16 %v4908_v18 }
 0x34e   : > { %v2751_v48 = vpack.c.b16 %v2714_v38, %v2714_v38  ;;  %v2752_v34 = vpack.c.b16 %v2715_v39, %v2715_v39 }
 0x34f   : > { %4125 = vst.msk [vmem:[%s6333_s18 + $0x24] sm:$0xf] %vm4115_vm15, %v4088_v43  ;;  %v3834_v6 = vadd.f32 %v6314_v46, %v3794_v60  ;;  %v3925_v47 = vrot.slane %v4855_v26, 3  ;;  %v3927_v23 = vrot.slane %v4856_v53, 3  ;;  %v4909_v60 = vld [vmem:[%s5020_s10 + $0x48] sm:$0xff]  }
 0x350   : > { %2825 = vst.msk [vmem:[#allocation2 + $0x88] sm:$0xf] %vm984_vm5, %v2751_v48  ;;  %v3110_v16 = vpop.f32.mrf.mxu3  ;;  %v4859_v15 = vunpack.c.l.bf16 %v4909_v60  ;;  %v4860_v55 = vunpack.c.h.bf16 %v4909_v60 }
 0x351   : > { %2826 = vst.msk [vmem:[#allocation2 + $0x8c] sm:$0xf] %vm984_vm5, %v2752_v34  ;;  %v4017_v63 = vadd.f32 %v3920_v59, %v3834_v6  ;;  %v3280_v8 = vadd.f32 %v6479_v10, %v3110_v16  ;;  %v3291_v27 = vpop.f32.mrf.mxu0  ;;  %v3928_v59 = vsel %vm3897_vm14, %v3925_v47, %v3927_v23 }
 0x352   : > { %v3607_v11 = vpop.f32.mrf.mxu1  ;;  %v3929_v3 = vrot.slane %v4859_v15, 3 }
 0x353   : > { %v4053_v17 = vmax.f32 %v4017_v63, 0.0  ;;  %v3681_v28 = vadd.f32 %v3607_v11, %v3277_v35 }
 0x355   : > { %v4089_v56 = vpack.c.bf16 %v4053_v17, %v4053_v17  ;;  %v3795_v21 = vmul.f32 %v6305_v51, %v3681_v28 }
 0x357   : > { %4126 = vst.msk [vmem:[%s6333_s18 + $0x28] sm:$0xf] %vm4115_vm15, %v4089_v56  ;;  %v3835_v13 = vadd.f32 %v6314_v46, %v3795_v21 }
 0x358   : > { %v3112_v42 = vpop.f32.mrf.mxu3  ;;  %v6563_v2 = vld [vmem:[#allocation2 + $0x88] sm:$0xff] }
 0x359   : > { %v6565_v33 = vld [vmem:[#allocation2 + $0x88] sm:$0xff]  ;;  %v4018_v52 = vadd.f32 %v3922_v50, %v3835_v13  ;;  %4621 = vmatmul.msk.bf16.gmra.mxu0 %vm1207_vm6, %v6563_v2  ;;  %v3003_v25 = vrot.slane %v6563_v2, 1  ;;  %v3282_v22 = vadd.f32 %v6519_v44, %v3112_v42  ;;  %v3294_v63 = vpop.f32.mrf.mxu0  ;;  %v3930_v50 = vsel %vm3897_vm14, %v3927_v23, %v3929_v3  ;;  %v4911_v23 = vld [vmem:[%s5020_s10 + $0x58] sm:$0xff]  }
 0x35a   : > { %v3610_v57 = vpop.f32.mrf.mxu1  ;;  %v3501_v4 = vrot.slane %v6565_v33, 2 }
 0x35b   : > { %v4054_v36 = vmax.f32 %v4018_v52, 0.0  ;;  %v3682_v58 = vadd.f32 %v3610_v57, %v3280_v8  ;;  %v3004_v41 = vsel %vm669_vm0, %v3001_v0, %v3003_v25  ;;  %v3931_v57 = vrot.slane %v4860_v55, 3 }
 0x35c   : > { %v3502_v10 = vsel %vm1262_vm4, %v3499_v62, %v3501_v4  ;;  %v3926_v62 = vsel %vm3897_vm14, %v3923_v45, %v3925_v47 }
 0x35d   : > { %v4090_v29 = vpack.c.bf16 %v4054_v36, %v4054_v36  ;;  %v3796_v24 = vmul.f32 %v6305_v51, %v3682_v58  ;;  %4593 = vmatmul.msk.bf16.gmra.mxu3 %vm1207_vm6, %v3004_v41  ;;  %4714 = vmatmul.msk.bf16.gmra.mxu1 %vm1207_vm6, %v3502_v10  ;;  %v4910_v58 = vld [vmem:[%s5020_s10 + $0x50] sm:$0xff]  }
 0x35f   : > { %4127 = vst.msk [vmem:[%s6333_s18 + $0x2c] sm:$0xf] %vm4115_vm15, %v4090_v29  ;;  %v3836_v19 = vadd.f32 %v6314_v46, %v3796_v24  ;;  %v3932_v29 = vsel %vm3897_vm14, %v3929_v3, %v3931_v57  ;;  %v4863_v24 = vunpack.c.l.bf16 %v4910_v58 }
 0x360   : > { %v3115_v37 = vpop.f32.mrf.mxu3 }
 0x361   : > { %v4019_v32 = vadd.f32 %v3924_v7, %v3836_v19  ;;  %v3285_v44 = vadd.f32 %v6535_v5, %v3115_v37  ;;  %v3296_v18 = vpop.f32.mrf.mxu0 }
 0x362   : > { %v3612_v30 = vpop.f32.mrf.mxu1 }
 0x363   : > { %v4055_v31 = vmax.f32 %v4019_v32, 0.0  ;;  %v3683_v20 = vadd.f32 %v3612_v30, %v3282_v22  ;;  %v3933_v22 = vrot.slane %v4863_v24, 3 }
 0x365   : > { %v4091_v1 = vpack.c.bf16 %v4055_v31, %v4055_v31  ;;  %v3797_v0 = vmul.f32 %v6305_v51, %v3683_v20 }
 0x367   : > { %4128 = vst.msk [vmem:[%s6333_s18 + $0x30] sm:$0xf] %vm4115_vm15, %v4091_v1  ;;  %v3837_v54 = vadd.f32 %v6314_v46, %v3797_v0  ;;  %v3934_v1 = vsel %vm3897_vm14, %v3931_v57, %v3933_v22  ;;  %v4864_v0 = vunpack.c.h.bf16 %v4910_v58 }
 0x368   : > { %v3117_v49 = vpop.f32.mrf.mxu3 }
 0x369   : > { %v4020_v38 = vadd.f32 %v3926_v62, %v3837_v54  ;;  %v3287_v35 = vadd.f32 %v3286_v9, %v3117_v49  ;;  %v3299_v20 = vpop.f32.mrf.mxu0 }
 0x36a   : > { %v3615_v39 = vpop.f32.mrf.mxu1 }
 0x36b   : > { %v4056_v40 = vmax.f32 %v4020_v38, 0.0  ;;  %v3684_v43 = vadd.f32 %v3615_v39, %v3285_v44  ;;  %v3935_v44 = vrot.slane %v4864_v0, 3 }
 0x36d   : > { %v4092_v48 = vpack.c.bf16 %v4056_v40, %v4056_v40  ;;  %v3798_v34 = vmul.f32 %v6305_v51, %v3684_v43  ;;  %v3936_v60 = vsel %vm3897_vm14, %v3933_v22, %v3935_v44 }
 0x36f   : > { %4129 = vst.msk [vmem:[%s6333_s18 + $0x34] sm:$0xf] %vm4115_vm15, %v4092_v48  ;;  %v3838_v6 = vadd.f32 %v6314_v46, %v3798_v34  ;;  %v4867_v48 = vunpack.c.l.bf16 %v4911_v23 }
 0x370   : > { %v3120_v16 = vpop.f32.mrf.mxu3 }
 0x371   : > { %v4021_v5 = vadd.f32 %v3928_v59, %v3838_v6  ;;  %v3290_v9 = vadd.f32 %v3289_v12, %v3120_v16  ;;  %v3301_v59 = vpop.f32.mrf.mxu0 }
 0x372   : > { %v3617_v11 = vpop.f32.mrf.mxu1 }
 0x373   : > { %v4057_v17 = vmax.f32 %v4021_v5, 0.0  ;;  %v3685_v28 = vadd.f32 %v3617_v11, %v3287_v35  ;;  %v3937_v5 = vrot.slane %v4867_v48, 3 }
 0x375   : > { %v4093_v56 = vpack.c.bf16 %v4057_v17, %v4057_v17  ;;  %v3799_v21 = vmul.f32 %v6305_v51, %v3685_v28  ;;  %v3938_v28 = vsel %vm3897_vm14, %v3935_v44, %v3937_v5 }
 0x377   : > { %4130 = vst.msk [vmem:[%s6333_s18 + $0x38] sm:$0xf] %vm4115_vm15, %v4093_v56  ;;  %v3839_v13 = vadd.f32 %v6314_v46, %v3799_v21  ;;  %v4868_v56 = vunpack.c.h.bf16 %v4911_v23 }
 0x378   : > { %v3122_v42 = vpop.f32.mrf.mxu3 }
 0x379   : > { %v4022_v8 = vadd.f32 %v3930_v50, %v3839_v13  ;;  %v3292_v12 = vadd.f32 %v3291_v27, %v3122_v42  ;;  %v3304_v42 = vpop.f32.mrf.mxu0 }
 0x37a   : > { %v3620_v52 = vpop.f32.mrf.mxu1 }
 0x37b   : > { %v4058_v45 = vmax.f32 %v4022_v8, 0.0  ;;  %v3686_v36 = vadd.f32 %v3620_v52, %v3290_v9  ;;  %v3939_v8 = vrot.slane %v4868_v56, 3 }
 0x37d   : > { %v4094_v41 = vpack.c.bf16 %v4058_v45, %v4058_v45  ;;  %v3800_v10 = vmul.f32 %v6305_v51, %v3686_v36  ;;  %v4912_v45 = vld [vmem:[%s5020_s10 + $0x60] sm:$0xff]  }
 0x37f   : > { %4131 = vst.msk [vmem:[%s6333_s18 + $0x3c] sm:$0xf] %vm4115_vm15, %v4094_v41  ;;  %v3840_v7 = vadd.f32 %v6314_v46, %v3800_v10  ;;  %v4871_v41 = vunpack.c.l.bf16 %v4912_v45 }
 0x380   : > { %v3125_v26 = vpop.f32.mrf.mxu3 }
 0x381   : > { %v4023_v19 = vadd.f32 %v3932_v29, %v3840_v7  ;;  %v3295_v54 = vadd.f32 %v3294_v63, %v3125_v26  ;;  %v3306_v22 = vpop.f32.mrf.mxu0 }
 0x382   : > { %v3622_v37 = vpop.f32.mrf.mxu1 }
 0x383   : > { %v4059_v32 = vmax.f32 %v4023_v19, 0.0  ;;  %v3687_v30 = vadd.f32 %v3622_v37, %v3292_v12  ;;  %v3941_v12 = vrot.slane %v4871_v41, 3 }
 0x385   : > { %v4095_v47 = vpack.c.bf16 %v4059_v32, %v4059_v32  ;;  %v3801_v31 = vmul.f32 %v6305_v51, %v3687_v30  ;;  %v2382_v32 = vsel %vm2221_vm10, %v6254_v14, %v6477_v61  ;;  %v3942_v0 = vsel %vm3897_vm14, %v3939_v8, %v3941_v12 }
 0x387   : > { %4132 = vst.msk [vmem:[%s6333_s18 + $0x40] sm:$0xf] %vm4115_vm15, %v4095_v47  ;;  %v3841_v62 = vadd.f32 %v6314_v46, %v3801_v31 }
 0x388   : > { %v3127_v53 = vpop.f32.mrf.mxu3 }
 0x389   : > { %v4024_v27 = vadd.f32 %v3934_v1, %v3841_v62  ;;  %v3297_v6 = vadd.f32 %v3296_v18, %v3127_v53  ;;  %v3940_v18 = vsel %vm3897_vm14, %v3937_v5, %v3939_v8  ;;  %v4872_v53 = vunpack.c.h.bf16 %v4912_v45 }
 0x38a   : > { %v3625_v49 = vpop.f32.mrf.mxu1 }
 0x38b   : > { %v4060_v38 = vmax.f32 %v4024_v27, 0.0  ;;  %v3688_v39 = vadd.f32 %v3625_v49, %v3295_v54 }
 0x38d   : > { %v4096_v40 = vpack.c.bf16 %v4060_v38, %v4060_v38  ;;  %v3802_v43 = vmul.f32 %v6305_v51, %v3688_v39 }
 0x38f   : > { %4133 = vst.msk [vmem:[%s6333_s18 + $0x44] sm:$0xf] %vm4115_vm15, %v4096_v40  ;;  %v3842_v34 = vadd.f32 %v6314_v46, %v3802_v43 }
 0x390   : > { %v3130_v15 = vpop.f32.mrf.mxu3  ;;  %v2565_v47 = vpop.permute.xlu2 %2564 }
 0x391   : > { %v4025_v16 = vadd.f32 %v3936_v60, %v3842_v34  ;;  %v3300_v55 = vadd.f32 %v3299_v20, %v3130_v15  ;;  %v3943_v60 = vrot.slane %v4872_v53, 3 }
 0x392   : > { %v3627_v35 = vpop.f32.mrf.mxu1 }
 0x393   : > { %v4061_v63 = vmax.f32 %v4025_v16, 0.0  ;;  %v3689_v11 = vadd.f32 %v3627_v35, %v3297_v6 }
 0x395   : > { %v4097_v3 = vpack.c.bf16 %v4061_v63, %v4061_v63  ;;  %v3803_v17 = vmul.f32 %v6305_v51, %v3689_v11  ;;  %v3309_v63 = vpop.f32.mrf.mxu0  ;;  %v3944_v11 = vsel %vm3897_vm14, %v3941_v12, %v3943_v60 }
 0x397   : > { %4134 = vst.msk [vmem:[%s6333_s18 + $0x48] sm:$0xf] %vm4115_vm15, %v4097_v3  ;;  %v3843_v21 = vadd.f32 %v6314_v46, %v3803_v17 }
 0x398   : > { %v3132_v50 = vpop.f32.mrf.mxu3 }
 0x399   : > { %v4026_v13 = vadd.f32 %v3938_v28, %v3843_v21  ;;  %v3302_v24 = vadd.f32 %v3301_v59, %v3132_v50  ;;  %v4913_v59 = vld [vmem:[%s5020_s10 + $0x68] sm:$0xff]   ;;  %v2831_v28 = vld [vmem:[#allocation2 + $0x98] sm:$0x3] }
 0x39a   : > { %v3630_v9 = vpop.f32.mrf.mxu1  ;;  %v4875_v17 = vunpack.c.l.bf16 %v4913_v59 }
 0x39b   : > { %v4062_v52 = vmax.f32 %v4026_v13, 0.0  ;;  %v3690_v57 = vadd.f32 %v3630_v9, %v3300_v55 }
 0x39d   : > { %v4098_v36 = vpack.c.bf16 %v4062_v52, %v4062_v52  ;;  %v3804_v58 = vmul.f32 %v6305_v51, %v3690_v57  ;;  %v3311_v12 = vpop.f32.mrf.mxu0 }
 0x39f   : > { %4135 = vst.msk [vmem:[%s6333_s18 + $0x4c] sm:$0xf] %vm4115_vm15, %v4098_v36  ;;  %v3844_v10 = vadd.f32 %v6314_v46, %v3804_v58  ;;  %v6658_v36 = vld [vmem:[%s6760_s5] ss:$0 sm:$0xff] }
 0x3a0   : > { %v3135_v29 = vpop.f32.mrf.mxu3 }
 0x3a1   : > { %v4027_v7 = vadd.f32 %v3940_v18, %v3844_v10  ;;  %v3305_v44 = vadd.f32 %v3304_v42, %v3135_v29  ;;  %v3945_v42 = vrot.slane %v4875_v17, 3  ;;  %v4876_v29 = vunpack.c.h.bf16 %v4913_v59 }
 0x3a2   : > { %v3632_v26 = vpop.f32.mrf.mxu1 }
 0x3a3   : > { %v4063_v19 = vmax.f32 %v4027_v7, 0.0  ;;  %v3691_v37 = vadd.f32 %v3632_v26, %v3302_v24  ;;  %v3946_v10 = vsel %vm3897_vm14, %v3943_v60, %v3945_v42 }
 0x3a4   : > { %v2525_v30 = vpop.permute.xlu1 %2524  ;;  %v2527_v39 = vpop.permute.xlu0 %2526 }
 0x3a5   : > { %v4099_v31 = vpack.c.bf16 %v4063_v19, %v4063_v19  ;;  %v3805_v20 = vmul.f32 %v6305_v51, %v3691_v37  ;;  %v2621_v1 = vsel %vm753_vm2, %v2382_v32, %v2525_v30  ;;  %v2624_v15 = vsel %vm753_vm2, %v6477_v61, %v2527_v39 }
 0x3a6   : > { %v2660_v62 = vsel %vm797_vm3, %v2621_v1, %v2565_v47  ;;  %v3947_v30 = vrot.slane %v4876_v29, 3 }
 0x3a7   : > { %4136 = vst.msk [vmem:[%s6333_s18 + $0x50] sm:$0xf] %vm4115_vm15, %v4099_v31  ;;  %v3845_v54 = vadd.f32 %v6314_v46, %v3805_v20  ;;  %v2716_v27 = vunpack.c.l.b16 %v2660_v62  ;;  %v2717_v49 = vunpack.c.h.b16 %v2660_v62  ;;  %v4914_v31 = vld [vmem:[%s5020_s10 + $0x70] sm:$0xff]  }
 0x3a8   : > { %v3137_v14 = vpop.f32.mrf.mxu3  ;;  %v4879_v1 = vunpack.c.l.bf16 %v4914_v31 }
 0x3a9   : > { %v4028_v38 = vadd.f32 %v3942_v0, %v3845_v54  ;;  %v2753_v23 = vpack.c.b16 %v2716_v27, %v2716_v27  ;;  %v2754_v40 = vpack.c.b16 %v2717_v49, %v2717_v49  ;;  %v3307_v50 = vadd.f32 %v3306_v22, %v3137_v14  ;;  %v6681_v0 = vld [vmem:[%s6761_s6] ss:$0 sm:$0xff] }
 0x3aa   : > { %v3635_v43 = vpop.f32.mrf.mxu1  ;;  %v3949_v39 = vrot.slane %v4879_v1, 3 }
 0x3ab   : > { %v4064_v48 = vmax.f32 %v4028_v38, 0.0  ;;  %2827 = vst.msk [vmem:[#allocation2 + $0x90] sm:$0xf] %vm984_vm5, %v2753_v23  ;;  %v3692_v34 = vadd.f32 %v3635_v43, %v3305_v44  ;;  %v3314_v44 = vpop.f32.mrf.mxu0 }
 0x3ac   : > { %2828 = vst.msk [vmem:[#allocation2 + $0x94] sm:$0xf] %vm984_vm5, %v2754_v40  ;;  %v2567_v6 = vpop.permute.xlu1 %2566  ;;  %v3950_v59 = vsel %vm3897_vm14, %v3947_v30, %v3949_v39 }
 0x3ad   : > { %v4100_v16 = vpack.c.bf16 %v4064_v48, %v4064_v48  ;;  %v3806_v35 = vmul.f32 %v6305_v51, %v3692_v34  ;;  %v2662_v5 = vsel %vm797_vm3, %v2624_v15, %v2567_v6  ;;  %v4880_v15 = vunpack.c.h.bf16 %v4914_v31 }
 0x3ae   : > { %v2718_v3 = vunpack.c.l.b16 %v2662_v5  ;;  %v3375_v5 = vld [vmem:[#allocation2 + $0xa0] sm:$0x3] }
 0x3af   : > { %4137 = vst.msk [vmem:[%s6333_s18 + $0x54] sm:$0xf] %vm4115_vm15, %v4100_v16  ;;  %v3846_v61 = vadd.f32 %v6314_v46, %v3806_v35 }
 0x3b0   : > { %v2755_v56 = vpack.c.b16 %v2718_v3, %v2718_v3  ;;  %v3140_v21 = vpop.f32.mrf.mxu3 }
 0x3b1   : > { %v4029_v55 = vadd.f32 %v3944_v11, %v3846_v61  ;;  %v3310_v37 = vadd.f32 %v3309_v63, %v3140_v21  ;;  %v3951_v61 = vrot.slane %v4880_v15, 3  ;;  %v4915_v21 = vld [vmem:[%s5020_s10 + $0x78] sm:$0xff]  }
 0x3b2   : > { %v2832_v51 = vsel %vm2830_vm1, %v2755_v56, %v2831_v28  ;;  %v3637_v13 = vpop.f32.mrf.mxu1 }
 0x3b3   : > { %v4065_v9 = vmax.f32 %v4029_v55, 0.0  ;;  %2833 = vst [vmem:[#allocation2 + $0x98] sm:$0x3] %v2832_v51  ;;  %v3693_v8 = vadd.f32 %v3637_v13, %v3307_v50  ;;  %v4796_v52 = vld [vmem:[#allocation2 + $0x90] sm:$0xff]  ;;  %v3452_v50 = vunpack.c.l.b16 %v3375_v5  ;;  %v3316_v55 = vpop.f32.mrf.mxu0 }
 0x3b4   : > { %v4814_v57 = vld [vmem:[#allocation2 + $0x90] sm:$0xff]  ;;  %v3005_v18 = vrot.slane %v4796_v52, 1 }
 0x3b5   : > { %v4101_v45 = vpack.c.bf16 %v4065_v9, %v4065_v9  ;;  %v3807_v58 = vmul.f32 %v6658_v36, %v3693_v8  ;;  %v3503_v41 = vrot.slane %v4814_v57, 2  ;;  %v4883_v9 = vunpack.c.l.bf16 %v4915_v21 }
 0x3b6   : > { %v3006_v7 = vsel %vm669_vm0, %v3003_v25, %v3005_v18  ;;  %v3471_v52 = vpack.c.b16 %v3452_v50, %v3452_v50 }
 0x3b7   : > { %4138 = vst.msk [vmem:[%s6333_s18 + $0x58] sm:$0xf] %vm4115_vm15, %v4101_v45  ;;  %v3847_v24 = vadd.f32 %v6314_v46, %v3807_v58  ;;  %v3504_v26 = vsel %vm1262_vm4, %v3501_v4, %v3503_v41  ;;  %4594 = vmatmul.msk.bf16.gmra.mxu3 %vm1207_vm6, %v3006_v7  ;;  %v3948_v4 = vsel %vm3897_vm14, %v3945_v42, %v3947_v30 }
 0x3b8   : > { %v3142_v19 = vpop.f32.mrf.mxu3  ;;  %4715 = vmatmul.msk.bf16.gmra.mxu1 %vm1207_vm6, %v3504_v26  ;;  %v3952_v42 = vsel %vm3897_vm14, %v3949_v39, %v3951_v61  ;;  %v3507_v29 = vrot.slane %v3471_v52, 2 }
 0x3b9   : > { %v4030_v22 = vadd.f32 %v3946_v10, %v3847_v24  ;;  %v3312_v49 = vadd.f32 %v3311_v12, %v3142_v19 }
 0x3ba   : > { %v3640_v32 = vpop.f32.mrf.mxu1  ;;  %v2875_v46 = vld [vmem:[#allocation2 + $0x98] sm:$0x1] }
 0x3bb   : > { %v4066_v47 = vmax.f32 %v4030_v22, 0.0  ;;  %v3694_v2 = vadd.f32 %v3640_v32, %v3310_v37  ;;  %v2952_v25 = vunpack.c.l.b16 %v2875_v46  ;;  %v4815_v54 = vld [vmem:[#allocation2 + $0x98] sm:$0xff]  ;;  %v3319_v12 = vpop.f32.mrf.mxu0  ;;  %v4884_v37 = vunpack.c.h.bf16 %v4915_v21 }
 0x3bc   : > { %v3505_v60 = vrot.slane %v4815_v54, 2 }
 0x3bd   : > { %v4102_v20 = vpack.c.bf16 %v4066_v47, %v4066_v47  ;;  %v3808_v33 = vmul.f32 %v6658_v36, %v3694_v2  ;;  %v2971_v53 = vpack.c.b16 %v2952_v25, %v2952_v25  ;;  %v3955_v2 = vrot.slane %v4884_v37, 3 }
 0x3be   : > { %v3506_v35 = vsel %vm1262_vm4, %v3503_v41, %v3505_v60  ;;  %v3508_v32 = vsel %vm1262_vm4, %v3505_v60, %v3507_v29 }
 0x3bf   : > { %4139 = vst.msk [vmem:[%s6333_s18 + $0x5c] sm:$0xf] %vm4115_vm15, %v4102_v20  ;;  %v3848_v62 = vadd.f32 %v6681_v0, %v3808_v33  ;;  %v3007_v43 = vrot.slane %v2971_v53, 1  ;;  %v4916_v20 = vld [vmem:[%s5020_s10 + $0x80] sm:$0xff]  }
 0x3c0   : > { %v3145_v27 = vpop.f32.mrf.mxu3  ;;  %v4887_v53 = vunpack.c.l.bf16 %v4916_v20 }
 0x3c1   : > { %v4031_v14 = vadd.f32 %v3948_v4, %v3848_v62  ;;  %v3008_v16 = vsel %vm669_vm0, %v3005_v18, %v3007_v43  ;;  %v3315_v63 = vadd.f32 %v3314_v44, %v3145_v27  ;;  %v3953_v18 = vrot.slane %v4883_v9, 3 }
 0x3c2   : > { %v3642_v38 = vpop.f32.mrf.mxu1 }
 0x3c3   : > { %v4067_v23 = vmax.f32 %v4031_v14, 0.0  ;;  %v3695_v40 = vadd.f32 %v3642_v38, %v3312_v49  ;;  %v3954_v19 = vsel %vm3897_vm14, %v3951_v61, %v3953_v18  ;;  %v3956_v62 = vsel %vm3897_vm14, %v3953_v18, %v3955_v2  ;;  %v3321_v27 = vpop.f32.mrf.mxu0 }
 0x3c4   : > { %v3957_v38 = vrot.slane %v4887_v53, 3 }
 0x3c5   : > { %v4103_v48 = vpack.c.bf16 %v4067_v23, %v4067_v23  ;;  %v3809_v34 = vmul.f32 %v6658_v36, %v3695_v40 }
 0x3c6   : > { %v3958_v60 = vsel %vm3897_vm14, %v3955_v2, %v3957_v38 }
 0x3c7   : > { %4140 = vst.msk [vmem:[%s6333_s18 + $0x60] sm:$0xf] %vm4115_vm15, %v4103_v48  ;;  %v3849_v6 = vadd.f32 %v6681_v0, %v3809_v34  ;;  %4595 = vmatmul.msk.bf16.gmra.mxu3 %vm1207_vm6, %v3008_v16 }
 0x3c8   : > { %4716 = vmatmul.msk.bf16.gmra.mxu1 %vm1207_vm6, %v3506_v35  ;;  %v3147_v3 = vpop.f32.mrf.mxu3  ;;  %v4888_v35 = vunpack.c.h.bf16 %v4916_v20 }
 0x3c9   : > { %v4032_v11 = vadd.f32 %v3950_v59, %v3849_v6  ;;  %v3317_v57 = vadd.f32 %v3316_v55, %v3147_v3 }
 0x3ca   : > { %v3645_v17 = vpop.f32.mrf.mxu1 }
 0x3cb   : > { %v4068_v28 = vmax.f32 %v4032_v11, 0.0  ;;  %v3696_v56 = vadd.f32 %v3645_v17, %v3315_v63  ;;  %v3324_v6 = vpop.f32.mrf.mxu0  ;;  %v3959_v17 = vrot.slane %v4888_v35, 3 }
 0x3cd   : > { %v4104_v51 = vpack.c.bf16 %v4068_v28, %v4068_v28  ;;  %v3810_v13 = vmul.f32 %v6658_v36, %v3696_v56  ;;  %v4917_v28 = vld [vmem:[%s5020_s10 + $0x88] sm:$0xff]   ;;  %v3960_v21 = vsel %vm3897_vm14, %v3957_v38, %v3959_v17 }
 0x3ce   : > { %v4891_v50 = vunpack.c.l.bf16 %v4917_v28 }
 0x3cf   : > { %4141 = vst.msk [vmem:[%s6333_s18 + $0x64] sm:$0xf] %vm4115_vm15, %v4104_v51  ;;  %v3850_v8 = vadd.f32 %v6681_v0, %v3810_v13 }
 0x3d0   : > { %v3150_v24 = vpop.f32.mrf.mxu3  ;;  %v3961_v52 = vrot.slane %v4891_v50, 3 }
 0x3d1   : > { %v4033_v45 = vadd.f32 %v3952_v42, %v3850_v8  ;;  %v3320_v30 = vadd.f32 %v3319_v12, %v3150_v24 }
 0x3d2   : > { %v3647_v58 = vpop.f32.mrf.mxu1 }
 0x3d3   : > { %v4069_v41 = vmax.f32 %v4033_v45, 0.0  ;;  %v3697_v10 = vadd.f32 %v3647_v58, %v3317_v57  ;;  %v3326_v5 = vpop.f32.mrf.mxu0 }
 0x3d5   : > { %v4105_v7 = vpack.c.bf16 %v4069_v41, %v4069_v41  ;;  %v3811_v26 = vmul.f32 %v6658_v36, %v3697_v10  ;;  %v3962_v41 = vsel %vm3897_vm14, %v3959_v17, %v3961_v52  ;;  %v4892_v10 = vunpack.c.h.bf16 %v4917_v28 }
 0x3d7   : > { %4142 = vst.msk [vmem:[%s6333_s18 + $0x68] sm:$0xf] %vm4115_vm15, %v4105_v7  ;;  %v3851_v22 = vadd.f32 %v6681_v0, %v3811_v26 }
 0x3d8   : > { %4717 = vmatmul.msk.bf16.gmra.mxu1 %vm1207_vm6, %v3508_v32  ;;  %v3152_v1 = vpop.f32.mrf.mxu3  ;;  %v4918_v32 = vld [vmem:[%s5020_s10 + $0x90] sm:$0xff]  }
 0x3d9   : > { %v4034_v46 = vadd.f32 %v3954_v19, %v3851_v22  ;;  %v3322_v49 = vadd.f32 %v3321_v27, %v3152_v1  ;;  %v3963_v19 = vrot.slane %v4892_v10, 3  ;;  %v4896_v38 = vunpack.c.h.bf16 %v4918_v32 }
 0x3da   : > { %v3650_v47 = vpop.f32.mrf.mxu1 }
 0x3db   : > { %v4070_v31 = vmax.f32 %v4034_v46, 0.0  ;;  %v3698_v25 = vadd.f32 %v3650_v47, %v3320_v30  ;;  %v3329_v9 = vpop.f32.mrf.mxu0  ;;  %v3964_v2 = vsel %vm3897_vm14, %v3961_v52, %v3963_v19 }
 0x3dd   : > { %v4106_v33 = vpack.c.bf16 %v4070_v31, %v4070_v31  ;;  %v3812_v4 = vmul.f32 %v6658_v36, %v3698_v25  ;;  %v4895_v31 = vunpack.c.l.bf16 %v4918_v32 }
 0x3df   : > { %4143 = vst.msk [vmem:[%s6333_s18 + $0x6c] sm:$0xf] %vm4115_vm15, %v4106_v33  ;;  %v3852_v54 = vadd.f32 %v6681_v0, %v3812_v4  ;;  %v3965_v1 = vrot.slane %v4895_v31, 3 }
 0x3e0   : > { %v3155_v16 = vpop.f32.mrf.mxu3 }
 0x3e1   : > { %v4035_v14 = vadd.f32 %v3956_v62, %v3852_v54  ;;  %v3325_v11 = vadd.f32 %v3324_v6, %v3155_v16 }
 0x3e2   : > { %v3652_v44 = vpop.f32.mrf.mxu1 }
 0x3e3   : > { %v4071_v39 = vmax.f32 %v4035_v14, 0.0  ;;  %v3699_v23 = vadd.f32 %v3652_v44, %v3322_v49  ;;  %v3331_v30 = vpop.f32.mrf.mxu0  ;;  %v3966_v44 = vsel %vm3897_vm14, %v3963_v19, %v3965_v1 }
 0x3e5   : > { %v4107_v40 = vpack.c.bf16 %v4071_v39, %v4071_v39  ;;  %v3813_v43 = vmul.f32 %v6658_v36, %v3699_v23 }
 0x3e7   : > { %4144 = vst.msk [vmem:[%s6333_s18 + $0x70] sm:$0xf] %vm4115_vm15, %v4107_v40  ;;  %v3853_v48 = vadd.f32 %v6681_v0, %v3813_v43 }
 0x3e8   : > { %v3157_v63 = vpop.f32.mrf.mxu3 }
 0x3e9   : > { %v4036_v34 = vadd.f32 %v3958_v60, %v3853_v48  ;;  %v3327_v13 = vadd.f32 %v3326_v5, %v3157_v63  ;;  %v3967_v60 = vrot.slane %v4896_v38, 3 }
 0x3eb   : > { %v4072_v59 = vmax.f32 %v4036_v34, 0.0  ;;  %v3334_v14 = vpop.f32.mrf.mxu0  ;;  %v3968_v35 = vsel %vm3897_vm14, %v3965_v1, %v3967_v60 }
 0x3ed   : > { %v4108_v15 = vpack.c.bf16 %v4072_v59, %v4072_v59  ;;  %v3742_v59 = vld [vmem:[%s5020_s10 + $0x98] sm:$0x3] }
 0x3ee   : > { %v3779_v5 = vunpack.c.l.bf16 %v3742_v59 }
 0x3ef   : > { %4145 = vst.msk [vmem:[%s6333_s18 + $0x74] sm:$0xf] %vm4115_vm15, %v4108_v15 }
 0x3f0   : > { %v3969_v28 = vrot.slane %v3779_v5, 3 }
 0x435   : > { %v3655_v3 = vpop.f32.mrf.mxu1 }
 0x436   : > { %v3700_v61 = vadd.f32 %v3655_v3, %v3325_v11  ;;  %v3336_v11 = vpop.f32.mrf.mxu0 }
 0x438   : > { %v3814_v56 = vmul.f32 %v6658_v36, %v3700_v61 }
 0x43a   : > { %v3854_v55 = vadd.f32 %v6681_v0, %v3814_v56  ;;  %v3160_v51 = vpop.f32.mrf.mxu3 }
 0x43b   : > { %v3330_v24 = vadd.f32 %v3329_v9, %v3160_v51  ;;  %v3970_v51 = vsel %vm3897_vm14, %v3967_v60, %v3969_v28 }
 0x43c   : > { %v4037_v42 = vadd.f32 %v3960_v21, %v3854_v55 }
 0x43d   : > { %v3657_v8 = vpop.f32.mrf.mxu1 }
 0x43e   : > { %v4073_v57 = vmax.f32 %v4037_v42, 0.0  ;;  %v3701_v45 = vadd.f32 %v3657_v8, %v3327_v13 }
 0x440   : > { %v4109_v58 = vpack.c.bf16 %v4073_v57, %v4073_v57  ;;  %v3815_v18 = vmul.f32 %v6658_v36, %v3701_v45 }
 0x442   : > { %4146 = vst.msk [vmem:[%s6333_s18 + $0x78] sm:$0xf] %vm4115_vm15, %v4109_v58  ;;  %v3855_v29 = vadd.f32 %v6681_v0, %v3815_v18  ;;  %v3162_v26 = vpop.f32.mrf.mxu3 }
 0x443   : > { %v3332_v20 = vadd.f32 %v3331_v30, %v3162_v26 }
 0x444   : > { %v4038_v7 = vadd.f32 %v3962_v41, %v3855_v29 }
 0x445   : > { %v3660_v12 = vpop.f32.mrf.mxu1 }
 0x446   : > { %v4074_v37 = vmax.f32 %v4038_v7, 0.0  ;;  %v3702_v22 = vadd.f32 %v3660_v12, %v3330_v24 }
 0x448   : > { %v4110_v46 = vpack.c.bf16 %v4074_v37, %v4074_v37  ;;  %v3816_v47 = vmul.f32 %v6658_v36, %v3702_v22 }
 0x44a   : > { %4147 = vst.msk [vmem:[%s6333_s18 + $0x7c] sm:$0xf] %vm4115_vm15, %v4110_v46  ;;  %v3856_v25 = vadd.f32 %v6681_v0, %v3816_v47  ;;  %v3165_v54 = vpop.f32.mrf.mxu3 }
 0x44b   : > { %v3335_v23 = vadd.f32 %v3334_v14, %v3165_v54 }
 0x44c   : > { %v4039_v33 = vadd.f32 %v3964_v2, %v3856_v25 }
 0x44d   : > { %v3662_v4 = vpop.f32.mrf.mxu1 }
 0x44e   : > { %v4075_v62 = vmax.f32 %v4039_v33, 0.0  ;;  %v3703_v53 = vadd.f32 %v3662_v4, %v3332_v20 }
 0x450   : > { %v4111_v27 = vpack.c.bf16 %v4075_v62, %v4075_v62  ;;  %v3817_v49 = vmul.f32 %v6658_v36, %v3703_v53 }
 0x452   : > { %4148 = vst.msk [vmem:[%s6333_s18 + $0x80] sm:$0xf] %vm4115_vm15, %v4111_v27  ;;  %v3857_v39 = vadd.f32 %v6681_v0, %v3817_v49  ;;  %v3167_v16 = vpop.f32.mrf.mxu3 }
 0x453   : > { %v3337_v3 = vadd.f32 %v3336_v11, %v3167_v16 }
 0x454   : > { %v4040_v40 = vadd.f32 %v3966_v44, %v3857_v39 }
 0x455   : > { %v3665_v43 = vpop.f32.mrf.mxu1 }
 0x456   : > { %v4076_v48 = vmax.f32 %v4040_v40, 0.0  ;;  %v3704_v34 = vadd.f32 %v3665_v43, %v3335_v23 }
 0x458   : > { %v4112_v15 = vpack.c.bf16 %v4076_v48, %v4076_v48  ;;  %v3818_v6 = vmul.f32 %v6658_v36, %v3704_v34 }
 0x45a   : > { %4149 = vst.msk [vmem:[%s6333_s18 + $0x84] sm:$0xf] %vm4115_vm15, %v4112_v15  ;;  %v3858_v63 = vadd.f32 %v6681_v0, %v3818_v6 }
 0x45c   : > { %v4041_v17 = vadd.f32 %v3968_v35, %v3858_v63 }
 0x45d   : > { %v3667_v61 = vpop.f32.mrf.mxu1 }
 0x45e   : > { %v4077_v56 = vmax.f32 %v4041_v17, 0.0  ;;  %v3705_v21 = vadd.f32 %v3667_v61, %v3337_v3 }
 0x460   : > { %v4113_v50 = vpack.c.bf16 %v4077_v56, %v4077_v56  ;;  %v3819_v55 = vmul.f32 %v6658_v36, %v3705_v21 }
 0x462   : > { %4150 = vst.msk [vmem:[%s6333_s18 + $0x88] sm:$0xf] %vm4115_vm15, %v4113_v50  ;;  %v3859_v13 = vadd.f32 %v6681_v0, %v3819_v55 }
 0x464   : > { %v4042_v42 = vadd.f32 %v3970_v51, %v3859_v13 }
 0x466   : > { %v4078_v9 = vmax.f32 %v4042_v42, 0.0 }
 0x468   : > { %v4114_v8 = vpack.c.bf16 %v4078_v9, %v4078_v9 }
 0x46a   : > { %4151 = vst.msk [vmem:[%s6333_s18 + $0x8c] sm:$0xf] %vm4115_vm15, %v4114_v8 }
 0x46b PF: > { %s18_s27 = sadd.s32 1, %s4956_s27  }
 0x46c   : > { %p15_p4 = scmp.ge.s32.totalorder %s18_s27, 4  }
 0x46e   :  { %17 = sbr.rel (!%p15_p4) target bundleno = 1 (0x1), region = 86 }

</bundles_post_ra>
